<compile_context>
chip_gen: v6e
topology: v6e:2x2x1
jax: 0.10.0
libtpu: 0.0.40
codegen_flags: <defaults>
</compile_context>

<pallas_src>
import functools

import jax
import jax.numpy as jnp
from jax.experimental import pallas as pl
from jax.experimental.pallas import tpu as pltpu


# -----------------------------------------------------------------------------
# Kernel
# -----------------------------------------------------------------------------
def _feature_fusion_kernel(x_ref, mask_ref, dww_ref, dwb_ref, pww_ref, pwb_ref,
                           cdw_ref, cdb_ref, o_ref, *, C, W, L):
    """Fused FeatureFusion forward for one (possibly batch-folded) block."""
    x = x_ref[0]                                   # (C, L) f32, lane-dense

    def dwconv3x3(v, idx):
        """Depthwise 3x3 conv, padding=1 (PyTorch cross-correlation)."""
        b = dwb_ref[idx]                           # (C, 1)
        acc = jnp.broadcast_to(b, (C, L))          # bias folded into init
        for k in range(9):
            dy, dx = k // 3 - 1, k % 3 - 1
            s = dy * W + dx                        # flattened-spatial shift
            # out[l] needs v[l + s] -> rotate by -s (XLU); wraps masked off.
            tap = v if s == 0 else pltpu.roll(v, shift=(-s) % L, axis=1)
            m = mask_ref[k:k + 1, :]               # (1, L) lane-only mask
            wt = dww_ref[idx, k]                   # (C, 1) tap weight
            acc = acc + tap * m * wt
        return acc

    def pwconv1x1(v, wmat_bf16, b):
        """Pointwise 1x1 conv == channel matmul on the MXU (bf16 in, f32 acc)."""
        return jnp.dot(wmat_bf16, v.astype(jnp.bfloat16),
                       preferred_element_type=jnp.float32) + b

    v = x
    for r in range(2):                             # two Resblocks
        i1, i2 = 2 * r, 2 * r + 1
        t = dwconv3x3(v, i1)                       # conv1: depthwise 3x3
        t = pwconv1x1(t, pww_ref[i1], pwb_ref[i1])  # conv1: 1x1
        t = jnp.maximum(t, 0.0)                    # ReLU
        t = dwconv3x3(t, i2)                       # conv2: depthwise 3x3
        t = pwconv1x1(t, pww_ref[i2], pwb_ref[i2])  # conv2: 1x1
        v = v + t                                  # residual add

    out = pwconv1x1(v, cdw_ref[...], cdb_ref[...])  # conv_down (1x1)
    o_ref[0] = out.astype(o_ref.dtype)


# -----------------------------------------------------------------------------
# Wrapper
# -----------------------------------------------------------------------------
def _tensorcores_per_chip():
    """2 on multi-TensorCore chips (v7x / v4 / v5p), else 1 (v5e / v6e)."""
    try:
        kind = jax.devices()[0].device_kind.lower()
    except Exception:
        return 1
    return 2 if any(t in kind for t in ("v7", "v4", "v5p")) else 1


def feature_fusion_pallas(x, res_params, cd_w, cd_b):
    """Pallas implementation of FeatureFusion.forward (NCHW float32)."""
    N, C, H, W = x.shape
    HW = H * W

    # Batch folding: 1 grid step on single-TC parts, >=2 parallel steps on
    # multi-TC parts so both TensorCores stay busy.
    num_tc = _tensorcores_per_chip()
    steps = num_tc if (N >= num_tc and N % num_tc == 0) else N
    n_blk = N // steps
    L = n_blk * HW                                 # lanes per grid step

    # Pack parameters into kernel-friendly layouts.
    dww, dwb, pww, pwb = [], [], [], []
    for p in res_params:                           # 2 Resblocks x {conv1, conv2}
        for j in ("1", "2"):
            dww.append(p[f"dw{j}_w"].reshape(C, 9).T.reshape(9, C, 1))
            dwb.append(p[f"dw{j}_b"].reshape(C, 1))
            pww.append(p[f"pw{j}_w"].reshape(C, C))
            pwb.append(p[f"pw{j}_b"].reshape(C, 1))
    dww = jnp.stack(dww)                           # (4, 9, C, 1) f32
    dwb = jnp.stack(dwb)                           # (4, C, 1)    f32
    pww = jnp.stack(pww).astype(jnp.bfloat16)      # (4, C, C)    bf16 (MXU)
    pwb = jnp.stack(pwb)                           # (4, C, 1)    f32
    cdw = cd_w.reshape(C, C).astype(jnp.bfloat16)  # (C, C)       bf16 (MXU)
    cdb = cd_b.reshape(C, 1)                       # (C, 1)       f32

    # Boundary masks, computed once on the host: (9, L) f32, lane-only.
    # They also zero cross-image wraps when the batch is folded into lanes.
    lane = jnp.arange(L, dtype=jnp.int32)
    li = lane % HW
    hh = li // W
    ww = li % W
    rows = []
    for dy in (-1, 0, 1):
        for dx in (-1, 0, 1):
            rows.append(((hh + dy >= 0) & (hh + dy < H) &
                         (ww + dx >= 0) & (ww + dx < W)).astype(jnp.float32))
    masks = jnp.stack(rows)                        # (9, L)

    # Activations: lane-dense (steps, C, n_blk*HW) slab (layout plumbing only).
    x_blk = (x.reshape(steps, n_blk, C, HW)
              .transpose(0, 2, 1, 3)
              .reshape(steps, C, L))

    kernel = functools.partial(_feature_fusion_kernel, C=C, W=W, L=L)

    out_blk = pl.pallas_call(
        kernel,
        out_shape=jax.ShapeDtypeStruct((steps, C, L), x.dtype),
        grid_spec=pltpu.PrefetchScalarGridSpec(
            num_scalar_prefetch=0,
            grid=(steps,),
            in_specs=[
                pl.BlockSpec((1, C, L), lambda s: (s, 0, 0)),
                pl.BlockSpec((9, L), lambda s: (0, 0)),
                pl.BlockSpec((4, 9, C, 1), lambda s: (0, 0, 0, 0)),
                pl.BlockSpec((4, C, 1), lambda s: (0, 0, 0)),
                pl.BlockSpec((4, C, C), lambda s: (0, 0, 0)),
                pl.BlockSpec((4, C, 1), lambda s: (0, 0, 0)),
                pl.BlockSpec((C, C), lambda s: (0, 0)),
                pl.BlockSpec((C, 1), lambda s: (0, 0)),
            ],
            out_specs=pl.BlockSpec((1, C, L), lambda s: (s, 0, 0)),
        ),
        compiler_params=pltpu.CompilerParams(
            dimension_semantics=("parallel",),     # shards across TCs when steps>1
        ),
    )(x_blk, masks, dww, dwb, pww, pwb, cdw, cdb)

    return (out_blk.reshape(steps, C, n_blk, HW)
                   .transpose(0, 2, 1, 3)
                   .reshape(N, C, H, W))


# -----------------------------------------------------------------------------
# Pure-JAX reference (mirrors the PyTorch module exactly)
# -----------------------------------------------------------------------------
def _conv2d_ref(x, w, b, groups=1, padding=0):
    out = jax.lax.conv_general_dilated(
        x, w, window_strides=(1, 1),
        padding=[(padding, padding), (padding, padding)],
        dimension_numbers=("NCHW", "OIHW", "NCHW"),
        feature_group_count=groups,
        precision=jax.lax.Precision.HIGHEST)
    return out + b[None, :, None, None]


def feature_fusion_ref(x, res_params, cd_w, cd_b):
    C = x.shape[1]
    v = x
    for p in res_params:
        t = _conv2d_ref(v, p["dw1_w"], p["dw1_b"], groups=C, padding=1)
        t = _conv2d_ref(t, p["pw1_w"], p["pw1_b"])
        t = jnp.maximum(t, 0.0)
        t = _conv2d_ref(t, p["dw2_w"], p["dw2_b"], groups=C, padding=1)
        t = _conv2d_ref(t, p["pw2_w"], p["pw2_b"])
        v = v + t
    return _conv2d_ref(v, cd_w, cd_b)


# -----------------------------------------------------------------------------
# Test
# -----------------------------------------------------------------------------
if __name__ == "__main__":
    N, C, H, W = 2, 32, 16, 16               # FeatureFusion(group_dim=32)

    key = jax.random.PRNGKey(0)
    ks = iter(jax.random.split(key, 24))

    def rnd(shape, scale=0.1):
        return scale * jax.random.normal(next(ks), shape, dtype=jnp.float32)

    res_params = []
    for _ in range(2):
        res_params.append({
            "dw1_w": rnd((C, 1, 3, 3)), "dw1_b": rnd((C,)),
            "pw1_w": rnd((C, C, 1, 1)), "pw1_b": rnd((C,)),
            "dw2_w": rnd((C, 1, 3, 3)), "dw2_b": rnd((C,)),
            "pw2_w": rnd((C, C, 1, 1)), "pw2_b": rnd((C,)),
        })
    cd_w = rnd((C, C, 1, 1))
    cd_b = rnd((C,))
    x = jax.random.normal(next(ks), (N, C, H, W), dtype=jnp.float32)

    out = jax.block_until_ready(feature_fusion_pallas(x, res_params, cd_w, cd_b))
    ref = jax.block_until_ready(feature_fusion_ref(x, res_params, cd_w, cd_b))

    if out.shape == ref.shape and bool(jnp.allclose(out, ref, rtol=1e-2, atol=1e-2)):
        print("KERNEL_OK")
    else:
        err = float(jnp.max(jnp.abs(out - ref)))
        raise SystemExit(f"mismatch with reference FeatureFusion (max abs err {err})")
</pallas_src>

<mosaic_0001>
module attributes {stable_mosaic.version = 11 : i64} {
  func.func @_feature_fusion_kernel(%arg0: i32, %arg1: memref<1x32x512xf32, #tpu.memory_space<vmem>>, %arg2: memref<9x512xf32, #tpu.memory_space<vmem>>, %arg3: memref<4x9x32x1xf32, #tpu.memory_space<vmem>>, %arg4: memref<4x32x1xf32, #tpu.memory_space<vmem>>, %arg5: memref<4x32x32xbf16, #tpu.memory_space<vmem>>, %arg6: memref<4x32x1xf32, #tpu.memory_space<vmem>>, %arg7: memref<32x32xbf16, #tpu.memory_space<vmem>>, %arg8: memref<32x1xf32, #tpu.memory_space<vmem>>, %arg9: memref<1x32x512xf32, #tpu.memory_space<vmem>>) attributes {dimension_semantics = [#tpu.dimension_semantics<parallel>], iteration_bounds = array<i64: 1>, scalar_prefetch = 0 : i64, scratch_operands = 0 : i64, tpu.core_type = #tpu.core_type<tc>, window_params = [{transform_indices = @transform_0, window_bounds = array<i64: 1, 32, 512>}, {pipeline_mode = #tpu.pipeline_mode<synchronous>, transform_indices = @transform_1, window_bounds = array<i64: 9, 512>}, {pipeline_mode = #tpu.pipeline_mode<synchronous>, transform_indices = @transform_2, window_bounds = array<i64: 4, 9, 32, 1>}, {pipeline_mode = #tpu.pipeline_mode<synchronous>, transform_indices = @transform_3, window_bounds = array<i64: 4, 32, 1>}, {pipeline_mode = #tpu.pipeline_mode<synchronous>, transform_indices = @transform_4, window_bounds = array<i64: 4, 32, 32>}, {pipeline_mode = #tpu.pipeline_mode<synchronous>, transform_indices = @transform_5, window_bounds = array<i64: 4, 32, 1>}, {pipeline_mode = #tpu.pipeline_mode<synchronous>, transform_indices = @transform_6, window_bounds = array<i64: 32, 32>}, {pipeline_mode = #tpu.pipeline_mode<synchronous>, transform_indices = @transform_7, window_bounds = array<i64: 32, 1>}, {transform_indices = @transform_8, window_bounds = array<i64: 1, 32, 512>}]} {
    %c0 = arith.constant 0 : index
    %c0_0 = arith.constant 0 : index
    %c0_1 = arith.constant 0 : index
    %0 = vector.load %arg1[%c0, %c0_0, %c0_1] : memref<1x32x512xf32, #tpu.memory_space<vmem>>, vector<1x32x512xf32>
    %1 = vector.shape_cast %0 : vector<1x32x512xf32> to vector<32x512xf32>
    %c0_2 = arith.constant 0 : index
    %c0_3 = arith.constant 0 : index
    %c0_4 = arith.constant 0 : index
    %2 = vector.load %arg4[%c0_2, %c0_3, %c0_4] : memref<4x32x1xf32, #tpu.memory_space<vmem>>, vector<1x32x1xf32>
    %3 = vector.shape_cast %2 : vector<1x32x1xf32> to vector<32x1xf32>
    %4 = vector.shape_cast %3 : vector<32x1xf32> to vector<32x1xf32>
    %5 = vector.broadcast %4 : vector<32x1xf32> to vector<32x512xf32>
    %c17_i32 = arith.constant 17 : i32
    %6 = tpu.dynamic_rotate %1 by %c17_i32 dim 1 : vector<32x512xf32>, i32 -> vector<32x512xf32>
    %c0_5 = arith.constant 0 : index
    %c0_6 = arith.constant 0 : index
    %7 = vector.load %arg2[%c0_5, %c0_6] : memref<9x512xf32, #tpu.memory_space<vmem>>, vector<1x512xf32>
    %c0_7 = arith.constant 0 : index
    %c0_8 = arith.constant 0 : index
    %c0_9 = arith.constant 0 : index
    %c0_10 = arith.constant 0 : index
    %8 = vector.load %arg3[%c0_7, %c0_8, %c0_9, %c0_10] : memref<4x9x32x1xf32, #tpu.memory_space<vmem>>, vector<1x1x32x1xf32>
    %9 = vector.shape_cast %8 : vector<1x1x32x1xf32> to vector<32x1xf32>
    %10 = vector.broadcast %7 : vector<1x512xf32> to vector<32x512xf32>
    %11 = arith.mulf %6, %10 : vector<32x512xf32>
    %12 = vector.broadcast %9 : vector<32x1xf32> to vector<32x512xf32>
    %13 = arith.mulf %11, %12 : vector<32x512xf32>
    %14 = arith.addf %5, %13 : vector<32x512xf32>
    %c16_i32 = arith.constant 16 : i32
    %15 = tpu.dynamic_rotate %1 by %c16_i32 dim 1 : vector<32x512xf32>, i32 -> vector<32x512xf32>
    %c1 = arith.constant 1 : index
    %c0_11 = arith.constant 0 : index
    %16 = vector.load %arg2[%c1, %c0_11] : memref<9x512xf32, #tpu.memory_space<vmem>>, vector<1x512xf32>
    %c0_12 = arith.constant 0 : index
    %c1_13 = arith.constant 1 : index
    %c0_14 = arith.constant 0 : index
    %c0_15 = arith.constant 0 : index
    %17 = vector.load %arg3[%c0_12, %c1_13, %c0_14, %c0_15] : memref<4x9x32x1xf32, #tpu.memory_space<vmem>>, vector<1x1x32x1xf32>
    %18 = vector.shape_cast %17 : vector<1x1x32x1xf32> to vector<32x1xf32>
    %19 = vector.broadcast %16 : vector<1x512xf32> to vector<32x512xf32>
    %20 = arith.mulf %15, %19 : vector<32x512xf32>
    %21 = vector.broadcast %18 : vector<32x1xf32> to vector<32x512xf32>
    %22 = arith.mulf %20, %21 : vector<32x512xf32>
    %23 = arith.addf %14, %22 : vector<32x512xf32>
    %c15_i32 = arith.constant 15 : i32
    %24 = tpu.dynamic_rotate %1 by %c15_i32 dim 1 : vector<32x512xf32>, i32 -> vector<32x512xf32>
    %c2 = arith.constant 2 : index
    %c0_16 = arith.constant 0 : index
    %25 = vector.load %arg2[%c2, %c0_16] : memref<9x512xf32, #tpu.memory_space<vmem>>, vector<1x512xf32>
    %c0_17 = arith.constant 0 : index
    %c2_18 = arith.constant 2 : index
    %c0_19 = arith.constant 0 : index
    %c0_20 = arith.constant 0 : index
    %26 = vector.load %arg3[%c0_17, %c2_18, %c0_19, %c0_20] : memref<4x9x32x1xf32, #tpu.memory_space<vmem>>, vector<1x1x32x1xf32>
    %27 = vector.shape_cast %26 : vector<1x1x32x1xf32> to vector<32x1xf32>
    %28 = vector.broadcast %25 : vector<1x512xf32> to vector<32x512xf32>
    %29 = arith.mulf %24, %28 : vector<32x512xf32>
    %30 = vector.broadcast %27 : vector<32x1xf32> to vector<32x512xf32>
    %31 = arith.mulf %29, %30 : vector<32x512xf32>
    %32 = arith.addf %23, %31 : vector<32x512xf32>
    %c1_i32 = arith.constant 1 : i32
    %33 = tpu.dynamic_rotate %1 by %c1_i32 dim 1 : vector<32x512xf32>, i32 -> vector<32x512xf32>
    %c3 = arith.constant 3 : index
    %c0_21 = arith.constant 0 : index
    %34 = vector.load %arg2[%c3, %c0_21] : memref<9x512xf32, #tpu.memory_space<vmem>>, vector<1x512xf32>
    %c0_22 = arith.constant 0 : index
    %c3_23 = arith.constant 3 : index
    %c0_24 = arith.constant 0 : index
    %c0_25 = arith.constant 0 : index
    %35 = vector.load %arg3[%c0_22, %c3_23, %c0_24, %c0_25] : memref<4x9x32x1xf32, #tpu.memory_space<vmem>>, vector<1x1x32x1xf32>
    %36 = vector.shape_cast %35 : vector<1x1x32x1xf32> to vector<32x1xf32>
    %37 = vector.broadcast %34 : vector<1x512xf32> to vector<32x512xf32>
    %38 = arith.mulf %33, %37 : vector<32x512xf32>
    %39 = vector.broadcast %36 : vector<32x1xf32> to vector<32x512xf32>
    %40 = arith.mulf %38, %39 : vector<32x512xf32>
    %41 = arith.addf %32, %40 : vector<32x512xf32>
    %c4 = arith.constant 4 : index
    %c0_26 = arith.constant 0 : index
    %42 = vector.load %arg2[%c4, %c0_26] : memref<9x512xf32, #tpu.memory_space<vmem>>, vector<1x512xf32>
    %c0_27 = arith.constant 0 : index
    %c4_28 = arith.constant 4 : index
    %c0_29 = arith.constant 0 : index
    %c0_30 = arith.constant 0 : index
    %43 = vector.load %arg3[%c0_27, %c4_28, %c0_29, %c0_30] : memref<4x9x32x1xf32, #tpu.memory_space<vmem>>, vector<1x1x32x1xf32>
    %44 = vector.shape_cast %43 : vector<1x1x32x1xf32> to vector<32x1xf32>
    %45 = vector.broadcast %42 : vector<1x512xf32> to vector<32x512xf32>
    %46 = arith.mulf %1, %45 : vector<32x512xf32>
    %47 = vector.broadcast %44 : vector<32x1xf32> to vector<32x512xf32>
    %48 = arith.mulf %46, %47 : vector<32x512xf32>
    %49 = arith.addf %41, %48 : vector<32x512xf32>
    %c511_i32 = arith.constant 511 : i32
    %50 = tpu.dynamic_rotate %1 by %c511_i32 dim 1 : vector<32x512xf32>, i32 -> vector<32x512xf32>
    %c5 = arith.constant 5 : index
    %c0_31 = arith.constant 0 : index
    %51 = vector.load %arg2[%c5, %c0_31] : memref<9x512xf32, #tpu.memory_space<vmem>>, vector<1x512xf32>
    %c0_32 = arith.constant 0 : index
    %c5_33 = arith.constant 5 : index
    %c0_34 = arith.constant 0 : index
    %c0_35 = arith.constant 0 : index
    %52 = vector.load %arg3[%c0_32, %c5_33, %c0_34, %c0_35] : memref<4x9x32x1xf32, #tpu.memory_space<vmem>>, vector<1x1x32x1xf32>
    %53 = vector.shape_cast %52 : vector<1x1x32x1xf32> to vector<32x1xf32>
    %54 = vector.broadcast %51 : vector<1x512xf32> to vector<32x512xf32>
    %55 = arith.mulf %50, %54 : vector<32x512xf32>
    %56 = vector.broadcast %53 : vector<32x1xf32> to vector<32x512xf32>
    %57 = arith.mulf %55, %56 : vector<32x512xf32>
    %58 = arith.addf %49, %57 : vector<32x512xf32>
    %c497_i32 = arith.constant 497 : i32
    %59 = tpu.dynamic_rotate %1 by %c497_i32 dim 1 : vector<32x512xf32>, i32 -> vector<32x512xf32>
    %c6 = arith.constant 6 : index
    %c0_36 = arith.constant 0 : index
    %60 = vector.load %arg2[%c6, %c0_36] : memref<9x512xf32, #tpu.memory_space<vmem>>, vector<1x512xf32>
    %c0_37 = arith.constant 0 : index
    %c6_38 = arith.constant 6 : index
    %c0_39 = arith.constant 0 : index
    %c0_40 = arith.constant 0 : index
    %61 = vector.load %arg3[%c0_37, %c6_38, %c0_39, %c0_40] : memref<4x9x32x1xf32, #tpu.memory_space<vmem>>, vector<1x1x32x1xf32>
    %62 = vector.shape_cast %61 : vector<1x1x32x1xf32> to vector<32x1xf32>
    %63 = vector.broadcast %60 : vector<1x512xf32> to vector<32x512xf32>
    %64 = arith.mulf %59, %63 : vector<32x512xf32>
    %65 = vector.broadcast %62 : vector<32x1xf32> to vector<32x512xf32>
    %66 = arith.mulf %64, %65 : vector<32x512xf32>
    %67 = arith.addf %58, %66 : vector<32x512xf32>
    %c496_i32 = arith.constant 496 : i32
    %68 = tpu.dynamic_rotate %1 by %c496_i32 dim 1 : vector<32x512xf32>, i32 -> vector<32x512xf32>
    %c7 = arith.constant 7 : index
    %c0_41 = arith.constant 0 : index
    %69 = vector.load %arg2[%c7, %c0_41] : memref<9x512xf32, #tpu.memory_space<vmem>>, vector<1x512xf32>
    %c0_42 = arith.constant 0 : index
    %c7_43 = arith.constant 7 : index
    %c0_44 = arith.constant 0 : index
    %c0_45 = arith.constant 0 : index
    %70 = vector.load %arg3[%c0_42, %c7_43, %c0_44, %c0_45] : memref<4x9x32x1xf32, #tpu.memory_space<vmem>>, vector<1x1x32x1xf32>
    %71 = vector.shape_cast %70 : vector<1x1x32x1xf32> to vector<32x1xf32>
    %72 = vector.broadcast %69 : vector<1x512xf32> to vector<32x512xf32>
    %73 = arith.mulf %68, %72 : vector<32x512xf32>
    %74 = vector.broadcast %71 : vector<32x1xf32> to vector<32x512xf32>
    %75 = arith.mulf %73, %74 : vector<32x512xf32>
    %76 = arith.addf %67, %75 : vector<32x512xf32>
    %c495_i32 = arith.constant 495 : i32
    %77 = tpu.dynamic_rotate %1 by %c495_i32 dim 1 : vector<32x512xf32>, i32 -> vector<32x512xf32>
    %c8 = arith.constant 8 : index
    %c0_46 = arith.constant 0 : index
    %78 = vector.load %arg2[%c8, %c0_46] : memref<9x512xf32, #tpu.memory_space<vmem>>, vector<1x512xf32>
    %c0_47 = arith.constant 0 : index
    %c8_48 = arith.constant 8 : index
    %c0_49 = arith.constant 0 : index
    %c0_50 = arith.constant 0 : index
    %79 = vector.load %arg3[%c0_47, %c8_48, %c0_49, %c0_50] : memref<4x9x32x1xf32, #tpu.memory_space<vmem>>, vector<1x1x32x1xf32>
    %80 = vector.shape_cast %79 : vector<1x1x32x1xf32> to vector<32x1xf32>
    %81 = vector.broadcast %78 : vector<1x512xf32> to vector<32x512xf32>
    %82 = arith.mulf %77, %81 : vector<32x512xf32>
    %83 = vector.broadcast %80 : vector<32x1xf32> to vector<32x512xf32>
    %84 = arith.mulf %82, %83 : vector<32x512xf32>
    %85 = arith.addf %76, %84 : vector<32x512xf32>
    %c0_51 = arith.constant 0 : index
    %c0_52 = arith.constant 0 : index
    %c0_53 = arith.constant 0 : index
    %86 = vector.load %arg5[%c0_51, %c0_52, %c0_53] : memref<4x32x32xbf16, #tpu.memory_space<vmem>>, vector<1x32x32xbf16>
    %87 = vector.shape_cast %86 : vector<1x32x32xbf16> to vector<32x32xbf16>
    %c0_54 = arith.constant 0 : index
    %c0_55 = arith.constant 0 : index
    %c0_56 = arith.constant 0 : index
    %88 = vector.load %arg6[%c0_54, %c0_55, %c0_56] : memref<4x32x1xf32, #tpu.memory_space<vmem>>, vector<1x32x1xf32>
    %89 = vector.shape_cast %88 : vector<1x32x1xf32> to vector<32x1xf32>
    %90 = arith.truncf %85 : vector<32x512xf32> to vector<32x512xbf16>
    %cst = arith.constant dense<0.000000e+00> : vector<32x512xf32>
    %91 = tpu.matmul %87, %90, %cst {dimension_numbers = #tpu.dot_dimension_numbers<[1], [0], [0], [1], [0, 0, 1, 1], [], []>} : vector<32x32xbf16>, vector<32x512xbf16>, vector<32x512xf32> -> vector<32x512xf32>
    %92 = vector.broadcast %89 : vector<32x1xf32> to vector<32x512xf32>
    %93 = arith.addf %91, %92 : vector<32x512xf32>
    %cst_57 = arith.constant 0.000000e+00 : f32
    %94 = vector.broadcast %cst_57 : f32 to vector<32x512xf32>
    %95 = arith.maximumf %93, %94 : vector<32x512xf32>
    %c1_58 = arith.constant 1 : index
    %c0_59 = arith.constant 0 : index
    %c0_60 = arith.constant 0 : index
    %96 = vector.load %arg4[%c1_58, %c0_59, %c0_60] : memref<4x32x1xf32, #tpu.memory_space<vmem>>, vector<1x32x1xf32>
    %97 = vector.shape_cast %96 : vector<1x32x1xf32> to vector<32x1xf32>
    %98 = vector.shape_cast %97 : vector<32x1xf32> to vector<32x1xf32>
    %99 = vector.broadcast %98 : vector<32x1xf32> to vector<32x512xf32>
    %c17_i32_61 = arith.constant 17 : i32
    %100 = tpu.dynamic_rotate %95 by %c17_i32_61 dim 1 : vector<32x512xf32>, i32 -> vector<32x512xf32>
    %c0_62 = arith.constant 0 : index
    %c0_63 = arith.constant 0 : index
    %101 = vector.load %arg2[%c0_62, %c0_63] : memref<9x512xf32, #tpu.memory_space<vmem>>, vector<1x512xf32>
    %c1_64 = arith.constant 1 : index
    %c0_65 = arith.constant 0 : index
    %c0_66 = arith.constant 0 : index
    %c0_67 = arith.constant 0 : index
    %102 = vector.load %arg3[%c1_64, %c0_65, %c0_66, %c0_67] : memref<4x9x32x1xf32, #tpu.memory_space<vmem>>, vector<1x1x32x1xf32>
    %103 = vector.shape_cast %102 : vector<1x1x32x1xf32> to vector<32x1xf32>
    %104 = vector.broadcast %101 : vector<1x512xf32> to vector<32x512xf32>
    %105 = arith.mulf %100, %104 : vector<32x512xf32>
    %106 = vector.broadcast %103 : vector<32x1xf32> to vector<32x512xf32>
    %107 = arith.mulf %105, %106 : vector<32x512xf32>
    %108 = arith.addf %99, %107 : vector<32x512xf32>
    %c16_i32_68 = arith.constant 16 : i32
    %109 = tpu.dynamic_rotate %95 by %c16_i32_68 dim 1 : vector<32x512xf32>, i32 -> vector<32x512xf32>
    %c1_69 = arith.constant 1 : index
    %c0_70 = arith.constant 0 : index
    %110 = vector.load %arg2[%c1_69, %c0_70] : memref<9x512xf32, #tpu.memory_space<vmem>>, vector<1x512xf32>
    %c1_71 = arith.constant 1 : index
    %c1_72 = arith.constant 1 : index
    %c0_73 = arith.constant 0 : index
    %c0_74 = arith.constant 0 : index
    %111 = vector.load %arg3[%c1_71, %c1_72, %c0_73, %c0_74] : memref<4x9x32x1xf32, #tpu.memory_space<vmem>>, vector<1x1x32x1xf32>
    %112 = vector.shape_cast %111 : vector<1x1x32x1xf32> to vector<32x1xf32>
    %113 = vector.broadcast %110 : vector<1x512xf32> to vector<32x512xf32>
    %114 = arith.mulf %109, %113 : vector<32x512xf32>
    %115 = vector.broadcast %112 : vector<32x1xf32> to vector<32x512xf32>
    %116 = arith.mulf %114, %115 : vector<32x512xf32>
    %117 = arith.addf %108, %116 : vector<32x512xf32>
    %c15_i32_75 = arith.constant 15 : i32
    %118 = tpu.dynamic_rotate %95 by %c15_i32_75 dim 1 : vector<32x512xf32>, i32 -> vector<32x512xf32>
    %c2_76 = arith.constant 2 : index
    %c0_77 = arith.constant 0 : index
    %119 = vector.load %arg2[%c2_76, %c0_77] : memref<9x512xf32, #tpu.memory_space<vmem>>, vector<1x512xf32>
    %c1_78 = arith.constant 1 : index
    %c2_79 = arith.constant 2 : index
    %c0_80 = arith.constant 0 : index
    %c0_81 = arith.constant 0 : index
    %120 = vector.load %arg3[%c1_78, %c2_79, %c0_80, %c0_81] : memref<4x9x32x1xf32, #tpu.memory_space<vmem>>, vector<1x1x32x1xf32>
    %121 = vector.shape_cast %120 : vector<1x1x32x1xf32> to vector<32x1xf32>
    %122 = vector.broadcast %119 : vector<1x512xf32> to vector<32x512xf32>
    %123 = arith.mulf %118, %122 : vector<32x512xf32>
    %124 = vector.broadcast %121 : vector<32x1xf32> to vector<32x512xf32>
    %125 = arith.mulf %123, %124 : vector<32x512xf32>
    %126 = arith.addf %117, %125 : vector<32x512xf32>
    %c1_i32_82 = arith.constant 1 : i32
    %127 = tpu.dynamic_rotate %95 by %c1_i32_82 dim 1 : vector<32x512xf32>, i32 -> vector<32x512xf32>
    %c3_83 = arith.constant 3 : index
    %c0_84 = arith.constant 0 : index
    %128 = vector.load %arg2[%c3_83, %c0_84] : memref<9x512xf32, #tpu.memory_space<vmem>>, vector<1x512xf32>
    %c1_85 = arith.constant 1 : index
    %c3_86 = arith.constant 3 : index
    %c0_87 = arith.constant 0 : index
    %c0_88 = arith.constant 0 : index
    %129 = vector.load %arg3[%c1_85, %c3_86, %c0_87, %c0_88] : memref<4x9x32x1xf32, #tpu.memory_space<vmem>>, vector<1x1x32x1xf32>
    %130 = vector.shape_cast %129 : vector<1x1x32x1xf32> to vector<32x1xf32>
    %131 = vector.broadcast %128 : vector<1x512xf32> to vector<32x512xf32>
    %132 = arith.mulf %127, %131 : vector<32x512xf32>
    %133 = vector.broadcast %130 : vector<32x1xf32> to vector<32x512xf32>
    %134 = arith.mulf %132, %133 : vector<32x512xf32>
    %135 = arith.addf %126, %134 : vector<32x512xf32>
    %c4_89 = arith.constant 4 : index
    %c0_90 = arith.constant 0 : index
    %136 = vector.load %arg2[%c4_89, %c0_90] : memref<9x512xf32, #tpu.memory_space<vmem>>, vector<1x512xf32>
    %c1_91 = arith.constant 1 : index
    %c4_92 = arith.constant 4 : index
    %c0_93 = arith.constant 0 : index
    %c0_94 = arith.constant 0 : index
    %137 = vector.load %arg3[%c1_91, %c4_92, %c0_93, %c0_94] : memref<4x9x32x1xf32, #tpu.memory_space<vmem>>, vector<1x1x32x1xf32>
    %138 = vector.shape_cast %137 : vector<1x1x32x1xf32> to vector<32x1xf32>
    %139 = vector.broadcast %136 : vector<1x512xf32> to vector<32x512xf32>
    %140 = arith.mulf %95, %139 : vector<32x512xf32>
    %141 = vector.broadcast %138 : vector<32x1xf32> to vector<32x512xf32>
    %142 = arith.mulf %140, %141 : vector<32x512xf32>
    %143 = arith.addf %135, %142 : vector<32x512xf32>
    %c511_i32_95 = arith.constant 511 : i32
    %144 = tpu.dynamic_rotate %95 by %c511_i32_95 dim 1 : vector<32x512xf32>, i32 -> vector<32x512xf32>
    %c5_96 = arith.constant 5 : index
    %c0_97 = arith.constant 0 : index
    %145 = vector.load %arg2[%c5_96, %c0_97] : memref<9x512xf32, #tpu.memory_space<vmem>>, vector<1x512xf32>
    %c1_98 = arith.constant 1 : index
    %c5_99 = arith.constant 5 : index
    %c0_100 = arith.constant 0 : index
    %c0_101 = arith.constant 0 : index
    %146 = vector.load %arg3[%c1_98, %c5_99, %c0_100, %c0_101] : memref<4x9x32x1xf32, #tpu.memory_space<vmem>>, vector<1x1x32x1xf32>
    %147 = vector.shape_cast %146 : vector<1x1x32x1xf32> to vector<32x1xf32>
    %148 = vector.broadcast %145 : vector<1x512xf32> to vector<32x512xf32>
    %149 = arith.mulf %144, %148 : vector<32x512xf32>
    %150 = vector.broadcast %147 : vector<32x1xf32> to vector<32x512xf32>
    %151 = arith.mulf %149, %150 : vector<32x512xf32>
    %152 = arith.addf %143, %151 : vector<32x512xf32>
    %c497_i32_102 = arith.constant 497 : i32
    %153 = tpu.dynamic_rotate %95 by %c497_i32_102 dim 1 : vector<32x512xf32>, i32 -> vector<32x512xf32>
    %c6_103 = arith.constant 6 : index
    %c0_104 = arith.constant 0 : index
    %154 = vector.load %arg2[%c6_103, %c0_104] : memref<9x512xf32, #tpu.memory_space<vmem>>, vector<1x512xf32>
    %c1_105 = arith.constant 1 : index
    %c6_106 = arith.constant 6 : index
    %c0_107 = arith.constant 0 : index
    %c0_108 = arith.constant 0 : index
    %155 = vector.load %arg3[%c1_105, %c6_106, %c0_107, %c0_108] : memref<4x9x32x1xf32, #tpu.memory_space<vmem>>, vector<1x1x32x1xf32>
    %156 = vector.shape_cast %155 : vector<1x1x32x1xf32> to vector<32x1xf32>
    %157 = vector.broadcast %154 : vector<1x512xf32> to vector<32x512xf32>
    %158 = arith.mulf %153, %157 : vector<32x512xf32>
    %159 = vector.broadcast %156 : vector<32x1xf32> to vector<32x512xf32>
    %160 = arith.mulf %158, %159 : vector<32x512xf32>
    %161 = arith.addf %152, %160 : vector<32x512xf32>
    %c496_i32_109 = arith.constant 496 : i32
    %162 = tpu.dynamic_rotate %95 by %c496_i32_109 dim 1 : vector<32x512xf32>, i32 -> vector<32x512xf32>
    %c7_110 = arith.constant 7 : index
    %c0_111 = arith.constant 0 : index
    %163 = vector.load %arg2[%c7_110, %c0_111] : memref<9x512xf32, #tpu.memory_space<vmem>>, vector<1x512xf32>
    %c1_112 = arith.constant 1 : index
    %c7_113 = arith.constant 7 : index
    %c0_114 = arith.constant 0 : index
    %c0_115 = arith.constant 0 : index
    %164 = vector.load %arg3[%c1_112, %c7_113, %c0_114, %c0_115] : memref<4x9x32x1xf32, #tpu.memory_space<vmem>>, vector<1x1x32x1xf32>
    %165 = vector.shape_cast %164 : vector<1x1x32x1xf32> to vector<32x1xf32>
    %166 = vector.broadcast %163 : vector<1x512xf32> to vector<32x512xf32>
    %167 = arith.mulf %162, %166 : vector<32x512xf32>
    %168 = vector.broadcast %165 : vector<32x1xf32> to vector<32x512xf32>
    %169 = arith.mulf %167, %168 : vector<32x512xf32>
    %170 = arith.addf %161, %169 : vector<32x512xf32>
    %c495_i32_116 = arith.constant 495 : i32
    %171 = tpu.dynamic_rotate %95 by %c495_i32_116 dim 1 : vector<32x512xf32>, i32 -> vector<32x512xf32>
    %c8_117 = arith.constant 8 : index
    %c0_118 = arith.constant 0 : index
    %172 = vector.load %arg2[%c8_117, %c0_118] : memref<9x512xf32, #tpu.memory_space<vmem>>, vector<1x512xf32>
    %c1_119 = arith.constant 1 : index
    %c8_120 = arith.constant 8 : index
    %c0_121 = arith.constant 0 : index
    %c0_122 = arith.constant 0 : index
    %173 = vector.load %arg3[%c1_119, %c8_120, %c0_121, %c0_122] : memref<4x9x32x1xf32, #tpu.memory_space<vmem>>, vector<1x1x32x1xf32>
    %174 = vector.shape_cast %173 : vector<1x1x32x1xf32> to vector<32x1xf32>
    %175 = vector.broadcast %172 : vector<1x512xf32> to vector<32x512xf32>
    %176 = arith.mulf %171, %175 : vector<32x512xf32>
    %177 = vector.broadcast %174 : vector<32x1xf32> to vector<32x512xf32>
    %178 = arith.mulf %176, %177 : vector<32x512xf32>
    %179 = arith.addf %170, %178 : vector<32x512xf32>
    %c1_123 = arith.constant 1 : index
    %c0_124 = arith.constant 0 : index
    %c0_125 = arith.constant 0 : index
    %180 = vector.load %arg5[%c1_123, %c0_124, %c0_125] : memref<4x32x32xbf16, #tpu.memory_space<vmem>>, vector<1x32x32xbf16>
    %181 = vector.shape_cast %180 : vector<1x32x32xbf16> to vector<32x32xbf16>
    %c1_126 = arith.constant 1 : index
    %c0_127 = arith.constant 0 : index
    %c0_128 = arith.constant 0 : index
    %182 = vector.load %arg6[%c1_126, %c0_127, %c0_128] : memref<4x32x1xf32, #tpu.memory_space<vmem>>, vector<1x32x1xf32>
    %183 = vector.shape_cast %182 : vector<1x32x1xf32> to vector<32x1xf32>
    %184 = arith.truncf %179 : vector<32x512xf32> to vector<32x512xbf16>
    %cst_129 = arith.constant dense<0.000000e+00> : vector<32x512xf32>
    %185 = tpu.matmul %181, %184, %cst_129 {dimension_numbers = #tpu.dot_dimension_numbers<[1], [0], [0], [1], [0, 0, 1, 1], [], []>} : vector<32x32xbf16>, vector<32x512xbf16>, vector<32x512xf32> -> vector<32x512xf32>
    %186 = vector.broadcast %183 : vector<32x1xf32> to vector<32x512xf32>
    %187 = arith.addf %185, %186 : vector<32x512xf32>
    %188 = arith.addf %1, %187 : vector<32x512xf32>
    %c2_130 = arith.constant 2 : index
    %c0_131 = arith.constant 0 : index
    %c0_132 = arith.constant 0 : index
    %189 = vector.load %arg4[%c2_130, %c0_131, %c0_132] : memref<4x32x1xf32, #tpu.memory_space<vmem>>, vector<1x32x1xf32>
    %190 = vector.shape_cast %189 : vector<1x32x1xf32> to vector<32x1xf32>
    %191 = vector.shape_cast %190 : vector<32x1xf32> to vector<32x1xf32>
    %192 = vector.broadcast %191 : vector<32x1xf32> to vector<32x512xf32>
    %c17_i32_133 = arith.constant 17 : i32
    %193 = tpu.dynamic_rotate %188 by %c17_i32_133 dim 1 : vector<32x512xf32>, i32 -> vector<32x512xf32>
    %c0_134 = arith.constant 0 : index
    %c0_135 = arith.constant 0 : index
    %194 = vector.load %arg2[%c0_134, %c0_135] : memref<9x512xf32, #tpu.memory_space<vmem>>, vector<1x512xf32>
    %c2_136 = arith.constant 2 : index
    %c0_137 = arith.constant 0 : index
    %c0_138 = arith.constant 0 : index
    %c0_139 = arith.constant 0 : index
    %195 = vector.load %arg3[%c2_136, %c0_137, %c0_138, %c0_139] : memref<4x9x32x1xf32, #tpu.memory_space<vmem>>, vector<1x1x32x1xf32>
    %196 = vector.shape_cast %195 : vector<1x1x32x1xf32> to vector<32x1xf32>
    %197 = vector.broadcast %194 : vector<1x512xf32> to vector<32x512xf32>
    %198 = arith.mulf %193, %197 : vector<32x512xf32>
    %199 = vector.broadcast %196 : vector<32x1xf32> to vector<32x512xf32>
    %200 = arith.mulf %198, %199 : vector<32x512xf32>
    %201 = arith.addf %192, %200 : vector<32x512xf32>
    %c16_i32_140 = arith.constant 16 : i32
    %202 = tpu.dynamic_rotate %188 by %c16_i32_140 dim 1 : vector<32x512xf32>, i32 -> vector<32x512xf32>
    %c1_141 = arith.constant 1 : index
    %c0_142 = arith.constant 0 : index
    %203 = vector.load %arg2[%c1_141, %c0_142] : memref<9x512xf32, #tpu.memory_space<vmem>>, vector<1x512xf32>
    %c2_143 = arith.constant 2 : index
    %c1_144 = arith.constant 1 : index
    %c0_145 = arith.constant 0 : index
    %c0_146 = arith.constant 0 : index
    %204 = vector.load %arg3[%c2_143, %c1_144, %c0_145, %c0_146] : memref<4x9x32x1xf32, #tpu.memory_space<vmem>>, vector<1x1x32x1xf32>
    %205 = vector.shape_cast %204 : vector<1x1x32x1xf32> to vector<32x1xf32>
    %206 = vector.broadcast %203 : vector<1x512xf32> to vector<32x512xf32>
    %207 = arith.mulf %202, %206 : vector<32x512xf32>
    %208 = vector.broadcast %205 : vector<32x1xf32> to vector<32x512xf32>
    %209 = arith.mulf %207, %208 : vector<32x512xf32>
    %210 = arith.addf %201, %209 : vector<32x512xf32>
    %c15_i32_147 = arith.constant 15 : i32
    %211 = tpu.dynamic_rotate %188 by %c15_i32_147 dim 1 : vector<32x512xf32>, i32 -> vector<32x512xf32>
    %c2_148 = arith.constant 2 : index
    %c0_149 = arith.constant 0 : index
    %212 = vector.load %arg2[%c2_148, %c0_149] : memref<9x512xf32, #tpu.memory_space<vmem>>, vector<1x512xf32>
    %c2_150 = arith.constant 2 : index
    %c2_151 = arith.constant 2 : index
    %c0_152 = arith.constant 0 : index
    %c0_153 = arith.constant 0 : index
    %213 = vector.load %arg3[%c2_150, %c2_151, %c0_152, %c0_153] : memref<4x9x32x1xf32, #tpu.memory_space<vmem>>, vector<1x1x32x1xf32>
    %214 = vector.shape_cast %213 : vector<1x1x32x1xf32> to vector<32x1xf32>
    %215 = vector.broadcast %212 : vector<1x512xf32> to vector<32x512xf32>
    %216 = arith.mulf %211, %215 : vector<32x512xf32>
    %217 = vector.broadcast %214 : vector<32x1xf32> to vector<32x512xf32>
    %218 = arith.mulf %216, %217 : vector<32x512xf32>
    %219 = arith.addf %210, %218 : vector<32x512xf32>
    %c1_i32_154 = arith.constant 1 : i32
    %220 = tpu.dynamic_rotate %188 by %c1_i32_154 dim 1 : vector<32x512xf32>, i32 -> vector<32x512xf32>
    %c3_155 = arith.constant 3 : index
    %c0_156 = arith.constant 0 : index
    %221 = vector.load %arg2[%c3_155, %c0_156] : memref<9x512xf32, #tpu.memory_space<vmem>>, vector<1x512xf32>
    %c2_157 = arith.constant 2 : index
    %c3_158 = arith.constant 3 : index
    %c0_159 = arith.constant 0 : index
    %c0_160 = arith.constant 0 : index
    %222 = vector.load %arg3[%c2_157, %c3_158, %c0_159, %c0_160] : memref<4x9x32x1xf32, #tpu.memory_space<vmem>>, vector<1x1x32x1xf32>
    %223 = vector.shape_cast %222 : vector<1x1x32x1xf32> to vector<32x1xf32>
    %224 = vector.broadcast %221 : vector<1x512xf32> to vector<32x512xf32>
    %225 = arith.mulf %220, %224 : vector<32x512xf32>
    %226 = vector.broadcast %223 : vector<32x1xf32> to vector<32x512xf32>
    %227 = arith.mulf %225, %226 : vector<32x512xf32>
    %228 = arith.addf %219, %227 : vector<32x512xf32>
    %c4_161 = arith.constant 4 : index
    %c0_162 = arith.constant 0 : index
    %229 = vector.load %arg2[%c4_161, %c0_162] : memref<9x512xf32, #tpu.memory_space<vmem>>, vector<1x512xf32>
    %c2_163 = arith.constant 2 : index
    %c4_164 = arith.constant 4 : index
    %c0_165 = arith.constant 0 : index
    %c0_166 = arith.constant 0 : index
    %230 = vector.load %arg3[%c2_163, %c4_164, %c0_165, %c0_166] : memref<4x9x32x1xf32, #tpu.memory_space<vmem>>, vector<1x1x32x1xf32>
    %231 = vector.shape_cast %230 : vector<1x1x32x1xf32> to vector<32x1xf32>
    %232 = vector.broadcast %229 : vector<1x512xf32> to vector<32x512xf32>
    %233 = arith.mulf %188, %232 : vector<32x512xf32>
    %234 = vector.broadcast %231 : vector<32x1xf32> to vector<32x512xf32>
    %235 = arith.mulf %233, %234 : vector<32x512xf32>
    %236 = arith.addf %228, %235 : vector<32x512xf32>
    %c511_i32_167 = arith.constant 511 : i32
    %237 = tpu.dynamic_rotate %188 by %c511_i32_167 dim 1 : vector<32x512xf32>, i32 -> vector<32x512xf32>
    %c5_168 = arith.constant 5 : index
    %c0_169 = arith.constant 0 : index
    %238 = vector.load %arg2[%c5_168, %c0_169] : memref<9x512xf32, #tpu.memory_space<vmem>>, vector<1x512xf32>
    %c2_170 = arith.constant 2 : index
    %c5_171 = arith.constant 5 : index
    %c0_172 = arith.constant 0 : index
    %c0_173 = arith.constant 0 : index
    %239 = vector.load %arg3[%c2_170, %c5_171, %c0_172, %c0_173] : memref<4x9x32x1xf32, #tpu.memory_space<vmem>>, vector<1x1x32x1xf32>
    %240 = vector.shape_cast %239 : vector<1x1x32x1xf32> to vector<32x1xf32>
    %241 = vector.broadcast %238 : vector<1x512xf32> to vector<32x512xf32>
    %242 = arith.mulf %237, %241 : vector<32x512xf32>
    %243 = vector.broadcast %240 : vector<32x1xf32> to vector<32x512xf32>
    %244 = arith.mulf %242, %243 : vector<32x512xf32>
    %245 = arith.addf %236, %244 : vector<32x512xf32>
    %c497_i32_174 = arith.constant 497 : i32
    %246 = tpu.dynamic_rotate %188 by %c497_i32_174 dim 1 : vector<32x512xf32>, i32 -> vector<32x512xf32>
    %c6_175 = arith.constant 6 : index
    %c0_176 = arith.constant 0 : index
    %247 = vector.load %arg2[%c6_175, %c0_176] : memref<9x512xf32, #tpu.memory_space<vmem>>, vector<1x512xf32>
    %c2_177 = arith.constant 2 : index
    %c6_178 = arith.constant 6 : index
    %c0_179 = arith.constant 0 : index
    %c0_180 = arith.constant 0 : index
    %248 = vector.load %arg3[%c2_177, %c6_178, %c0_179, %c0_180] : memref<4x9x32x1xf32, #tpu.memory_space<vmem>>, vector<1x1x32x1xf32>
    %249 = vector.shape_cast %248 : vector<1x1x32x1xf32> to vector<32x1xf32>
    %250 = vector.broadcast %247 : vector<1x512xf32> to vector<32x512xf32>
    %251 = arith.mulf %246, %250 : vector<32x512xf32>
    %252 = vector.broadcast %249 : vector<32x1xf32> to vector<32x512xf32>
    %253 = arith.mulf %251, %252 : vector<32x512xf32>
    %254 = arith.addf %245, %253 : vector<32x512xf32>
    %c496_i32_181 = arith.constant 496 : i32
    %255 = tpu.dynamic_rotate %188 by %c496_i32_181 dim 1 : vector<32x512xf32>, i32 -> vector<32x512xf32>
    %c7_182 = arith.constant 7 : index
    %c0_183 = arith.constant 0 : index
    %256 = vector.load %arg2[%c7_182, %c0_183] : memref<9x512xf32, #tpu.memory_space<vmem>>, vector<1x512xf32>
    %c2_184 = arith.constant 2 : index
    %c7_185 = arith.constant 7 : index
    %c0_186 = arith.constant 0 : index
    %c0_187 = arith.constant 0 : index
    %257 = vector.load %arg3[%c2_184, %c7_185, %c0_186, %c0_187] : memref<4x9x32x1xf32, #tpu.memory_space<vmem>>, vector<1x1x32x1xf32>
    %258 = vector.shape_cast %257 : vector<1x1x32x1xf32> to vector<32x1xf32>
    %259 = vector.broadcast %256 : vector<1x512xf32> to vector<32x512xf32>
    %260 = arith.mulf %255, %259 : vector<32x512xf32>
    %261 = vector.broadcast %258 : vector<32x1xf32> to vector<32x512xf32>
    %262 = arith.mulf %260, %261 : vector<32x512xf32>
    %263 = arith.addf %254, %262 : vector<32x512xf32>
    %c495_i32_188 = arith.constant 495 : i32
    %264 = tpu.dynamic_rotate %188 by %c495_i32_188 dim 1 : vector<32x512xf32>, i32 -> vector<32x512xf32>
    %c8_189 = arith.constant 8 : index
    %c0_190 = arith.constant 0 : index
    %265 = vector.load %arg2[%c8_189, %c0_190] : memref<9x512xf32, #tpu.memory_space<vmem>>, vector<1x512xf32>
    %c2_191 = arith.constant 2 : index
    %c8_192 = arith.constant 8 : index
    %c0_193 = arith.constant 0 : index
    %c0_194 = arith.constant 0 : index
    %266 = vector.load %arg3[%c2_191, %c8_192, %c0_193, %c0_194] : memref<4x9x32x1xf32, #tpu.memory_space<vmem>>, vector<1x1x32x1xf32>
    %267 = vector.shape_cast %266 : vector<1x1x32x1xf32> to vector<32x1xf32>
    %268 = vector.broadcast %265 : vector<1x512xf32> to vector<32x512xf32>
    %269 = arith.mulf %264, %268 : vector<32x512xf32>
    %270 = vector.broadcast %267 : vector<32x1xf32> to vector<32x512xf32>
    %271 = arith.mulf %269, %270 : vector<32x512xf32>
    %272 = arith.addf %263, %271 : vector<32x512xf32>
    %c2_195 = arith.constant 2 : index
    %c0_196 = arith.constant 0 : index
    %c0_197 = arith.constant 0 : index
    %273 = vector.load %arg5[%c2_195, %c0_196, %c0_197] : memref<4x32x32xbf16, #tpu.memory_space<vmem>>, vector<1x32x32xbf16>
    %274 = vector.shape_cast %273 : vector<1x32x32xbf16> to vector<32x32xbf16>
    %c2_198 = arith.constant 2 : index
    %c0_199 = arith.constant 0 : index
    %c0_200 = arith.constant 0 : index
    %275 = vector.load %arg6[%c2_198, %c0_199, %c0_200] : memref<4x32x1xf32, #tpu.memory_space<vmem>>, vector<1x32x1xf32>
    %276 = vector.shape_cast %275 : vector<1x32x1xf32> to vector<32x1xf32>
    %277 = arith.truncf %272 : vector<32x512xf32> to vector<32x512xbf16>
    %cst_201 = arith.constant dense<0.000000e+00> : vector<32x512xf32>
    %278 = tpu.matmul %274, %277, %cst_201 {dimension_numbers = #tpu.dot_dimension_numbers<[1], [0], [0], [1], [0, 0, 1, 1], [], []>} : vector<32x32xbf16>, vector<32x512xbf16>, vector<32x512xf32> -> vector<32x512xf32>
    %279 = vector.broadcast %276 : vector<32x1xf32> to vector<32x512xf32>
    %280 = arith.addf %278, %279 : vector<32x512xf32>
    %cst_202 = arith.constant 0.000000e+00 : f32
    %281 = vector.broadcast %cst_202 : f32 to vector<32x512xf32>
    %282 = arith.maximumf %280, %281 : vector<32x512xf32>
    %c3_203 = arith.constant 3 : index
    %c0_204 = arith.constant 0 : index
    %c0_205 = arith.constant 0 : index
    %283 = vector.load %arg4[%c3_203, %c0_204, %c0_205] : memref<4x32x1xf32, #tpu.memory_space<vmem>>, vector<1x32x1xf32>
    %284 = vector.shape_cast %283 : vector<1x32x1xf32> to vector<32x1xf32>
    %285 = vector.shape_cast %284 : vector<32x1xf32> to vector<32x1xf32>
    %286 = vector.broadcast %285 : vector<32x1xf32> to vector<32x512xf32>
    %c17_i32_206 = arith.constant 17 : i32
    %287 = tpu.dynamic_rotate %282 by %c17_i32_206 dim 1 : vector<32x512xf32>, i32 -> vector<32x512xf32>
    %c0_207 = arith.constant 0 : index
    %c0_208 = arith.constant 0 : index
    %288 = vector.load %arg2[%c0_207, %c0_208] : memref<9x512xf32, #tpu.memory_space<vmem>>, vector<1x512xf32>
    %c3_209 = arith.constant 3 : index
    %c0_210 = arith.constant 0 : index
    %c0_211 = arith.constant 0 : index
    %c0_212 = arith.constant 0 : index
    %289 = vector.load %arg3[%c3_209, %c0_210, %c0_211, %c0_212] : memref<4x9x32x1xf32, #tpu.memory_space<vmem>>, vector<1x1x32x1xf32>
    %290 = vector.shape_cast %289 : vector<1x1x32x1xf32> to vector<32x1xf32>
    %291 = vector.broadcast %288 : vector<1x512xf32> to vector<32x512xf32>
    %292 = arith.mulf %287, %291 : vector<32x512xf32>
    %293 = vector.broadcast %290 : vector<32x1xf32> to vector<32x512xf32>
    %294 = arith.mulf %292, %293 : vector<32x512xf32>
    %295 = arith.addf %286, %294 : vector<32x512xf32>
    %c16_i32_213 = arith.constant 16 : i32
    %296 = tpu.dynamic_rotate %282 by %c16_i32_213 dim 1 : vector<32x512xf32>, i32 -> vector<32x512xf32>
    %c1_214 = arith.constant 1 : index
    %c0_215 = arith.constant 0 : index
    %297 = vector.load %arg2[%c1_214, %c0_215] : memref<9x512xf32, #tpu.memory_space<vmem>>, vector<1x512xf32>
    %c3_216 = arith.constant 3 : index
    %c1_217 = arith.constant 1 : index
    %c0_218 = arith.constant 0 : index
    %c0_219 = arith.constant 0 : index
    %298 = vector.load %arg3[%c3_216, %c1_217, %c0_218, %c0_219] : memref<4x9x32x1xf32, #tpu.memory_space<vmem>>, vector<1x1x32x1xf32>
    %299 = vector.shape_cast %298 : vector<1x1x32x1xf32> to vector<32x1xf32>
    %300 = vector.broadcast %297 : vector<1x512xf32> to vector<32x512xf32>
    %301 = arith.mulf %296, %300 : vector<32x512xf32>
    %302 = vector.broadcast %299 : vector<32x1xf32> to vector<32x512xf32>
    %303 = arith.mulf %301, %302 : vector<32x512xf32>
    %304 = arith.addf %295, %303 : vector<32x512xf32>
    %c15_i32_220 = arith.constant 15 : i32
    %305 = tpu.dynamic_rotate %282 by %c15_i32_220 dim 1 : vector<32x512xf32>, i32 -> vector<32x512xf32>
    %c2_221 = arith.constant 2 : index
    %c0_222 = arith.constant 0 : index
    %306 = vector.load %arg2[%c2_221, %c0_222] : memref<9x512xf32, #tpu.memory_space<vmem>>, vector<1x512xf32>
    %c3_223 = arith.constant 3 : index
    %c2_224 = arith.constant 2 : index
    %c0_225 = arith.constant 0 : index
    %c0_226 = arith.constant 0 : index
    %307 = vector.load %arg3[%c3_223, %c2_224, %c0_225, %c0_226] : memref<4x9x32x1xf32, #tpu.memory_space<vmem>>, vector<1x1x32x1xf32>
    %308 = vector.shape_cast %307 : vector<1x1x32x1xf32> to vector<32x1xf32>
    %309 = vector.broadcast %306 : vector<1x512xf32> to vector<32x512xf32>
    %310 = arith.mulf %305, %309 : vector<32x512xf32>
    %311 = vector.broadcast %308 : vector<32x1xf32> to vector<32x512xf32>
    %312 = arith.mulf %310, %311 : vector<32x512xf32>
    %313 = arith.addf %304, %312 : vector<32x512xf32>
    %c1_i32_227 = arith.constant 1 : i32
    %314 = tpu.dynamic_rotate %282 by %c1_i32_227 dim 1 : vector<32x512xf32>, i32 -> vector<32x512xf32>
    %c3_228 = arith.constant 3 : index
    %c0_229 = arith.constant 0 : index
    %315 = vector.load %arg2[%c3_228, %c0_229] : memref<9x512xf32, #tpu.memory_space<vmem>>, vector<1x512xf32>
    %c3_230 = arith.constant 3 : index
    %c3_231 = arith.constant 3 : index
    %c0_232 = arith.constant 0 : index
    %c0_233 = arith.constant 0 : index
    %316 = vector.load %arg3[%c3_230, %c3_231, %c0_232, %c0_233] : memref<4x9x32x1xf32, #tpu.memory_space<vmem>>, vector<1x1x32x1xf32>
    %317 = vector.shape_cast %316 : vector<1x1x32x1xf32> to vector<32x1xf32>
    %318 = vector.broadcast %315 : vector<1x512xf32> to vector<32x512xf32>
    %319 = arith.mulf %314, %318 : vector<32x512xf32>
    %320 = vector.broadcast %317 : vector<32x1xf32> to vector<32x512xf32>
    %321 = arith.mulf %319, %320 : vector<32x512xf32>
    %322 = arith.addf %313, %321 : vector<32x512xf32>
    %c4_234 = arith.constant 4 : index
    %c0_235 = arith.constant 0 : index
    %323 = vector.load %arg2[%c4_234, %c0_235] : memref<9x512xf32, #tpu.memory_space<vmem>>, vector<1x512xf32>
    %c3_236 = arith.constant 3 : index
    %c4_237 = arith.constant 4 : index
    %c0_238 = arith.constant 0 : index
    %c0_239 = arith.constant 0 : index
    %324 = vector.load %arg3[%c3_236, %c4_237, %c0_238, %c0_239] : memref<4x9x32x1xf32, #tpu.memory_space<vmem>>, vector<1x1x32x1xf32>
    %325 = vector.shape_cast %324 : vector<1x1x32x1xf32> to vector<32x1xf32>
    %326 = vector.broadcast %323 : vector<1x512xf32> to vector<32x512xf32>
    %327 = arith.mulf %282, %326 : vector<32x512xf32>
    %328 = vector.broadcast %325 : vector<32x1xf32> to vector<32x512xf32>
    %329 = arith.mulf %327, %328 : vector<32x512xf32>
    %330 = arith.addf %322, %329 : vector<32x512xf32>
    %c511_i32_240 = arith.constant 511 : i32
    %331 = tpu.dynamic_rotate %282 by %c511_i32_240 dim 1 : vector<32x512xf32>, i32 -> vector<32x512xf32>
    %c5_241 = arith.constant 5 : index
    %c0_242 = arith.constant 0 : index
    %332 = vector.load %arg2[%c5_241, %c0_242] : memref<9x512xf32, #tpu.memory_space<vmem>>, vector<1x512xf32>
    %c3_243 = arith.constant 3 : index
    %c5_244 = arith.constant 5 : index
    %c0_245 = arith.constant 0 : index
    %c0_246 = arith.constant 0 : index
    %333 = vector.load %arg3[%c3_243, %c5_244, %c0_245, %c0_246] : memref<4x9x32x1xf32, #tpu.memory_space<vmem>>, vector<1x1x32x1xf32>
    %334 = vector.shape_cast %333 : vector<1x1x32x1xf32> to vector<32x1xf32>
    %335 = vector.broadcast %332 : vector<1x512xf32> to vector<32x512xf32>
    %336 = arith.mulf %331, %335 : vector<32x512xf32>
    %337 = vector.broadcast %334 : vector<32x1xf32> to vector<32x512xf32>
    %338 = arith.mulf %336, %337 : vector<32x512xf32>
    %339 = arith.addf %330, %338 : vector<32x512xf32>
    %c497_i32_247 = arith.constant 497 : i32
    %340 = tpu.dynamic_rotate %282 by %c497_i32_247 dim 1 : vector<32x512xf32>, i32 -> vector<32x512xf32>
    %c6_248 = arith.constant 6 : index
    %c0_249 = arith.constant 0 : index
    %341 = vector.load %arg2[%c6_248, %c0_249] : memref<9x512xf32, #tpu.memory_space<vmem>>, vector<1x512xf32>
    %c3_250 = arith.constant 3 : index
    %c6_251 = arith.constant 6 : index
    %c0_252 = arith.constant 0 : index
    %c0_253 = arith.constant 0 : index
    %342 = vector.load %arg3[%c3_250, %c6_251, %c0_252, %c0_253] : memref<4x9x32x1xf32, #tpu.memory_space<vmem>>, vector<1x1x32x1xf32>
    %343 = vector.shape_cast %342 : vector<1x1x32x1xf32> to vector<32x1xf32>
    %344 = vector.broadcast %341 : vector<1x512xf32> to vector<32x512xf32>
    %345 = arith.mulf %340, %344 : vector<32x512xf32>
    %346 = vector.broadcast %343 : vector<32x1xf32> to vector<32x512xf32>
    %347 = arith.mulf %345, %346 : vector<32x512xf32>
    %348 = arith.addf %339, %347 : vector<32x512xf32>
    %c496_i32_254 = arith.constant 496 : i32
    %349 = tpu.dynamic_rotate %282 by %c496_i32_254 dim 1 : vector<32x512xf32>, i32 -> vector<32x512xf32>
    %c7_255 = arith.constant 7 : index
    %c0_256 = arith.constant 0 : index
    %350 = vector.load %arg2[%c7_255, %c0_256] : memref<9x512xf32, #tpu.memory_space<vmem>>, vector<1x512xf32>
    %c3_257 = arith.constant 3 : index
    %c7_258 = arith.constant 7 : index
    %c0_259 = arith.constant 0 : index
    %c0_260 = arith.constant 0 : index
    %351 = vector.load %arg3[%c3_257, %c7_258, %c0_259, %c0_260] : memref<4x9x32x1xf32, #tpu.memory_space<vmem>>, vector<1x1x32x1xf32>
    %352 = vector.shape_cast %351 : vector<1x1x32x1xf32> to vector<32x1xf32>
    %353 = vector.broadcast %350 : vector<1x512xf32> to vector<32x512xf32>
    %354 = arith.mulf %349, %353 : vector<32x512xf32>
    %355 = vector.broadcast %352 : vector<32x1xf32> to vector<32x512xf32>
    %356 = arith.mulf %354, %355 : vector<32x512xf32>
    %357 = arith.addf %348, %356 : vector<32x512xf32>
    %c495_i32_261 = arith.constant 495 : i32
    %358 = tpu.dynamic_rotate %282 by %c495_i32_261 dim 1 : vector<32x512xf32>, i32 -> vector<32x512xf32>
    %c8_262 = arith.constant 8 : index
    %c0_263 = arith.constant 0 : index
    %359 = vector.load %arg2[%c8_262, %c0_263] : memref<9x512xf32, #tpu.memory_space<vmem>>, vector<1x512xf32>
    %c3_264 = arith.constant 3 : index
    %c8_265 = arith.constant 8 : index
    %c0_266 = arith.constant 0 : index
    %c0_267 = arith.constant 0 : index
    %360 = vector.load %arg3[%c3_264, %c8_265, %c0_266, %c0_267] : memref<4x9x32x1xf32, #tpu.memory_space<vmem>>, vector<1x1x32x1xf32>
    %361 = vector.shape_cast %360 : vector<1x1x32x1xf32> to vector<32x1xf32>
    %362 = vector.broadcast %359 : vector<1x512xf32> to vector<32x512xf32>
    %363 = arith.mulf %358, %362 : vector<32x512xf32>
    %364 = vector.broadcast %361 : vector<32x1xf32> to vector<32x512xf32>
    %365 = arith.mulf %363, %364 : vector<32x512xf32>
    %366 = arith.addf %357, %365 : vector<32x512xf32>
    %c3_268 = arith.constant 3 : index
    %c0_269 = arith.constant 0 : index
    %c0_270 = arith.constant 0 : index
    %367 = vector.load %arg5[%c3_268, %c0_269, %c0_270] : memref<4x32x32xbf16, #tpu.memory_space<vmem>>, vector<1x32x32xbf16>
    %368 = vector.shape_cast %367 : vector<1x32x32xbf16> to vector<32x32xbf16>
    %c3_271 = arith.constant 3 : index
    %c0_272 = arith.constant 0 : index
    %c0_273 = arith.constant 0 : index
    %369 = vector.load %arg6[%c3_271, %c0_272, %c0_273] : memref<4x32x1xf32, #tpu.memory_space<vmem>>, vector<1x32x1xf32>
    %370 = vector.shape_cast %369 : vector<1x32x1xf32> to vector<32x1xf32>
    %371 = arith.truncf %366 : vector<32x512xf32> to vector<32x512xbf16>
    %cst_274 = arith.constant dense<0.000000e+00> : vector<32x512xf32>
    %372 = tpu.matmul %368, %371, %cst_274 {dimension_numbers = #tpu.dot_dimension_numbers<[1], [0], [0], [1], [0, 0, 1, 1], [], []>} : vector<32x32xbf16>, vector<32x512xbf16>, vector<32x512xf32> -> vector<32x512xf32>
    %373 = vector.broadcast %370 : vector<32x1xf32> to vector<32x512xf32>
    %374 = arith.addf %372, %373 : vector<32x512xf32>
    %375 = arith.addf %188, %374 : vector<32x512xf32>
    %c0_275 = arith.constant 0 : index
    %c0_276 = arith.constant 0 : index
    %376 = vector.load %arg7[%c0_275, %c0_276] : memref<32x32xbf16, #tpu.memory_space<vmem>>, vector<32x32xbf16>
    %c0_277 = arith.constant 0 : index
    %c0_278 = arith.constant 0 : index
    %377 = vector.load %arg8[%c0_277, %c0_278] : memref<32x1xf32, #tpu.memory_space<vmem>>, vector<32x1xf32>
    %378 = arith.truncf %375 : vector<32x512xf32> to vector<32x512xbf16>
    %cst_279 = arith.constant dense<0.000000e+00> : vector<32x512xf32>
    %379 = tpu.matmul %376, %378, %cst_279 {dimension_numbers = #tpu.dot_dimension_numbers<[1], [0], [0], [1], [0, 0, 1, 1], [], []>} : vector<32x32xbf16>, vector<32x512xbf16>, vector<32x512xf32> -> vector<32x512xf32>
    %380 = vector.broadcast %377 : vector<32x1xf32> to vector<32x512xf32>
    %381 = arith.addf %379, %380 : vector<32x512xf32>
    %c0_280 = arith.constant 0 : index
    %c0_281 = arith.constant 0 : index
    %c0_282 = arith.constant 0 : index
    %382 = vector.load %arg9[%c0_280, %c0_281, %c0_282] : memref<1x32x512xf32, #tpu.memory_space<vmem>>, vector<1x32x512xf32>
    %383 = vector.shape_cast %382 : vector<1x32x512xf32> to vector<32x512xf32>
    %384 = vector.shape_cast %381 : vector<32x512xf32> to vector<1x32x512xf32>
    tpu.vector_store %arg9[%c0_280, %c0_281, %c0_282], %384 {strides = array<i32>} : memref<1x32x512xf32, #tpu.memory_space<vmem>>, vector<1x32x512xf32>,
    return
  }
  func.func @transform_0(%arg0: i32) -> (i32, i32, i32) {
    %c0_i32 = arith.constant 0 : i32
    %c0_i32_0 = arith.constant 0 : i32
    %c0_i32_1 = arith.constant 0 : i32
    return %arg0, %c0_i32, %c0_i32_0 : i32, i32, i32
  }
  func.func @transform_1(%arg0: i32) -> (i32, i32) {
    %c0_i32 = arith.constant 0 : i32
    %c0_i32_0 = arith.constant 0 : i32
    %c0_i32_1 = arith.constant 0 : i32
    return %c0_i32, %c0_i32_0 : i32, i32
  }
  func.func @transform_2(%arg0: i32) -> (i32, i32, i32, i32) {
    %c0_i32 = arith.constant 0 : i32
    %c0_i32_0 = arith.constant 0 : i32
    %c0_i32_1 = arith.constant 0 : i32
    %c0_i32_2 = arith.constant 0 : i32
    %c0_i32_3 = arith.constant 0 : i32
    return %c0_i32, %c0_i32_0, %c0_i32_1, %c0_i32_2 : i32, i32, i32, i32
  }
  func.func @transform_3(%arg0: i32) -> (i32, i32, i32) {
    %c0_i32 = arith.constant 0 : i32
    %c0_i32_0 = arith.constant 0 : i32
    %c0_i32_1 = arith.constant 0 : i32
    %c0_i32_2 = arith.constant 0 : i32
    return %c0_i32, %c0_i32_0, %c0_i32_1 : i32, i32, i32
  }
  func.func @transform_4(%arg0: i32) -> (i32, i32, i32) {
    %c0_i32 = arith.constant 0 : i32
    %c0_i32_0 = arith.constant 0 : i32
    %c0_i32_1 = arith.constant 0 : i32
    %c0_i32_2 = arith.constant 0 : i32
    return %c0_i32, %c0_i32_0, %c0_i32_1 : i32, i32, i32
  }
  func.func @transform_5(%arg0: i32) -> (i32, i32, i32) {
    %c0_i32 = arith.constant 0 : i32
    %c0_i32_0 = arith.constant 0 : i32
    %c0_i32_1 = arith.constant 0 : i32
    %c0_i32_2 = arith.constant 0 : i32
    return %c0_i32, %c0_i32_0, %c0_i32_1 : i32, i32, i32
  }
  func.func @transform_6(%arg0: i32) -> (i32, i32) {
    %c0_i32 = arith.constant 0 : i32
    %c0_i32_0 = arith.constant 0 : i32
    %c0_i32_1 = arith.constant 0 : i32
    return %c0_i32, %c0_i32_0 : i32, i32
  }
  func.func @transform_7(%arg0: i32) -> (i32, i32) {
    %c0_i32 = arith.constant 0 : i32
    %c0_i32_0 = arith.constant 0 : i32
    %c0_i32_1 = arith.constant 0 : i32
    return %c0_i32, %c0_i32_0 : i32, i32
  }
  func.func @transform_8(%arg0: i32) -> (i32, i32, i32) {
    %c0_i32 = arith.constant 0 : i32
    %c0_i32_0 = arith.constant 0 : i32
    %c0_i32_1 = arith.constant 0 : i32
    return %arg0, %c0_i32, %c0_i32_0 : i32, i32, i32
  }
}

</mosaic_0001>

<bundles_post_ra>
// kernel: tpu_custom_call.1
= control target key start
LH: loop header
LB: loop body
LE: loop exit
PB: predicated region body
PF: predicated region fallthrough
CT: control target
= control target key end

     0   :  { %v12931_v2 = vmov 0   ;;  %s5695_s17 = smov 17   ;;  %s12922_s0 = inlined_call_operand.vmem [shape: f32[1,32,512], index: 0, kind: input, shape index: {}]   ;;  %s12923_s1 = inlined_call_operand.vmem [shape: f32[9,512], index: 1, kind: input, shape index: {}]   ;;  %s12924_s2 = inlined_call_operand.vmem [shape: f32[4,9,32,1], index: 2, kind: input, shape index: {}]   ;;  %s12925_s3 = inlined_call_operand.vmem [shape: f32[4,32,1], index: 3, kind: input, shape index: {}]   ;;  %s12926_s4 = inlined_call_operand.vmem [shape: bf16[4,32,32], index: 4, kind: input, shape index: {}]   ;;  %s12927_s5 = inlined_call_operand.vmem [shape: f32[4,32,1], index: 5, kind: input, shape index: {}]   ;;  %s12928_s6 = inlined_call_operand.vmem [shape: bf16[32,32], index: 6, kind: input, shape index: {}]   ;;  %s12929_s7 = inlined_call_operand.vmem [shape: f32[32,1], index: 7, kind: input, shape index: {}]   ;;  %s12930_s8 = inlined_call_operand.hbm [shape: f32[1,32,512], index: 8, kind: output, shape index: {}]  }
   0x1   :  { %v49_v0 = vld [vmem:[%s12925_s3 + $0x10] sm:$0xff]  ;;  %v47_v1 = vld [vmem:[%s12925_s3] sm:$0xff]  ;;  %5645 = vset.pattern.permute.xlu1 %v12931_v2  ;;  %5644 = vset.pattern.permute.xlu0 %v12931_v2  ;;  %v50_v3 = vld [vmem:[%s12925_s3 + $0x18] sm:$0xff] }
   0x2   :  { %63 = vperm.xlu1 %5645, %v49_v0   ;;  %53 = vperm.xlu0 %5644, %v47_v1   ;;  %v48_v4 = vld [vmem:[%s12925_s3 + $0x8] sm:$0xff]  ;;  %v5770_v5 = vld [vmem:[%s12922_s0 + $0x20] sm:$0xff] }
   0x3   :  { %1412 = vmatprep.mubr.bf16.mxu0 %v12931_v2  ;;  %1465 = vmatprep.mubr.bf16.mxu1 %v12931_v2  ;;  %v5775_v6 = vld [vmem:[%s12922_s0] sm:$0xff]  ;;  %v5794_v9 = vld [vmem:[%s12922_s0 + $0x28] sm:$0xff] }
   0x4   :  { %v5784_v7 = vld [vmem:[%s12922_s0 + $0x60] sm:$0xff]  ;;  %v5799_v10 = vld [vmem:[%s12922_s0 + $0x8] sm:$0xff] }
   0x5   :  { %v5789_v8 = vld [vmem:[%s12922_s0 + $0x40] sm:$0xff]  ;;  %v5808_v11 = vld [vmem:[%s12922_s0 + $0x68] sm:$0xff] }
   0x6   :  { %68 = vperm.xlu1 %5645, %v50_v3   ;;  %58 = vperm.xlu0 %5644, %v48_v4   ;;  %13452 = vst [vmem:[#allocation5_spill] sm:$0xff] %v5789_v8  ;;  %v5817_v12 = vld [vmem:[%s12922_s0 + $0x48] sm:$0xff] }
   0x7   :  { %13453 = vst [vmem:[#allocation6_spill] sm:$0xff] %v5817_v12 }
   0xa   :  { %73 = vrot.lane.b32.xlu1 %v5770_v5, %s5695_s17  ;;  %71 = vrot.lane.b32.xlu0 %v5775_v6, %s5695_s17 }
   0xe   :  { %77 = vrot.lane.b32.xlu1 %v5784_v7, %s5695_s17  ;;  %75 = vrot.lane.b32.xlu0 %v5789_v8, %s5695_s17 }
  0x12   :  { %81 = vrot.lane.b32.xlu1 %v5794_v9, %s5695_s17  ;;  %79 = vrot.lane.b32.xlu0 %v5799_v10, %s5695_s17 }
  0x13   :  { %13 = vsyncpa [#allocation3], 0  ;;  %v5826_v13 = vld [vmem:[%s12922_s0 + $0x30] sm:$0xff]  ;;  %v5854_v17 = vld [vmem:[%s12922_s0 + $0x38] sm:$0xff]  ;;  %s5696_s11 = smov 16   ;;  %s5697_s21 = smov 15  }
  0x14   :  { %v5831_v14 = vld [vmem:[%s12922_s0 + $0x10] sm:$0xff]  ;;  %v5859_v18 = vld [vmem:[%s12922_s0 + $0x18] sm:$0xff]  ;;  %v124_v21 = vld [vmem:[%s12924_s2 + $0x8] sm:$0xff]  ;;  %s5698_s30 = smov 1   ;;  %s5699_s28 = smov 127   ;;  %vm1373_vm8 = vcmask 261120  }
  0x15   :  { %v5840_v15 = vld [vmem:[%s12922_s0 + $0x70] sm:$0xff]  ;;  %v5868_v19 = vld [vmem:[%s12922_s0 + $0x78] sm:$0xff]  ;;  %v123_v22 = vld [vmem:[%s12924_s2] sm:$0xff]  ;;  %s5700_s18 = smov 113   ;;  %s5701_s29 = smov 112  }
  0x16   :  { %85 = vrot.lane.b32.xlu1 %v5808_v11, %s5695_s17  ;;  %83 = vrot.lane.b32.xlu0 %v5817_v12, %s5695_s17  ;;  %13454 = vst [vmem:[#allocation7_spill] sm:$0xff] %v5840_v15  ;;  %v5845_v16 = vld [vmem:[%s12922_s0 + $0x50] sm:$0xff]  ;;  %13456 = vst [vmem:[#allocation9_spill] sm:$0xff] %v5868_v19  ;;  %v5873_v20 = vld [vmem:[%s12922_s0 + $0x58] sm:$0xff]  ;;  %s5702_s25 = smov 111  }
  0x17   :  { %13455 = vst [vmem:[#allocation8_spill] sm:$0xff] %v5845_v16  ;;  %13457 = vst [vmem:[#allocation10_spill] sm:$0xff] %v5873_v20  ;;  %v126_v23 = vld [vmem:[%s12924_s2 + $0x18] sm:$0xff]  ;;  %v125_v24 = vld [vmem:[%s12924_s2 + $0x10] sm:$0xff] }
  0x18   :  { %v5420_v25 = vld [vmem:[%s12924_s2 + $0x28] sm:$0xff]  ;;  %v5419_v26 = vld [vmem:[%s12924_s2 + $0x20] sm:$0xff]  ;;  %v5422_v27 = vld [vmem:[%s12924_s2 + $0x38] sm:$0xff] }
  0x19   :  { %v5421_v28 = vld [vmem:[%s12924_s2 + $0x30] sm:$0xff]  ;;  %v5425_v29 = vld [vmem:[%s12924_s2 + $0x48] sm:$0xff]  ;;  %v5424_v30 = vld [vmem:[%s12924_s2 + $0x40] sm:$0xff] }
  0x1a   :  { %89 = vrot.lane.b32.xlu1 %v5826_v13, %s5695_s17  ;;  %87 = vrot.lane.b32.xlu0 %v5831_v14, %s5695_s17  ;;  %v5427_v31 = vld [vmem:[%s12924_s2 + $0x58] sm:$0xff]  ;;  %v5426_v32 = vld [vmem:[%s12924_s2 + $0x50] sm:$0xff] }
  0x1b   :  { %v5430_v51 = vld [vmem:[%s12924_s2 + $0x68] sm:$0xff]  ;;  %v5429_v52 = vld [vmem:[%s12924_s2 + $0x60] sm:$0xff]  ;;  %v5432_v55 = vld [vmem:[%s12924_s2 + $0x78] sm:$0xff] }
  0x1c   :  { %v5431_v56 = vld [vmem:[%s12924_s2 + $0x70] sm:$0xff]  ;;  %v5435_v59 = vld [vmem:[%s12924_s2 + $0x88] sm:$0xff]  ;;  %v5434_v60 = vld [vmem:[%s12924_s2 + $0x80] sm:$0xff] }
  0x1d   :  { %v5437_v63 = vld [vmem:[%s12924_s2 + $0x98] sm:$0xff]  ;;  %v5436_v0 = vld [vmem:[%s12924_s2 + $0x90] sm:$0xff] }
  0x1e   :  { %93 = vrot.lane.b32.xlu1 %v5840_v15, %s5695_s17  ;;  %91 = vrot.lane.b32.xlu0 %v5845_v16, %s5695_s17  ;;  %v5441_v2 = vld [vmem:[%s12924_s2 + $0xb0] sm:$0xff] }
  0x22   :  { %97 = vrot.lane.b32.xlu1 %v5854_v17, %s5695_s17  ;;  %95 = vrot.lane.b32.xlu0 %v5859_v18, %s5695_s17 }
  0x26   :  { %101 = vrot.lane.b32.xlu1 %v5868_v19, %s5695_s17  ;;  %99 = vrot.lane.b32.xlu0 %v5873_v20, %s5695_s17 }
  0x2a   :  { %171 = vperm.xlu1 %5645, %v124_v21   ;;  %166 = vperm.xlu0 %5644, %v123_v22  }
  0x2e   :  { %181 = vperm.xlu1 %5645, %v126_v23   ;;  %176 = vperm.xlu0 %5644, %v125_v24  }
  0x32   :  { %218 = vrot.lane.b32.xlu1 %v5770_v5, %s5696_s11  ;;  %216 = vrot.lane.b32.xlu0 %v5775_v6, %s5696_s11 }
  0x36   :  { %222 = vrot.lane.b32.xlu1 %v5784_v7, %s5696_s11  ;;  %220 = vrot.lane.b32.xlu0 %v5789_v8, %s5696_s11 }
  0x3a   :  { %226 = vrot.lane.b32.xlu1 %v5794_v9, %s5696_s11  ;;  %224 = vrot.lane.b32.xlu0 %v5799_v10, %s5696_s11 }
  0x3e   :  { %230 = vrot.lane.b32.xlu1 %v5808_v11, %s5696_s11  ;;  %228 = vrot.lane.b32.xlu0 %v5817_v12, %s5696_s11 }
  0x42   :  { %234 = vrot.lane.b32.xlu1 %v5826_v13, %s5696_s11  ;;  %232 = vrot.lane.b32.xlu0 %v5831_v14, %s5696_s11 }
  0x46   :  { %238 = vrot.lane.b32.xlu1 %v5840_v15, %s5696_s11  ;;  %236 = vrot.lane.b32.xlu0 %v5845_v16, %s5696_s11 }
  0x4a   :  { %242 = vrot.lane.b32.xlu1 %v5854_v17, %s5696_s11  ;;  %240 = vrot.lane.b32.xlu0 %v5859_v18, %s5696_s11 }
  0x4e   :  { %246 = vrot.lane.b32.xlu1 %v5868_v19, %s5696_s11  ;;  %244 = vrot.lane.b32.xlu0 %v5873_v20, %s5696_s11 }
  0x52   :  { %316 = vperm.xlu1 %5645, %v5420_v25   ;;  %311 = vperm.xlu0 %5644, %v5419_v26  }
  0x56   :  { %326 = vperm.xlu1 %5645, %v5422_v27   ;;  %321 = vperm.xlu0 %5644, %v5421_v28  }
  0x5a   :  { %363 = vrot.lane.b32.xlu1 %v5770_v5, %s5697_s21  ;;  %361 = vrot.lane.b32.xlu0 %v5775_v6, %s5697_s21 }
  0x5e   :  { %367 = vrot.lane.b32.xlu1 %v5784_v7, %s5697_s21  ;;  %365 = vrot.lane.b32.xlu0 %v5789_v8, %s5697_s21 }
  0x62   :  { %371 = vrot.lane.b32.xlu1 %v5794_v9, %s5697_s21  ;;  %369 = vrot.lane.b32.xlu0 %v5799_v10, %s5697_s21 }
  0x66   :  { %375 = vrot.lane.b32.xlu1 %v5808_v11, %s5697_s21  ;;  %373 = vrot.lane.b32.xlu0 %v5817_v12, %s5697_s21 }
  0x6a   :  { %379 = vrot.lane.b32.xlu1 %v5826_v13, %s5697_s21  ;;  %377 = vrot.lane.b32.xlu0 %v5831_v14, %s5697_s21 }
  0x6e   :  { %383 = vrot.lane.b32.xlu1 %v5840_v15, %s5697_s21  ;;  %381 = vrot.lane.b32.xlu0 %v5845_v16, %s5697_s21 }
  0x72   :  { %387 = vrot.lane.b32.xlu1 %v5854_v17, %s5697_s21  ;;  %385 = vrot.lane.b32.xlu0 %v5859_v18, %s5697_s21 }
  0x76   :  { %391 = vrot.lane.b32.xlu1 %v5868_v19, %s5697_s21  ;;  %389 = vrot.lane.b32.xlu0 %v5873_v20, %s5697_s21 }
  0x7a   :  { %461 = vperm.xlu1 %5645, %v5425_v29   ;;  %456 = vperm.xlu0 %5644, %v5424_v30  }
  0x7d   :  { %v5979_v33 = vpop.permute.xlu1 %63  ;;  %v5981_v34 = vpop.permute.xlu0 %53 }
  0x7e   :  { %471 = vperm.xlu1 %5645, %v5427_v31   ;;  %466 = vperm.xlu0 %5644, %v5426_v32  }
  0x81   :  { %v5983_v35 = vpop.permute.xlu1 %68  ;;  %v5985_v36 = vpop.permute.xlu0 %58 }
  0x82   :  { %508 = vrot.lane.b32.xlu1 %v5770_v5, %s5698_s30  ;;  %506 = vrot.lane.b32.xlu0 %v5775_v6, %s5698_s30 }
  0x85   :  { %v5991_v37 = vpop.permute.xlu1 %73  ;;  %v5993_v38 = vpop.permute.xlu0 %71 }
  0x86   :  { %512 = vrot.lane.b32.xlu1 %v5784_v7, %s5698_s30  ;;  %510 = vrot.lane.b32.xlu0 %v5789_v8, %s5698_s30 }
  0x89   :  { %v5999_v39 = vpop.permute.xlu1 %77  ;;  %v6001_v40 = vpop.permute.xlu0 %75 }
  0x8a   :  { %516 = vrot.lane.b32.xlu1 %v5794_v9, %s5698_s30  ;;  %514 = vrot.lane.b32.xlu0 %v5799_v10, %s5698_s30 }
  0x8d   :  { %v6007_v41 = vpop.permute.xlu1 %81  ;;  %v6009_v42 = vpop.permute.xlu0 %79 }
  0x8e   :  { %520 = vrot.lane.b32.xlu1 %v5808_v11, %s5698_s30  ;;  %518 = vrot.lane.b32.xlu0 %v5817_v12, %s5698_s30 }
  0x91   :  { %v6015_v43 = vpop.permute.xlu1 %85  ;;  %v6017_v44 = vpop.permute.xlu0 %83 }
  0x92   :  { %524 = vrot.lane.b32.xlu1 %v5826_v13, %s5698_s30  ;;  %522 = vrot.lane.b32.xlu0 %v5831_v14, %s5698_s30 }
  0x95   :  { %v6023_v45 = vpop.permute.xlu1 %89  ;;  %v6025_v46 = vpop.permute.xlu0 %87 }
  0x96   :  { %528 = vrot.lane.b32.xlu1 %v5840_v15, %s5698_s30  ;;  %526 = vrot.lane.b32.xlu0 %v5845_v16, %s5698_s30 }
  0x99   :  { %v6031_v47 = vpop.permute.xlu1 %93  ;;  %v6033_v48 = vpop.permute.xlu0 %91 }
  0x9a   :  { %532 = vrot.lane.b32.xlu1 %v5854_v17, %s5698_s30  ;;  %530 = vrot.lane.b32.xlu0 %v5859_v18, %s5698_s30 }
  0x9d   :  { %v6039_v49 = vpop.permute.xlu1 %97  ;;  %v6041_v50 = vpop.permute.xlu0 %95 }
  0x9e   :  { %536 = vrot.lane.b32.xlu1 %v5868_v19, %s5698_s30  ;;  %534 = vrot.lane.b32.xlu0 %v5873_v20, %s5698_s30 }
  0xa1   :  { %v6053_v53 = vpop.permute.xlu1 %101  ;;  %v6055_v54 = vpop.permute.xlu0 %99 }
  0xa2   :  { %606 = vperm.xlu1 %5645, %v5430_v51   ;;  %601 = vperm.xlu0 %5644, %v5429_v52  }
  0xa5   :  { %v6063_v57 = vpop.permute.xlu1 %171  ;;  %v6065_v58 = vpop.permute.xlu0 %166 }
  0xa6   :  { %616 = vperm.xlu1 %5645, %v5432_v55   ;;  %611 = vperm.xlu0 %5644, %v5431_v56   ;;  %v5440_v56 = vld [vmem:[%s12924_s2 + $0xa8] sm:$0xff] }
  0xa9   :  { %v6073_v61 = vpop.permute.xlu1 %181  ;;  %v6075_v62 = vpop.permute.xlu0 %176 }
  0xaa   :  { %702 = vperm.xlu1 %5645, %v5435_v59   ;;  %697 = vperm.xlu0 %5644, %v5434_v60   ;;  %v5439_v59 = vld [vmem:[%s12924_s2 + $0xa0] sm:$0xff] }
  0xad   :  { %v6083_v1 = vpop.permute.xlu1 %218  ;;  %v6085_v3 = vpop.permute.xlu0 %216 }
  0xae   :  { %712 = vperm.xlu1 %5645, %v5437_v63   ;;  %707 = vperm.xlu0 %5644, %v5436_v0   ;;  %v5442_v0 = vld [vmem:[%s12924_s2 + $0xb8] sm:$0xff] }
  0xb1   :  { %v6087_v4 = vpop.permute.xlu1 %222  ;;  %v6089_v21 = vpop.permute.xlu0 %220 }
  0xb2   :  { %13458 = vst [vmem:[#allocation11_spill] sm:$0xff] %v6087_v4  ;;  %13459 = vst [vmem:[#allocation12_spill] sm:$0xff] %v6089_v21  ;;  %749 = vrot.lane.b32.xlu1 %v5770_v5, %s5699_s28  ;;  %747 = vrot.lane.b32.xlu0 %v5775_v6, %s5699_s28 }
  0xb5   :  { %v6095_v22 = vpop.permute.xlu1 %226  ;;  %v6097_v23 = vpop.permute.xlu0 %224 }
  0xb6   :  { %753 = vrot.lane.b32.xlu1 %v5784_v7, %s5699_s28  ;;  %751 = vrot.lane.b32.xlu0 %v5789_v8, %s5699_s28 }
  0xb9   :  { %v6103_v24 = vpop.permute.xlu1 %230  ;;  %v6105_v25 = vpop.permute.xlu0 %228 }
  0xba   :  { %13460 = vst [vmem:[#allocation13_spill] sm:$0xff] %v6103_v24  ;;  %13461 = vst [vmem:[#allocation14_spill] sm:$0xff] %v6105_v25  ;;  %757 = vrot.lane.b32.xlu1 %v5794_v9, %s5699_s28  ;;  %755 = vrot.lane.b32.xlu0 %v5799_v10, %s5699_s28 }
  0xbd   :  { %v6111_v26 = vpop.permute.xlu1 %234  ;;  %v6113_v27 = vpop.permute.xlu0 %232 }
  0xbe   :  { %13462 = vst [vmem:[#allocation15_spill] sm:$0xff] %v6111_v26  ;;  %13463 = vst [vmem:[#allocation16_spill] sm:$0xff] %v6113_v27  ;;  %761 = vrot.lane.b32.xlu1 %v5808_v11, %s5699_s28  ;;  %759 = vrot.lane.b32.xlu0 %v5817_v12, %s5699_s28 }
  0xc1   :  { %v6119_v28 = vpop.permute.xlu1 %238  ;;  %v6121_v29 = vpop.permute.xlu0 %236 }
  0xc2   :  { %13464 = vst [vmem:[#allocation17_spill] sm:$0xff] %v6119_v28  ;;  %13465 = vst [vmem:[#allocation18_spill] sm:$0xff] %v6121_v29  ;;  %765 = vrot.lane.b32.xlu1 %v5826_v13, %s5699_s28  ;;  %763 = vrot.lane.b32.xlu0 %v5831_v14, %s5699_s28 }
  0xc5   :  { %v6127_v30 = vpop.permute.xlu1 %242  ;;  %v6129_v31 = vpop.permute.xlu0 %240 }
  0xc6   :  { %13466 = vst [vmem:[#allocation19_spill] sm:$0xff] %v6127_v30  ;;  %13467 = vst [vmem:[#allocation20_spill] sm:$0xff] %v6129_v31  ;;  %769 = vrot.lane.b32.xlu1 %v5840_v15, %s5699_s28  ;;  %767 = vrot.lane.b32.xlu0 %v5845_v16, %s5699_s28 }
  0xc9   :  { %v6135_v32 = vpop.permute.xlu1 %246  ;;  %v6137_v51 = vpop.permute.xlu0 %244 }
  0xca   :  { %13468 = vst [vmem:[#allocation21_spill] sm:$0xff] %v6135_v32  ;;  %13469 = vst [vmem:[#allocation22_spill] sm:$0xff] %v6137_v51  ;;  %773 = vrot.lane.b32.xlu1 %v5854_v17, %s5699_s28  ;;  %771 = vrot.lane.b32.xlu0 %v5859_v18, %s5699_s28 }
  0xcd   :  { %v6143_v52 = vpop.permute.xlu1 %316  ;;  %v6145_v55 = vpop.permute.xlu0 %311 }
  0xce   :  { %13470 = vst [vmem:[#allocation23_spill] sm:$0xff] %v6143_v52  ;;  %13471 = vst [vmem:[#allocation24_spill] sm:$0xff] %v6145_v55  ;;  %777 = vrot.lane.b32.xlu1 %v5868_v19, %s5699_s28  ;;  %775 = vrot.lane.b32.xlu0 %v5873_v20, %s5699_s28 }
  0xd1   :  { %v6157_v60 = vpop.permute.xlu1 %326  ;;  %v6159_v63 = vpop.permute.xlu0 %321 }
  0xd2   :  { %13472 = vst [vmem:[#allocation25_spill] sm:$0xff] %v6157_v60  ;;  %13473 = vst [vmem:[#allocation26_spill] sm:$0xff] %v6159_v63  ;;  %847 = vperm.xlu1 %5645, %v5440_v56   ;;  %842 = vperm.xlu0 %5644, %v5439_v59  }
  0xd5   :  { %v6167_v55 = vpop.permute.xlu1 %363  ;;  %v6169_v52 = vpop.permute.xlu0 %361 }
  0xd6   :  { %13474 = vst [vmem:[#allocation27_spill] sm:$0xff] %v6167_v55  ;;  %13475 = vst [vmem:[#allocation28_spill] sm:$0xff] %v6169_v52  ;;  %857 = vperm.xlu1 %5645, %v5442_v0   ;;  %852 = vperm.xlu0 %5644, %v5441_v2  }
  0xd9   :  { %v6171_v51 = vpop.permute.xlu1 %367  ;;  %v6173_v60 = vpop.permute.xlu0 %365 }
  0xda   :  { %13476 = vst [vmem:[#allocation29_spill] sm:$0xff] %v6171_v51  ;;  %13477 = vst [vmem:[#allocation30_spill] sm:$0xff] %v6173_v60  ;;  %894 = vrot.lane.b32.xlu1 %v5770_v5, %s5700_s18  ;;  %892 = vrot.lane.b32.xlu0 %v5775_v6, %s5700_s18 }
  0xdd   :  { %v6179_v56 = vpop.permute.xlu1 %371  ;;  %v6181_v59 = vpop.permute.xlu0 %369 }
  0xde   :  { %13478 = vst [vmem:[#allocation31_spill] sm:$0xff] %v6179_v56  ;;  %13479 = vst [vmem:[#allocation32_spill] sm:$0xff] %v6181_v59  ;;  %898 = vrot.lane.b32.xlu1 %v5784_v7, %s5700_s18  ;;  %896 = vrot.lane.b32.xlu0 %v5789_v8, %s5700_s18 }
  0xe1   :  { %v6187_v2 = vpop.permute.xlu1 %375  ;;  %v6189_v0 = vpop.permute.xlu0 %373 }
  0xe2   :  { %13480 = vst [vmem:[#allocation33_spill] sm:$0xff] %v6187_v2  ;;  %13481 = vst [vmem:[#allocation34_spill] sm:$0xff] %v6189_v0  ;;  %902 = vrot.lane.b32.xlu1 %v5794_v9, %s5700_s18  ;;  %900 = vrot.lane.b32.xlu0 %v5799_v10, %s5700_s18 }
  0xe5   :  { %v6195_v60 = vpop.permute.xlu1 %379  ;;  %v6197_v51 = vpop.permute.xlu0 %377 }
  0xe6   :  { %13482 = vst [vmem:[#allocation35_spill] sm:$0xff] %v6195_v60  ;;  %13483 = vst [vmem:[#allocation36_spill] sm:$0xff] %v6197_v51  ;;  %906 = vrot.lane.b32.xlu1 %v5808_v11, %s5700_s18  ;;  %904 = vrot.lane.b32.xlu0 %v5817_v12, %s5700_s18 }
  0xe9   :  { %v6203_v52 = vpop.permute.xlu1 %383  ;;  %v6205_v2 = vpop.permute.xlu0 %381 }
  0xea   :  { %13484 = vst [vmem:[#allocation37_spill] sm:$0xff] %v6203_v52  ;;  %13485 = vst [vmem:[#allocation38_spill] sm:$0xff] %v6205_v2  ;;  %910 = vrot.lane.b32.xlu1 %v5826_v13, %s5700_s18  ;;  %908 = vrot.lane.b32.xlu0 %v5831_v14, %s5700_s18 }
  0xed   :  { %v6211_v0 = vpop.permute.xlu1 %387  ;;  %v6213_v60 = vpop.permute.xlu0 %385 }
  0xee   :  { %13486 = vst [vmem:[#allocation39_spill] sm:$0xff] %v6211_v0  ;;  %13487 = vst [vmem:[#allocation40_spill] sm:$0xff] %v6213_v60  ;;  %914 = vrot.lane.b32.xlu1 %v5840_v15, %s5700_s18  ;;  %912 = vrot.lane.b32.xlu0 %v5845_v16, %s5700_s18 }
  0xf1   :  { %v6219_v51 = vpop.permute.xlu1 %391  ;;  %v6221_v52 = vpop.permute.xlu0 %389 }
  0xf2   :  { %13488 = vst [vmem:[#allocation41_spill] sm:$0xff] %v6219_v51  ;;  %13489 = vst [vmem:[#allocation42_spill] sm:$0xff] %v6221_v52  ;;  %918 = vrot.lane.b32.xlu1 %v5854_v17, %s5700_s18  ;;  %916 = vrot.lane.b32.xlu0 %v5859_v18, %s5700_s18  ;;  %v5445_v52 = vld [vmem:[%s12924_s2 + $0xc8] sm:$0xff]  ;;  %v5444_v51 = vld [vmem:[%s12924_s2 + $0xc0] sm:$0xff] }
  0xf5   :  { %v6227_v2 = vpop.permute.xlu1 %461  ;;  %v6229_v0 = vpop.permute.xlu0 %456 }
  0xf6   :  { %13490 = vst [vmem:[#allocation43_spill] sm:$0xff] %v6227_v2  ;;  %13491 = vst [vmem:[#allocation44_spill] sm:$0xff] %v6229_v0  ;;  %922 = vrot.lane.b32.xlu1 %v5868_v19, %s5700_s18  ;;  %920 = vrot.lane.b32.xlu0 %v5873_v20, %s5700_s18  ;;  %v5447_v0 = vld [vmem:[%s12924_s2 + $0xd8] sm:$0xff]  ;;  %v5446_v2 = vld [vmem:[%s12924_s2 + $0xd0] sm:$0xff] }
  0xf9   :  { %v6241_v60 = vpop.permute.xlu1 %471  ;;  %v6243_v59 = vpop.permute.xlu0 %466 }
  0xfa   :  { %13492 = vst [vmem:[#allocation45_spill] sm:$0xff] %v6241_v60  ;;  %13493 = vst [vmem:[#allocation46_spill] sm:$0xff] %v6243_v59  ;;  %992 = vperm.xlu1 %5645, %v5445_v52   ;;  %987 = vperm.xlu0 %5644, %v5444_v51  }
  0xfd   :  { %v6251_v55 = vpop.permute.xlu1 %508  ;;  %v6253_v56 = vpop.permute.xlu0 %506 }
  0xfe   :  { %13494 = vst [vmem:[#allocation47_spill] sm:$0xff] %v6251_v55  ;;  %13495 = vst [vmem:[#allocation48_spill] sm:$0xff] %v6253_v56  ;;  %1002 = vperm.xlu1 %5645, %v5447_v0   ;;  %997 = vperm.xlu0 %5644, %v5446_v2   ;;  %v5452_v2 = vld [vmem:[%s12924_s2 + $0xf8] sm:$0xff]  ;;  %v5451_v0 = vld [vmem:[%s12924_s2 + $0xf0] sm:$0xff] }
 0x101   :  { %v6255_v63 = vpop.permute.xlu1 %512  ;;  %v6257_v60 = vpop.permute.xlu0 %510 }
 0x102   :  { %13496 = vst [vmem:[#allocation49_spill] sm:$0xff] %v6255_v63  ;;  %13497 = vst [vmem:[#allocation50_spill] sm:$0xff] %v6257_v60  ;;  %1039 = vrot.lane.b32.xlu1 %v5770_v5, %s5701_s29  ;;  %1037 = vrot.lane.b32.xlu0 %v5775_v6, %s5701_s29 }
 0x105   :  { %v6263_v51 = vpop.permute.xlu1 %516  ;;  %v6265_v52 = vpop.permute.xlu0 %514 }
 0x106   :  { %13498 = vst [vmem:[#allocation51_spill] sm:$0xff] %v6263_v51  ;;  %13499 = vst [vmem:[#allocation52_spill] sm:$0xff] %v6265_v52  ;;  %1043 = vrot.lane.b32.xlu1 %v5784_v7, %s5701_s29  ;;  %1041 = vrot.lane.b32.xlu0 %v5789_v8, %s5701_s29 }
 0x109   :  { %v6277_v60 = vpop.permute.xlu1 %520  ;;  %v6279_v63 = vpop.permute.xlu0 %518 }
 0x10a   :  { %13500 = vst [vmem:[#allocation53_spill] sm:$0xff] %v6277_v60  ;;  %13501 = vst [vmem:[#allocation54_spill] sm:$0xff] %v6279_v63  ;;  %1147 = vperm.xlu1 %5645, %v5452_v2   ;;  %1142 = vperm.xlu0 %5644, %v5451_v0  }
 0x10d   :  { %v6281_v56 = vpop.permute.xlu1 %524  ;;  %v6283_v52 = vpop.permute.xlu0 %522 }
 0x10e   :  { %13502 = vst [vmem:[#allocation55_spill] sm:$0xff] %v6281_v56  ;;  %13503 = vst [vmem:[#allocation56_spill] sm:$0xff] %v6283_v52  ;;  %1051 = vrot.lane.b32.xlu1 %v5808_v11, %s5701_s29  ;;  %1049 = vrot.lane.b32.xlu0 %v5817_v12, %s5701_s29 }
 0x111   :  { %v6289_v55 = vpop.permute.xlu1 %528  ;;  %v6291_v51 = vpop.permute.xlu0 %526 }
 0x112   :  { %13504 = vst [vmem:[#allocation57_spill] sm:$0xff] %v6289_v55  ;;  %13505 = vst [vmem:[#allocation58_spill] sm:$0xff] %v6291_v51  ;;  %1059 = vrot.lane.b32.xlu1 %v5840_v15, %s5701_s29  ;;  %1057 = vrot.lane.b32.xlu0 %v5845_v16, %s5701_s29  ;;  %v5457_v51 = vld [vmem:[%s12924_s2 + $0x118] sm:$0xff]  ;;  %v5456_v55 = vld [vmem:[%s12924_s2 + $0x110] sm:$0xff] }
 0x115   :  { %v6297_v2 = vpop.permute.xlu1 %532  ;;  %v6299_v0 = vpop.permute.xlu0 %530 }
 0x116   :  { %13506 = vst [vmem:[#allocation59_spill] sm:$0xff] %v6297_v2  ;;  %13507 = vst [vmem:[#allocation60_spill] sm:$0xff] %v6299_v0  ;;  %1067 = vrot.lane.b32.xlu1 %v5868_v19, %s5701_s29  ;;  %1065 = vrot.lane.b32.xlu0 %v5873_v20, %s5701_s29  ;;  %v5450_v0 = vld [vmem:[%s12924_s2 + $0xe8] sm:$0xff]  ;;  %v5449_v2 = vld [vmem:[%s12924_s2 + $0xe0] sm:$0xff] }
 0x119   :  { %v6311_v52 = vpop.permute.xlu1 %536  ;;  %v6313_v56 = vpop.permute.xlu0 %534 }
 0x11a   :  { %13508 = vst [vmem:[#allocation61_spill] sm:$0xff] %v6311_v52  ;;  %13509 = vst [vmem:[#allocation62_spill] sm:$0xff] %v6313_v56  ;;  %1292 = vperm.xlu1 %5645, %v5457_v51   ;;  %1287 = vperm.xlu0 %5644, %v5456_v55  }
 0x11d   :  { %v6321_v63 = vpop.permute.xlu1 %606  ;;  %v6323_v60 = vpop.permute.xlu0 %601 }
 0x11e   :  { %13510 = vst [vmem:[#allocation63_spill] sm:$0xff] %v6321_v63  ;;  %13511 = vst [vmem:[#allocation64_spill] sm:$0xff] %v6323_v60  ;;  %1137 = vperm.xlu1 %5645, %v5450_v0   ;;  %1132 = vperm.xlu0 %5644, %v5449_v2   ;;  %v122_v63 = vld [vmem:[%s12923_s1] ss:$8 sm:$0xf] }
 0x121   :  { %v6325_v59 = vpop.permute.xlu1 %616  ;;  %v6327_v52 = vpop.permute.xlu0 %611 }
 0x122   :  { %13512 = vst [vmem:[#allocation65_spill] sm:$0xff] %v6325_v59  ;;  %13513 = vst [vmem:[#allocation66_spill] sm:$0xff] %v6327_v52  ;;  %1188 = vrot.lane.b32.xlu1 %v5784_v7, %s5702_s25  ;;  %1186 = vrot.lane.b32.xlu0 %v5789_v8, %s5702_s25  ;;  %v103_v52 = vlaneseq }
 0x125   :  { %v6333_v55 = vpop.permute.xlu1 %702  ;;  %v6335_v51 = vpop.permute.xlu0 %697 }
 0x126   :  { %13514 = vst [vmem:[#allocation67_spill] sm:$0xff] %v6333_v55  ;;  %13515 = vst [vmem:[#allocation68_spill] sm:$0xff] %v6335_v51  ;;  %1196 = vrot.lane.b32.xlu1 %v5808_v11, %s5702_s25  ;;  %1194 = vrot.lane.b32.xlu0 %v5817_v12, %s5702_s25  ;;  %v5455_v12 = vld [vmem:[%s12924_s2 + $0x108] sm:$0xff] }
 0x129   :  { %v6341_v2 = vpop.permute.xlu1 %712  ;;  %v6343_v0 = vpop.permute.xlu0 %707 }
 0x12a   :  { %13516 = vst [vmem:[#allocation69_spill] sm:$0xff] %v6341_v2  ;;  %13517 = vst [vmem:[#allocation70_spill] sm:$0xff] %v6343_v0  ;;  %1204 = vrot.lane.b32.xlu1 %v5840_v15, %s5702_s25  ;;  %1202 = vrot.lane.b32.xlu0 %v5845_v16, %s5702_s25  ;;  %v129_v2 = vshrl.u32 %v103_v52, 7 }
 0x12c   :  { %v6374_v56 = vsub.s32 2, %v129_v2 }
 0x12d   :  { %v6349_v55 = vpop.permute.xlu1 %749  ;;  %v6351_v51 = vpop.permute.xlu0 %747 }
 0x12e   :  { %13518 = vst [vmem:[#allocation71_spill] sm:$0xff] %v6349_v55  ;;  %13519 = vst [vmem:[#allocation72_spill] sm:$0xff] %v6351_v51  ;;  %1212 = vrot.lane.b32.xlu1 %v5868_v19, %s5702_s25  ;;  %1210 = vrot.lane.b32.xlu0 %v5873_v20, %s5702_s25  ;;  %v6365_v55 = vand.u32 127, %v103_v52  ;;  %v6367_v51 = vsub.s32 1, %v129_v2  ;;  %v6399_v31 = vrot.slane %v122_v63, %v6374_v56  ;;  %v5454_v19 = vld [vmem:[%s12924_s2 + $0x100] sm:$0xff] }
 0x12f   :  { %v5418_v52 = vld [vmem:[%s12923_s1 + $0x1] ss:$8 sm:$0xf]  ;;  %v5428_v20 = vld [vmem:[%s12923_s1 + $0x3] ss:$8 sm:$0xf] }
 0x130   :  { %vm105_vm0 = vcmp.lt.s32.totalorder %v6365_v55, 17  ;;  %13526 = vst [vmem:[#allocation79_spill] sm:$0xff] %v6399_v31  ;;  %v6408_v28 = vrot.slane %v5418_v52, %v6367_v51  ;;  %v6471_v15 = vrot.slane %v5428_v20, %v6374_v56  ;;  %vm248_vm1 = vcmp.lt.s32.totalorder %v6365_v55, 16 }
 0x131   :  { %v6357_v59 = vpop.permute.xlu1 %753  ;;  %v6359_v0 = vpop.permute.xlu0 %751  ;;  %v116_v27 = vsel %vm105_vm0, %v6001_v40, %v6017_v44  ;;  %vm393_vm2 = vcmp.lt.s32.totalorder %v6365_v55, 15  ;;  %vm538_vm3 = vcmp.lt.s32.totalorder %v6365_v55, 1  ;;  %vm779_vm4 = vcmp.lt.s32.totalorder %v6365_v55, 127 }
 0x132   :  { %13520 = vst [vmem:[#allocation73_spill] sm:$0xff] %v6357_v59  ;;  %13521 = vst [vmem:[#allocation74_spill] sm:$0xff] %v6359_v0  ;;  %1047 = vrot.lane.b32.xlu1 %v5794_v9, %s5701_s29  ;;  %1045 = vrot.lane.b32.xlu0 %v5799_v10, %s5701_s29  ;;  %v6376_v59 = vsub.s32 0, %v129_v2  ;;  %v6378_v0 = vsub.s32 3, %v129_v2  ;;  %vm924_vm5 = vcmp.lt.s32.totalorder %v6365_v55, 113  ;;  %vm1069_vm6 = vcmp.lt.s32.totalorder %v6365_v55, 112 }
 0x133   :  { %v5423_v2 = vld [vmem:[%s12923_s1 + $0x2] ss:$8 sm:$0xf]  ;;  %13529 = vst [vmem:[#allocation82_spill] sm:$0xff] %v6408_v28  ;;  %v117_v28 = vsel %vm105_vm0, %v5999_v39, %v6015_v43  ;;  %13540 = vst [vmem:[#allocation93_spill] sm:$0xff] %v6471_v15  ;;  %vm1214_vm7 = vcmp.lt.s32.totalorder %v6365_v55, 111 }
 0x134   :  { %v6402_v30 = vrot.slane %v122_v63, %v6376_v59  ;;  %v6405_v29 = vrot.slane %v122_v63, %v6378_v0  ;;  %v6442_v26 = vrot.slane %v5418_v52, %v6376_v59  ;;  %v6445_v8 = vrot.slane %v5418_v52, %v6378_v0 }
 0x135   :  { %v6369_v60 = vpop.permute.xlu1 %757  ;;  %v6380_v32 = vpop.permute.xlu0 %755  ;;  %v6454_v21 = vrot.slane %v5423_v2, %v6374_v56  ;;  %v6457_v25 = vrot.slane %v5423_v2, %v6376_v59  ;;  %v6460_v4 = vrot.slane %v5423_v2, %v6378_v0 }
 0x136   :  { %13522 = vst [vmem:[#allocation75_spill] sm:$0xff] %v6369_v60  ;;  %13523 = vst [vmem:[#allocation76_spill] sm:$0xff] %v6380_v32  ;;  %1055 = vrot.lane.b32.xlu1 %v5826_v13, %s5701_s29  ;;  %1053 = vrot.lane.b32.xlu0 %v5831_v14, %s5701_s29  ;;  %v6391_v60 = vrot.slane %v122_v63, %v6367_v51  ;;  %v114_v63 = vsel %vm105_vm0, %v5993_v38, %v6009_v42 }
 0x137   :  { %13527 = vst [vmem:[#allocation80_spill] sm:$0xff] %v6402_v30  ;;  %13528 = vst [vmem:[#allocation81_spill] sm:$0xff] %v6405_v29 }
 0x138   :  { %13524 = vst [vmem:[#allocation77_spill] sm:$0xff] %v6391_v60  ;;  %13532 = vst [vmem:[#allocation85_spill] sm:$0xff] %v6442_v26  ;;  %v6463_v26 = vrot.slane %v5428_v20, %v6367_v51  ;;  %v161_v24 = vmul.f32 %v6391_v60, %v117_v28  ;;  %v110_v28 = vsel %vm105_vm0, %v6009_v42, %v6025_v46 }
 0x139   :  { %v6396_v32 = vpop.permute.xlu1 %761  ;;  %v6413_v16 = vpop.permute.xlu0 %759  ;;  %13533 = vst [vmem:[#allocation86_spill] sm:$0xff] %v6445_v8  ;;  %13535 = vst [vmem:[#allocation88_spill] sm:$0xff] %v6454_v21  ;;  %v149_v8 = vmul.f32 %v6391_v60, %v114_v63  ;;  %v106_v42 = vsel %vm105_vm0, %v6025_v46, %v6041_v50  ;;  %v108_v46 = vsel %vm105_vm0, %v6033_v48, %v6055_v54 }
 0x13a   :  { %13525 = vst [vmem:[#allocation78_spill] sm:$0xff] %v6396_v32  ;;  %13530 = vst [vmem:[#allocation83_spill] sm:$0xff] %v6413_v16  ;;  %1063 = vrot.lane.b32.xlu1 %v5854_v17, %s5701_s29  ;;  %v115_v32 = vsel %vm105_vm0, %v5991_v37, %v6007_v41  ;;  %v6430_v16 = vrot.slane %v5418_v52, %v6374_v56  ;;  %1061 = vrot.lane.b32.xlu0 %v5859_v18, %s5701_s29 }
 0x13b   :  { %13536 = vst [vmem:[#allocation89_spill] sm:$0xff] %v6457_v25  ;;  %13537 = vst [vmem:[#allocation90_spill] sm:$0xff] %v6460_v4 }
 0x13c   :  { %13531 = vst [vmem:[#allocation84_spill] sm:$0xff] %v6430_v16  ;;  %v6448_v16 = vrot.slane %v5423_v2, %v6367_v51  ;;  %13538 = vst [vmem:[#allocation91_spill] sm:$0xff] %v6463_v26  ;;  %v157_v2 = vmul.f32 %v6391_v60, %v116_v27  ;;  %v111_v26 = vsel %vm105_vm0, %v6007_v41, %v6023_v45 }
 0x13d   :  { %v6465_v52 = vpop.permute.xlu1 %765  ;;  %v6473_v21 = vpop.permute.xlu0 %763  ;;  %v112_v41 = vsel %vm105_vm0, %v6017_v44, %v6033_v48  ;;  %v154_v27 = vmul.f32 %v6399_v31, %v111_v26  ;;  %v151_v26 = vmul.f32 %v6405_v29, %v106_v42 }
 0x13e   :  { %13534 = vst [vmem:[#allocation87_spill] sm:$0xff] %v6448_v16  ;;  %13539 = vst [vmem:[#allocation92_spill] sm:$0xff] %v6465_v52  ;;  %v153_v16 = vmul.f32 %v6391_v60, %v115_v32  ;;  %1282 = vperm.xlu1 %5645, %v5455_v12   ;;  %v6481_v52 = vrot.slane %v5428_v20, %v6376_v59  ;;  %v6484_v32 = vrot.slane %v5428_v20, %v6378_v0 }
 0x13f   :  { %13541 = vst [vmem:[#allocation94_spill] sm:$0xff] %v6473_v21  ;;  %1277 = vperm.xlu0 %5644, %v5454_v19   ;;  %v113_v12 = vsel %vm105_vm0, %v6015_v43, %v6031_v47  ;;  %v119_v19 = vsel %vm105_vm0, %v6039_v49, %v5991_v37  ;;  %v107_v20 = vsel %vm105_vm0, %v6023_v45, %v6039_v49  ;;  %v13569_v21 = vld [vmem:[#allocation5_spill] sm:$0xff] }
 0x140   :  { %13542 = vst [vmem:[#allocation95_spill] sm:$0xff] %v6481_v52  ;;  %13543 = vst [vmem:[#allocation96_spill] sm:$0xff] %v6484_v32  ;;  %v118_v43 = vsel %vm105_vm0, %v6041_v50, %v5993_v38  ;;  %v121_v37 = vsel %vm105_vm0, %v6053_v53, %v5999_v39  ;;  %v109_v45 = vsel %vm105_vm0, %v6031_v47, %v6053_v53  ;;  %v5433_v39 = vld [vmem:[%s12923_s1 + $0x4] ss:$8 sm:$0xf] }
 0x141   :  { %v6518_v44 = vpop.permute.xlu1 %769  ;;  %v120_v38 = vsel %vm105_vm0, %v6055_v54, %v6001_v40  ;;  %v6536_v49 = vpop.permute.xlu0 %767  ;;  %v150_v47 = vmul.f32 %v6399_v31, %v110_v28  ;;  %v162_v50 = vmul.f32 %v6399_v31, %v113_v12  ;;  %v158_v48 = vmul.f32 %v6399_v31, %v112_v41 }
 0x142   :  { %13544 = vst [vmem:[#allocation97_spill] sm:$0xff] %v6518_v44  ;;  %13545 = vst [vmem:[#allocation98_spill] sm:$0xff] %v6536_v49  ;;  %1184 = vrot.lane.b32.xlu1 %v5770_v5, %s5702_s25  ;;  %v152_v53 = vmul.f32 %v6402_v30, %v119_v19  ;;  %v155_v40 = vmul.f32 %v6405_v29, %v107_v20  ;;  %v148_v54 = vmul.f32 %v6402_v30, %v118_v43  ;;  %v13573_v44 = vld [vmem:[#allocation16_spill] sm:$0xff] }
 0x143   :  { %1182 = vrot.lane.b32.xlu0 %v5775_v6, %s5702_s25  ;;  %v160_v63 = vmul.f32 %v6402_v30, %v121_v37  ;;  %v163_v60 = vmul.f32 %v6405_v29, %v109_v45  ;;  %v156_v28 = vmul.f32 %v6402_v30, %v120_v38  ;;  %v159_v12 = vmul.f32 %v6405_v29, %v108_v46 }
 0x144   :  { %v6554_v41 = vrot.slane %v5433_v39, %v6376_v59  ;;  %v188_v31 = vmul.f32 %v6063_v57, %v152_v53  ;;  %v6561_v20 = vrot.slane %v5433_v39, %v6367_v51  ;;  %v6564_v42 = vrot.slane %v5433_v39, %v6374_v56 }
 0x145   :  { %v6556_v19 = vpop.permute.xlu1 %773  ;;  %v6567_v43 = vrot.slane %v5433_v39, %v6378_v0  ;;  %v6569_v37 = vpop.permute.xlu0 %771  ;;  %v189_v45 = vmul.f32 %v6063_v57, %v153_v16  ;;  %v190_v46 = vmul.f32 %v6063_v57, %v154_v27  ;;  %v191_v38 = vmul.f32 %v6063_v57, %v155_v40 }
 0x146   :  { %13546 = vst [vmem:[#allocation99_spill] sm:$0xff] %v6554_v41  ;;  %13547 = vst [vmem:[#allocation100_spill] sm:$0xff] %v6556_v19  ;;  %1192 = vrot.lane.b32.xlu1 %v5794_v9, %s5702_s25  ;;  %v184_v53 = vmul.f32 %v6065_v58, %v148_v54  ;;  %v185_v29 = vmul.f32 %v6065_v58, %v149_v8  ;;  %v186_v39 = vmul.f32 %v6065_v58, %v150_v47 }
 0x147   :  { %13548 = vst [vmem:[#allocation101_spill] sm:$0xff] %v6561_v20  ;;  %13549 = vst [vmem:[#allocation102_spill] sm:$0xff] %v6564_v42  ;;  %1190 = vrot.lane.b32.xlu0 %v5799_v10, %s5702_s25  ;;  %v187_v30 = vmul.f32 %v6065_v58, %v151_v26  ;;  %v197_v19 = vmul.f32 %v6073_v61, %v161_v24  ;;  %v198_v16 = vmul.f32 %v6073_v61, %v162_v50 }
 0x148   :  { %13550 = vst [vmem:[#allocation103_spill] sm:$0xff] %v6567_v43  ;;  %13551 = vst [vmem:[#allocation104_spill] sm:$0xff] %v6569_v37  ;;  %v196_v37 = vmul.f32 %v6073_v61, %v160_v63  ;;  %v199_v27 = vmul.f32 %v6073_v61, %v163_v60  ;;  %v192_v57 = vmul.f32 %v6075_v62, %v156_v28 }
 0x149   :  { %v6587_v40 = vpop.permute.xlu1 %777  ;;  %v6590_v54 = vadd.f32 %v188_v31, %v5985_v36  ;;  %v193_v8 = vmul.f32 %v6075_v62, %v157_v2  ;;  %v194_v47 = vmul.f32 %v6075_v62, %v158_v48  ;;  %v195_v58 = vmul.f32 %v6075_v62, %v159_v12  ;;  %v6595_v26 = vpop.permute.xlu0 %775 }
 0x14a   :  { %13552 = vst [vmem:[#allocation105_spill] sm:$0xff] %v6587_v40  ;;  %13553 = vst [vmem:[#allocation106_spill] sm:$0xff] %v6595_v26  ;;  %1200 = vrot.lane.b32.xlu1 %v5826_v13, %s5702_s25  ;;  %v6600_v61 = vadd.f32 %v189_v45, %v5985_v36  ;;  %v6603_v24 = vadd.f32 %v190_v46, %v5985_v36  ;;  %v6606_v31 = vadd.f32 %v191_v38, %v5985_v36 }
 0x14b   :  { %v6609_v60 = vadd.f32 %v184_v53, %v5981_v34  ;;  %1198 = vrot.lane.b32.xlu0 %v5831_v14, %s5702_s25  ;;  %v6614_v62 = vadd.f32 %v185_v29, %v5981_v34  ;;  %v6617_v2 = vadd.f32 %v186_v39, %v5981_v34  ;;  %v6620_v50 = vadd.f32 %v187_v30, %v5981_v34  ;;  %v1331_v53 = vld [vmem:[%s12927_s5] sm:$0xff] }
 0x14c   :  { %v6623_v48 = vadd.f32 %v196_v37, %v5983_v35  ;;  %v6626_v36 = vadd.f32 %v197_v19, %v5983_v35  ;;  %v6629_v63 = vadd.f32 %v198_v16, %v5983_v35  ;;  %v6632_v28 = vadd.f32 %v199_v27, %v5983_v35  ;;  %v5438_v16 = vld [vmem:[%s12923_s1 + $0x5] ss:$8 sm:$0xf] }
 0x14d   :  { %v6635_v29 = vadd.f32 %v192_v57, %v5979_v33  ;;  %v6637_v12 = vpop.permute.xlu1 %847  ;;  %v6640_v34 = vadd.f32 %v193_v8, %v5979_v33  ;;  %v6643_v30 = vadd.f32 %v194_v47, %v5979_v33  ;;  %v6646_v19 = vadd.f32 %v195_v58, %v5979_v33  ;;  %v6652_v35 = vpop.permute.xlu0 %842  ;;  %v13563_v57 = vld [vmem:[#allocation13_spill] sm:$0xff]  ;;  %v13564_v8 = vld [vmem:[#allocation11_spill] sm:$0xff]  ;;  %v13565_v58 = vld [vmem:[#allocation14_spill] sm:$0xff] }
 0x14e   :  { %13554 = vst [vmem:[#allocation107_spill] sm:$0xff] %v6637_v12  ;;  %v6650_v37 = vmul.f32 %v6561_v20, %v5794_v9  ;;  %13555 = vst [vmem:[#allocation108_spill] sm:$0xff] %v6652_v35  ;;  %1208 = vrot.lane.b32.xlu1 %v5854_v17, %s5702_s25  ;;  %v6658_v45 = vmul.f32 %v6564_v42, %v5826_v13  ;;  %v6662_v46 = vmul.f32 %v6567_v43, %v5854_v17  ;;  %v1332_v13 = vld [vmem:[%s12927_s5 + $0x8] sm:$0xff]  ;;  %v13566_v35 = vld [vmem:[#allocation12_spill] sm:$0xff] }
 0x14f   :  { %v6666_v33 = vmul.f32 %v6554_v41, %v5770_v5  ;;  %v6670_v9 = vmul.f32 %v6561_v20, %v5799_v10  ;;  %1206 = vrot.lane.b32.xlu0 %v5859_v18, %s5702_s25  ;;  %v6679_v38 = vmul.f32 %v6564_v42, %v5831_v14  ;;  %v6683_v17 = vmul.f32 %v6567_v43, %v5859_v18  ;;  %v13567_v12 = vld [vmem:[#allocation9_spill] sm:$0xff] }
 0x150   :  { %v6687_v5 = vmul.f32 %v6554_v41, %v5775_v6  ;;  %v6691_v10 = vmul.f32 %v6554_v41, %v5784_v7  ;;  %v258_v14 = vsel %vm248_vm1, %v6083_v1, %v6095_v22  ;;  %v257_v18 = vsel %vm248_vm1, %v6085_v3, %v6097_v23  ;;  %v13560_v7 = vld [vmem:[#allocation7_spill] sm:$0xff] }
 0x151   :  { %13556 = vst [vmem:[#allocation109_spill] sm:$0xff] %v6679_v38  ;;  %13557 = vst [vmem:[#allocation110_spill] sm:$0xff] %v6683_v17  ;;  %v6706_v6 = vmul.f32 %v6561_v20, %v5808_v11  ;;  %v6710_v39 = vmul.f32 %v6564_v42, %v13560_v7  ;;  %v6715_v27 = vpop.permute.xlu1 %857  ;;  %v260_v47 = vsel %vm248_vm1, %v13564_v8, %v13563_v57  ;;  %v6733_v49 = vpop.permute.xlu0 %852  ;;  %v13574_v17 = vld [vmem:[#allocation6_spill] sm:$0xff]  ;;  %v13598_v38 = vld [vmem:[#allocation23_spill] sm:$0xff] }
 0x152   :  { %13558 = vst [vmem:[#allocation111_spill] sm:$0xff] %v6691_v10  ;;  %13562 = vst [vmem:[#allocation113_spill] sm:$0xff] %v6715_v27  ;;  %v259_v11 = vsel %vm248_vm1, %v13566_v35, %v13565_v58  ;;  %v6727_v7 = vmul.f32 %v6567_v43, %v13567_v12  ;;  %v6731_v26 = vmul.f32 %v6554_v41, %v13569_v21  ;;  %1350 = vperm.xlu1 %5645, %v1332_v13   ;;  %v13572_v27 = vld [vmem:[#allocation15_spill] sm:$0xff]  ;;  %v1334_v13 = vld [vmem:[%s12927_s5 + $0x18] sm:$0xff] }
 0x153   :  { %13559 = vst [vmem:[#allocation112_spill] sm:$0xff] %v6706_v6  ;;  %13561 = vst [vmem:[#allocation7_spill] sm:$0xff] %v6710_v39  ;;  %v254_v40 = vsel %vm248_vm1, %v6095_v22, %v13572_v27  ;;  %v253_v6 = vsel %vm248_vm1, %v6097_v23, %v13573_v44  ;;  %v6745_v12 = vmul.f32 %v6561_v20, %v13574_v17  ;;  %1345 = vperm.xlu0 %5644, %v1331_v53   ;;  %v13578_v41 = vld [vmem:[#allocation82_spill] sm:$0xff]  ;;  %v13582_v20 = vld [vmem:[#allocation17_spill] sm:$0xff] }
 0x154   :  { %13568 = vst [vmem:[#allocation13_spill] sm:$0xff] %v6727_v7  ;;  %13570 = vst [vmem:[#allocation11_spill] sm:$0xff] %v6731_v26  ;;  %v13576_v7 = vld [vmem:[#allocation8_spill] sm:$0xff]  ;;  %v298_v22 = vmul.f32 %v13578_v41, %v258_v14  ;;  %v13579_v26 = vld [vmem:[#allocation10_spill] sm:$0xff]  ;;  %v6761_v17 = vrot.slane %v5438_v16, %v6376_v59  ;;  %v306_v53 = vmul.f32 %v13578_v41, %v260_v47 }
 0x155   :  { %13571 = vst [vmem:[#allocation14_spill] sm:$0xff] %v6733_v49  ;;  %13575 = vst [vmem:[#allocation12_spill] sm:$0xff] %v6745_v12  ;;  %v6749_v21 = vmul.f32 %v6564_v42, %v13576_v7  ;;  %v294_v49 = vmul.f32 %v13578_v41, %v257_v18  ;;  %v6758_v23 = vmul.f32 %v6567_v43, %v13579_v26  ;;  %v1333_v7 = vld [vmem:[%s12927_s5 + $0x10] sm:$0xff]  ;;  %v13583_v18 = vld [vmem:[#allocation18_spill] sm:$0xff]  ;;  %v6776_v43 = vpop.permute.xlu1 %894 }
 0x156   :  { %13581 = vst [vmem:[#allocation15_spill] sm:$0xff] %v6761_v17  ;;  %v302_v42 = vmul.f32 %v13578_v41, %v259_v11  ;;  %v256_v14 = vsel %vm248_vm1, %v13563_v57, %v13582_v20  ;;  %v255_v26 = vsel %vm248_vm1, %v13565_v58, %v13583_v18  ;;  %13584 = vst [vmem:[#allocation16_spill] sm:$0xff] %v6776_v43  ;;  %v13585_v17 = vld [vmem:[#allocation84_spill] sm:$0xff]  ;;  %v13586_v47 = vld [vmem:[#allocation19_spill] sm:$0xff]  ;;  %v6787_v57 = vpop.permute.xlu0 %892  ;;  %1360 = vperm.xlu1 %5645, %v1334_v13  }
 0x157   :  { %13577 = vst [vmem:[#allocation9_spill] sm:$0xff] %v6749_v21  ;;  %13580 = vst [vmem:[#allocation5_spill] sm:$0xff] %v6758_v23  ;;  %v299_v23 = vmul.f32 %v13585_v17, %v254_v40  ;;  %v295_v12 = vmul.f32 %v13585_v17, %v253_v6  ;;  %v262_v11 = vsel %vm248_vm1, %v13586_v47, %v6083_v1  ;;  %v13589_v43 = vld [vmem:[#allocation20_spill] sm:$0xff]  ;;  %v13590_v6 = vld [vmem:[#allocation21_spill] sm:$0xff]  ;;  %1355 = vperm.xlu0 %5644, %v1333_v7  }
 0x158   :  { %v6785_v41 = vrot.slane %v5438_v16, %v6367_v51  ;;  %13588 = vst [vmem:[#allocation8_spill] sm:$0xff] %v6787_v57  ;;  %v250_v58 = vsel %vm248_vm1, %v13572_v27, %v13586_v47  ;;  %v249_v40 = vsel %vm248_vm1, %v13573_v44, %v13589_v43  ;;  %v261_v1 = vsel %vm248_vm1, %v13589_v43, %v6085_v3  ;;  %v5465_v27 = vld [vmem:[%s12925_s3 + $0x28] sm:$0xff]  ;;  %v5464_v43 = vld [vmem:[%s12925_s3 + $0x20] sm:$0xff] }
 0x159   :  { %v264_v13 = vsel %vm248_vm1, %v13590_v6, %v13564_v8  ;;  %v307_v47 = vmul.f32 %v13585_v17, %v256_v14  ;;  %v303_v57 = vmul.f32 %v13585_v17, %v255_v26  ;;  %v252_v44 = vsel %vm248_vm1, %v13582_v20, %v13590_v6  ;;  %v13592_v8 = vld [vmem:[#allocation85_spill] sm:$0xff]  ;;  %v6833_v6 = vpop.permute.xlu1 %898  ;;  %v13596_v17 = vld [vmem:[#allocation86_spill] sm:$0xff] }
 0x15a   :  { %13587 = vst [vmem:[#allocation6_spill] sm:$0xff] %v6785_v41  ;;  %v6816_v3 = vrot.slane %v5438_v16, %v6374_v56  ;;  %v297_v7 = vmul.f32 %v13592_v8, %v262_v11  ;;  %v13593_v41 = vld [vmem:[#allocation22_spill] sm:$0xff]  ;;  %v6831_v26 = vrot.slane %v5438_v16, %v6378_v0  ;;  %13595 = vst [vmem:[#allocation18_spill] sm:$0xff] %v6833_v6  ;;  %v6839_v10 = vpop.permute.xlu0 %896  ;;  %1514 = vperm.xlu1 %5645, %v5465_v27   ;;  %v13599_v27 = vld [vmem:[#allocation24_spill] sm:$0xff] }
 0x15b   :  { %v251_v14 = vsel %vm248_vm1, %v13583_v18, %v13593_v41  ;;  %v263_v20 = vsel %vm248_vm1, %v13593_v41, %v13566_v35  ;;  %v293_v21 = vmul.f32 %v13592_v8, %v261_v1  ;;  %v296_v11 = vmul.f32 %v13596_v17, %v249_v40  ;;  %13597 = vst [vmem:[#allocation19_spill] sm:$0xff] %v6839_v10 }
 0x15c   :  { %13591 = vst [vmem:[#allocation10_spill] sm:$0xff] %v6816_v3  ;;  %13594 = vst [vmem:[#allocation17_spill] sm:$0xff] %v6831_v26  ;;  %v300_v3 = vmul.f32 %v13596_v17, %v250_v58  ;;  %v305_v39 = vmul.f32 %v13592_v8, %v264_v13  ;;  %v308_v18 = vmul.f32 %v13596_v17, %v252_v44  ;;  %1509 = vperm.xlu0 %5644, %v5464_v43   ;;  %v5467_v58 = vld [vmem:[%s12925_s3 + $0x38] sm:$0xff]  ;;  %v5466_v44 = vld [vmem:[%s12925_s3 + $0x30] sm:$0xff] }
 0x15d   :  { %v333_v41 = vmul.f32 %v13598_v38, %v297_v7  ;;  %v334_v35 = vmul.f32 %v13598_v38, %v298_v22  ;;  %v335_v16 = vmul.f32 %v13598_v38, %v299_v23  ;;  %v301_v40 = vmul.f32 %v13592_v8, %v263_v20  ;;  %v13600_v7 = vld [vmem:[#allocation25_spill] sm:$0xff]  ;;  %v6859_v26 = vpop.permute.xlu1 %902  ;;  %v13621_v8 = vld [vmem:[#allocation88_spill] sm:$0xff] }
 0x15e   :  { %v304_v1 = vmul.f32 %v13596_v17, %v251_v14  ;;  %v336_v13 = vmul.f32 %v13598_v38, %v300_v3  ;;  %v329_v10 = vmul.f32 %v13599_v27, %v293_v21  ;;  %v330_v22 = vmul.f32 %v13599_v27, %v294_v49  ;;  %13601 = vst [vmem:[#allocation20_spill] sm:$0xff] %v6859_v26  ;;  %v13602_v3 = vld [vmem:[#allocation26_spill] sm:$0xff]  ;;  %v6865_v17 = vpop.permute.xlu0 %900  ;;  %v13630_v26 = vld [vmem:[#allocation43_spill] sm:$0xff] }
 0x15f   :  { %v331_v23 = vmul.f32 %v13599_v27, %v295_v12  ;;  %v332_v43 = vmul.f32 %v13599_v27, %v296_v11  ;;  %v341_v6 = vmul.f32 %v13600_v7, %v305_v39  ;;  %v342_v14 = vmul.f32 %v13600_v7, %v306_v53  ;;  %13603 = vst [vmem:[#allocation21_spill] sm:$0xff] %v6865_v17  ;;  %v13611_v27 = vld [vmem:[#allocation30_spill] sm:$0xff] }
 0x160   :  { %v343_v38 = vmul.f32 %v13600_v7, %v307_v47  ;;  %v344_v21 = vmul.f32 %v13600_v7, %v308_v18  ;;  %v337_v20 = vmul.f32 %v13602_v3, %v301_v40  ;;  %1524 = vperm.xlu1 %5645, %v5467_v58   ;;  %v6868_v49 = vadd.f32 %v333_v41, %v6590_v54  ;;  %v13609_v58 = vld [vmem:[#allocation29_spill] sm:$0xff] }
 0x161   :  { %v6871_v12 = vadd.f32 %v334_v35, %v6600_v61  ;;  %v6874_v39 = vadd.f32 %v335_v16, %v6603_v24  ;;  %v338_v53 = vmul.f32 %v13602_v3, %v302_v42  ;;  %1519 = vperm.xlu0 %5644, %v5466_v44   ;;  %v6878_v47 = vadd.f32 %v336_v13, %v6606_v31  ;;  %v6897_v31 = vpop.permute.xlu1 %906  ;;  %v13606_v35 = vld [vmem:[#allocation32_spill] sm:$0xff]  ;;  %v13608_v16 = vld [vmem:[#allocation33_spill] sm:$0xff]  ;;  %v13610_v13 = vld [vmem:[#allocation34_spill] sm:$0xff] }
 0x162   :  { %v6881_v11 = vadd.f32 %v329_v10, %v6609_v60  ;;  %v339_v18 = vmul.f32 %v13602_v3, %v303_v57  ;;  %v340_v54 = vmul.f32 %v13602_v3, %v304_v1  ;;  %v6886_v41 = vadd.f32 %v330_v22, %v6614_v62  ;;  %v13612_v22 = vld [vmem:[#allocation35_spill] sm:$0xff] }
 0x163   :  { %v6889_v61 = vadd.f32 %v331_v23, %v6617_v2  ;;  %v6892_v24 = vadd.f32 %v332_v43, %v6620_v50  ;;  %v6895_v42 = vadd.f32 %v341_v6, %v6623_v48  ;;  %v6900_v60 = vadd.f32 %v342_v14, %v6626_v36  ;;  %v5443_v50 = vld [vmem:[%s12923_s1 + $0x6] ss:$8 sm:$0xf]  ;;  %v6914_v48 = vpop.permute.xlu0 %904 }
 0x164   :  { %v6903_v10 = vadd.f32 %v343_v38, %v6629_v63  ;;  %v6906_v62 = vadd.f32 %v344_v21, %v6632_v28  ;;  %v6909_v2 = vadd.f32 %v337_v20, %v6635_v29  ;;  %v6917_v57 = vadd.f32 %v338_v53, %v6640_v34  ;;  %v13604_v36 = vld [vmem:[#allocation31_spill] sm:$0xff]  ;;  %v13607_v28 = vld [vmem:[#allocation28_spill] sm:$0xff]  ;;  %v13615_v14 = vld [vmem:[#allocation38_spill] sm:$0xff] }
 0x165   :  { %v13605_v6 = vld [vmem:[#allocation27_spill] sm:$0xff]  ;;  %v402_v29 = vsel %vm393_vm2, %v13607_v28, %v13606_v35  ;;  %v405_v40 = vsel %vm393_vm2, %v13609_v58, %v13608_v16  ;;  %v6932_v1 = vadd.f32 %v339_v18, %v6643_v30  ;;  %v6935_v34 = vadd.f32 %v340_v54, %v6646_v19  ;;  %v13613_v43 = vld [vmem:[#allocation36_spill] sm:$0xff]  ;;  %v13614_v30 = vld [vmem:[#allocation37_spill] sm:$0xff]  ;;  %v6960_v3 = vpop.permute.xlu1 %910 }
 0x166   :  { %v403_v63 = vsel %vm393_vm2, %v13605_v6, %v13604_v36  ;;  %v404_v44 = vsel %vm393_vm2, %v13611_v27, %v13610_v13  ;;  %v399_v23 = vsel %vm393_vm2, %v13604_v36, %v13612_v22  ;;  %v398_v7 = vsel %vm393_vm2, %v13606_v35, %v13613_v43  ;;  %13617 = vst [vmem:[#allocation23_spill] sm:$0xff] %v6960_v3  ;;  %v13618_v20 = vld [vmem:[#allocation87_spill] sm:$0xff] }
 0x167   :  { %v401_v19 = vsel %vm393_vm2, %v13608_v16, %v13614_v30  ;;  %v400_v38 = vsel %vm393_vm2, %v13610_v13, %v13615_v14  ;;  %v6958_v21 = vrot.slane %v5443_v50, %v6376_v59  ;;  %v443_v53 = vmul.f32 %v13618_v20, %v403_v63  ;;  %v13619_v36 = vld [vmem:[#allocation39_spill] sm:$0xff]  ;;  %v6969_v16 = vpop.permute.xlu0 %908 }
 0x168   :  { %v439_v18 = vmul.f32 %v13618_v20, %v402_v29  ;;  %v451_v54 = vmul.f32 %v13618_v20, %v405_v40  ;;  %v407_v35 = vsel %vm393_vm2, %v13619_v36, %v13605_v6  ;;  %13620 = vst [vmem:[#allocation24_spill] sm:$0xff] %v6969_v16  ;;  %v447_v13 = vmul.f32 %v13618_v20, %v404_v44  ;;  %v13623_v16 = vld [vmem:[#allocation40_spill] sm:$0xff] }
 0x169   :  { %13616 = vst [vmem:[#allocation22_spill] sm:$0xff] %v6958_v21  ;;  %v444_v17 = vmul.f32 %v13621_v8, %v399_v23  ;;  %v395_v63 = vsel %vm393_vm2, %v13612_v22, %v13619_v36  ;;  %v6978_v29 = vrot.slane %v5443_v50, %v6367_v51  ;;  %v440_v40 = vmul.f32 %v13621_v8, %v398_v7  ;;  %v13624_v7 = vld [vmem:[#allocation41_spill] sm:$0xff]  ;;  %v13631_v21 = vld [vmem:[#allocation44_spill] sm:$0xff] }
 0x16a   :  { %v452_v3 = vmul.f32 %v13621_v8, %v401_v19  ;;  %v448_v6 = vmul.f32 %v13621_v8, %v400_v38  ;;  %v406_v44 = vsel %vm393_vm2, %v13623_v16, %v13607_v28  ;;  %v442_v23 = vmul.f32 %v6457_v25, %v407_v35  ;;  %v6997_v38 = vpop.permute.xlu1 %914  ;;  %v13627_v8 = vld [vmem:[#allocation42_spill] sm:$0xff] }
 0x16b   :  { %13622 = vst [vmem:[#allocation25_spill] sm:$0xff] %v6978_v29  ;;  %v394_v22 = vsel %vm393_vm2, %v13613_v43, %v13623_v16  ;;  %v409_v19 = vsel %vm393_vm2, %v13624_v7, %v13609_v58  ;;  %13625 = vst [vmem:[#allocation26_spill] sm:$0xff] %v6997_v38  ;;  %v7000_v36 = vrot.slane %v5443_v50, %v6374_v56  ;;  %v7011_v16 = vpop.permute.xlu0 %912 }
 0x16c   :  { %v445_v28 = vmul.f32 %v6460_v4, %v395_v63  ;;  %v397_v35 = vsel %vm393_vm2, %v13614_v30, %v13624_v7  ;;  %v408_v43 = vsel %vm393_vm2, %v13627_v8, %v13611_v27  ;;  %13628 = vst [vmem:[#allocation27_spill] sm:$0xff] %v7011_v16  ;;  %v7014_v58 = vrot.slane %v5443_v50, %v6378_v0 }
 0x16d   :  { %13626 = vst [vmem:[#allocation31_spill] sm:$0xff] %v7000_v36  ;;  %v438_v20 = vmul.f32 %v6457_v25, %v406_v44  ;;  %v396_v63 = vsel %vm393_vm2, %v13615_v14, %v13627_v8  ;;  %v478_v36 = vmul.f32 %v13630_v26, %v442_v23  ;;  %v479_v30 = vmul.f32 %v13630_v26, %v443_v53 }
 0x16e   :  { %13629 = vst [vmem:[#allocation32_spill] sm:$0xff] %v7014_v58  ;;  %v441_v7 = vmul.f32 %v6460_v4, %v394_v22  ;;  %v450_v27 = vmul.f32 %v6457_v25, %v409_v19  ;;  %v480_v29 = vmul.f32 %v13630_v26, %v444_v17  ;;  %v481_v50 = vmul.f32 %v13630_v26, %v445_v28  ;;  %v7031_v14 = vpop.permute.xlu1 %918  ;;  %v13633_v19 = vld [vmem:[#allocation45_spill] sm:$0xff] }
 0x16f   :  { %v453_v58 = vmul.f32 %v6460_v4, %v397_v35  ;;  %v446_v44 = vmul.f32 %v6457_v25, %v408_v43  ;;  %v474_v16 = vmul.f32 %v13631_v21, %v438_v20  ;;  %v475_v8 = vmul.f32 %v13631_v21, %v439_v18  ;;  %13632 = vst [vmem:[#allocation28_spill] sm:$0xff] %v7031_v14  ;;  %v7037_v38 = vpop.permute.xlu0 %916  ;;  %v13635_v43 = vld [vmem:[#allocation46_spill] sm:$0xff] }
 0x170   :  { %v449_v53 = vmul.f32 %v6460_v4, %v396_v63  ;;  %v476_v23 = vmul.f32 %v13631_v21, %v440_v40  ;;  %v477_v22 = vmul.f32 %v13631_v21, %v441_v7  ;;  %v486_v17 = vmul.f32 %v13633_v19, %v450_v27  ;;  %13634 = vst [vmem:[#allocation33_spill] sm:$0xff] %v7037_v38  ;;  %v5448_v7 = vld [vmem:[%s12923_s1 + $0x7] ss:$8 sm:$0xf] }
 0x171   :  { %v7040_v26 = vadd.f32 %v478_v36, %v6868_v49  ;;  %v7043_v28 = vadd.f32 %v479_v30, %v6871_v12  ;;  %v487_v20 = vmul.f32 %v13633_v19, %v451_v54  ;;  %v488_v18 = vmul.f32 %v13633_v19, %v452_v3  ;;  %v13639_v30 = vld [vmem:[#allocation48_spill] sm:$0xff]  ;;  %v13640_v27 = vld [vmem:[#allocation53_spill] sm:$0xff] }
 0x172   :  { %v7048_v35 = vadd.f32 %v480_v29, %v6874_v39  ;;  %v7051_v40 = vadd.f32 %v481_v50, %v6878_v47  ;;  %v489_v21 = vmul.f32 %v13633_v19, %v453_v58  ;;  %v482_v63 = vmul.f32 %v13635_v43, %v446_v44  ;;  %v7063_v36 = vpop.permute.xlu1 %922  ;;  %v13637_v58 = vld [vmem:[#allocation47_spill] sm:$0xff]  ;;  %v13641_v50 = vld [vmem:[#allocation49_spill] sm:$0xff] }
 0x173   :  { %v7056_v49 = vadd.f32 %v474_v16, %v6881_v11  ;;  %v7059_v12 = vadd.f32 %v475_v8, %v6886_v41  ;;  %v483_v54 = vmul.f32 %v13635_v43, %v447_v13  ;;  %v484_v3 = vmul.f32 %v13635_v43, %v448_v6  ;;  %v7075_v16 = vpop.permute.xlu0 %920  ;;  %v13636_v6 = vld [vmem:[#allocation51_spill] sm:$0xff]  ;;  %v13642_v8 = vld [vmem:[#allocation54_spill] sm:$0xff] }
 0x174   :  { %v7066_v39 = vadd.f32 %v476_v23, %v6889_v61  ;;  %v7069_v47 = vadd.f32 %v477_v22, %v6892_v24  ;;  %v7072_v29 = vadd.f32 %v486_v17, %v6895_v42  ;;  %v485_v11 = vmul.f32 %v13635_v43, %v449_v53  ;;  %v13638_v24 = vld [vmem:[#allocation52_spill] sm:$0xff]  ;;  %v13643_v53 = vld [vmem:[#allocation50_spill] sm:$0xff] }
 0x175   :  { %v7078_v41 = vadd.f32 %v487_v20, %v6900_v60  ;;  %v7081_v13 = vadd.f32 %v488_v18, %v6903_v10  ;;  %v548_v61 = vsel %vm538_vm3, %v13637_v58, %v13636_v6  ;;  %v547_v42 = vsel %vm538_vm3, %v13639_v30, %v13638_v24  ;;  %v13645_v17 = vld [vmem:[#allocation56_spill] sm:$0xff] }
 0x176   :  { %v7095_v60 = vadd.f32 %v489_v21, %v6906_v62  ;;  %v7098_v10 = vadd.f32 %v482_v63, %v6909_v2  ;;  %v550_v44 = vsel %vm538_vm3, %v13641_v50, %v13640_v27  ;;  %v549_v23 = vsel %vm538_vm3, %v13643_v53, %v13642_v8  ;;  %v13644_v62 = vld [vmem:[#allocation55_spill] sm:$0xff]  ;;  %v7122_v18 = vpop.permute.xlu1 %992 }
 0x177   :  { %v7109_v22 = vadd.f32 %v483_v54, %v6917_v57  ;;  %v7112_v19 = vadd.f32 %v484_v3, %v6932_v1  ;;  %v544_v2 = vsel %vm538_vm3, %v13636_v6, %v13644_v62  ;;  %v543_v20 = vsel %vm538_vm3, %v13638_v24, %v13645_v17  ;;  %13646 = vst [vmem:[#allocation29_spill] sm:$0xff] %v7122_v18  ;;  %v13647_v57 = vld [vmem:[#allocation91_spill] sm:$0xff]  ;;  %v7129_v63 = vpop.permute.xlu0 %987  ;;  %v13656_v18 = vld [vmem:[#allocation61_spill] sm:$0xff] }
 0x178   :  { %v7125_v21 = vadd.f32 %v485_v11, %v6935_v34  ;;  %v588_v43 = vmul.f32 %v13647_v57, %v548_v61  ;;  %v584_v1 = vmul.f32 %v13647_v57, %v547_v42  ;;  %13648 = vst [vmem:[#allocation34_spill] sm:$0xff] %v7129_v63  ;;  %v7132_v54 = vrot.slane %v5448_v7, %v6376_v59  ;;  %v13650_v24 = vld [vmem:[#allocation59_spill] sm:$0xff]  ;;  %v13652_v42 = vld [vmem:[#allocation57_spill] sm:$0xff] }
 0x179   :  { %v596_v3 = vmul.f32 %v13647_v57, %v550_v44  ;;  %v592_v6 = vmul.f32 %v13647_v57, %v549_v23  ;;  %v552_v4 = vsel %vm538_vm3, %v13650_v24, %v13637_v58  ;;  %v7141_v34 = vrot.slane %v5448_v7, %v6367_v51  ;;  %v13653_v44 = vld [vmem:[#allocation58_spill] sm:$0xff]  ;;  %v13654_v57 = vld [vmem:[#allocation60_spill] sm:$0xff] }
 0x17a   :  { %13649 = vst [vmem:[#allocation30_spill] sm:$0xff] %v7132_v54  ;;  %v589_v11 = vmul.f32 %v6471_v15, %v544_v2  ;;  %v585_v61 = vmul.f32 %v6471_v15, %v543_v20  ;;  %v546_v25 = vsel %vm538_vm3, %v13640_v27, %v13652_v42  ;;  %v545_v23 = vsel %vm538_vm3, %v13642_v8, %v13653_v44  ;;  %v7165_v20 = vpop.permute.xlu1 %1002 }
 0x17b   :  { %13651 = vst [vmem:[#allocation35_spill] sm:$0xff] %v7141_v34  ;;  %v540_v58 = vsel %vm538_vm3, %v13644_v62, %v13650_v24  ;;  %v539_v2 = vsel %vm538_vm3, %v13645_v17, %v13654_v57  ;;  %v551_v27 = vsel %vm538_vm3, %v13654_v57, %v13639_v30  ;;  %v7168_v63 = vrot.slane %v5448_v7, %v6374_v56  ;;  %v7179_v24 = vpop.permute.xlu0 %997 }
 0x17c   :  { %v587_v8 = vmul.f32 %v6481_v52, %v552_v4  ;;  %v542_v62 = vsel %vm538_vm3, %v13652_v42, %v13656_v18  ;;  %v554_v17 = vsel %vm538_vm3, %v13656_v18, %v13641_v50  ;;  %v7182_v30 = vrot.slane %v5448_v7, %v6378_v0  ;;  %v13658_v4 = vld [vmem:[#allocation62_spill] sm:$0xff] }
 0x17d   :  { %13655 = vst [vmem:[#allocation36_spill] sm:$0xff] %v7168_v63  ;;  %v597_v57 = vmul.f32 %v6471_v15, %v546_v25  ;;  %v593_v38 = vmul.f32 %v6471_v15, %v545_v23  ;;  %v541_v14 = vsel %vm538_vm3, %v13653_v44, %v13658_v4  ;;  %v553_v42 = vsel %vm538_vm3, %v13658_v4, %v13643_v53  ;;  %v13659_v63 = vld [vmem:[#allocation63_spill] sm:$0xff]  ;;  %v13661_v4 = vld [vmem:[#allocation64_spill] sm:$0xff] }
 0x17e   :  { %13657 = vst [vmem:[#allocation37_spill] sm:$0xff] %v7182_v30  ;;  %v590_v50 = vmul.f32 %v6484_v32, %v540_v58  ;;  %v583_v18 = vmul.f32 %v6481_v52, %v551_v27  ;;  %v586_v7 = vmul.f32 %v6484_v32, %v539_v2  ;;  %v623_v25 = vmul.f32 %v13659_v63, %v587_v8  ;;  %v7202_v34 = vpop.permute.xlu1 %1039 }
 0x17f   :  { %v595_v23 = vmul.f32 %v6481_v52, %v554_v17  ;;  %v598_v15 = vmul.f32 %v6484_v32, %v542_v62  ;;  %v624_v30 = vmul.f32 %v13659_v63, %v588_v43  ;;  %v625_v44 = vmul.f32 %v13659_v63, %v589_v11  ;;  %13660 = vst [vmem:[#allocation38_spill] sm:$0xff] %v7202_v34  ;;  %v7208_v54 = vpop.permute.xlu0 %1037  ;;  %v13663_v17 = vld [vmem:[#allocation65_spill] sm:$0xff] }
 0x180   :  { %v591_v53 = vmul.f32 %v6481_v52, %v553_v42  ;;  %v594_v58 = vmul.f32 %v6484_v32, %v541_v14  ;;  %v626_v27 = vmul.f32 %v13659_v63, %v590_v50  ;;  %v619_v2 = vmul.f32 %v13661_v4, %v583_v18  ;;  %13662 = vst [vmem:[#allocation39_spill] sm:$0xff] %v7208_v54  ;;  %v13664_v32 = vld [vmem:[#allocation66_spill] sm:$0xff] }
 0x181   :  { %v620_v8 = vmul.f32 %v13661_v4, %v584_v1  ;;  %v621_v62 = vmul.f32 %v13661_v4, %v585_v61  ;;  %v622_v43 = vmul.f32 %v13661_v4, %v586_v7  ;;  %v631_v11 = vmul.f32 %v13663_v17, %v595_v23  ;;  %v13677_v4 = vld [vmem:[#allocation110_spill] sm:$0xff] }
 0x182   :  { %v639_v34 = vadd.f32 %v623_v25, %v7040_v26  ;;  %v632_v42 = vmul.f32 %v13663_v17, %v596_v3  ;;  %v633_v14 = vmul.f32 %v13663_v17, %v597_v57  ;;  %v634_v63 = vmul.f32 %v13663_v17, %v598_v15  ;;  %v7222_v52 = vpop.permute.xlu1 %1043  ;;  %v5453_v17 = vld [vmem:[%s12923_s1 + $0x20] ss:$8 sm:$0xf] }
 0x183   :  { %v640_v50 = vadd.f32 %v624_v30, %v7043_v28  ;;  %v641_v18 = vadd.f32 %v625_v44, %v7048_v35  ;;  %v627_v1 = vmul.f32 %v13664_v32, %v591_v53  ;;  %v628_v61 = vmul.f32 %v13664_v32, %v592_v6  ;;  %v7228_v25 = vpop.permute.xlu0 %1041  ;;  %v13668_v6 = vld [vmem:[#allocation67_spill] sm:$0xff] }
 0x184   :  { %v642_v7 = vadd.f32 %v626_v27, %v7051_v40  ;;  %v635_v26 = vadd.f32 %v619_v2, %v7056_v49  ;;  %v629_v3 = vmul.f32 %v13664_v32, %v593_v38  ;;  %v630_v57 = vmul.f32 %v13664_v32, %v594_v58  ;;  %v13673_v53 = vld [vmem:[#allocation111_spill] sm:$0xff] }
 0x185   :  { %v7232_v15 = vadd.f32 %v620_v8, %v7059_v12  ;;  %v7235_v28 = vadd.f32 %v621_v62, %v7066_v39  ;;  %v7238_v35 = vadd.f32 %v622_v43, %v7069_v47  ;;  %v647_v40 = vadd.f32 %v631_v11, %v7072_v29  ;;  %v13679_v2 = vld [vmem:[#allocation11_spill] sm:$0xff]  ;;  %v13680_v8 = vld [vmem:[#allocation70_spill] sm:$0xff]  ;;  %v13681_v62 = vld [vmem:[#allocation9_spill] sm:$0xff] }
 0x186   :  { %v648_v49 = vadd.f32 %v632_v42, %v7078_v41  ;;  %v649_v38 = vadd.f32 %v633_v14, %v7081_v13  ;;  %v650_v32 = vadd.f32 %v634_v63, %v7095_v60  ;;  %v719_v30 = vmul.f32 %v13668_v6, %v6666_v33  ;;  %v7252_v29 = vpop.permute.xlu1 %1147  ;;  %v13669_v33 = vld [vmem:[#allocation68_spill] sm:$0xff] }
 0x187   :  { %13665 = vst [vmem:[#allocation40_spill] sm:$0xff] %v7232_v15  ;;  %13666 = vst [vmem:[#allocation41_spill] sm:$0xff] %v7235_v28  ;;  %v643_v12 = vadd.f32 %v627_v1, %v7098_v10  ;;  %v644_v23 = vadd.f32 %v628_v61, %v7109_v22  ;;  %v720_v39 = vmul.f32 %v13668_v6, %v6650_v37  ;;  %v7260_v44 = vpop.permute.xlu0 %1142  ;;  %v13671_v22 = vld [vmem:[#allocation109_spill] sm:$0xff]  ;;  %v13685_v63 = vld [vmem:[#allocation12_spill] sm:$0xff] }
 0x188   :  { %13667 = vst [vmem:[#allocation42_spill] sm:$0xff] %v7238_v35  ;;  %v721_v47 = vmul.f32 %v13668_v6, %v6658_v45  ;;  %v645_v41 = vadd.f32 %v629_v3, %v7112_v19  ;;  %v646_v13 = vadd.f32 %v630_v57, %v7125_v21  ;;  %v722_v60 = vmul.f32 %v13668_v6, %v6662_v46  ;;  %v13674_v19 = vld [vmem:[#allocation69_spill] sm:$0xff]  ;;  %v13675_v21 = vld [vmem:[#allocation7_spill] sm:$0xff]  ;;  %v13722_v15 = vld [vmem:[#allocation22_spill] sm:$0xff] }
 0x189   :  { %v715_v10 = vmul.f32 %v13669_v33, %v6687_v5  ;;  %v7264_v37 = vmul.f32 %v13669_v33, %v6670_v9  ;;  %v7268_v45 = vmul.f32 %v13669_v33, %v13671_v22  ;;  %v727_v58 = vmul.f32 %v13674_v19, %v13673_v53  ;;  %v13688_v6 = vld [vmem:[#allocation13_spill] sm:$0xff] }
 0x18a   :  { %v729_v27 = vmul.f32 %v13674_v19, %v13675_v21  ;;  %v7274_v46 = vadd.f32 %v719_v30, %v639_v34  ;;  %v7278_v5 = vmul.f32 %v13669_v33, %v13677_v4  ;;  %v723_v9 = vmul.f32 %v13680_v8, %v13679_v2  ;;  %v13684_v34 = vld [vmem:[#allocation112_spill] sm:$0xff]  ;;  %v7295_v61 = vpop.permute.xlu1 %1051  ;;  %v13689_v33 = vld [vmem:[#allocation5_spill] sm:$0xff] }
 0x18b   :  { %13670 = vst [vmem:[#allocation43_spill] sm:$0xff] %v7264_v37  ;;  %13672 = vst [vmem:[#allocation44_spill] sm:$0xff] %v7268_v45  ;;  %v725_v43 = vmul.f32 %v13680_v8, %v13681_v62  ;;  %v7287_v11 = vadd.f32 %v720_v39, %v640_v50  ;;  %v7289_v42 = vadd.f32 %v721_v47, %v641_v18  ;;  %v7305_v18 = vpop.permute.xlu0 %1049  ;;  %v13699_v4 = vld [vmem:[#allocation105_spill] sm:$0xff]  ;;  %v13718_v45 = vld [vmem:[#allocation18_spill] sm:$0xff] }
 0x18c   :  { %13676 = vst [vmem:[#allocation45_spill] sm:$0xff] %v7274_v46  ;;  %13678 = vst [vmem:[#allocation46_spill] sm:$0xff] %v7278_v5  ;;  %v728_v14 = vmul.f32 %v13674_v19, %v13684_v34  ;;  %v724_v1 = vmul.f32 %v13680_v8, %v13685_v63  ;;  %v7297_v3 = vadd.f32 %v722_v60, %v642_v7  ;;  %v13692_v60 = vld [vmem:[#allocation97_spill] sm:$0xff]  ;;  %v13701_v34 = vld [vmem:[#allocation74_spill] sm:$0xff] }
 0x18d   :  { %13682 = vst [vmem:[#allocation51_spill] sm:$0xff] %v7287_v11  ;;  %13683 = vst [vmem:[#allocation47_spill] sm:$0xff] %v7289_v42  ;;  %v7299_v57 = vadd.f32 %v715_v10, %v635_v26  ;;  %v730_v30 = vmul.f32 %v13674_v19, %v13688_v6  ;;  %v726_v50 = vmul.f32 %v13680_v8, %v13689_v33  ;;  %v13693_v10 = vld [vmem:[#allocation78_spill] sm:$0xff] }
 0x18e   :  { %13686 = vst [vmem:[#allocation52_spill] sm:$0xff] %v7297_v3  ;;  %v743_v39 = vadd.f32 %v727_v58, %v647_v40  ;;  %v7307_v47 = vadd.f32 %v729_v27, %v649_v38  ;;  %v7310_v22 = vrot.slane %v5453_v17, %v6376_v59  ;;  %v7313_v53 = vrot.slane %v5453_v17, %v6367_v51  ;;  %v13695_v40 = vld [vmem:[#allocation73_spill] sm:$0xff]  ;;  %v7329_v51 = vpop.permute.xlu1 %1059  ;;  %v13697_v58 = vld [vmem:[#allocation75_spill] sm:$0xff]  ;;  %v13714_v46 = vld [vmem:[#allocation94_spill] sm:$0xff] }
 0x18f   :  { %13687 = vst [vmem:[#allocation48_spill] sm:$0xff] %v7299_v57  ;;  %v739_v7 = vadd.f32 %v723_v9, %v643_v12  ;;  %v7315_v26 = vadd.f32 %v725_v43, %v645_v41  ;;  %v787_v19 = vsel %vm779_vm4, %v13693_v10, %v13692_v60  ;;  %v7322_v21 = vrot.slane %v5453_v17, %v6374_v56  ;;  %v13698_v27 = vld [vmem:[#allocation71_spill] sm:$0xff]  ;;  %v7342_v8 = vpop.permute.xlu0 %1057 }
 0x190   :  { %13690 = vst [vmem:[#allocation53_spill] sm:$0xff] %v7310_v22  ;;  %13691 = vst [vmem:[#allocation49_spill] sm:$0xff] %v7313_v53  ;;  %v791_v59 = vsel %vm779_vm4, %v13695_v40, %v13693_v10  ;;  %v7332_v38 = vrot.slane %v5453_v17, %v6378_v0  ;;  %v740_v12 = vadd.f32 %v724_v1, %v644_v23  ;;  %v13700_v43 = vld [vmem:[#allocation83_spill] sm:$0xff]  ;;  %v13703_v17 = vld [vmem:[#allocation98_spill] sm:$0xff] }
 0x191   :  { %13694 = vst [vmem:[#allocation54_spill] sm:$0xff] %v7322_v21  ;;  %v744_v41 = vadd.f32 %v728_v14, %v648_v49  ;;  %v789_v56 = vsel %vm779_vm4, %v13698_v27, %v13697_v58  ;;  %v795_v2 = vsel %vm779_vm4, %v13699_v4, %v13695_v40  ;;  %v742_v9 = vadd.f32 %v726_v50, %v646_v13  ;;  %v13702_v49 = vld [vmem:[#allocation6_spill] sm:$0xff]  ;;  %v13705_v1 = vld [vmem:[#allocation92_spill] sm:$0xff] }
 0x192   :  { %13696 = vst [vmem:[#allocation50_spill] sm:$0xff] %v7332_v38  ;;  %v746_v62 = vadd.f32 %v730_v30, %v650_v32  ;;  %v790_v0 = vsel %vm779_vm4, %v13701_v34, %v13700_v43  ;;  %v837_v23 = vmul.f32 %v13702_v49, %v787_v19  ;;  %v786_v14 = vsel %vm779_vm4, %v13700_v43, %v13703_v17  ;;  %v13704_v32 = vld [vmem:[#allocation15_spill] sm:$0xff]  ;;  %v13706_v30 = vld [vmem:[#allocation106_spill] sm:$0xff]  ;;  %v13708_v10 = vld [vmem:[#allocation76_spill] sm:$0xff]  ;;  %v7382_v54 = vpop.permute.xlu1 %1067 }
 0x193   :  { %v783_v63 = vsel %vm779_vm4, %v13692_v60, %v13699_v4  ;;  %v836_v13 = vmul.f32 %v13704_v32, %v791_v59  ;;  %v785_v6 = vsel %vm779_vm4, %v13697_v58, %v13705_v1  ;;  %v782_v33 = vsel %vm779_vm4, %v13703_v17, %v13706_v30  ;;  %v13709_v19 = vld [vmem:[#allocation72_spill] sm:$0xff]  ;;  %v13710_v59 = vld [vmem:[#allocation17_spill] sm:$0xff]  ;;  %v7388_v3 = vpop.permute.xlu0 %1065 }
 0x194   :  { %v794_v50 = vsel %vm779_vm4, %v13706_v30, %v13701_v34  ;;  %v7372_v60 = vmul.f32 %v13704_v32, %v789_v56  ;;  %v7378_v40 = vsel %vm779_vm4, %v13709_v19, %v13708_v10  ;;  %v839_v58 = vmul.f32 %v13710_v59, %v795_v2  ;;  %v13711_v4 = vld [vmem:[#allocation113_spill] sm:$0xff]  ;;  %v13712_v34 = vld [vmem:[#allocation10_spill] sm:$0xff] }
 0x195   :  { %v873_v43 = vmul.f32 %v13711_v4, %v837_v23  ;;  %v832_v17 = vmul.f32 %v13704_v32, %v790_v0  ;;  %v833_v57 = vmul.f32 %v13702_v49, %v786_v14  ;;  %v838_v30 = vmul.f32 %v13712_v34, %v783_v63  ;;  %v13715_v63 = vld [vmem:[#allocation14_spill] sm:$0xff] }
 0x196   :  { %13707 = vst [vmem:[#allocation55_spill] sm:$0xff] %v7372_v60  ;;  %v872_v56 = vmul.f32 %v13711_v4, %v836_v13  ;;  %v7391_v42 = vmul.f32 %v13702_v49, %v785_v6  ;;  %v834_v11 = vmul.f32 %v13712_v34, %v782_v33  ;;  %v835_v2 = vmul.f32 %v13710_v59, %v794_v50  ;;  %v13716_v6 = vld [vmem:[#allocation100_spill] sm:$0xff]  ;;  %v7413_v35 = vpop.permute.xlu1 %1292 }
 0x197   :  { %v875_v23 = vmul.f32 %v13711_v4, %v839_v58  ;;  %v7400_v0 = vsel %vm779_vm4, %v13708_v10, %v13714_v46  ;;  %v874_v14 = vmul.f32 %v13711_v4, %v838_v30  ;;  %v868_v13 = vmul.f32 %v13715_v63, %v832_v17  ;;  %v13720_v30 = vld [vmem:[#allocation26_spill] sm:$0xff] }
 0x198   :  { %13713 = vst [vmem:[#allocation56_spill] sm:$0xff] %v7391_v42  ;;  %v869_v5 = vmul.f32 %v13715_v63, %v833_v57  ;;  %v7409_v33 = vsel %vm779_vm4, %v13705_v1, %v13716_v6  ;;  %v870_v50 = vmul.f32 %v13715_v63, %v834_v11  ;;  %v871_v58 = vmul.f32 %v13715_v63, %v835_v2  ;;  %v13719_v57 = vld [vmem:[#allocation19_spill] sm:$0xff]  ;;  %v7427_v1 = vpop.permute.xlu0 %1287 }
 0x199   :  { %13717 = vst [vmem:[#allocation59_spill] sm:$0xff] %v7409_v33  ;;  %v889_v10 = vadd.f32 %v873_v43, %v744_v41  ;;  %v936_v4 = vsel %vm924_vm5, %v13718_v45, %v6897_v31  ;;  %v935_v17 = vsel %vm924_vm5, %v13719_v57, %v6914_v48  ;;  %v932_v11 = vsel %vm924_vm5, %v6897_v31, %v13720_v30  ;;  %v13721_v41 = vld [vmem:[#allocation27_spill] sm:$0xff] }
 0x19a   :  { %v888_v2 = vadd.f32 %v872_v56, %v743_v39  ;;  %v931_v43 = vsel %vm924_vm5, %v6914_v48, %v13721_v41  ;;  %v928_v63 = vsel %vm924_vm5, %v13720_v30, %v7063_v36  ;;  %v940_v31 = vsel %vm924_vm5, %v7063_v36, %v13718_v45  ;;  %v13723_v30 = vld [vmem:[#allocation25_spill] sm:$0xff]  ;;  %v7450_v34 = vpop.permute.xlu1 %1137  ;;  %v13724_v45 = vld [vmem:[#allocation31_spill] sm:$0xff] }
 0x19b   :  { %v891_v28 = vadd.f32 %v875_v23, %v746_v62  ;;  %v927_v39 = vsel %vm924_vm5, %v13721_v41, %v7075_v16  ;;  %v885_v56 = vadd.f32 %v869_v5, %v740_v12  ;;  %v884_v37 = vadd.f32 %v868_v13, %v739_v7  ;;  %v13725_v23 = vld [vmem:[#allocation32_spill] sm:$0xff] }
 0x19c   :  { %v890_v48 = vadd.f32 %v874_v14, %v7307_v47  ;;  %v981_v42 = vmul.f32 %v13722_v15, %v936_v4  ;;  %v977_v59 = vmul.f32 %v13722_v15, %v935_v17  ;;  %v982_v60 = vmul.f32 %v13723_v30, %v932_v11  ;;  %v7459_v47 = vpop.permute.xlu0 %1132 }
 0x19d   :  { %v887_v33 = vadd.f32 %v871_v58, %v742_v9  ;;  %v978_v36 = vmul.f32 %v13723_v30, %v931_v43  ;;  %v983_v62 = vmul.f32 %v13724_v45, %v928_v63  ;;  %v984_v49 = vmul.f32 %v13725_v23, %v940_v31  ;;  %v13726_v63 = vld [vmem:[#allocation30_spill] sm:$0xff] }
 0x19e   :  { %v939_v5 = vsel %vm924_vm5, %v7075_v16, %v13719_v57  ;;  %v979_v7 = vmul.f32 %v13724_v45, %v927_v39  ;;  %v1017_v12 = vmul.f32 %v7165_v20, %v981_v42  ;;  %v1081_v9 = vsel %vm1069_vm6, %v7222_v52, %v7295_v61  ;;  %v1189_v57 = vpop.permute.xlu1 %1188 }
 0x19f   :  { %v1018_v14 = vmul.f32 %v7165_v20, %v982_v60  ;;  %v1019_v13 = vmul.f32 %v7165_v20, %v983_v62  ;;  %v1080_v16 = vsel %vm1069_vm6, %v7228_v25, %v7305_v18  ;;  %v1076_v58 = vsel %vm1069_vm6, %v7305_v18, %v7342_v8 }
 0x1a0   :  { %v1020_v42 = vmul.f32 %v7165_v20, %v984_v49  ;;  %v980_v4 = vmul.f32 %v13725_v23, %v939_v5  ;;  %v1077_v60 = vsel %vm1069_vm6, %v7295_v61, %v7329_v51  ;;  %v1014_v17 = vmul.f32 %v7179_v24, %v978_v36  ;;  %v1187_v49 = vpop.permute.xlu0 %1186  ;;  %v13727_v61 = vld [vmem:[#allocation35_spill] sm:$0xff] }
 0x1a1   :  { %v886_v11 = vadd.f32 %v870_v50, %v7315_v26  ;;  %v1013_v41 = vmul.f32 %v7179_v24, %v977_v59  ;;  %v1015_v43 = vmul.f32 %v7179_v24, %v979_v7  ;;  %v1126_v18 = vmul.f32 %v13726_v63, %v1081_v9  ;;  %v13728_v9 = vld [vmem:[#allocation37_spill] sm:$0xff] }
 0x1a2   :  { %v1085_v20 = vsel %vm1069_vm6, %v7382_v54, %v7222_v52  ;;  %v1122_v31 = vmul.f32 %v13726_v63, %v1080_v16  ;;  %v1123_v39 = vmul.f32 %v13727_v61, %v1076_v58  ;;  %v1034_v62 = vadd.f32 %v1018_v14, %v889_v10  ;;  %v1197_v10 = vpop.permute.xlu1 %1196 }
 0x1a3   :  { %v1016_v36 = vmul.f32 %v7179_v24, %v980_v4  ;;  %v1127_v26 = vmul.f32 %v13727_v61, %v1077_v60  ;;  %v1033_v59 = vadd.f32 %v1017_v12, %v888_v2  ;;  %v1036_v50 = vadd.f32 %v1020_v42, %v891_v28 }
 0x1a4   :  { %v1035_v5 = vadd.f32 %v1019_v13, %v890_v48  ;;  %v1073_v7 = vsel %vm1069_vm6, %v7329_v51, %v7382_v54  ;;  %v1129_v52 = vmul.f32 %v13728_v9, %v1085_v20  ;;  %v1072_v16 = vsel %vm1069_vm6, %v7342_v8, %v7388_v3  ;;  %v1195_v54 = vpop.permute.xlu0 %1194  ;;  %v13729_v13 = vld [vmem:[#allocation36_spill] sm:$0xff] }
 0x1a5   :  { %v1030_v14 = vadd.f32 %v1014_v17, %v885_v56  ;;  %v1162_v24 = vmul.f32 %v7252_v29, %v1126_v18  ;;  %v1084_v28 = vsel %vm1069_vm6, %v7388_v3, %v7228_v25  ;;  %v1226_v2 = vsel %vm1214_vm7, %v1189_v57, %v1197_v10 }
 0x1a6   :  { %v1029_v51 = vadd.f32 %v1013_v41, %v884_v37  ;;  %v1158_v48 = vmul.f32 %v7260_v44, %v1122_v31  ;;  %v1271_v12 = vmul.f32 %v7310_v22, %v1226_v2  ;;  %v1225_v8 = vsel %vm1214_vm7, %v1187_v49, %v1195_v54  ;;  %v1205_v37 = vpop.permute.xlu1 %1204 }
 0x1a7   :  { %v1159_v56 = vmul.f32 %v7260_v44, %v1123_v39  ;;  %v1128_v58 = vmul.f32 %v13729_v13, %v1073_v7  ;;  %v1124_v42 = vmul.f32 %v13729_v13, %v1072_v16  ;;  %v1267_v25 = vmul.f32 %v7310_v22, %v1225_v8 }
 0x1a8   :  { %v1163_v3 = vmul.f32 %v7252_v29, %v1127_v26  ;;  %v1125_v4 = vmul.f32 %v13728_v9, %v1084_v28  ;;  %v1307_v60 = vmul.f32 %v7413_v35, %v1271_v12  ;;  %v1032_v17 = vadd.f32 %v1016_v36, %v887_v33  ;;  %v1203_v20 = vpop.permute.xlu0 %1202 }
 0x1a9   :  { %v1165_v41 = vmul.f32 %v7252_v29, %v1129_v52  ;;  %v1222_v18 = vsel %vm1214_vm7, %v1197_v10, %v1205_v37  ;;  %v1178_v31 = vadd.f32 %v1162_v24, %v1033_v59  ;;  %v1303_v39 = vmul.f32 %v7427_v1, %v1267_v25 }
 0x1aa   :  { %v1031_v7 = vadd.f32 %v1015_v43, %v886_v11  ;;  %v1272_v16 = vmul.f32 %v7313_v53, %v1222_v18  ;;  %v1221_v26 = vsel %vm1214_vm7, %v1195_v54, %v1203_v20  ;;  %v1175_v28 = vadd.f32 %v1159_v56, %v1030_v14  ;;  %v1213_v10 = vpop.permute.xlu1 %1212 }
 0x1ab   :  { %v1174_v2 = vadd.f32 %v1158_v48, %v1029_v51  ;;  %v1164_v12 = vmul.f32 %v7252_v29, %v1128_v58  ;;  %v1160_v33 = vmul.f32 %v7260_v44, %v1124_v42  ;;  %v1268_v36 = vmul.f32 %v7313_v53, %v1221_v26 }
 0x1ac   :  { %v1179_v52 = vadd.f32 %v1163_v3, %v1034_v62  ;;  %v1308_v59 = vmul.f32 %v7413_v35, %v1272_v16  ;;  %v1323_v24 = vadd.f32 %v1307_v60, %v1178_v31  ;;  %v1161_v11 = vmul.f32 %v7260_v44, %v1125_v4  ;;  %v1211_v54 = vpop.permute.xlu0 %1210 }
 0x1ad   :  { %v1181_v43 = vadd.f32 %v1165_v41, %v1036_v50  ;;  %v1218_v8 = vsel %vm1214_vm7, %v1205_v37, %v1213_v10  ;;  %v1230_v14 = vsel %vm1214_vm7, %v1213_v10, %v1189_v57  ;;  %v1304_v29 = vmul.f32 %v7427_v1, %v1268_v36  ;;  %v13735_v10 = vld [vmem:[#allocation107_spill] sm:$0xff] }
 0x1ae   :  { %v1319_v51 = vadd.f32 %v1303_v39, %v1174_v2  ;;  %v1273_v48 = vmul.f32 %v7322_v21, %v1218_v8  ;;  %v1274_v62 = vmul.f32 %v7332_v38, %v1230_v14  ;;  %v1217_v56 = vsel %vm1214_vm7, %v1203_v20, %v1211_v54  ;;  %v7548_v25 = vpop.permute.xlu1 %1047 }
 0x1af   :  { %v1229_v44 = vsel %vm1214_vm7, %v1211_v54, %v1187_v49  ;;  %v1269_v50 = vmul.f32 %v7322_v21, %v1217_v56  ;;  %v1320_v42 = vadd.f32 %v1304_v29, %v1175_v28  ;;  %v1324_v57 = vadd.f32 %v1308_v59, %v1179_v52  ;;  %v13730_v28 = vld [vmem:[#allocation104_spill] sm:$0xff]  ;;  %v13734_v52 = vld [vmem:[#allocation55_spill] sm:$0xff]  ;;  %v13740_v56 = vld [vmem:[#allocation41_spill] sm:$0xff] }
 0x1b0   :  { %v1270_v58 = vmul.f32 %v7332_v38, %v1229_v44  ;;  %v1177_v3 = vadd.f32 %v1161_v11, %v1032_v17  ;;  %v1310_v4 = vmul.f32 %v7413_v35, %v1274_v62  ;;  %v1180_v37 = vadd.f32 %v1164_v12, %v1035_v5  ;;  %v7552_v41 = vpop.permute.xlu0 %1045  ;;  %v13732_v12 = vld [vmem:[#allocation59_spill] sm:$0xff]  ;;  %v13737_v11 = vld [vmem:[#allocation56_spill] sm:$0xff] }
 0x1b1   :  { %v1309_v60 = vmul.f32 %v7413_v35, %v1273_v48  ;;  %v1340_v18 = vpack.c.bf16 %v1324_v57, %v1320_v42  ;;  %v1176_v49 = vadd.f32 %v1160_v33, %v1031_v7  ;;  %v1305_v31 = vmul.f32 %v7427_v1, %v1269_v50  ;;  %v13733_v33 = vld [vmem:[#allocation10_spill] sm:$0xff]  ;;  %v13738_v54 = vld [vmem:[#allocation40_spill] sm:$0xff] }
 0x1b2   :  { %v1306_v20 = vmul.f32 %v7427_v1, %v1270_v58  ;;  %v793_v39 = vsel %vm779_vm4, %v13716_v6, %v13698_v27  ;;  %v1339_v16 = vpack.c.bf16 %v1323_v24, %v1319_v51  ;;  %v1326_v17 = vadd.f32 %v1310_v4, %v1181_v43  ;;  %v13731_v27 = vld [vmem:[#allocation6_spill] sm:$0xff]  ;;  %v7576_v59 = vpop.permute.xlu1 %1055  ;;  %v13736_v24 = vld [vmem:[#allocation17_spill] sm:$0xff]  ;;  %v13741_v44 = vld [vmem:[#allocation44_spill] sm:$0xff] }
 0x1b3   :  { %v1325_v26 = vadd.f32 %v1309_v60, %v1180_v37  ;;  %v780_v35 = vsel %vm779_vm4, %v13714_v46, %v13730_v28  ;;  %v792_v5 = vsel %vm779_vm4, %v13730_v28, %v13709_v19  ;;  %1392 = vmatprep.subr.bf16.mxu0 %v1340_v18  ;;  %v1321_v7 = vadd.f32 %v1305_v31, %v1176_v49  ;;  %v13742_v42 = vld [vmem:[#allocation108_spill] sm:$0xff]  ;;  %v13743_v4 = vld [vmem:[#allocation42_spill] sm:$0xff]  ;;  %v13745_v18 = vld [vmem:[#allocation45_spill] sm:$0xff] }
 0x1b4   :  { %v1322_v1 = vadd.f32 %v1306_v20, %v1177_v3  ;;  %v824_v2 = vmul.f32 %v13704_v32, %v7378_v40  ;;  %v825_v6 = vmul.f32 %v13731_v27, %v7400_v0  ;;  %v830_v36 = vmul.f32 %v13733_v33, %v13732_v12  ;;  %1393 = vmatpush1.bf16.msra.mxu0 %v1339_v16  ;;  %v7581_v8 = vpop.permute.xlu0 %1053  ;;  %v13739_v0 = vld [vmem:[#allocation43_spill] sm:$0xff]  ;;  %v13744_v37 = vld [vmem:[#allocation46_spill] sm:$0xff]  ;;  %v13748_v28 = vld [vmem:[#allocation16_spill] sm:$0xff] }
 0x1b5   :  { %v864_v46 = vmul.f32 %v13735_v10, %v13734_v52  ;;  %v831_v19 = vmul.f32 %v13736_v24, %v793_v39  ;;  %v865_v43 = vmul.f32 %v13735_v10, %v13737_v11  ;;  %v1341_v14 = vpack.c.bf16 %v1325_v26, %v1321_v7  ;;  %v13746_v16 = vld [vmem:[#allocation51_spill] sm:$0xff]  ;;  %v13747_v26 = vld [vmem:[#allocation20_spill] sm:$0xff] }
 0x1b6   :  { %v1342_v40 = vpack.c.bf16 %v1326_v17, %v1322_v1  ;;  %v732_v29 = vadd.f32 %v13739_v0, %v13738_v54  ;;  %v826_v51 = vmul.f32 %v13733_v33, %v780_v35  ;;  %v827_v48 = vmul.f32 %v13736_v24, %v792_v5  ;;  %v1064_v39 = vpop.permute.xlu1 %1063  ;;  %v13749_v5 = vld [vmem:[#allocation21_spill] sm:$0xff]  ;;  %v13750_v1 = vld [vmem:[#allocation8_spill] sm:$0xff] }
 0x1b7   :  { %v866_v62 = vmul.f32 %v13735_v10, %v830_v36  ;;  %v733_v50 = vadd.f32 %v13741_v44, %v13740_v56  ;;  %v867_v58 = vmul.f32 %v13735_v10, %v831_v19  ;;  %v860_v57 = vmul.f32 %v13742_v42, %v824_v2  ;;  %v13751_v2 = vld [vmem:[#allocation23_spill] sm:$0xff]  ;;  %v13753_v10 = vld [vmem:[#allocation24_spill] sm:$0xff] }
 0x1b8   :  { %v861_v3 = vmul.f32 %v13742_v42, %v825_v6  ;;  %1445 = vmatprep.subr.bf16.mxu1 %v1342_v40  ;;  %v734_v60 = vadd.f32 %v13744_v37, %v13743_v4  ;;  %v880_v20 = vadd.f32 %v864_v46, %v13745_v18  ;;  %v862_v49 = vmul.f32 %v13742_v42, %v826_v51  ;;  %v1062_v12 = vpop.permute.xlu0 %1061  ;;  %v13752_v36 = vld [vmem:[#allocation47_spill] sm:$0xff]  ;;  %v13754_v19 = vld [vmem:[#allocation28_spill] sm:$0xff] }
 0x1b9   :  { %v863_v31 = vmul.f32 %v13742_v42, %v827_v48  ;;  %1446 = vmatpush1.bf16.msra.mxu1 %v1341_v14  ;;  %v881_v17 = vadd.f32 %v865_v43, %v13746_v16  ;;  %v934_v35 = vsel %vm924_vm5, %v13748_v28, %v13747_v26  ;;  %v933_v7 = vsel %vm924_vm5, %v13750_v1, %v13749_v5  ;;  %v13755_v40 = vld [vmem:[#allocation52_spill] sm:$0xff]  ;;  %v13757_v48 = vld [vmem:[#allocation33_spill] sm:$0xff] }
 0x1ba   :  { %v930_v6 = vsel %vm924_vm5, %v13747_v26, %v13751_v2  ;;  %v882_v52 = vadd.f32 %v866_v62, %v13752_v36  ;;  %v929_v46 = vsel %vm924_vm5, %v13749_v5, %v13753_v10  ;;  %v926_v11 = vsel %vm924_vm5, %v13751_v2, %v13754_v19  ;;  %v13756_v54 = vld [vmem:[#allocation48_spill] sm:$0xff]  ;;  %v7635_v37 = vpop.permute.xlu1 %1282  ;;  %v13760_v2 = vld [vmem:[#allocation39_spill] sm:$0xff] }
 0x1bb   :  { %v938_v43 = vsel %vm924_vm5, %v13754_v19, %v13748_v28  ;;  %v883_v14 = vadd.f32 %v867_v58, %v13755_v40  ;;  %v876_v0 = vadd.f32 %v860_v57, %v13756_v54  ;;  %v877_v51 = vadd.f32 %v861_v3, %v732_v29  ;;  %v13759_v28 = vld [vmem:[#allocation38_spill] sm:$0xff] }
 0x1bc   :  { %v925_v62 = vsel %vm924_vm5, %v13753_v10, %v13757_v48  ;;  %v7630_v56 = vadd.f32 %v862_v49, %v733_v50  ;;  %v973_v44 = vmul.f32 %v13722_v15, %v934_v35  ;;  %v969_v42 = vmul.f32 %v13722_v15, %v933_v7  ;;  %v7644_v3 = vpop.permute.xlu0 %1277  ;;  %v13758_v49 = vld [vmem:[#allocation29_spill] sm:$0xff]  ;;  %v5489_v15 = vld [vmem:[%s12924_s2 + $0x1c8] sm:$0xff] }
 0x1bd   :  { %v974_v4 = vmul.f32 %v13723_v30, %v930_v6  ;;  %v970_v58 = vmul.f32 %v13723_v30, %v929_v46  ;;  %v975_v57 = vmul.f32 %v13724_v45, %v926_v11  ;;  %v976_v29 = vmul.f32 %v13725_v23, %v938_v43  ;;  %v13761_v46 = vld [vmem:[#allocation34_spill] sm:$0xff] }
 0x1be   :  { %v937_v50 = vsel %vm924_vm5, %v13757_v48, %v13750_v1  ;;  %v971_v18 = vmul.f32 %v13724_v45, %v925_v62  ;;  %v1009_v16 = vmul.f32 %v13758_v49, %v973_v44  ;;  %v1079_v35 = vsel %vm1069_vm6, %v13759_v28, %v7548_v25  ;;  %v1185_v43 = vpop.permute.xlu1 %1184 }
 0x1bf   :  { %v1010_v26 = vmul.f32 %v13758_v49, %v974_v4  ;;  %v1011_v5 = vmul.f32 %v13758_v49, %v975_v57  ;;  %v1012_v7 = vmul.f32 %v13758_v49, %v976_v29  ;;  %v1078_v1 = vsel %vm1069_vm6, %v13760_v2, %v7552_v41 }
 0x1c0   :  { %v1074_v6 = vsel %vm1069_vm6, %v7552_v41, %v7581_v8  ;;  %v879_v36 = vadd.f32 %v863_v31, %v734_v60  ;;  %v972_v10 = vmul.f32 %v13725_v23, %v937_v50  ;;  %v1006_v19 = vmul.f32 %v13761_v46, %v970_v58  ;;  %v1183_v60 = vpop.permute.xlu0 %1182  ;;  %v5488_v23 = vld [vmem:[%s12924_s2 + $0x1c0] sm:$0xff] }
 0x1c1   :  { %v1075_v11 = vsel %vm1069_vm6, %v7548_v25, %v7576_v59  ;;  %v1005_v40 = vmul.f32 %v13761_v46, %v969_v42  ;;  %v1007_v54 = vmul.f32 %v13761_v46, %v971_v18  ;;  %v1118_v48 = vmul.f32 %v13726_v63, %v1079_v35 }
 0x1c2   :  { %v1083_v41 = vsel %vm1069_vm6, %v1064_v39, %v13759_v28  ;;  %v1008_v31 = vmul.f32 %v13761_v46, %v972_v10  ;;  %v1114_v62 = vmul.f32 %v13726_v63, %v1078_v1  ;;  %v1115_v44 = vmul.f32 %v13727_v61, %v1074_v6  ;;  %v1193_v49 = vpop.permute.xlu1 %1192  ;;  %v5495_v63 = vld [vmem:[%s12924_s2 + $0x1f8] sm:$0xff] }
 0x1c3   :  { %v1026_v4 = vadd.f32 %v1010_v26, %v881_v17  ;;  %v1119_v25 = vmul.f32 %v13727_v61, %v1075_v11  ;;  %v1025_v58 = vadd.f32 %v1009_v16, %v880_v20  ;;  %v1028_v42 = vadd.f32 %v1012_v7, %v883_v14 }
 0x1c4   :  { %v1027_v57 = vadd.f32 %v1011_v5, %v882_v52  ;;  %v1071_v29 = vsel %vm1069_vm6, %v7576_v59, %v1064_v39  ;;  %v1121_v50 = vmul.f32 %v13728_v9, %v1083_v41  ;;  %v1070_v18 = vsel %vm1069_vm6, %v7581_v8, %v1062_v12  ;;  %v1191_v52 = vpop.permute.xlu0 %1190 }
 0x1c5   :  { %v1022_v28 = vadd.f32 %v1006_v19, %v877_v51  ;;  %v1154_v35 = vmul.f32 %v7450_v34, %v1118_v48  ;;  %v1082_v20 = vsel %vm1069_vm6, %v1062_v12, %v13760_v2  ;;  %v1224_v17 = vsel %vm1214_vm7, %v1185_v43, %v1193_v49 }
 0x1c6   :  { %v1021_v14 = vadd.f32 %v1005_v40, %v876_v0  ;;  %v1150_v59 = vmul.f32 %v7459_v47, %v1114_v62  ;;  %v1151_v39 = vmul.f32 %v7459_v47, %v1115_v44  ;;  %v1263_v16 = vmul.f32 %v7310_v22, %v1224_v17  ;;  %v1201_v1 = vpop.permute.xlu1 %1200 }
 0x1c7   :  { %v1223_v8 = vsel %vm1214_vm7, %v1183_v60, %v1191_v52  ;;  %v1155_v51 = vmul.f32 %v7450_v34, %v1119_v25  ;;  %v1120_v26 = vmul.f32 %v13729_v13, %v1071_v29  ;;  %v1116_v12 = vmul.f32 %v13729_v13, %v1070_v18 }
 0x1c8   :  { %v1259_v5 = vmul.f32 %v7310_v22, %v1223_v8  ;;  %v1157_v7 = vmul.f32 %v7450_v34, %v1121_v50  ;;  %v1117_v0 = vmul.f32 %v13728_v9, %v1082_v20  ;;  %v1299_v2 = vmul.f32 %v7635_v37, %v1263_v16  ;;  %v1199_v19 = vpop.permute.xlu0 %1198  ;;  %v5494_v9 = vld [vmem:[%s12924_s2 + $0x1f0] sm:$0xff] }
 0x1c9   :  { %v1024_v6 = vadd.f32 %v1008_v31, %v879_v36  ;;  %v1220_v46 = vsel %vm1214_vm7, %v1193_v49, %v1201_v1  ;;  %v1170_v11 = vadd.f32 %v1154_v35, %v1025_v58  ;;  %v1023_v40 = vadd.f32 %v1007_v54, %v7630_v56 }
 0x1ca   :  { %v1295_v10 = vmul.f32 %v7644_v3, %v1259_v5  ;;  %v1264_v48 = vmul.f32 %v7313_v53, %v1220_v46  ;;  %v1219_v41 = vsel %vm1214_vm7, %v1191_v52, %v1199_v19  ;;  %v1167_v62 = vadd.f32 %v1151_v39, %v1022_v28  ;;  %v1209_v18 = vpop.permute.xlu1 %1208 }
 0x1cb   :  { %v1166_v44 = vadd.f32 %v1150_v59, %v1021_v14  ;;  %v1156_v25 = vmul.f32 %v7450_v34, %v1120_v26  ;;  %v1152_v36 = vmul.f32 %v7459_v47, %v1116_v12  ;;  %v1260_v31 = vmul.f32 %v7313_v53, %v1219_v41 }
 0x1cc   :  { %v1171_v29 = vadd.f32 %v1155_v51, %v1026_v4  ;;  %v1153_v50 = vmul.f32 %v7459_v47, %v1117_v0  ;;  %v1300_v58 = vmul.f32 %v7635_v37, %v1264_v48  ;;  %v1315_v56 = vadd.f32 %v1299_v2, %v1170_v11  ;;  %v1207_v35 = vpop.permute.xlu0 %1206 }
 0x1cd   :  { %v1173_v54 = vadd.f32 %v1157_v7, %v1028_v42  ;;  %v1296_v49 = vmul.f32 %v7644_v3, %v1260_v31  ;;  %v1216_v28 = vsel %vm1214_vm7, %v1201_v1, %v1209_v18  ;;  %v1228_v34 = vsel %vm1214_vm7, %v1209_v18, %v1185_v43  ;;  %v5646_v1 = vld [vmem:[%s12926_s4] sm:$0xff]  }
 0x1ce   :  { %v1311_v20 = vadd.f32 %v1295_v10, %v1166_v44  ;;  %v1265_v17 = vmul.f32 %v7322_v21, %v1216_v28  ;;  %v1266_v4 = vmul.f32 %v7332_v38, %v1228_v34  ;;  %v1215_v47 = vsel %vm1214_vm7, %v1199_v19, %v1207_v35  ;;  %v1351_v41 = vpop.permute.xlu1 %1350 }
 0x1cf   :  { %v1227_v42 = vsel %vm1214_vm7, %v1207_v35, %v1183_v60  ;;  %v1261_v52 = vmul.f32 %v7322_v21, %v1215_v47  ;;  %v1312_v59 = vadd.f32 %v1296_v49, %v1167_v62  ;;  %v1316_v39 = vadd.f32 %v1300_v58, %v1171_v29 }
 0x1d0   :  { %v1262_v14 = vmul.f32 %v7332_v38, %v1227_v42  ;;  %v1301_v43 = vmul.f32 %v7635_v37, %v1265_v17  ;;  %v1302_v16 = vmul.f32 %v7635_v37, %v1266_v4  ;;  %v1169_v8 = vadd.f32 %v1153_v50, %v1024_v6  ;;  %v5647_v6 = vld [vmem:[%s12926_s4 + $0x8] sm:$0xff]   ;;  %v1346_v19 = vpop.permute.xlu0 %1345 }
 0x1d1   :  { %v1172_v51 = vadd.f32 %v1156_v25, %v1027_v57  ;;  %v1297_v26 = vmul.f32 %v7644_v3, %v1261_v52  ;;  %v1336_v5 = vpack.c.bf16 %v1316_v39, %v1312_v59  ;;  %v1168_v7 = vadd.f32 %v1152_v36, %v1023_v40  ;;  %v5485_v38 = vld [vmem:[%s12924_s2 + $0x1a8] sm:$0xff] }
 0x1d2   :  { %v1298_v12 = vmul.f32 %v7644_v3, %v1262_v14  ;;  %v1335_v0 = vpack.c.bf16 %v1315_v56, %v1311_v20  ;;  %v1318_v60 = vadd.f32 %v1302_v16, %v1173_v54  ;;  %v13762_v3 = vmov 0   ;;  %v1361_v17 = vpop.permute.xlu1 %1360 }
 0x1d3   :  { %v1317_v2 = vadd.f32 %v1301_v43, %v1172_v51  ;;  %1394 = vmatprep.subr.bf16.mxu0 %v1336_v5  ;;  %v1313_v46 = vadd.f32 %v1297_v26, %v1168_v7 }
 0x1d4   :  { %v1314_v10 = vadd.f32 %v1298_v12, %v1169_v8  ;;  %1395 = vmatpush1.bf16.msra.mxu0 %v1335_v0  ;;  %v1356_v58 = vpop.permute.xlu0 %1355 }
 0x1d5   :  { %v1337_v57 = vpack.c.bf16 %v1317_v2, %v1313_v46 }
 0x1d6   :  { %v1338_v37 = vpack.c.bf16 %v1318_v60, %v1314_v10 }
 0x1d7   :  { %5460 = vmatmul.mubr.msk.bf16.vlgmr.msra.gmra.mxu0 %vm1373_vm8, %v5646_v1 }
 0x1d8   :  { %1447 = vmatprep.subr.bf16.mxu1 %v1338_v37  ;;  %1422 = vmatprep.mubr.bf16.mxu0 %v13762_v3 }
 0x1d9   :  { %1448 = vmatpush1.bf16.msra.mxu1 %v1337_v57 }
 0x1dc   :  { %5462 = vmatmul.mubr.msk.bf16.vlgmr.msra.gmra.mxu1 %vm1373_vm8, %v5646_v1 }
 0x1dd   :  { %1475 = vmatprep.mubr.bf16.mxu1 %v13762_v3 }
 0x1df   :  { %5461 = vmatmul.mubr.msk.bf16.gmra.mxu0 %vm1373_vm8, %v5647_v6 }
 0x1e0   :  { %2654 = vmatprep.mubr.bf16.mxu0 %v13762_v3 }
 0x1e4   :  { %5463 = vmatmul.mubr.msk.bf16.gmra.mxu1 %vm1373_vm8, %v5647_v6 }
 0x1e5   :  { %2707 = vmatprep.mubr.bf16.mxu1 %v13762_v3 }
 0x297   :  { %v1414_v11 = vpop.f32.mrf.mxu0 }
 0x298   :  { %v1415_v40 = vadd.f32 %v1414_v11, %v1346_v19 }
 0x299   :  { %v1416_v48 = vpop.f32.mrf.mxu0 }
 0x29a   :  { %v7747_v62 = vmax.f32 %v1415_v40, 0.0  ;;  %v1417_v44 = vadd.f32 %v1416_v48, %v1346_v19 }
 0x29b   :  { %v1418_v25 = vpop.f32.mrf.mxu0 }
 0x29c   :  { %v1467_v36 = vpop.f32.mrf.mxu1  ;;  %v1419_v31 = vadd.f32 %v1418_v25, %v1351_v41  ;;  %1527 = vrot.lane.b32.xlu0 %v7747_v62, %s5695_s17  ;;  %v7751_v18 = vmax.f32 %v1417_v44, 0.0 }
 0x29d   :  { %v1420_v29 = vpop.f32.mrf.mxu0  ;;  %v1468_v43 = vadd.f32 %v1467_v36, %v1346_v19  ;;  %v5469_v36 = vld [vmem:[%s12924_s2 + $0x128] sm:$0xff] }
 0x29e   :  { %v1469_v50 = vpop.f32.mrf.mxu1  ;;  %v7753_v56 = vmax.f32 %v1419_v31, 0.0  ;;  %v1421_v54 = vadd.f32 %v1420_v29, %v1351_v41  ;;  %v5470_v31 = vld [vmem:[%s12924_s2 + $0x130] sm:$0xff]  ;;  %v5471_v29 = vld [vmem:[%s12924_s2 + $0x138] sm:$0xff] }
 0x29f   :  { %v1424_v49 = vpop.f32.mrf.mxu0  ;;  %v7775_v12 = vmax.f32 %v1468_v43, 0.0  ;;  %v1470_v2 = vadd.f32 %v1469_v50, %v1346_v19  ;;  %v5472_v50 = vld [vmem:[%s12924_s2 + $0x140] sm:$0xff] }
 0x2a0   :  { %v1471_v28 = vpop.f32.mrf.mxu1  ;;  %v1425_v34 = vadd.f32 %v1424_v49, %v1356_v58  ;;  %1529 = vrot.lane.b32.xlu1 %v7753_v56, %s5695_s17  ;;  %1535 = vrot.lane.b32.xlu0 %v7751_v18, %s5695_s17  ;;  %v7759_v4 = vmax.f32 %v1421_v54, 0.0  ;;  %v5474_v54 = vld [vmem:[%s12924_s2 + $0x150] sm:$0xff]  ;;  %v5475_v49 = vld [vmem:[%s12924_s2 + $0x158] sm:$0xff] }
 0x2a1   :  { %v1426_v35 = vpop.f32.mrf.mxu0  ;;  %v1472_v5 = vadd.f32 %v1471_v28, %v1351_v41  ;;  %v7791_v37 = vmax.f32 %v1470_v2, 0.0  ;;  %v7889_v28 = vpop.permute.xlu0 %1509 }
 0x2a2   :  { %v1473_v20 = vpop.f32.mrf.mxu1  ;;  %v7761_v47 = vmax.f32 %v1425_v34, 0.0  ;;  %v1427_v42 = vadd.f32 %v1426_v35, %v1356_v58  ;;  %v7895_v34 = vpop.permute.xlu1 %1514  ;;  %v5476_v35 = vld [vmem:[%s12924_s2 + $0x160] sm:$0xff] }
 0x2a3   :  { %v1428_v52 = vpop.f32.mrf.mxu0  ;;  %v7783_v1 = vmax.f32 %v1472_v5, 0.0  ;;  %v1474_v57 = vadd.f32 %v1473_v20, %v1351_v41  ;;  %v5468_v41 = vld [vmem:[%s12924_s2 + $0x120] sm:$0xff] }
 0x2a4   :  { %v1477_v14 = vpop.f32.mrf.mxu1  ;;  %v1429_v59 = vadd.f32 %v1428_v52, %v1361_v17  ;;  %1537 = vrot.lane.b32.xlu1 %v7759_v4, %s5695_s17  ;;  %1531 = vrot.lane.b32.xlu0 %v7761_v47, %s5695_s17  ;;  %v7767_v16 = vmax.f32 %v1427_v42, 0.0  ;;  %v5478_v42 = vld [vmem:[%s12924_s2 + $0x170] sm:$0xff] }
 0x2a5   :  { %v1430_v39 = vpop.f32.mrf.mxu0  ;;  %v1478_v7 = vadd.f32 %v1477_v14, %v1356_v58  ;;  %v7799_v19 = vmax.f32 %v1474_v57, 0.0  ;;  %v7904_v20 = vpop.permute.xlu0 %1519 }
 0x2a6   :  { %v7769_v8 = vmax.f32 %v1429_v59, 0.0  ;;  %v1431_v51 = vadd.f32 %v1430_v39, %v1361_v17  ;;  %v1479_v26 = vpop.f32.mrf.mxu1  ;;  %v7914_v52 = vpop.permute.xlu1 %1524  ;;  %v5479_v59 = vld [vmem:[%s12924_s2 + $0x178] sm:$0xff] }
 0x2a7   :  { %v7785_v10 = vmax.f32 %v1478_v7, 0.0  ;;  %v1480_v6 = vadd.f32 %v1479_v26, %v1356_v58  ;;  %v5473_v58 = vld [vmem:[%s12924_s2 + $0x148] sm:$0xff] }
 0x2a8   :  { %1533 = vrot.lane.b32.xlu1 %v7769_v8, %s5695_s17  ;;  %1539 = vrot.lane.b32.xlu0 %v7767_v16, %s5695_s17  ;;  %v7777_v0 = vmax.f32 %v1431_v51, 0.0  ;;  %v1481_v60 = vpop.f32.mrf.mxu1 }
 0x2a9   :  { %v1482_v46 = vadd.f32 %v1481_v60, %v1361_v17  ;;  %v7801_v48 = vmax.f32 %v1480_v6, 0.0 }
 0x2aa   :  { %v1483_v40 = vpop.f32.mrf.mxu1 }
 0x2ab   :  { %v7793_v11 = vmax.f32 %v1482_v46, 0.0  ;;  %v1484_v44 = vadd.f32 %v1483_v40, %v1361_v17  ;;  %v5477_v17 = vld [vmem:[%s12924_s2 + $0x168] sm:$0xff] }
 0x2ac   :  { %1541 = vrot.lane.b32.xlu1 %v7777_v0, %s5695_s17  ;;  %1543 = vrot.lane.b32.xlu0 %v7775_v12, %s5695_s17 }
 0x2ad   :  { %v7810_v25 = vmax.f32 %v1484_v44, 0.0 }
 0x2b0   :  { %1545 = vrot.lane.b32.xlu1 %v7783_v1, %s5695_s17  ;;  %1547 = vrot.lane.b32.xlu0 %v7785_v10, %s5695_s17 }
 0x2b4   :  { %1549 = vrot.lane.b32.xlu1 %v7793_v11, %s5695_s17  ;;  %1551 = vrot.lane.b32.xlu0 %v7791_v37, %s5695_s17 }
 0x2b8   :  { %1553 = vrot.lane.b32.xlu1 %v7799_v19, %s5695_s17  ;;  %1555 = vrot.lane.b32.xlu0 %v7801_v48, %s5695_s17 }
 0x2bc   :  { %1557 = vrot.lane.b32.xlu1 %v7810_v25, %s5695_s17  ;;  %1598 = vperm.xlu0 %5644, %v5468_v41   ;;  %v5482_v41 = vld [vmem:[%s12924_s2 + $0x190] sm:$0xff] }
 0x2c0   :  { %1603 = vperm.xlu1 %5645, %v5469_v36   ;;  %1608 = vperm.xlu0 %5644, %v5470_v31   ;;  %v5483_v36 = vld [vmem:[%s12924_s2 + $0x198] sm:$0xff] }
 0x2c4   :  { %1613 = vperm.xlu1 %5645, %v5471_v29   ;;  %1648 = vrot.lane.b32.xlu0 %v7747_v62, %s5696_s11  ;;  %v5486_v29 = vld [vmem:[%s12924_s2 + $0x1b0] sm:$0xff] }
 0x2c8   :  { %1650 = vrot.lane.b32.xlu1 %v7753_v56, %s5696_s11  ;;  %1652 = vrot.lane.b32.xlu0 %v7761_v47, %s5696_s11 }
 0x2cc   :  { %1654 = vrot.lane.b32.xlu1 %v7769_v8, %s5696_s11  ;;  %1656 = vrot.lane.b32.xlu0 %v7751_v18, %s5696_s11 }
 0x2d0   :  { %1658 = vrot.lane.b32.xlu1 %v7759_v4, %s5696_s11  ;;  %1660 = vrot.lane.b32.xlu0 %v7767_v16, %s5696_s11 }
 0x2d4   :  { %1662 = vrot.lane.b32.xlu1 %v7777_v0, %s5696_s11  ;;  %1664 = vrot.lane.b32.xlu0 %v7775_v12, %s5696_s11 }
 0x2d8   :  { %1666 = vrot.lane.b32.xlu1 %v7783_v1, %s5696_s11  ;;  %1668 = vrot.lane.b32.xlu0 %v7785_v10, %s5696_s11 }
 0x2dc   :  { %1670 = vrot.lane.b32.xlu1 %v7793_v11, %s5696_s11  ;;  %1672 = vrot.lane.b32.xlu0 %v7791_v37, %s5696_s11 }
 0x2e0   :  { %1674 = vrot.lane.b32.xlu1 %v7799_v19, %s5696_s11  ;;  %1676 = vrot.lane.b32.xlu0 %v7801_v48, %s5696_s11 }
 0x2e4   :  { %1678 = vrot.lane.b32.xlu1 %v7810_v25, %s5696_s11  ;;  %1719 = vperm.xlu0 %5644, %v5472_v50  }
 0x2e8   :  { %1724 = vperm.xlu1 %5645, %v5473_v58   ;;  %1729 = vperm.xlu0 %5644, %v5474_v54   ;;  %v5487_v54 = vld [vmem:[%s12924_s2 + $0x1b8] sm:$0xff] }
 0x2ec   :  { %1734 = vperm.xlu1 %5645, %v5475_v49   ;;  %1769 = vrot.lane.b32.xlu0 %v7747_v62, %s5697_s21  ;;  %v5480_v49 = vld [vmem:[%s12924_s2 + $0x180] sm:$0xff] }
 0x2f0   :  { %1771 = vrot.lane.b32.xlu1 %v7753_v56, %s5697_s21  ;;  %1773 = vrot.lane.b32.xlu0 %v7761_v47, %s5697_s21 }
 0x2f4   :  { %1775 = vrot.lane.b32.xlu1 %v7769_v8, %s5697_s21  ;;  %1777 = vrot.lane.b32.xlu0 %v7751_v18, %s5697_s21 }
 0x2f8   :  { %1779 = vrot.lane.b32.xlu1 %v7759_v4, %s5697_s21  ;;  %1781 = vrot.lane.b32.xlu0 %v7767_v16, %s5697_s21 }
 0x2fc   :  { %1783 = vrot.lane.b32.xlu1 %v7777_v0, %s5697_s21  ;;  %1785 = vrot.lane.b32.xlu0 %v7775_v12, %s5697_s21 }
 0x300   :  { %1787 = vrot.lane.b32.xlu1 %v7783_v1, %s5697_s21  ;;  %1789 = vrot.lane.b32.xlu0 %v7785_v10, %s5697_s21 }
 0x304   :  { %1791 = vrot.lane.b32.xlu1 %v7793_v11, %s5697_s21  ;;  %1793 = vrot.lane.b32.xlu0 %v7791_v37, %s5697_s21 }
 0x308   :  { %1795 = vrot.lane.b32.xlu1 %v7799_v19, %s5697_s21  ;;  %1797 = vrot.lane.b32.xlu0 %v7801_v48, %s5697_s21 }
 0x30c   :  { %1799 = vrot.lane.b32.xlu1 %v7810_v25, %s5697_s21  ;;  %1840 = vperm.xlu0 %5644, %v5476_v35  }
 0x30e   :  { %v7916_v14 = vpop.permute.xlu0 %1527 }
 0x310   :  { %1845 = vperm.xlu1 %5645, %v5477_v17   ;;  %1850 = vperm.xlu0 %5644, %v5478_v42   ;;  %v5481_v42 = vld [vmem:[%s12924_s2 + $0x188] sm:$0xff] }
 0x312   :  { %v7921_v39 = vpop.permute.xlu1 %1529  ;;  %v7923_v43 = vpop.permute.xlu0 %1535 }
 0x314   :  { %1855 = vperm.xlu1 %5645, %v5479_v59   ;;  %1890 = vrot.lane.b32.xlu0 %v7747_v62, %s5698_s30  ;;  %v5490_v59 = vld [vmem:[%s12924_s2 + $0x1d0] sm:$0xff] }
 0x316   :  { %v7927_v51 = vpop.permute.xlu1 %1537  ;;  %v7929_v26 = vpop.permute.xlu0 %1531 }
 0x318   :  { %1892 = vrot.lane.b32.xlu1 %v7753_v56, %s5698_s30  ;;  %1894 = vrot.lane.b32.xlu0 %v7761_v47, %s5698_s30 }
 0x31a   :  { %v7935_v5 = vpop.permute.xlu1 %1533  ;;  %v7937_v7 = vpop.permute.xlu0 %1539 }
 0x31c   :  { %1896 = vrot.lane.b32.xlu1 %v7769_v8, %s5698_s30  ;;  %1898 = vrot.lane.b32.xlu0 %v7751_v18, %s5698_s30 }
 0x31e   :  { %v7943_v60 = vpop.permute.xlu1 %1541  ;;  %v7949_v2 = vpop.permute.xlu0 %1543 }
 0x320   :  { %1900 = vrot.lane.b32.xlu1 %v7759_v4, %s5698_s30  ;;  %1902 = vrot.lane.b32.xlu0 %v7767_v16, %s5698_s30 }
 0x322   :  { %v7955_v46 = vpop.permute.xlu1 %1545  ;;  %v7957_v57 = vpop.permute.xlu0 %1547 }
 0x324   :  { %1904 = vrot.lane.b32.xlu1 %v7777_v0, %s5698_s30  ;;  %1906 = vrot.lane.b32.xlu0 %v7775_v12, %s5698_s30 }
 0x326   :  { %v7963_v6 = vpop.permute.xlu1 %1549  ;;  %v7967_v40 = vpop.permute.xlu0 %1551 }
 0x328   :  { %1908 = vrot.lane.b32.xlu1 %v7783_v1, %s5698_s30  ;;  %1910 = vrot.lane.b32.xlu0 %v7785_v10, %s5698_s30 }
 0x32a   :  { %v7973_v44 = vpop.permute.xlu1 %1553  ;;  %v7983_v31 = vpop.permute.xlu0 %1555 }
 0x32c   :  { %1912 = vrot.lane.b32.xlu1 %v7793_v11, %s5698_s30  ;;  %1914 = vrot.lane.b32.xlu0 %v7791_v37, %s5698_s30 }
 0x32e   :  { %v7988_v50 = vpop.permute.xlu1 %1557 }
 0x330   :  { %1916 = vrot.lane.b32.xlu1 %v7799_v19, %s5698_s30  ;;  %1918 = vrot.lane.b32.xlu0 %v7801_v48, %s5698_s30 }
 0x334   :  { %1971 = vperm.xlu1 %5645, %v5482_v41   ;;  %1976 = vperm.xlu0 %5644, %v5483_v36  }
 0x337   :  { %v7990_v58 = vpop.permute.xlu0 %1598 }
 0x338   :  { %1920 = vrot.lane.b32.xlu1 %v7810_v25, %s5698_s30  ;;  %2044 = vperm.xlu0 %5644, %v5486_v29   ;;  %v5491_v29 = vld [vmem:[%s12924_s2 + $0x1d8] sm:$0xff] }
 0x33b   :  { %v8000_v35 = vpop.permute.xlu1 %1603  ;;  %v8002_v17 = vpop.permute.xlu0 %1608 }
 0x33c   :  { %2049 = vperm.xlu1 %5645, %v5487_v54   ;;  %1961 = vperm.xlu0 %5644, %v5480_v49   ;;  %v5484_v54 = vld [vmem:[%s12924_s2 + $0x1a0] sm:$0xff] }
 0x33f   :  { %v8010_v41 = vpop.permute.xlu1 %1613  ;;  %v8012_v36 = vpop.permute.xlu0 %1648 }
 0x340   :  { %1966 = vperm.xlu1 %5645, %v5481_v42   ;;  %2165 = vperm.xlu0 %5644, %v5490_v59  }
 0x343   :  { %v8020_v49 = vpop.permute.xlu1 %1650  ;;  %v8022_v3 = vpop.permute.xlu0 %1652 }
 0x344   :  { %2170 = vperm.xlu1 %5645, %v5491_v29   ;;  %2034 = vperm.xlu0 %5644, %v5484_v54  }
 0x347   :  { %v8027_v42 = vpop.permute.xlu1 %1654  ;;  %v8029_v59 = vpop.permute.xlu0 %1656 }
 0x348   :  { %2039 = vperm.xlu1 %5645, %v5485_v38   ;;  %2088 = vrot.lane.b32.xlu0 %v7761_v47, %s5699_s28 }
 0x34b   :  { %v8033_v21 = vpop.permute.xlu1 %1658  ;;  %v8035_v53 = vpop.permute.xlu0 %1660 }
 0x34c   :  { %2090 = vrot.lane.b32.xlu1 %v7769_v8, %s5699_s28  ;;  %2096 = vrot.lane.b32.xlu0 %v7767_v16, %s5699_s28 }
 0x34f   :  { %v8041_v29 = vpop.permute.xlu1 %1662  ;;  %v8043_v54 = vpop.permute.xlu0 %1664 }
 0x350   :  { %2098 = vrot.lane.b32.xlu1 %v7777_v0, %s5699_s28  ;;  %2104 = vrot.lane.b32.xlu0 %v7785_v10, %s5699_s28 }
 0x353   :  { %v8049_v38 = vpop.permute.xlu1 %1666  ;;  %v8051_v22 = vpop.permute.xlu0 %1668 }
 0x354   :  { %2106 = vrot.lane.b32.xlu1 %v7793_v11, %s5699_s28  ;;  %2112 = vrot.lane.b32.xlu0 %v7801_v48, %s5699_s28 }
 0x357   :  { %v8060_v13 = vpop.permute.xlu1 %1670  ;;  %v8062_v61 = vpop.permute.xlu0 %1672 }
 0x358   :  { %2114 = vrot.lane.b32.xlu1 %v7810_v25, %s5699_s28  ;;  %2286 = vperm.xlu0 %5644, %v5494_v9  }
 0x35b   :  { %v8072_v45 = vpop.permute.xlu1 %1674  ;;  %v8074_v30 = vpop.permute.xlu0 %1676 }
 0x35c   :  { %13763 = vst [vmem:[#allocation57_spill] sm:$0xff] %v8072_v45  ;;  %13764 = vst [vmem:[#allocation58_spill] sm:$0xff] %v8074_v30  ;;  %2291 = vperm.xlu1 %5645, %v5495_v63   ;;  %2155 = vperm.xlu0 %5644, %v5488_v23   ;;  %v13830_v30 = vld [vmem:[#allocation102_spill] sm:$0xff] }
 0x35d   :  { %v8339_v45 = vmul.f32 %v7775_v12, %v13830_v30 }
 0x35f   :  { %v8079_v24 = vpop.permute.xlu1 %1678  ;;  %v8081_v9 = vpop.permute.xlu0 %1719  ;;  %13831 = vst [vmem:[#allocation28_spill] sm:$0xff] %v8339_v45 }
 0x360   :  { %13765 = vst [vmem:[#allocation60_spill] sm:$0xff] %v8079_v24  ;;  %13766 = vst [vmem:[#allocation61_spill] sm:$0xff] %v8081_v9  ;;  %2160 = vperm.xlu1 %5645, %v5489_v15   ;;  %2209 = vrot.lane.b32.xlu0 %v7761_v47, %s5700_s18  ;;  %v13828_v24 = vld [vmem:[#allocation101_spill] sm:$0xff] }
 0x361   :  { %v8359_v45 = vmul.f32 %v7767_v16, %v13828_v24 }
 0x363   :  { %v8085_v33 = vpop.permute.xlu1 %1724  ;;  %v8087_v27 = vpop.permute.xlu0 %1729 }
 0x364   :  { %13767 = vst [vmem:[#allocation62_spill] sm:$0xff] %v8085_v33  ;;  %13768 = vst [vmem:[#allocation63_spill] sm:$0xff] %v8087_v27  ;;  %2211 = vrot.lane.b32.xlu1 %v7769_v8, %s5700_s18  ;;  %2217 = vrot.lane.b32.xlu0 %v7767_v16, %s5700_s18 }
 0x367   :  { %v8093_v23 = vpop.permute.xlu1 %1734  ;;  %v8095_v63 = vpop.permute.xlu0 %1769 }
 0x368   :  { %13769 = vst [vmem:[#allocation64_spill] sm:$0xff] %v8093_v23  ;;  %13770 = vst [vmem:[#allocation65_spill] sm:$0xff] %v8095_v63  ;;  %2219 = vrot.lane.b32.xlu1 %v7777_v0, %s5700_s18  ;;  %2225 = vrot.lane.b32.xlu0 %v7785_v10, %s5700_s18  ;;  %v5498_v63 = vld [vmem:[%s12924_s2 + $0x210] sm:$0xff] }
 0x36b   :  { %v8101_v15 = vpop.permute.xlu1 %1771  ;;  %v8103_v32 = vpop.permute.xlu0 %1773 }
 0x36c   :  { %13771 = vst [vmem:[#allocation66_spill] sm:$0xff] %v8101_v15  ;;  %13772 = vst [vmem:[#allocation67_spill] sm:$0xff] %v8103_v32  ;;  %2227 = vrot.lane.b32.xlu1 %v7793_v11, %s5700_s18  ;;  %2233 = vrot.lane.b32.xlu0 %v7801_v48, %s5700_s18  ;;  %v5499_v32 = vld [vmem:[%s12924_s2 + $0x218] sm:$0xff] }
 0x36f   :  { %v8112_v23 = vpop.permute.xlu1 %1775  ;;  %v8114_v27 = vpop.permute.xlu0 %1777 }
 0x370   :  { %13773 = vst [vmem:[#allocation68_spill] sm:$0xff] %v8112_v23  ;;  %13774 = vst [vmem:[#allocation109_spill] sm:$0xff] %v8114_v27  ;;  %2235 = vrot.lane.b32.xlu1 %v7810_v25, %s5700_s18  ;;  %2407 = vperm.xlu0 %5644, %v5498_v63  }
 0x373   :  { %v8121_v15 = vpop.permute.xlu1 %1779  ;;  %v8123_v33 = vpop.permute.xlu0 %1781 }
 0x374   :  { %13775 = vst [vmem:[#allocation111_spill] sm:$0xff] %v8121_v15  ;;  %13776 = vst [vmem:[#allocation69_spill] sm:$0xff] %v8123_v33  ;;  %2412 = vperm.xlu1 %5645, %v5499_v32   ;;  %2084 = vrot.lane.b32.xlu0 %v7747_v62, %s5699_s28 }
 0x377   :  { %v8127_v9 = vpop.permute.xlu1 %1783  ;;  %v8129_v23 = vpop.permute.xlu0 %1785 }
 0x378   :  { %13777 = vst [vmem:[#allocation7_spill] sm:$0xff] %v8127_v9  ;;  %13778 = vst [vmem:[#allocation110_spill] sm:$0xff] %v8129_v23  ;;  %2086 = vrot.lane.b32.xlu1 %v7753_v56, %s5699_s28  ;;  %2092 = vrot.lane.b32.xlu0 %v7751_v18, %s5699_s28 }
 0x37b   :  { %v8135_v63 = vpop.permute.xlu1 %1787  ;;  %v8137_v27 = vpop.permute.xlu0 %1789 }
 0x37c   :  { %13779 = vst [vmem:[#allocation11_spill] sm:$0xff] %v8135_v63  ;;  %13780 = vst [vmem:[#allocation70_spill] sm:$0xff] %v8137_v27  ;;  %2094 = vrot.lane.b32.xlu1 %v7759_v4, %s5699_s28  ;;  %2100 = vrot.lane.b32.xlu0 %v7775_v12, %s5699_s28  ;;  %v5492_v27 = vld [vmem:[%s12924_s2 + $0x1e0] sm:$0xff] }
 0x37f   :  { %v8143_v32 = vpop.permute.xlu1 %1791  ;;  %v8145_v9 = vpop.permute.xlu0 %1793 }
 0x380   :  { %13781 = vst [vmem:[#allocation9_spill] sm:$0xff] %v8143_v32  ;;  %13782 = vst [vmem:[#allocation112_spill] sm:$0xff] %v8145_v9  ;;  %2102 = vrot.lane.b32.xlu1 %v7783_v1, %s5699_s28  ;;  %2108 = vrot.lane.b32.xlu0 %v7791_v37, %s5699_s28  ;;  %v5493_v32 = vld [vmem:[%s12924_s2 + $0x1e8] sm:$0xff] }
 0x383   :  { %v8154_v63 = vpop.permute.xlu1 %1795  ;;  %v8156_v23 = vpop.permute.xlu0 %1797 }
 0x384   :  { %13783 = vst [vmem:[#allocation12_spill] sm:$0xff] %v8154_v63  ;;  %13784 = vst [vmem:[#allocation13_spill] sm:$0xff] %v8156_v23  ;;  %2110 = vrot.lane.b32.xlu1 %v7799_v19, %s5699_s28  ;;  %2276 = vperm.xlu0 %5644, %v5492_v27  }
 0x387   :  { %v8163_v9 = vpop.permute.xlu1 %1799  ;;  %v8165_v33 = vpop.permute.xlu0 %1840 }
 0x388   :  { %13785 = vst [vmem:[#allocation5_spill] sm:$0xff] %v8163_v9  ;;  %13786 = vst [vmem:[#allocation97_spill] sm:$0xff] %v8165_v33  ;;  %2281 = vperm.xlu1 %5645, %v5493_v32   ;;  %2330 = vrot.lane.b32.xlu0 %v7761_v47, %s5701_s29 }
 0x38b   :  { %v8169_v15 = vpop.permute.xlu1 %1845  ;;  %v8171_v63 = vpop.permute.xlu0 %1850 }
 0x38c   :  { %13787 = vst [vmem:[#allocation78_spill] sm:$0xff] %v8169_v15  ;;  %13788 = vst [vmem:[#allocation73_spill] sm:$0xff] %v8171_v63  ;;  %2332 = vrot.lane.b32.xlu1 %v7769_v8, %s5701_s29  ;;  %2338 = vrot.lane.b32.xlu0 %v7767_v16, %s5701_s29 }
 0x38f   :  { %v8177_v27 = vpop.permute.xlu1 %1855  ;;  %v8179_v23 = vpop.permute.xlu0 %1890 }
 0x390   :  { %13789 = vst [vmem:[#allocation75_spill] sm:$0xff] %v8177_v27  ;;  %13790 = vst [vmem:[#allocation71_spill] sm:$0xff] %v8179_v23  ;;  %2340 = vrot.lane.b32.xlu1 %v7777_v0, %s5701_s29  ;;  %2346 = vrot.lane.b32.xlu0 %v7785_v10, %s5701_s29  ;;  %v5502_v23 = vld [vmem:[%s12924_s2 + $0x230] sm:$0xff] }
 0x393   :  { %v8185_v32 = vpop.permute.xlu1 %1892  ;;  %v8187_v15 = vpop.permute.xlu0 %1894 }
 0x394   :  { %13791 = vst [vmem:[#allocation105_spill] sm:$0xff] %v8185_v32  ;;  %13792 = vst [vmem:[#allocation83_spill] sm:$0xff] %v8187_v15  ;;  %2348 = vrot.lane.b32.xlu1 %v7793_v11, %s5701_s29  ;;  %2354 = vrot.lane.b32.xlu0 %v7801_v48, %s5701_s29  ;;  %v5503_v32 = vld [vmem:[%s12924_s2 + $0x238] sm:$0xff] }
 0x397   :  { %v8196_v27 = vpop.permute.xlu1 %1896  ;;  %v8198_v63 = vpop.permute.xlu0 %1898 }
 0x398   :  { %13793 = vst [vmem:[#allocation74_spill] sm:$0xff] %v8196_v27  ;;  %13794 = vst [vmem:[#allocation98_spill] sm:$0xff] %v8198_v63  ;;  %2356 = vrot.lane.b32.xlu1 %v7810_v25, %s5701_s29  ;;  %2528 = vperm.xlu0 %5644, %v5502_v23  }
 0x39b   :  { %v8205_v15 = vpop.permute.xlu1 %1900  ;;  %v8207_v33 = vpop.permute.xlu0 %1902 }
 0x39c   :  { %13795 = vst [vmem:[#allocation92_spill] sm:$0xff] %v8205_v15  ;;  %13796 = vst [vmem:[#allocation106_spill] sm:$0xff] %v8207_v33  ;;  %2533 = vperm.xlu1 %5645, %v5503_v32   ;;  %2205 = vrot.lane.b32.xlu0 %v7747_v62, %s5700_s18 }
 0x39f   :  { %v8211_v9 = vpop.permute.xlu1 %1904  ;;  %v8213_v27 = vpop.permute.xlu0 %1906 }
 0x3a0   :  { %13797 = vst [vmem:[#allocation76_spill] sm:$0xff] %v8211_v9  ;;  %13798 = vst [vmem:[#allocation72_spill] sm:$0xff] %v8213_v27  ;;  %2207 = vrot.lane.b32.xlu1 %v7753_v56, %s5700_s18  ;;  %2213 = vrot.lane.b32.xlu0 %v7751_v18, %s5700_s18 }
 0x3a3   :  { %v8219_v23 = vpop.permute.xlu1 %1908  ;;  %v8221_v63 = vpop.permute.xlu0 %1910 }
 0x3a4   :  { %13799 = vst [vmem:[#allocation113_spill] sm:$0xff] %v8219_v23  ;;  %13800 = vst [vmem:[#allocation94_spill] sm:$0xff] %v8221_v63  ;;  %2215 = vrot.lane.b32.xlu1 %v7759_v4, %s5700_s18  ;;  %2221 = vrot.lane.b32.xlu0 %v7775_v12, %s5700_s18  ;;  %v5496_v23 = vld [vmem:[%s12924_s2 + $0x200] sm:$0xff] }
 0x3a7   :  { %v8227_v32 = vpop.permute.xlu1 %1912  ;;  %v8229_v9 = vpop.permute.xlu0 %1914 }
 0x3a8   :  { %13801 = vst [vmem:[#allocation14_spill] sm:$0xff] %v8227_v32  ;;  %13802 = vst [vmem:[#allocation100_spill] sm:$0xff] %v8229_v9  ;;  %2223 = vrot.lane.b32.xlu1 %v7783_v1, %s5700_s18  ;;  %2229 = vrot.lane.b32.xlu0 %v7791_v37, %s5700_s18  ;;  %v5497_v9 = vld [vmem:[%s12924_s2 + $0x208] sm:$0xff] }
 0x3ab   :  { %v8238_v27 = vpop.permute.xlu1 %1916  ;;  %v8240_v63 = vpop.permute.xlu0 %1918 }
 0x3ac   :  { %13803 = vst [vmem:[#allocation18_spill] sm:$0xff] %v8238_v27  ;;  %13804 = vst [vmem:[#allocation19_spill] sm:$0xff] %v8240_v63  ;;  %2231 = vrot.lane.b32.xlu1 %v7799_v19, %s5700_s18  ;;  %2397 = vperm.xlu0 %5644, %v5496_v23  }
 0x3af   :  { %v8247_v32 = vpop.permute.xlu1 %1971  ;;  %v8249_v33 = vpop.permute.xlu0 %1976 }
 0x3b0   :  { %13805 = vst [vmem:[#allocation26_spill] sm:$0xff] %v8247_v32  ;;  %13806 = vst [vmem:[#allocation27_spill] sm:$0xff] %v8249_v33  ;;  %2402 = vperm.xlu1 %5645, %v5497_v9   ;;  %2451 = vrot.lane.b32.xlu0 %v7761_v47, %s5702_s25 }
 0x3b3   :  { %v8253_v15 = vpop.permute.xlu1 %1920  ;;  %v8255_v27 = vpop.permute.xlu0 %2044 }
 0x3b4   :  { %13807 = vst [vmem:[#allocation104_spill] sm:$0xff] %v8253_v15  ;;  %13808 = vst [vmem:[#allocation59_spill] sm:$0xff] %v8255_v27  ;;  %2453 = vrot.lane.b32.xlu1 %v7769_v8, %s5702_s25  ;;  %2459 = vrot.lane.b32.xlu0 %v7767_v16, %s5702_s25  ;;  %v13825_v15 = vld [vmem:[#allocation99_spill] sm:$0xff]  ;;  %v8381_v16 = vmul.f32 %v7785_v10, %v13830_v30 }
 0x3b7   :  { %v8261_v23 = vpop.permute.xlu1 %2049  ;;  %v8263_v63 = vpop.permute.xlu0 %1961 }
 0x3b8   :  { %13809 = vst [vmem:[#allocation55_spill] sm:$0xff] %v8261_v23  ;;  %13810 = vst [vmem:[#allocation107_spill] sm:$0xff] %v8263_v63  ;;  %2461 = vrot.lane.b32.xlu1 %v7777_v0, %s5702_s25  ;;  %2467 = vrot.lane.b32.xlu0 %v7785_v10, %s5702_s25  ;;  %v8401_v10 = vmul.f32 %v7769_v8, %v13825_v15  ;;  %v8419_v8 = vmul.f32 %v7793_v11, %v13830_v30 }
 0x3ba   :  { %13839 = vst [vmem:[#allocation34_spill] sm:$0xff] %v8401_v10 }
 0x3bb   :  { %v8269_v9 = vpop.permute.xlu1 %1966  ;;  %v8271_v33 = vpop.permute.xlu0 %2165 }
 0x3bc   :  { %13811 = vst [vmem:[#allocation56_spill] sm:$0xff] %v8269_v9  ;;  %13812 = vst [vmem:[#allocation40_spill] sm:$0xff] %v8271_v33  ;;  %2469 = vrot.lane.b32.xlu1 %v7793_v11, %s5702_s25  ;;  %2475 = vrot.lane.b32.xlu0 %v7801_v48, %s5702_s25 }
 0x3bf   :  { %v8277_v27 = vpop.permute.xlu1 %2170  ;;  %v8279_v23 = vpop.permute.xlu0 %2034 }
 0x3c0   :  { %13813 = vst [vmem:[#allocation43_spill] sm:$0xff] %v8277_v27  ;;  %13814 = vst [vmem:[#allocation41_spill] sm:$0xff] %v8279_v23  ;;  %2477 = vrot.lane.b32.xlu1 %v7810_v25, %s5702_s25  ;;  %2326 = vrot.lane.b32.xlu0 %v7747_v62, %s5701_s29 }
 0x3c3   :  { %v8285_v63 = vpop.permute.xlu1 %2039  ;;  %v8287_v9 = vpop.permute.xlu0 %2088 }
 0x3c4   :  { %13815 = vst [vmem:[#allocation44_spill] sm:$0xff] %v8285_v63  ;;  %13816 = vst [vmem:[#allocation108_spill] sm:$0xff] %v8287_v9  ;;  %2328 = vrot.lane.b32.xlu1 %v7753_v56, %s5701_s29  ;;  %2334 = vrot.lane.b32.xlu0 %v7751_v18, %s5701_s29 }
 0x3c7   :  { %v8293_v33 = vpop.permute.xlu1 %2090  ;;  %v8295_v27 = vpop.permute.xlu0 %2096 }
 0x3c8   :  { %13817 = vst [vmem:[#allocation42_spill] sm:$0xff] %v8293_v33  ;;  %13818 = vst [vmem:[#allocation46_spill] sm:$0xff] %v8295_v27  ;;  %2336 = vrot.lane.b32.xlu1 %v7759_v4, %s5701_s29  ;;  %2342 = vrot.lane.b32.xlu0 %v7775_v12, %s5701_s29  ;;  %v5500_v33 = vld [vmem:[%s12924_s2 + $0x220] sm:$0xff] }
 0x3cb   :  { %v8301_v23 = vpop.permute.xlu1 %2098  ;;  %v8303_v63 = vpop.permute.xlu0 %2104 }
 0x3cc   :  { %13819 = vst [vmem:[#allocation45_spill] sm:$0xff] %v8301_v23  ;;  %13820 = vst [vmem:[#allocation51_spill] sm:$0xff] %v8303_v63  ;;  %2344 = vrot.lane.b32.xlu1 %v7783_v1, %s5701_s29  ;;  %2350 = vrot.lane.b32.xlu0 %v7791_v37, %s5701_s29  ;;  %v5501_v63 = vld [vmem:[%s12924_s2 + $0x228] sm:$0xff] }
 0x3cf   :  { %v8312_v9 = vpop.permute.xlu1 %2106  ;;  %v8314_v27 = vpop.permute.xlu0 %2112 }
 0x3d0   :  { %13821 = vst [vmem:[#allocation20_spill] sm:$0xff] %v8312_v9  ;;  %13822 = vst [vmem:[#allocation16_spill] sm:$0xff] %v8314_v27  ;;  %2352 = vrot.lane.b32.xlu1 %v7799_v19, %s5701_s29  ;;  %2518 = vperm.xlu0 %5644, %v5500_v33   ;;  %v8329_v9 = vmul.f32 %v7747_v62, %v13825_v15  ;;  %v8335_v33 = vmul.f32 %v7751_v18, %v13828_v24 }
 0x3d2   :  { %13826 = vst [vmem:[#allocation23_spill] sm:$0xff] %v8329_v9  ;;  %13829 = vst [vmem:[#allocation24_spill] sm:$0xff] %v8335_v33  ;;  %v1564_v9 = vsel %vm105_vm0, %v7927_v51, %v7955_v46 }
 0x3d3   :  { %v8321_v23 = vpop.permute.xlu1 %2114  ;;  %v8323_v32 = vpop.permute.xlu0 %2286 }
 0x3d4   :  { %13823 = vst [vmem:[#allocation21_spill] sm:$0xff] %v8321_v23  ;;  %13824 = vst [vmem:[#allocation8_spill] sm:$0xff] %v8323_v32  ;;  %2523 = vperm.xlu1 %5645, %v5501_v63   ;;  %2447 = vrot.lane.b32.xlu0 %v7747_v62, %s5702_s25  ;;  %v13832_v23 = vld [vmem:[#allocation103_spill] sm:$0xff]  ;;  %v8347_v32 = vmul.f32 %v7753_v56, %v13825_v15 }
 0x3d5   :  { %v8343_v63 = vmul.f32 %v7791_v37, %v13832_v23 }
 0x3d6   :  { %13834 = vst [vmem:[#allocation48_spill] sm:$0xff] %v8347_v32  ;;  %v8367_v32 = vmul.f32 %v7783_v1, %v13830_v30  ;;  %v13852_v30 = vld [vmem:[#allocation58_spill] sm:$0xff] }
 0x3d7   :  { %v8331_v27 = vpop.permute.xlu1 %2291  ;;  %13833 = vst [vmem:[#allocation52_spill] sm:$0xff] %v8343_v63  ;;  %v8349_v62 = vpop.permute.xlu0 %2155  ;;  %v8363_v63 = vmul.f32 %v7759_v4, %v13828_v24 }
 0x3d8   :  { %13827 = vst [vmem:[#allocation47_spill] sm:$0xff] %v8331_v27  ;;  %13835 = vst [vmem:[#allocation33_spill] sm:$0xff] %v8349_v62  ;;  %2449 = vrot.lane.b32.xlu1 %v7753_v56, %s5702_s25  ;;  %v8355_v27 = vmul.f32 %v7761_v47, %v13825_v15  ;;  %2455 = vrot.lane.b32.xlu0 %v7751_v18, %s5702_s25  ;;  %v1567_v56 = vsel %vm105_vm0, %v7916_v14, %v7923_v43 }
 0x3d9   :  { %13836 = vst [vmem:[#allocation29_spill] sm:$0xff] %v8363_v63  ;;  %13837 = vst [vmem:[#allocation38_spill] sm:$0xff] %v8367_v32  ;;  %v1568_v47 = vsel %vm105_vm0, %v7921_v39, %v7927_v51  ;;  %v8385_v62 = vmul.f32 %v7799_v19, %v13832_v23  ;;  %v1569_v18 = vsel %vm105_vm0, %v7929_v26, %v7937_v7 }
 0x3da   :  { %v1570_v32 = vsel %vm105_vm0, %v7935_v5, %v7943_v60  ;;  %v8397_v63 = vmul.f32 %v7801_v48, %v13832_v23  ;;  %v8415_v48 = vmul.f32 %v7777_v0, %v13828_v24  ;;  %v1571_v51 = vsel %vm105_vm0, %v7967_v40, %v7916_v14 }
 0x3db   :  { %13838 = vst [vmem:[#allocation39_spill] sm:$0xff] %v8385_v62  ;;  %v8403_v33 = vpop.permute.xlu1 %2160  ;;  %v1563_v62 = vsel %vm105_vm0, %v7923_v43, %v7949_v2  ;;  %v8421_v15 = vpop.permute.xlu0 %2209  ;;  %v8433_v0 = vmul.f32 %v7810_v25, %v13832_v23  ;;  %v1566_v14 = vsel %vm105_vm0, %v7943_v60, %v7963_v6  ;;  %v1560_v60 = vsel %vm105_vm0, %v7955_v46, %v7973_v44 }
 0x3dc   :  { %13840 = vst [vmem:[#allocation114_spill] sm:$0xff] %v8403_v33  ;;  %2457 = vrot.lane.b32.xlu1 %v7759_v4, %s5702_s25  ;;  %v13841_v33 = vld [vmem:[#allocation77_spill] sm:$0xff]  ;;  %2463 = vrot.lane.b32.xlu0 %v7775_v12, %s5702_s25  ;;  %v1559_v12 = vsel %vm105_vm0, %v7949_v2, %v7967_v40  ;;  %v1573_v2 = vsel %vm105_vm0, %v7983_v31, %v7929_v26 }
 0x3dd   :  { %v1581_v43 = vmul.f32 %v1567_v56, %v13841_v33  ;;  %v1585_v10 = vmul.f32 %v1568_v47, %v13841_v33  ;;  %v1589_v11 = vmul.f32 %v1569_v18, %v13841_v33  ;;  %v1593_v4 = vmul.f32 %v1570_v32, %v13841_v33  ;;  %v13842_v47 = vld [vmem:[#allocation79_spill] sm:$0xff]  ;;  %v13843_v18 = vld [vmem:[#allocation80_spill] sm:$0xff]  ;;  %v13844_v26 = vld [vmem:[#allocation81_spill] sm:$0xff] }
 0x3de   :  { %v1565_v56 = vsel %vm105_vm0, %v7937_v7, %v7957_v57  ;;  %v1582_v25 = vmul.f32 %v1563_v62, %v13842_v47  ;;  %v1586_v23 = vmul.f32 %v1564_v9, %v13842_v47  ;;  %v1572_v32 = vsel %vm105_vm0, %v7973_v44, %v7921_v39 }
 0x3df   :  { %v8457_v7 = vpop.permute.xlu1 %2211  ;;  %v1580_v33 = vmul.f32 %v1571_v51, %v13843_v18  ;;  %v1561_v9 = vsel %vm105_vm0, %v7957_v57, %v7983_v31  ;;  %v8472_v39 = vpop.permute.xlu0 %2217  ;;  %v1590_v40 = vmul.f32 %v1565_v56, %v13842_v47  ;;  %v1594_v62 = vmul.f32 %v1566_v14, %v13842_v47 }
 0x3e0   :  { %2465 = vrot.lane.b32.xlu1 %v7783_v1, %s5702_s25  ;;  %v1562_v46 = vsel %vm105_vm0, %v7963_v6, %v7988_v50  ;;  %v1574_v57 = vsel %vm105_vm0, %v7988_v50, %v7935_v5  ;;  %2471 = vrot.lane.b32.xlu0 %v7791_v37, %s5702_s25  ;;  %v1583_v44 = vmul.f32 %v1559_v12, %v13844_v26  ;;  %v5508_v6 = vld [vmem:[%s12927_s5 + $0x20] sm:$0xff] }
 0x3e1   :  { %v1584_v1 = vmul.f32 %v1572_v32, %v13843_v18  ;;  %v1616_v31 = vmul.f32 %v7990_v58, %v1580_v33  ;;  %v1617_v51 = vmul.f32 %v7990_v58, %v1581_v43  ;;  %v1587_v56 = vmul.f32 %v1560_v60, %v13844_v26 }
 0x3e2   :  { %v1588_v14 = vmul.f32 %v1573_v2, %v13843_v18  ;;  %v1591_v5 = vmul.f32 %v1561_v9, %v13844_v26  ;;  %v1618_v37 = vmul.f32 %v7990_v58, %v1582_v25  ;;  %v1592_v12 = vmul.f32 %v1574_v57, %v13843_v18 }
 0x3e3   :  { %v8499_v50 = vpop.permute.xlu1 %2219  ;;  %v1595_v33 = vmul.f32 %v1562_v46, %v13844_v26  ;;  %v1619_v43 = vmul.f32 %v7990_v58, %v1583_v44  ;;  %v1620_v32 = vmul.f32 %v8000_v35, %v1584_v1  ;;  %v8505_v47 = vpop.permute.xlu0 %2225  ;;  %v1621_v60 = vmul.f32 %v8000_v35, %v1585_v10  ;;  %v5509_v58 = vld [vmem:[%s12927_s5 + $0x28] sm:$0xff] }
 0x3e4   :  { %2473 = vrot.lane.b32.xlu1 %v7799_v19, %s5702_s25  ;;  %v1622_v9 = vmul.f32 %v8000_v35, %v1586_v23  ;;  %v1623_v25 = vmul.f32 %v8000_v35, %v1587_v56  ;;  %v1624_v2 = vmul.f32 %v8002_v17, %v1588_v14  ;;  %2588 = vperm.xlu0 %5644, %v5508_v6   ;;  %v5510_v35 = vld [vmem:[%s12927_s5 + $0x30] sm:$0xff] }
 0x3e5   :  { %v8517_v46 = vadd.f32 %v1616_v31, %v7889_v28  ;;  %v8520_v57 = vadd.f32 %v1617_v51, %v7889_v28  ;;  %v1625_v19 = vmul.f32 %v8002_v17, %v1589_v11  ;;  %v1626_v10 = vmul.f32 %v8002_v17, %v1590_v40 }
 0x3e6   :  { %v8528_v23 = vadd.f32 %v1618_v37, %v7889_v28  ;;  %v1627_v44 = vmul.f32 %v8002_v17, %v1591_v5  ;;  %v1628_v1 = vmul.f32 %v8010_v41, %v1592_v12  ;;  %v1629_v31 = vmul.f32 %v8010_v41, %v1593_v4 }
 0x3e7   :  { %v8533_v6 = vpop.permute.xlu1 %2227  ;;  %v8536_v51 = vadd.f32 %v1619_v43, %v7889_v28  ;;  %v8539_v11 = vadd.f32 %v1620_v32, %v7895_v34  ;;  %v1630_v40 = vmul.f32 %v8010_v41, %v1594_v62  ;;  %v1631_v56 = vmul.f32 %v8010_v41, %v1595_v33  ;;  %v8543_v14 = vpop.permute.xlu0 %2233  ;;  %v5511_v41 = vld [vmem:[%s12927_s5 + $0x38] sm:$0xff]  ;;  %v5518_v33 = vld [vmem:[%s12925_s3 + $0x40] sm:$0xff] }
 0x3e8   :  { %2593 = vperm.xlu1 %5645, %v5509_v58   ;;  %v8546_v17 = vadd.f32 %v1621_v60, %v7895_v34  ;;  %v8549_v4 = vadd.f32 %v1622_v9, %v7895_v34  ;;  %v8552_v5 = vadd.f32 %v1623_v25, %v7895_v34  ;;  %v8555_v28 = vadd.f32 %v1624_v2, %v7904_v20 }
 0x3e9   :  { %2598 = vperm.xlu0 %5644, %v5510_v35   ;;  %v8561_v62 = vadd.f32 %v1625_v19, %v7904_v20  ;;  %v8564_v37 = vadd.f32 %v1626_v10, %v7904_v20  ;;  %v1688_v34 = vsel %vm248_vm1, %v8012_v36, %v8029_v59  ;;  %v1689_v12 = vsel %vm248_vm1, %v8020_v49, %v8033_v21  ;;  %v13847_v35 = vld [vmem:[#allocation82_spill] sm:$0xff] }
 0x3ea   :  { %v8578_v43 = vadd.f32 %v1627_v44, %v7904_v20  ;;  %v8581_v32 = vadd.f32 %v1628_v1, %v7914_v52  ;;  %v8584_v60 = vadd.f32 %v1629_v31, %v7914_v52  ;;  %v1690_v9 = vsel %vm248_vm1, %v8022_v3, %v8035_v53 }
 0x3eb   :  { %v8590_v25 = vpop.permute.xlu1 %2235  ;;  %v8593_v2 = vadd.f32 %v1630_v40, %v7914_v52  ;;  %v8596_v58 = vadd.f32 %v1631_v56, %v7914_v52  ;;  %v1691_v20 = vsel %vm248_vm1, %v8027_v42, %v8041_v29  ;;  %v1684_v19 = vsel %vm248_vm1, %v8029_v59, %v8043_v54  ;;  %v8606_v10 = vpop.permute.xlu0 %2407  ;;  %v5519_v59 = vld [vmem:[%s12925_s3 + $0x48] sm:$0xff] }
 0x3ec   :  { %13845 = vst [vmem:[#allocation115_spill] sm:$0xff] %v8590_v25  ;;  %13846 = vst [vmem:[#allocation116_spill] sm:$0xff] %v8606_v10  ;;  %2603 = vperm.xlu1 %5645, %v5511_v41   ;;  %v1702_v44 = vmul.f32 %v1688_v34, %v13847_v35  ;;  %v1706_v1 = vmul.f32 %v1689_v12, %v13847_v35  ;;  %v1685_v52 = vsel %vm248_vm1, %v8033_v21, %v8049_v38  ;;  %v5520_v41 = vld [vmem:[%s12925_s3 + $0x50] sm:$0xff]  ;;  %v13848_v12 = vld [vmem:[#allocation84_spill] sm:$0xff] }
 0x3ed   :  { %v1692_v31 = vsel %vm248_vm1, %v8062_v61, %v8012_v36  ;;  %2751 = vperm.xlu0 %5644, %v5518_v33   ;;  %v1710_v40 = vmul.f32 %v1690_v9, %v13847_v35  ;;  %v1686_v56 = vsel %vm248_vm1, %v8035_v53, %v8051_v22  ;;  %v1687_v21 = vsel %vm248_vm1, %v8041_v29, %v8060_v13  ;;  %v13849_v9 = vld [vmem:[#allocation57_spill] sm:$0xff]  ;;  %v13858_v10 = vld [vmem:[#allocation62_spill] sm:$0xff] }
 0x3ee   :  { %v1680_v36 = vsel %vm248_vm1, %v8043_v54, %v8062_v61  ;;  %v1714_v34 = vmul.f32 %v1691_v20, %v13847_v35  ;;  %v1703_v33 = vmul.f32 %v1684_v19, %v13848_v12  ;;  %v1681_v53 = vsel %vm248_vm1, %v8049_v38, %v13849_v9  ;;  %v13851_v54 = vld [vmem:[#allocation85_spill] sm:$0xff] }
 0x3ef   :  { %v1693_v29 = vsel %vm248_vm1, %v13849_v9, %v8020_v49  ;;  %v8647_v26 = vpop.permute.xlu1 %2412  ;;  %v1707_v61 = vmul.f32 %v1685_v52, %v13848_v12  ;;  %v1701_v18 = vmul.f32 %v1692_v31, %v13851_v54  ;;  %v1682_v20 = vsel %vm248_vm1, %v8051_v22, %v13852_v30  ;;  %v8659_v19 = vpop.permute.xlu0 %2084  ;;  %v13854_v52 = vld [vmem:[#allocation86_spill] sm:$0xff]  ;;  %v13855_v31 = vld [vmem:[#allocation60_spill] sm:$0xff] }
 0x3f0   :  { %13850 = vst [vmem:[#allocation57_spill] sm:$0xff] %v8647_v26  ;;  %v1694_v38 = vsel %vm248_vm1, %v13852_v30, %v8022_v3  ;;  %13853 = vst [vmem:[#allocation58_spill] sm:$0xff] %v8659_v19  ;;  %2756 = vperm.xlu1 %5645, %v5519_v59   ;;  %v1711_v49 = vmul.f32 %v1686_v56, %v13848_v12  ;;  %v1715_v9 = vmul.f32 %v1687_v21, %v13848_v12  ;;  %v5521_v22 = vld [vmem:[%s12925_s3 + $0x58] sm:$0xff]  ;;  %v13856_v56 = vld [vmem:[#allocation61_spill] sm:$0xff] }
 0x3f1   :  { %v1704_v35 = vmul.f32 %v1680_v36, %v13854_v52  ;;  %v1695_v24 = vsel %vm248_vm1, %v13855_v31, %v8027_v42  ;;  %2761 = vperm.xlu0 %5644, %v5520_v41   ;;  %v1705_v30 = vmul.f32 %v1693_v29, %v13851_v54  ;;  %v1708_v3 = vmul.f32 %v1681_v53, %v13854_v52 }
 0x3f2   :  { %v1683_v59 = vsel %vm248_vm1, %v8060_v13, %v13855_v31  ;;  %v1737_v21 = vmul.f32 %v13856_v56, %v1701_v18  ;;  %v1709_v36 = vmul.f32 %v1694_v38, %v13851_v54  ;;  %v1712_v42 = vmul.f32 %v1682_v20, %v13854_v52 }
 0x3f3   :  { %v1738_v41 = vmul.f32 %v13856_v56, %v1702_v44  ;;  %v1739_v12 = vmul.f32 %v13856_v56, %v1703_v33  ;;  %v8682_v26 = vpop.permute.xlu1 %2086  ;;  %v1713_v29 = vmul.f32 %v1695_v24, %v13851_v54  ;;  %v1740_v53 = vmul.f32 %v13856_v56, %v1704_v35  ;;  %v8688_v31 = vpop.permute.xlu0 %2092  ;;  %v13860_v33 = vld [vmem:[#allocation63_spill] sm:$0xff]  ;;  %v13883_v54 = vld [vmem:[#allocation89_spill] sm:$0xff] }
 0x3f4   :  { %13857 = vst [vmem:[#allocation60_spill] sm:$0xff] %v8682_v26  ;;  %v1741_v19 = vmul.f32 %v13858_v10, %v1705_v30  ;;  %v1742_v13 = vmul.f32 %v13858_v10, %v1706_v1  ;;  %13859 = vst [vmem:[#allocation61_spill] sm:$0xff] %v8688_v31  ;;  %2766 = vperm.xlu1 %5645, %v5521_v22   ;;  %v1716_v18 = vmul.f32 %v1683_v59, %v13854_v52 }
 0x3f5   :  { %v1743_v20 = vmul.f32 %v13858_v10, %v1707_v61  ;;  %v1744_v44 = vmul.f32 %v13858_v10, %v1708_v3  ;;  %v1745_v38 = vmul.f32 %v13860_v33, %v1709_v36  ;;  %v8695_v26 = vadd.f32 %v1737_v21, %v8517_v46  ;;  %v13861_v61 = vld [vmem:[#allocation64_spill] sm:$0xff]  ;;  %v13866_v36 = vld [vmem:[#allocation111_spill] sm:$0xff] }
 0x3f6   :  { %v1746_v24 = vmul.f32 %v13860_v33, %v1710_v40  ;;  %v1747_v35 = vmul.f32 %v13860_v33, %v1711_v49  ;;  %v1748_v1 = vmul.f32 %v13860_v33, %v1712_v42  ;;  %v8701_v30 = vadd.f32 %v1738_v41, %v8520_v57  ;;  %v13868_v42 = vld [vmem:[#allocation69_spill] sm:$0xff]  ;;  %v13869_v41 = vld [vmem:[#allocation67_spill] sm:$0xff] }
 0x3f7   :  { %v8704_v22 = vadd.f32 %v1739_v12, %v8528_v23  ;;  %v1749_v59 = vmul.f32 %v13861_v61, %v1713_v29  ;;  %v1750_v10 = vmul.f32 %v13861_v61, %v1714_v34  ;;  %v8708_v3 = vpop.permute.xlu1 %2094  ;;  %v8711_v46 = vadd.f32 %v1740_v53, %v8536_v51  ;;  %v8720_v56 = vpop.permute.xlu0 %2100 }
 0x3f8   :  { %13862 = vst [vmem:[#allocation62_spill] sm:$0xff] %v8708_v3  ;;  %v8714_v40 = vadd.f32 %v1741_v19, %v8539_v11  ;;  %v8717_v49 = vadd.f32 %v1742_v13, %v8546_v17  ;;  %v1751_v57 = vmul.f32 %v13861_v61, %v1715_v9  ;;  %13863 = vst [vmem:[#allocation63_spill] sm:$0xff] %v8720_v56  ;;  %v13864_v9 = vld [vmem:[#allocation109_spill] sm:$0xff]  ;;  %v13872_v13 = vld [vmem:[#allocation68_spill] sm:$0xff] }
 0x3f9   :  { %v8723_v23 = vadd.f32 %v1743_v20, %v8549_v4  ;;  %v8726_v34 = vadd.f32 %v1744_v44, %v8552_v5  ;;  %v8729_v12 = vadd.f32 %v1745_v38, %v8555_v28  ;;  %v1752_v51 = vmul.f32 %v13861_v61, %v1716_v18  ;;  %v13865_v4 = vld [vmem:[#allocation65_spill] sm:$0xff]  ;;  %v13873_v18 = vld [vmem:[#allocation110_spill] sm:$0xff]  ;;  %v13874_v44 = vld [vmem:[#allocation11_spill] sm:$0xff] }
 0x3fa   :  { %v8733_v11 = vadd.f32 %v1746_v24, %v8561_v62  ;;  %v8736_v17 = vadd.f32 %v1747_v35, %v8564_v37  ;;  %v8739_v19 = vadd.f32 %v1748_v1, %v8578_v43  ;;  %v1809_v5 = vsel %vm393_vm2, %v13865_v4, %v13864_v9  ;;  %v13867_v62 = vld [vmem:[#allocation66_spill] sm:$0xff]  ;;  %v13876_v24 = vld [vmem:[#allocation87_spill] sm:$0xff] }
 0x3fb   :  { %v8746_v21 = vadd.f32 %v1749_v59, %v8581_v32  ;;  %v8749_v28 = vadd.f32 %v1750_v10, %v8584_v60  ;;  %v1810_v37 = vsel %vm393_vm2, %v13867_v62, %v13866_v36  ;;  %v1811_v43 = vsel %vm393_vm2, %v13869_v41, %v13868_v42  ;;  %v8759_v29 = vpop.permute.xlu1 %2102  ;;  %v13871_v32 = vld [vmem:[#allocation7_spill] sm:$0xff]  ;;  %v8776_v38 = vpop.permute.xlu0 %2108  ;;  %v13877_v1 = vld [vmem:[#allocation70_spill] sm:$0xff]  ;;  %v13878_v59 = vld [vmem:[#allocation112_spill] sm:$0xff] }
 0x3fc   :  { %13870 = vst [vmem:[#allocation64_spill] sm:$0xff] %v8759_v29  ;;  %v8762_v53 = vadd.f32 %v1751_v57, %v8593_v2  ;;  %v1812_v60 = vsel %vm393_vm2, %v13872_v13, %v13871_v32  ;;  %v1805_v20 = vsel %vm393_vm2, %v13864_v9, %v13873_v18  ;;  %v1806_v33 = vsel %vm393_vm2, %v13866_v36, %v13874_v44  ;;  %v13889_v56 = vld [vmem:[#allocation78_spill] sm:$0xff] }
 0x3fd   :  { %13875 = vst [vmem:[#allocation109_spill] sm:$0xff] %v8776_v38  ;;  %v8779_v2 = vadd.f32 %v1752_v51, %v8596_v58  ;;  %v1823_v35 = vmul.f32 %v1809_v5, %v13876_v24  ;;  %v1807_v61 = vsel %vm393_vm2, %v13868_v42, %v13877_v1  ;;  %v1813_v10 = vsel %vm393_vm2, %v13878_v59, %v13865_v4  ;;  %v13879_v51 = vld [vmem:[#allocation12_spill] sm:$0xff]  ;;  %v13886_v38 = vld [vmem:[#allocation90_spill] sm:$0xff] }
 0x3fe   :  { %v1827_v57 = vmul.f32 %v1810_v37, %v13876_v24  ;;  %v1831_v9 = vmul.f32 %v1811_v43, %v13876_v24  ;;  %v1801_v58 = vsel %vm393_vm2, %v13873_v18, %v13878_v59  ;;  %v1814_v5 = vsel %vm393_vm2, %v13879_v51, %v13867_v62  ;;  %v13880_v42 = vld [vmem:[#allocation88_spill] sm:$0xff]  ;;  %v13882_v59 = vld [vmem:[#allocation9_spill] sm:$0xff] }
 0x3ff   :  { %v1835_v36 = vmul.f32 %v1812_v60, %v13876_v24  ;;  %v1824_v52 = vmul.f32 %v1805_v20, %v13880_v42  ;;  %v1828_v4 = vmul.f32 %v1806_v33, %v13880_v42  ;;  %v1802_v37 = vsel %vm393_vm2, %v13874_v44, %v13879_v51  ;;  %v8807_v43 = vpop.permute.xlu1 %2110  ;;  %v13884_v20 = vld [vmem:[#allocation13_spill] sm:$0xff]  ;;  %v8819_v24 = vpop.permute.xlu0 %2276 }
 0x400   :  { %13881 = vst [vmem:[#allocation65_spill] sm:$0xff] %v8807_v43  ;;  %v1832_v18 = vmul.f32 %v1807_v61, %v13880_v42  ;;  %v1808_v62 = vsel %vm393_vm2, %v13871_v32, %v13882_v59  ;;  %v1822_v60 = vmul.f32 %v1813_v10, %v13883_v54  ;;  %v1815_v33 = vsel %vm393_vm2, %v13884_v20, %v13869_v41  ;;  %v13887_v32 = vld [vmem:[#allocation5_spill] sm:$0xff] }
 0x401   :  { %13885 = vst [vmem:[#allocation111_spill] sm:$0xff] %v8819_v24  ;;  %v1825_v44 = vmul.f32 %v1801_v58, %v13886_v38  ;;  %v1826_v51 = vmul.f32 %v1814_v5, %v13883_v54  ;;  %v1803_v61 = vsel %vm393_vm2, %v13877_v1, %v13884_v20  ;;  %v1816_v10 = vsel %vm393_vm2, %v13887_v32, %v13872_v13  ;;  %v13888_v58 = vld [vmem:[#allocation97_spill] sm:$0xff] }
 0x402   :  { %v1829_v43 = vmul.f32 %v1802_v37, %v13886_v38  ;;  %v1804_v41 = vsel %vm393_vm2, %v13882_v59, %v13887_v32  ;;  %v1858_v24 = vmul.f32 %v13888_v58, %v1822_v60  ;;  %v1859_v5 = vmul.f32 %v13888_v58, %v1823_v35 }
 0x403   :  { %v1830_v29 = vmul.f32 %v1815_v33, %v13883_v54  ;;  %v1860_v1 = vmul.f32 %v13888_v58, %v1824_v52  ;;  %v1861_v20 = vmul.f32 %v13888_v58, %v1825_v44  ;;  %v1862_v3 = vmul.f32 %v13889_v56, %v1826_v51  ;;  %v8842_v13 = vpop.permute.xlu1 %2281  ;;  %v8848_v32 = vpop.permute.xlu0 %2330  ;;  %v13892_v44 = vld [vmem:[#allocation73_spill] sm:$0xff] }
 0x404   :  { %13890 = vst [vmem:[#allocation66_spill] sm:$0xff] %v8842_v13  ;;  %v1836_v37 = vmul.f32 %v1808_v62, %v13880_v42  ;;  %v1833_v31 = vmul.f32 %v1803_v61, %v13886_v38  ;;  %v1834_v59 = vmul.f32 %v1816_v10, %v13883_v54  ;;  %v1863_v60 = vmul.f32 %v13889_v56, %v1827_v57  ;;  %v13910_v54 = vld [vmem:[#allocation95_spill] sm:$0xff]  ;;  %v13911_v42 = vld [vmem:[#allocation14_spill] sm:$0xff] }
 0x405   :  { %13891 = vst [vmem:[#allocation69_spill] sm:$0xff] %v8848_v32  ;;  %v1837_v35 = vmul.f32 %v1804_v41, %v13886_v38  ;;  %v1864_v52 = vmul.f32 %v13889_v56, %v1828_v4  ;;  %v1865_v33 = vmul.f32 %v13889_v56, %v1829_v43  ;;  %v1866_v51 = vmul.f32 %v13892_v44, %v1830_v29 }
 0x406   :  { %v8855_v58 = vadd.f32 %v1858_v24, %v8695_v26  ;;  %v8858_v62 = vadd.f32 %v1859_v5, %v8701_v30  ;;  %v1867_v61 = vmul.f32 %v13892_v44, %v1831_v9  ;;  %v1868_v57 = vmul.f32 %v13892_v44, %v1832_v18  ;;  %v13894_v24 = vld [vmem:[#allocation75_spill] sm:$0xff]  ;;  %v13897_v5 = vld [vmem:[#allocation98_spill] sm:$0xff] }
 0x407   :  { %v8863_v10 = vadd.f32 %v1860_v1, %v8704_v22  ;;  %v8866_v41 = vadd.f32 %v1861_v20, %v8711_v46  ;;  %v8869_v56 = vadd.f32 %v1862_v3, %v8714_v40  ;;  %v1869_v29 = vmul.f32 %v13892_v44, %v1833_v31  ;;  %v8872_v26 = vpop.permute.xlu1 %2332  ;;  %v8880_v43 = vpop.permute.xlu0 %2338  ;;  %v13899_v20 = vld [vmem:[#allocation83_spill] sm:$0xff] }
 0x408   :  { %13893 = vst [vmem:[#allocation67_spill] sm:$0xff] %v8872_v26  ;;  %v8875_v30 = vadd.f32 %v1863_v60, %v8717_v49  ;;  %v1870_v9 = vmul.f32 %v13894_v24, %v1834_v59  ;;  %v1871_v4 = vmul.f32 %v13894_v24, %v1835_v36  ;;  %v1872_v22 = vmul.f32 %v13894_v24, %v1836_v37  ;;  %v13898_v36 = vld [vmem:[#allocation71_spill] sm:$0xff]  ;;  %v13901_v59 = vld [vmem:[#allocation92_spill] sm:$0xff] }
 0x409   :  { %13895 = vst [vmem:[#allocation7_spill] sm:$0xff] %v8880_v43  ;;  %v8883_v46 = vadd.f32 %v1864_v52, %v8723_v23  ;;  %v8886_v3 = vadd.f32 %v1865_v33, %v8726_v34  ;;  %v1882_v31 = vadd.f32 %v1866_v51, %v8729_v12  ;;  %v1873_v40 = vmul.f32 %v13894_v24, %v1837_v35  ;;  %v13900_v37 = vld [vmem:[#allocation19_spill] sm:$0xff]  ;;  %v13902_v12 = vld [vmem:[#allocation105_spill] sm:$0xff]  ;;  %v13904_v35 = vld [vmem:[#allocation94_spill] sm:$0xff] }
 0x40a   :  { %v1883_v49 = vadd.f32 %v1867_v61, %v8733_v11  ;;  %v1884_v18 = vadd.f32 %v1868_v57, %v8736_v17  ;;  %v1930_v1 = vsel %vm538_vm3, %v13898_v36, %v13897_v5  ;;  %v1936_v23 = vsel %vm538_vm3, %v13900_v37, %v13899_v20  ;;  %v13903_v11 = vld [vmem:[#allocation106_spill] sm:$0xff]  ;;  %v13906_v51 = vld [vmem:[#allocation76_spill] sm:$0xff]  ;;  %v13922_v26 = vld [vmem:[#allocation27_spill] sm:$0xff] }
 0x40b   :  { %13896 = vst [vmem:[#allocation68_spill] sm:$0xff] %v8886_v3  ;;  %v1885_v34 = vadd.f32 %v1869_v29, %v8739_v19  ;;  %v1931_v60 = vsel %vm538_vm3, %v13902_v12, %v13901_v59  ;;  %v1932_v17 = vsel %vm538_vm3, %v13899_v20, %v13903_v11  ;;  %v1924_v52 = vsel %vm538_vm3, %v13904_v35, %v13900_v37  ;;  %v8913_v33 = vpop.permute.xlu1 %2340  ;;  %v13907_v61 = vld [vmem:[#allocation74_spill] sm:$0xff]  ;;  %v8922_v24 = vpop.permute.xlu0 %2346  ;;  %v13909_v20 = vld [vmem:[#allocation91_spill] sm:$0xff]  ;;  %v13913_v3 = vld [vmem:[#allocation72_spill] sm:$0xff] }
 0x40c   :  { %13905 = vst [vmem:[#allocation110_spill] sm:$0xff] %v8913_v33  ;;  %v1887_v44 = vadd.f32 %v1871_v4, %v8749_v28  ;;  %v1888_v19 = vadd.f32 %v1872_v22, %v8762_v53  ;;  %v1933_v57 = vsel %vm538_vm3, %v13907_v61, %v13906_v51  ;;  %v1886_v29 = vadd.f32 %v1870_v9, %v8746_v21  ;;  %v13912_v9 = vld [vmem:[#allocation96_spill] sm:$0xff] }
 0x40d   :  { %13908 = vst [vmem:[#allocation11_spill] sm:$0xff] %v8922_v24  ;;  %v1944_v38 = vmul.f32 %v1930_v1, %v13909_v20  ;;  %v1928_v37 = vsel %vm538_vm3, %v13903_v11, %v13904_v35  ;;  %v1951_v28 = vmul.f32 %v1936_v23, %v13910_v54  ;;  %v1889_v53 = vadd.f32 %v1873_v40, %v8779_v2  ;;  %v13914_v2 = vld [vmem:[#allocation113_spill] sm:$0xff] }
 0x40e   :  { %v8932_v4 = vmul.f32 %v1931_v60, %v13909_v20  ;;  %v1952_v22 = vmul.f32 %v1932_v17, %v13909_v20  ;;  %v1929_v21 = vsel %vm538_vm3, %v13906_v51, %v13911_v42  ;;  %v1954_v1 = vmul.f32 %v1924_v52, %v13912_v9  ;;  %v13915_v60 = vld [vmem:[#allocation104_spill] sm:$0xff]  ;;  %v13917_v35 = vld [vmem:[#allocation93_spill] sm:$0xff] }
 0x40f   :  { %v1956_v13 = vmul.f32 %v1933_v57, %v13909_v20  ;;  %v1926_v23 = vsel %vm538_vm3, %v13897_v5, %v13913_v3  ;;  %v1927_v40 = vsel %vm538_vm3, %v13901_v59, %v13914_v2  ;;  %v1937_v11 = vsel %vm538_vm3, %v13915_v60, %v13907_v61  ;;  %v8953_v17 = vpop.permute.xlu1 %2348  ;;  %v13918_v51 = vld [vmem:[#allocation100_spill] sm:$0xff]  ;;  %v8968_v61 = vpop.permute.xlu0 %2354 }
 0x410   :  { %13916 = vst [vmem:[#allocation70_spill] sm:$0xff] %v8953_v17  ;;  %v1953_v52 = vmul.f32 %v1928_v37, %v13917_v35  ;;  %v1922_v57 = vsel %vm538_vm3, %v13913_v3, %v13918_v51  ;;  %v1934_v5 = vsel %vm538_vm3, %v13918_v51, %v13898_v36  ;;  %v1925_v59 = vsel %vm538_vm3, %v13911_v42, %v13915_v60  ;;  %v13920_v37 = vld [vmem:[#allocation18_spill] sm:$0xff] }
 0x411   :  { %13919 = vst [vmem:[#allocation112_spill] sm:$0xff] %v8968_v61  ;;  %v1957_v20 = vmul.f32 %v1929_v21, %v13917_v35  ;;  %v1923_v17 = vsel %vm538_vm3, %v13914_v2, %v13920_v37  ;;  %v1935_v3 = vsel %vm538_vm3, %v13920_v37, %v13902_v12  ;;  %v13921_v36 = vld [vmem:[#allocation26_spill] sm:$0xff]  ;;  %v1955_v21 = vmul.f32 %v1937_v11, %v13910_v54 }
 0x412   :  { %v1987_v51 = vmul.f32 %v13921_v36, %v1951_v28  ;;  %v1988_v24 = vmul.f32 %v13921_v36, %v1952_v22  ;;  %v1989_v42 = vmul.f32 %v13921_v36, %v1953_v52  ;;  %v1990_v60 = vmul.f32 %v13921_v36, %v1954_v1  ;;  %v13924_v1 = vld [vmem:[#allocation59_spill] sm:$0xff] }
 0x413   :  { %v1945_v61 = vmul.f32 %v1926_v23, %v13917_v35  ;;  %v1992_v33 = vmul.f32 %v13922_v26, %v1956_v13  ;;  %v1993_v2 = vmul.f32 %v13922_v26, %v1957_v20  ;;  %v1958_v32 = vmul.f32 %v1925_v59, %v13912_v9  ;;  %v8988_v43 = vpop.permute.xlu1 %2356  ;;  %v8995_v11 = vpop.permute.xlu0 %2528 }
 0x414   :  { %13923 = vst [vmem:[#allocation12_spill] sm:$0xff] %v8988_v43  ;;  %v1949_v12 = vmul.f32 %v1927_v40, %v13917_v35  ;;  %v1943_v28 = vmul.f32 %v1934_v5, %v13910_v54  ;;  %v1946_v22 = vmul.f32 %v1922_v57, %v13912_v9  ;;  %v2060_v52 = vmul.f32 %v13924_v1, %v8355_v27  ;;  %v13926_v27 = vld [vmem:[#allocation55_spill] sm:$0xff] }
 0x415   :  { %13925 = vst [vmem:[#allocation9_spill] sm:$0xff] %v8995_v11  ;;  %v1947_v23 = vmul.f32 %v1935_v3, %v13910_v54  ;;  %v1950_v13 = vmul.f32 %v1923_v17, %v13912_v9  ;;  %v2003_v20 = vadd.f32 %v1987_v51, %v1882_v31  ;;  %v2061_v59 = vmul.f32 %v13924_v1, %v8359_v45  ;;  %v13959_v54 = vld [vmem:[#allocation32_spill] sm:$0xff] }
 0x416   :  { %v2004_v37 = vadd.f32 %v1988_v24, %v1883_v49  ;;  %v2005_v36 = vadd.f32 %v1989_v42, %v1884_v18  ;;  %v2006_v40 = vadd.f32 %v1990_v60, %v1885_v34  ;;  %v1991_v5 = vmul.f32 %v13922_v26, %v1955_v21  ;;  %v13927_v18 = vld [vmem:[#allocation46_spill] sm:$0xff]  ;;  %v13928_v34 = vld [vmem:[#allocation108_spill] sm:$0xff]  ;;  %v13931_v21 = vld [vmem:[#allocation15_spill] sm:$0xff] }
 0x417   :  { %v2008_v35 = vadd.f32 %v1992_v33, %v1887_v44  ;;  %v2009_v57 = vadd.f32 %v1993_v2, %v1888_v19  ;;  %v1994_v43 = vmul.f32 %v13922_v26, %v1958_v32  ;;  %v2065_v11 = vmul.f32 %v13926_v27, %v8415_v48  ;;  %v9005_v25 = vpop.permute.xlu1 %2533  ;;  %v9015_v44 = vpop.permute.xlu0 %2205  ;;  %v13929_v32 = vld [vmem:[#allocation34_spill] sm:$0xff]  ;;  %v13930_v48 = vld [vmem:[#allocation107_spill] sm:$0xff] }
 0x418   :  { %v2062_v31 = vmul.f32 %v13924_v1, %v8381_v16  ;;  %v2063_v45 = vmul.f32 %v13924_v1, %v8397_v63  ;;  %v2076_v49 = vadd.f32 %v2060_v52, %v2003_v20  ;;  %v2126_v33 = vsel %vm779_vm4, %v13928_v34, %v13927_v18  ;;  %v13935_v20 = vld [vmem:[#allocation42_spill] sm:$0xff] }
 0x419   :  { %v2064_v26 = vmul.f32 %v13926_v27, %v13929_v32  ;;  %v1979_v19 = vmul.f32 %v13930_v48, %v1943_v28  ;;  %v1980_v24 = vmul.f32 %v13930_v48, %v1944_v38  ;;  %v9021_v17 = vadd.f32 %v2061_v59, %v2004_v37  ;;  %v13933_v38 = vld [vmem:[#allocation56_spill] sm:$0xff]  ;;  %v13936_v59 = vld [vmem:[#allocation51_spill] sm:$0xff] }
 0x41a   :  { %v2007_v16 = vadd.f32 %v1991_v5, %v1886_v29  ;;  %v2066_v63 = vmul.f32 %v13926_v27, %v8419_v8  ;;  %v2067_v3 = vmul.f32 %v13926_v27, %v8433_v0  ;;  %v1981_v51 = vmul.f32 %v13930_v48, %v1945_v61  ;;  %v13934_v29 = vld [vmem:[#allocation45_spill] sm:$0xff]  ;;  %v13937_v5 = vld [vmem:[#allocation20_spill] sm:$0xff] }
 0x41b   :  { %v2010_v42 = vadd.f32 %v1994_v43, %v1889_v53  ;;  %v1982_v60 = vmul.f32 %v13930_v48, %v1946_v22  ;;  %v2145_v2 = vmul.f32 %v2126_v33, %v13931_v21  ;;  %v9030_v1 = vadd.f32 %v2065_v11, %v2008_v35  ;;  %v9032_v28 = vpop.permute.xlu1 %2207  ;;  %v9045_v53 = vpop.permute.xlu0 %2213 }
 0x41c   :  { %13932 = vst [vmem:[#allocation13_spill] sm:$0xff] %v9032_v28  ;;  %v1983_v52 = vmul.f32 %v13933_v38, %v1947_v23  ;;  %v2127_v8 = vsel %vm779_vm4, %v13935_v20, %v13934_v29  ;;  %v2122_v0 = vsel %vm779_vm4, %v13927_v18, %v13936_v59  ;;  %v9043_v43 = vadd.f32 %v2062_v31, %v2005_v36  ;;  %v13939_v18 = vld [vmem:[#allocation6_spill] sm:$0xff] }
 0x41d   :  { %v9048_v35 = vadd.f32 %v1979_v19, %v8855_v58  ;;  %v9051_v61 = vadd.f32 %v1980_v24, %v8858_v62  ;;  %v1984_v22 = vmul.f32 %v13933_v38, %v8932_v4  ;;  %v1985_v11 = vmul.f32 %v13933_v38, %v1949_v12  ;;  %v13938_v62 = vld [vmem:[#allocation40_spill] sm:$0xff] }
 0x41e   :  { %v9057_v23 = vadd.f32 %v1981_v51, %v8863_v10  ;;  %v2080_v37 = vadd.f32 %v2064_v26, %v2007_v16  ;;  %v2123_v36 = vsel %vm779_vm4, %v13934_v29, %v13937_v5  ;;  %v9063_v27 = vadd.f32 %v2063_v45, %v2006_v40  ;;  %v13942_v24 = vld [vmem:[#allocation16_spill] sm:$0xff]  ;;  %v13944_v16 = vld [vmem:[#allocation41_spill] sm:$0xff] }
 0x41f   :  { %v9066_v58 = vadd.f32 %v1982_v60, %v8866_v41  ;;  %v2181_v31 = vmul.f32 %v13938_v62, %v2145_v2  ;;  %v2149_v4 = vmul.f32 %v2127_v8, %v13931_v21  ;;  %v2146_v12 = vmul.f32 %v2122_v0, %v13939_v18  ;;  %v9071_v33 = vpop.permute.xlu1 %2215  ;;  %v9081_v45 = vpop.permute.xlu0 %2221  ;;  %v13947_v60 = vld [vmem:[#allocation43_spill] sm:$0xff] }
 0x420   :  { %13940 = vst [vmem:[#allocation5_spill] sm:$0xff] %v9071_v33  ;;  %v9074_v10 = vmul.f32 %v13933_v38, %v1950_v13  ;;  %v9077_v32 = vadd.f32 %v1983_v52, %v8869_v56  ;;  %v2082_v26 = vadd.f32 %v2066_v63, %v2009_v57  ;;  %v9079_v40 = vadd.f32 %v2067_v3, %v2010_v42  ;;  %v13943_v56 = vld [vmem:[#allocation23_spill] sm:$0xff]  ;;  %v13945_v63 = vld [vmem:[#allocation24_spill] sm:$0xff]  ;;  %v13948_v52 = vld [vmem:[#allocation21_spill] sm:$0xff] }
 0x421   :  { %13941 = vst [vmem:[#allocation97_spill] sm:$0xff] %v9081_v45  ;;  %v9084_v41 = vadd.f32 %v1984_v22, %v8875_v30  ;;  %v9087_v48 = vadd.f32 %v1985_v11, %v8883_v46  ;;  %v2150_v19 = vmul.f32 %v2123_v36, %v13939_v18  ;;  %v2118_v13 = vsel %vm779_vm4, %v13936_v59, %v13942_v24  ;;  %v13946_v30 = vld [vmem:[#allocation28_spill] sm:$0xff]  ;;  %v13950_v59 = vld [vmem:[#allocation10_spill] sm:$0xff]  ;;  %v13952_v36 = vld [vmem:[#allocation17_spill] sm:$0xff] }
 0x422   :  { %v9096_v57 = vmul.f32 %v13944_v16, %v13943_v56  ;;  %v9100_v3 = vmul.f32 %v13944_v16, %v13945_v63  ;;  %v9104_v51 = vmul.f32 %v13944_v16, %v13946_v30  ;;  %v2130_v46 = vsel %vm779_vm4, %v13942_v24, %v13928_v34  ;;  %v13969_v45 = vld [vmem:[#allocation35_spill] sm:$0xff]  ;;  %v13970_v33 = vld [vmem:[#allocation70_spill] sm:$0xff] }
 0x423   :  { %v2197_v42 = vadd.f32 %v2181_v31, %v2076_v49  ;;  %v2185_v2 = vmul.f32 %v13947_v60, %v2149_v4  ;;  %v2182_v38 = vmul.f32 %v13938_v62, %v2146_v12  ;;  %v2119_v29 = vsel %vm779_vm4, %v13937_v5, %v13948_v52  ;;  %v9116_v8 = vpop.permute.xlu1 %2223  ;;  %v9131_v11 = vpop.permute.xlu0 %2229 }
 0x424   :  { %13949 = vst [vmem:[#allocation78_spill] sm:$0xff] %v9116_v8  ;;  %v2147_v0 = vmul.f32 %v2118_v13, %v13950_v59  ;;  %v2131_v22 = vsel %vm779_vm4, %v13948_v52, %v13935_v20  ;;  %v2247_v49 = vsel %vm924_vm5, %v8421_v15, %v8472_v39  ;;  %v2248_v34 = vsel %vm924_vm5, %v8457_v7, %v8499_v50  ;;  %v13953_v13 = vld [vmem:[#allocation115_spill] sm:$0xff] }
 0x425   :  { %13951 = vst [vmem:[#allocation73_spill] sm:$0xff] %v9131_v11  ;;  %v2186_v5 = vmul.f32 %v13947_v60, %v2150_v19  ;;  %v2148_v31 = vmul.f32 %v2130_v46, %v13952_v36  ;;  %v2243_v20 = vsel %vm924_vm5, %v8472_v39, %v8505_v47  ;;  %v2244_v4 = vsel %vm924_vm5, %v8499_v50, %v8533_v6  ;;  %v13954_v50 = vld [vmem:[#allocation22_spill] sm:$0xff] }
 0x426   :  { %v2151_v12 = vmul.f32 %v2119_v29, %v13950_v59  ;;  %v2239_v24 = vsel %vm924_vm5, %v8505_v47, %v8543_v14  ;;  %v2251_v19 = vsel %vm924_vm5, %v8543_v14, %v8421_v15  ;;  %v2240_v39 = vsel %vm924_vm5, %v8533_v6, %v13953_v13  ;;  %v13956_v14 = vld [vmem:[#allocation25_spill] sm:$0xff] }
 0x427   :  { %v2152_v56 = vmul.f32 %v2131_v22, %v13952_v36  ;;  %v2266_v63 = vmul.f32 %v2247_v49, %v13954_v50  ;;  %v2270_v30 = vmul.f32 %v2248_v34, %v13954_v50  ;;  %v2252_v47 = vsel %vm924_vm5, %v13953_v13, %v8457_v7  ;;  %v9163_v46 = vpop.permute.xlu1 %2231  ;;  %v9168_v9 = vpop.permute.xlu0 %2397  ;;  %v13958_v49 = vld [vmem:[#allocation31_spill] sm:$0xff] }
 0x428   :  { %13955 = vst [vmem:[#allocation75_spill] sm:$0xff] %v9163_v46  ;;  %v2201_v52 = vadd.f32 %v2185_v2, %v2080_v37  ;;  %v2183_v15 = vmul.f32 %v13938_v62, %v2147_v0  ;;  %v2267_v29 = vmul.f32 %v2243_v20, %v13956_v14  ;;  %v2271_v6 = vmul.f32 %v2244_v4, %v13956_v14  ;;  %v13960_v4 = vld [vmem:[#allocation8_spill] sm:$0xff] }
 0x429   :  { %13957 = vst [vmem:[#allocation98_spill] sm:$0xff] %v9168_v9  ;;  %v2198_v22 = vadd.f32 %v2182_v38, %v9021_v17  ;;  %v2268_v34 = vmul.f32 %v2239_v24, %v13958_v49  ;;  %v2269_v50 = vmul.f32 %v2251_v19, %v13959_v54  ;;  %v2272_v11 = vmul.f32 %v2240_v39, %v13958_v49  ;;  %v13961_v9 = vld [vmem:[#allocation47_spill] sm:$0xff]  ;;  %v13963_v24 = vld [vmem:[#allocation69_spill] sm:$0xff] }
 0x42a   :  { %v2202_v7 = vadd.f32 %v2186_v5, %v9030_v1  ;;  %v2184_v37 = vmul.f32 %v13938_v62, %v2148_v31  ;;  %v2187_v2 = vmul.f32 %v13947_v60, %v2151_v12  ;;  %v2273_v0 = vmul.f32 %v2252_v47, %v13959_v54  ;;  %v13962_v38 = vld [vmem:[#allocation7_spill] sm:$0xff]  ;;  %v13965_v31 = vld [vmem:[#allocation110_spill] sm:$0xff] }
 0x42b   :  { %v2188_v20 = vmul.f32 %v13947_v60, %v2152_v56  ;;  %v2302_v13 = vmul.f32 %v13960_v4, %v2266_v63  ;;  %v2306_v17 = vmul.f32 %v13961_v9, %v2270_v30  ;;  %v2368_v19 = vsel %vm1069_vm6, %v13963_v24, %v13962_v38  ;;  %v9185_v39 = vpop.permute.xlu1 %2402  ;;  %v13966_v12 = vld [vmem:[#allocation67_spill] sm:$0xff]  ;;  %v2452_v56 = vpop.permute.xlu0 %2451 }
 0x42c   :  { %13964 = vst [vmem:[#allocation71_spill] sm:$0xff] %v9185_v39  ;;  %v2199_v1 = vadd.f32 %v2183_v15, %v9043_v43  ;;  %v2303_v62 = vmul.f32 %v13960_v4, %v2267_v29  ;;  %v2307_v5 = vmul.f32 %v13961_v9, %v2271_v6  ;;  %v2369_v60 = vsel %vm1069_vm6, %v13966_v12, %v13965_v31  ;;  %v13967_v54 = vld [vmem:[#allocation11_spill] sm:$0xff]  ;;  %v13968_v39 = vld [vmem:[#allocation30_spill] sm:$0xff] }
 0x42d   :  { %v2304_v63 = vmul.f32 %v13960_v4, %v2268_v34  ;;  %v2305_v30 = vmul.f32 %v13960_v4, %v2269_v50  ;;  %v2308_v47 = vmul.f32 %v13961_v9, %v2272_v11  ;;  %v2364_v43 = vsel %vm1069_vm6, %v13962_v38, %v13967_v54  ;;  %v13975_v38 = vld [vmem:[#allocation57_spill] sm:$0xff] }
 0x42e   :  { %v2200_v15 = vadd.f32 %v2184_v37, %v9063_v27  ;;  %v2203_v29 = vadd.f32 %v2187_v2, %v2082_v26  ;;  %v2309_v6 = vmul.f32 %v13961_v9, %v2273_v0  ;;  %v2387_v49 = vmul.f32 %v2368_v19, %v13968_v39  ;;  %v13971_v0 = vld [vmem:[#allocation112_spill] sm:$0xff] }
 0x42f   :  { %v2204_v14 = vadd.f32 %v2188_v20, %v9079_v40  ;;  %v2318_v46 = vadd.f32 %v2302_v13, %v2197_v42  ;;  %v2322_v34 = vadd.f32 %v2306_v17, %v2201_v52  ;;  %v2391_v50 = vmul.f32 %v2369_v60, %v13968_v39  ;;  %v2454_v4 = vpop.permute.xlu1 %2453  ;;  %v2460_v26 = vpop.permute.xlu0 %2459  ;;  %v13972_v52 = vld [vmem:[#allocation61_spill] sm:$0xff]  ;;  %v13974_v20 = vld [vmem:[#allocation116_spill] sm:$0xff] }
 0x430   :  { %v2319_v11 = vadd.f32 %v2303_v62, %v2198_v22  ;;  %v2323_v8 = vadd.f32 %v2307_v5, %v2202_v7  ;;  %v2388_v28 = vmul.f32 %v2364_v43, %v13969_v45  ;;  %v2365_v27 = vsel %vm1069_vm6, %v13965_v31, %v13970_v33  ;;  %v13973_v22 = vld [vmem:[#allocation58_spill] sm:$0xff]  ;;  %v13976_v62 = vld [vmem:[#allocation12_spill] sm:$0xff]  ;;  %v13981_v39 = vld [vmem:[#allocation9_spill] sm:$0xff] }
 0x431   :  { %v2320_v9 = vadd.f32 %v2304_v63, %v2199_v1  ;;  %v2321_v37 = vadd.f32 %v2305_v30, %v2200_v15  ;;  %v2324_v2 = vadd.f32 %v2308_v47, %v2203_v29  ;;  %v2360_v40 = vsel %vm1069_vm6, %v13967_v54, %v13971_v0  ;;  %v13977_v31 = vld [vmem:[#allocation36_spill] sm:$0xff]  ;;  %v13979_v15 = vld [vmem:[#allocation53_spill] sm:$0xff] }
 0x432   :  { %v2325_v42 = vadd.f32 %v2309_v6, %v2204_v14  ;;  %v2124_v7 = vsel %vm779_vm4, %v13973_v22, %v13972_v52  ;;  %v2423_v13 = vmul.f32 %v13974_v20, %v2387_v49  ;;  %v2372_v17 = vsel %vm1069_vm6, %v13971_v0, %v13963_v24 }
 0x433   :  { %v2427_v19 = vmul.f32 %v13975_v38, %v2391_v50  ;;  %v2392_v1 = vmul.f32 %v2365_v27, %v13969_v45  ;;  %v2361_v54 = vsel %vm1069_vm6, %v13970_v33, %v13976_v62  ;;  %v2489_v14 = vsel %vm1214_vm7, %v2452_v56, %v2460_v26  ;;  %v2462_v5 = vpop.permute.xlu1 %2461  ;;  %v2468_v30 = vpop.permute.xlu0 %2467  ;;  %v13978_v33 = vld [vmem:[#allocation37_spill] sm:$0xff] }
 0x434   :  { %v2424_v49 = vmul.f32 %v13974_v20, %v2388_v28  ;;  %v2389_v60 = vmul.f32 %v2360_v40, %v13977_v31  ;;  %v2373_v24 = vsel %vm1069_vm6, %v13976_v62, %v13966_v12  ;;  %v2490_v63 = vsel %vm1214_vm7, %v2454_v4, %v2462_v5  ;;  %v13980_v12 = vld [vmem:[#allocation49_spill] sm:$0xff] }
 0x435   :  { %v9241_v47 = vmul.f32 %v2124_v7, %v13931_v21  ;;  %v2390_v43 = vmul.f32 %v2372_v17, %v13978_v33  ;;  %v2512_v29 = vmul.f32 %v2490_v63, %v13979_v15  ;;  %v2485_v28 = vsel %vm1214_vm7, %v2460_v26, %v2468_v30 }
 0x436   :  { %v2439_v6 = vadd.f32 %v2423_v13, %v2318_v46  ;;  %v2393_v50 = vmul.f32 %v2361_v54, %v13977_v31  ;;  %v2508_v27 = vmul.f32 %v2489_v14, %v13979_v15  ;;  %v2509_v0 = vmul.f32 %v2485_v28, %v13980_v12  ;;  %v13983_v28 = vld [vmem:[#allocation50_spill] sm:$0xff] }
 0x437   :  { %v2443_v40 = vadd.f32 %v2427_v19, %v2322_v34  ;;  %v2428_v62 = vmul.f32 %v13975_v38, %v2392_v1  ;;  %v2394_v7 = vmul.f32 %v2373_v24, %v13978_v33  ;;  %v2548_v45 = vmul.f32 %v9005_v25, %v2512_v29  ;;  %v2470_v17 = vpop.permute.xlu1 %2469  ;;  %v2476_v26 = vpop.permute.xlu0 %2475  ;;  %v13982_v24 = vld [vmem:[#allocation54_spill] sm:$0xff] }
 0x438   :  { %v2425_v63 = vmul.f32 %v13974_v20, %v2389_v60  ;;  %v2545_v36 = vmul.f32 %v13981_v39, %v2509_v0  ;;  %v2486_v46 = vsel %vm1214_vm7, %v2462_v5, %v2470_v17  ;;  %v2440_v13 = vadd.f32 %v2424_v49, %v2319_v11 }
 0x439   :  { %v2426_v54 = vmul.f32 %v13974_v20, %v2390_v43  ;;  %v2513_v34 = vmul.f32 %v2486_v46, %v13980_v12  ;;  %v2481_v19 = vsel %vm1214_vm7, %v2468_v30, %v2476_v26  ;;  %v2493_v1 = vsel %vm1214_vm7, %v2476_v26, %v2452_v56 }
 0x43a   :  { %v2429_v14 = vmul.f32 %v13975_v38, %v2393_v50  ;;  %v2544_v60 = vmul.f32 %v13981_v39, %v2508_v27  ;;  %v2510_v29 = vmul.f32 %v2481_v19, %v13982_v24  ;;  %v2511_v5 = vmul.f32 %v2493_v1, %v13983_v28 }
 0x43b   :  { %v2430_v11 = vmul.f32 %v13975_v38, %v2394_v7  ;;  %v2564_v49 = vadd.f32 %v2548_v45, %v2443_v40  ;;  %v2549_v20 = vmul.f32 %v9005_v25, %v2513_v34  ;;  %v2478_v43 = vpop.permute.xlu1 %2477  ;;  %v2444_v0 = vadd.f32 %v2428_v62, %v2323_v8  ;;  %v9274_v27 = vpop.permute.xlu0 %2326 }
 0x43c   :  { %v2546_v30 = vmul.f32 %v13981_v39, %v2510_v29  ;;  %v2482_v56 = vsel %vm1214_vm7, %v2470_v17, %v2478_v43  ;;  %v2494_v50 = vsel %vm1214_vm7, %v2478_v43, %v2454_v4  ;;  %v2561_v46 = vadd.f32 %v2545_v36, %v2440_v13  ;;  %v13984_v36 = vld [vmem:[#allocation52_spill] sm:$0xff] }
 0x43d   :  { %v2547_v26 = vmul.f32 %v13981_v39, %v2511_v5  ;;  %v2514_v38 = vmul.f32 %v2482_v56, %v13982_v24  ;;  %v2515_v45 = vmul.f32 %v2494_v50, %v13983_v28  ;;  %v2565_v40 = vadd.f32 %v2549_v20, %v2444_v0  ;;  %v13985_v13 = vld [vmem:[#allocation48_spill] sm:$0xff]  ;;  %v13987_v56 = vld [vmem:[#allocation62_spill] sm:$0xff]  ;;  %v13992_v50 = vld [vmem:[#allocation63_spill] sm:$0xff] }
 0x43e   :  { %v2441_v7 = vadd.f32 %v2425_v63, %v2320_v9  ;;  %v2445_v8 = vadd.f32 %v2429_v14, %v2324_v2  ;;  %v2560_v62 = vadd.f32 %v2544_v60, %v2439_v6  ;;  %v2442_v34 = vadd.f32 %v2426_v54, %v2321_v37  ;;  %v13986_v5 = vld [vmem:[#allocation44_spill] sm:$0xff] }
 0x43f   :  { %v2550_v19 = vmul.f32 %v9005_v25, %v2514_v38  ;;  %v2551_v17 = vmul.f32 %v9005_v25, %v2515_v45  ;;  %v9281_v1 = vpop.permute.xlu1 %2328  ;;  %v2583_v4 = vpack.c.bf16 %v2565_v40, %v2561_v46  ;;  %v2446_v29 = vadd.f32 %v2430_v11, %v2325_v42  ;;  %v13988_v20 = vld [vmem:[#allocation60_spill] sm:$0xff]  ;;  %v9291_v37 = vpop.permute.xlu0 %2334  ;;  %v13989_v42 = vld [vmem:[#allocation29_spill] sm:$0xff]  ;;  %v13991_v11 = vld [vmem:[#allocation39_spill] sm:$0xff] }
 0x440   :  { %v2055_v39 = vmul.f32 %v13944_v16, %v13984_v36  ;;  %v2056_v43 = vmul.f32 %v13986_v5, %v13985_v13  ;;  %v2125_v9 = vsel %vm779_vm4, %v13988_v20, %v13987_v56  ;;  %v2582_v2 = vpack.c.bf16 %v2564_v49, %v2560_v62  ;;  %v13990_v16 = vld [vmem:[#allocation38_spill] sm:$0xff]  ;;  %v13993_v49 = vld [vmem:[#allocation33_spill] sm:$0xff] }
 0x441   :  { %v2562_v6 = vadd.f32 %v2546_v30, %v2441_v7  ;;  %v2566_v25 = vadd.f32 %v2550_v19, %v2445_v8  ;;  %2634 = vmatprep.subr.bf16.mxu0 %v2583_v4  ;;  %v2563_v63 = vadd.f32 %v2547_v26, %v2442_v34  ;;  %v2567_v54 = vadd.f32 %v2551_v17, %v2446_v29  ;;  %v13994_v26 = vld [vmem:[#allocation64_spill] sm:$0xff]  ;;  %v13996_v36 = vld [vmem:[#allocation109_spill] sm:$0xff] }
 0x442   :  { %v2057_v14 = vmul.f32 %v13986_v5, %v13989_v42  ;;  %v2058_v60 = vmul.f32 %v13986_v5, %v13990_v16  ;;  %v2059_v0 = vmul.f32 %v13986_v5, %v13991_v11  ;;  %v2120_v46 = vsel %vm779_vm4, %v13972_v52, %v13992_v50  ;;  %2635 = vmatpush1.bf16.msra.mxu0 %v2582_v2  ;;  %v13995_v8 = vld [vmem:[#allocation68_spill] sm:$0xff]  ;;  %v13999_v2 = vld [vmem:[#allocation17_spill] sm:$0xff] }
 0x443   :  { %v2173_v30 = vmul.f32 %v13993_v49, %v9241_v47  ;;  %v2121_v38 = vsel %vm779_vm4, %v13987_v56, %v13994_v26  ;;  %v9309_v45 = vpop.permute.xlu1 %2336  ;;  %v2585_v40 = vpack.c.bf16 %v2567_v54, %v2563_v63  ;;  %v2584_v7 = vpack.c.bf16 %v2566_v25, %v2562_v6  ;;  %v9318_v19 = vpop.permute.xlu0 %2342  ;;  %v14000_v25 = vld [vmem:[#allocation5_spill] sm:$0xff] }
 0x444   :  { %v2002_v62 = vadd.f32 %v9074_v10, %v13995_v8  ;;  %v2068_v34 = vadd.f32 %v9096_v57, %v9048_v35  ;;  %v2141_v52 = vmul.f32 %v2125_v9, %v13931_v21  ;;  %v2069_v47 = vadd.f32 %v9100_v3, %v9051_v61  ;;  %v14001_v63 = vld [vmem:[#allocation13_spill] sm:$0xff] }
 0x445   :  { %v2138_v17 = vmul.f32 %v2120_v46, %v13939_v18  ;;  %v2070_v4 = vadd.f32 %v9104_v51, %v9057_v23  ;;  %v2071_v29 = vadd.f32 %v2055_v39, %v9066_v58  ;;  %v2116_v10 = vsel %vm779_vm4, %v13992_v50, %v13996_v36  ;;  %2687 = vmatprep.subr.bf16.mxu1 %v2585_v40  ;;  %v13997_v39 = vld [vmem:[#allocation65_spill] sm:$0xff] }
 0x446   :  { %v2072_v35 = vadd.f32 %v2056_v43, %v9077_v32  ;;  %v2073_v57 = vadd.f32 %v2057_v14, %v9084_v41  ;;  %v2142_v61 = vmul.f32 %v2121_v38, %v13939_v18  ;;  %v2128_v3 = vsel %vm779_vm4, %v13996_v36, %v13973_v22  ;;  %2688 = vmatpush1.bf16.msra.mxu1 %v2584_v7  ;;  %v13998_v41 = vld [vmem:[#allocation114_spill] sm:$0xff]  ;;  %v14002_v42 = vld [vmem:[#allocation97_spill] sm:$0xff]  ;;  %v14006_v38 = vld [vmem:[#allocation75_spill] sm:$0xff] }
 0x447   :  { %v2189_v23 = vadd.f32 %v2173_v30, %v2068_v34  ;;  %v2074_v58 = vadd.f32 %v2058_v60, %v9087_v48  ;;  %v2075_v51 = vadd.f32 %v2059_v0, %v2002_v62  ;;  %v2117_v13 = vsel %vm779_vm4, %v13994_v26, %v13997_v39  ;;  %v9340_v32 = vpop.permute.xlu1 %2344  ;;  %v9352_v56 = vpop.permute.xlu0 %2350  ;;  %v14003_v60 = vld [vmem:[#allocation78_spill] sm:$0xff]  ;;  %v14004_v0 = vld [vmem:[#allocation73_spill] sm:$0xff] }
 0x448   :  { %v2177_v5 = vmul.f32 %v13998_v41, %v2141_v52  ;;  %v2139_v43 = vmul.f32 %v2116_v10, %v13950_v59  ;;  %v2129_v22 = vsel %vm779_vm4, %v13997_v39, %v13988_v20  ;;  %v2245_v48 = vsel %vm924_vm5, %v9015_v44, %v9045_v53  ;;  %v14005_v30 = vld [vmem:[#allocation22_spill] sm:$0xff]  ;;  %v14007_v52 = vld [vmem:[#allocation25_spill] sm:$0xff] }
 0x449   :  { %v2174_v9 = vmul.f32 %v13993_v49, %v2138_v17  ;;  %v2140_v6 = vmul.f32 %v2128_v3, %v13999_v2  ;;  %v2246_v54 = vsel %vm924_vm5, %v14001_v63, %v14000_v25  ;;  %v2241_v20 = vsel %vm924_vm5, %v9045_v53, %v14002_v42  ;;  %v14008_v3 = vld [vmem:[#allocation31_spill] sm:$0xff] }
 0x44a   :  { %v2178_v14 = vmul.f32 %v13998_v41, %v2142_v61  ;;  %v2143_v16 = vmul.f32 %v2117_v13, %v13950_v59  ;;  %v2242_v11 = vsel %vm924_vm5, %v14000_v25, %v14003_v60  ;;  %v2237_v50 = vsel %vm924_vm5, %v14002_v42, %v14004_v0 }
 0x44b   :  { %v2144_v46 = vmul.f32 %v2129_v22, %v13999_v2  ;;  %v2258_v26 = vmul.f32 %v2245_v48, %v14005_v30  ;;  %v2249_v53 = vsel %vm924_vm5, %v14004_v0, %v9015_v44  ;;  %v2238_v40 = vsel %vm924_vm5, %v14003_v60, %v14006_v38  ;;  %v2353_v7 = vpop.permute.xlu1 %2352  ;;  %v9387_v36 = vpop.permute.xlu0 %2518  ;;  %v14009_v22 = vld [vmem:[#allocation32_spill] sm:$0xff] }
 0x44c   :  { %v2193_v8 = vadd.f32 %v2177_v5, %v2072_v35  ;;  %v2175_v62 = vmul.f32 %v13993_v49, %v2139_v43  ;;  %v2262_v34 = vmul.f32 %v2246_v54, %v14005_v30  ;;  %v2259_v17 = vmul.f32 %v2241_v20, %v14007_v52  ;;  %v14011_v54 = vld [vmem:[#allocation66_spill] sm:$0xff] }
 0x44d   :  { %v2190_v10 = vadd.f32 %v2174_v9, %v2069_v47  ;;  %v2176_v61 = vmul.f32 %v13993_v49, %v2140_v6  ;;  %v2263_v44 = vmul.f32 %v2242_v11, %v14007_v52  ;;  %v2260_v39 = vmul.f32 %v2237_v50, %v14008_v3  ;;  %v14010_v9 = vld [vmem:[#allocation111_spill] sm:$0xff]  ;;  %v5543_v30 = vld [vmem:[%s12924_s2 + $0x2e8] sm:$0xff] }
 0x44e   :  { %v2194_v13 = vadd.f32 %v2178_v14, %v2073_v57  ;;  %v2261_v48 = vmul.f32 %v2249_v53, %v14009_v22  ;;  %v2250_v35 = vsel %vm924_vm5, %v14006_v38, %v14001_v63  ;;  %v2264_v5 = vmul.f32 %v2238_v40, %v14008_v3 }
 0x44f   :  { %v2179_v43 = vmul.f32 %v13998_v41, %v2143_v16  ;;  %v2180_v47 = vmul.f32 %v13998_v41, %v2144_v46  ;;  %v2294_v49 = vmul.f32 %v14010_v9, %v2258_v26  ;;  %v2366_v57 = vsel %vm1069_vm6, %v9274_v27, %v9291_v37  ;;  %v9405_v6 = vpop.permute.xlu1 %2523  ;;  %v2448_v41 = vpop.permute.xlu0 %2447  ;;  %v14012_v46 = vld [vmem:[#allocation30_spill] sm:$0xff] }
 0x450   :  { %v2191_v25 = vadd.f32 %v2175_v62, %v2070_v4  ;;  %v2298_v42 = vmul.f32 %v14011_v54, %v2262_v34  ;;  %v2295_v63 = vmul.f32 %v14010_v9, %v2259_v17  ;;  %v2367_v20 = vsel %vm1069_vm6, %v9281_v1, %v9309_v45 }
 0x451   :  { %v2299_v14 = vmul.f32 %v14011_v54, %v2263_v44  ;;  %v2296_v16 = vmul.f32 %v14010_v9, %v2260_v39  ;;  %v2265_v60 = vmul.f32 %v2250_v35, %v14009_v22  ;;  %v2362_v4 = vsel %vm1069_vm6, %v9291_v37, %v9318_v19  ;;  %v14013_v39 = vld [vmem:[#allocation35_spill] sm:$0xff]  ;;  %v5542_v22 = vld [vmem:[%s12924_s2 + $0x2e0] sm:$0xff] }
 0x452   :  { %v2192_v11 = vadd.f32 %v2176_v61, %v2071_v29  ;;  %v2297_v0 = vmul.f32 %v14010_v9, %v2261_v48  ;;  %v2300_v50 = vmul.f32 %v14011_v54, %v2264_v5  ;;  %v2379_v26 = vmul.f32 %v2366_v57, %v14012_v46 }
 0x453   :  { %v2195_v53 = vadd.f32 %v2179_v43, %v2074_v58  ;;  %v2196_v38 = vadd.f32 %v2180_v47, %v2075_v51  ;;  %v2310_v40 = vadd.f32 %v2294_v49, %v2189_v23  ;;  %v2383_v62 = vmul.f32 %v2367_v20, %v14012_v46  ;;  %v2450_v34 = vpop.permute.xlu1 %2449  ;;  %v2456_v29 = vpop.permute.xlu0 %2455  ;;  %v5549_v46 = vld [vmem:[%s12924_s2 + $0x318] sm:$0xff] }
 0x454   :  { %v2314_v17 = vadd.f32 %v2298_v42, %v2193_v8  ;;  %v2311_v44 = vadd.f32 %v2295_v63, %v2190_v10  ;;  %v2380_v35 = vmul.f32 %v2362_v4, %v14013_v39  ;;  %v2363_v37 = vsel %vm1069_vm6, %v9309_v45, %v9340_v32  ;;  %v14014_v8 = vld [vmem:[#allocation98_spill] sm:$0xff]  ;;  %v14015_v45 = vld [vmem:[#allocation71_spill] sm:$0xff] }
 0x455   :  { %v2315_v61 = vadd.f32 %v2299_v14, %v2194_v13  ;;  %v2312_v48 = vadd.f32 %v2296_v16, %v2191_v25  ;;  %v2301_v5 = vmul.f32 %v14011_v54, %v2265_v60  ;;  %v2358_v23 = vsel %vm1069_vm6, %v9318_v19, %v9352_v56 }
 0x456   :  { %v2313_v58 = vadd.f32 %v2297_v0, %v2192_v11  ;;  %v2316_v51 = vadd.f32 %v2300_v50, %v2195_v53  ;;  %v2415_v10 = vmul.f32 %v14014_v8, %v2379_v26  ;;  %v2370_v43 = vsel %vm1069_vm6, %v9352_v56, %v9274_v27 }
 0x457   :  { %v2419_v47 = vmul.f32 %v14015_v45, %v2383_v62  ;;  %v2384_v13 = vmul.f32 %v2363_v37, %v14013_v39  ;;  %v2359_v9 = vsel %vm1069_vm6, %v9340_v32, %v2353_v7  ;;  %v2487_v19 = vsel %vm1214_vm7, %v2448_v41, %v2456_v29  ;;  %v2458_v49 = vpop.permute.xlu1 %2457  ;;  %v2464_v54 = vpop.permute.xlu0 %2463 }
 0x458   :  { %v2416_v57 = vmul.f32 %v14014_v8, %v2380_v35  ;;  %v2381_v25 = vmul.f32 %v2358_v23, %v13977_v31  ;;  %v2371_v27 = vsel %vm1069_vm6, %v2353_v7, %v9281_v1  ;;  %v2488_v56 = vsel %vm1214_vm7, %v2450_v34, %v2458_v49 }
 0x459   :  { %v2317_v42 = vadd.f32 %v2301_v5, %v2196_v38  ;;  %v2382_v63 = vmul.f32 %v2370_v43, %v13978_v33  ;;  %v2504_v32 = vmul.f32 %v2488_v56, %v13979_v15  ;;  %v2483_v20 = vsel %vm1214_vm7, %v2456_v29, %v2464_v54 }
 0x45a   :  { %v2431_v14 = vadd.f32 %v2415_v10, %v2310_v40  ;;  %v2385_v16 = vmul.f32 %v2359_v9, %v13977_v31  ;;  %v2500_v60 = vmul.f32 %v2487_v19, %v13979_v15  ;;  %v2501_v4 = vmul.f32 %v2483_v20, %v13980_v12 }
 0x45b   :  { %v2435_v1 = vadd.f32 %v2419_v47, %v2314_v17  ;;  %v2420_v7 = vmul.f32 %v14015_v45, %v2384_v13  ;;  %v2386_v11 = vmul.f32 %v2371_v27, %v13978_v33  ;;  %v2540_v0 = vmul.f32 %v9405_v6, %v2504_v32  ;;  %v2466_v50 = vpop.permute.xlu1 %2465  ;;  %v2472_v40 = vpop.permute.xlu0 %2471  ;;  %v5548_v33 = vld [vmem:[%s12924_s2 + $0x310] sm:$0xff] }
 0x45c   :  { %v2417_v26 = vmul.f32 %v14014_v8, %v2381_v25  ;;  %v2537_v53 = vmul.f32 %v9387_v36, %v2501_v4  ;;  %v2484_v38 = vsel %vm1214_vm7, %v2458_v49, %v2466_v50  ;;  %v2432_v62 = vadd.f32 %v2416_v57, %v2311_v44 }
 0x45d   :  { %v2418_v35 = vmul.f32 %v14014_v8, %v2382_v63  ;;  %v2505_v17 = vmul.f32 %v2484_v38, %v13980_v12  ;;  %v2479_v37 = vsel %vm1214_vm7, %v2464_v54, %v2472_v40  ;;  %v2491_v29 = vsel %vm1214_vm7, %v2472_v40, %v2448_v41  ;;  %v5656_v38 = vld [vmem:[%s12922_s0] sm:$0xff] }
 0x45e   :  { %v2421_v5 = vmul.f32 %v14015_v45, %v2385_v16  ;;  %v2536_v23 = vmul.f32 %v9387_v36, %v2500_v60  ;;  %v2502_v10 = vmul.f32 %v2479_v37, %v13982_v24  ;;  %v2503_v43 = vmul.f32 %v2491_v29, %v13983_v28 }
 0x45f   :  { %v2422_v44 = vmul.f32 %v14015_v45, %v2386_v11  ;;  %v2556_v47 = vadd.f32 %v2540_v0, %v2435_v1  ;;  %v2541_v8 = vmul.f32 %v9405_v6, %v2505_v17  ;;  %v2474_v13 = vpop.permute.xlu1 %2473  ;;  %v2436_v9 = vadd.f32 %v2420_v7, %v2315_v61 }
 0x460   :  { %v2538_v19 = vmul.f32 %v9387_v36, %v2502_v10  ;;  %v2480_v41 = vsel %vm1214_vm7, %v2466_v50, %v2474_v13  ;;  %v2492_v49 = vsel %vm1214_vm7, %v2474_v13, %v2450_v34  ;;  %v2553_v57 = vadd.f32 %v2537_v53, %v2432_v62 }
 0x461   :  { %v2539_v25 = vmul.f32 %v9387_v36, %v2503_v43  ;;  %v2506_v27 = vmul.f32 %v2480_v41, %v13982_v24  ;;  %v2507_v45 = vmul.f32 %v2492_v49, %v13983_v28  ;;  %v2557_v56 = vadd.f32 %v2541_v8, %v2436_v9  ;;  %v5648_v36 = vld [vmem:[%s12926_s4 + $0x10] sm:$0xff]  }
 0x462   :  { %v2433_v54 = vadd.f32 %v2417_v26, %v2312_v48  ;;  %v2437_v63 = vadd.f32 %v2421_v5, %v2316_v51  ;;  %v2552_v32 = vadd.f32 %v2536_v23, %v2431_v14  ;;  %v2434_v61 = vadd.f32 %v2418_v35, %v2313_v58  ;;  %v5649_v58 = vld [vmem:[%s12926_s4 + $0x18] sm:$0xff]   ;;  %v5657_v23 = vld [vmem:[%s12922_s0 + $0x20] sm:$0xff]  ;;  %v5658_v43 = vld [vmem:[%s12922_s0 + $0x10] sm:$0xff] }
 0x463   :  { %v2542_v20 = vmul.f32 %v9405_v6, %v2506_v27  ;;  %v2543_v16 = vmul.f32 %v9405_v6, %v2507_v45  ;;  %v2579_v60 = vpack.c.bf16 %v2557_v56, %v2553_v57  ;;  %v2438_v4 = vadd.f32 %v2422_v44, %v2317_v42  ;;  %v2589_v42 = vpop.permute.xlu0 %2588  ;;  %v2594_v53 = vpop.permute.xlu1 %2593  ;;  %v5659_v49 = vld [vmem:[%s12922_s0 + $0x30] sm:$0xff] }
 0x464   :  { %v2578_v1 = vpack.c.bf16 %v2556_v47, %v2552_v32  ;;  %v2554_v34 = vadd.f32 %v2538_v19, %v2433_v54  ;;  %v2555_v11 = vadd.f32 %v2539_v25, %v2434_v61  ;;  %v14016_v6 = vmov 0   ;;  %v5660_v25 = vld [vmem:[%s12922_s0 + $0x8] sm:$0xff] }
 0x465   :  { %v2558_v7 = vadd.f32 %v2542_v20, %v2437_v63  ;;  %2636 = vmatprep.subr.bf16.mxu0 %v2579_v60  ;;  %v2559_v0 = vadd.f32 %v2543_v16, %v2438_v4  ;;  %v5661_v32 = vld [vmem:[%s12922_s0 + $0x28] sm:$0xff]  ;;  %v5662_v16 = vld [vmem:[%s12922_s0 + $0x18] sm:$0xff] }
 0x466   :  { %2637 = vmatpush1.bf16.msra.mxu0 %v2578_v1 }
 0x467   :  { %v2581_v48 = vpack.c.bf16 %v2559_v0, %v2555_v11  ;;  %v2580_v51 = vpack.c.bf16 %v2558_v7, %v2554_v34  ;;  %v2599_v63 = vpop.permute.xlu0 %2598  ;;  %v2604_v7 = vpop.permute.xlu1 %2603 }
 0x469   :  { %5514 = vmatmul.mubr.msk.bf16.vlgmr.msra.gmra.mxu0 %vm1373_vm8, %v5648_v36  ;;  %2689 = vmatprep.subr.bf16.mxu1 %v2581_v48  ;;  %v5664_v48 = vld [vmem:[%s12922_s0 + $0x40] sm:$0xff] }
 0x46a   :  { %2690 = vmatpush1.bf16.msra.mxu1 %v2580_v51  ;;  %2664 = vmatprep.mubr.bf16.mxu0 %v14016_v6 }
 0x46d   :  { %5516 = vmatmul.mubr.msk.bf16.vlgmr.msra.gmra.mxu1 %vm1373_vm8, %v5648_v36  ;;  %v5663_v36 = vld [vmem:[%s12922_s0 + $0x38] sm:$0xff] }
 0x46e   :  { %2717 = vmatprep.mubr.bf16.mxu1 %v14016_v6 }
 0x471   :  { %5515 = vmatmul.mubr.msk.bf16.gmra.mxu0 %vm1373_vm8, %v5649_v58 }
 0x472   :  { %3896 = vmatprep.mubr.bf16.mxu0 %v14016_v6 }
 0x475   :  { %5517 = vmatmul.mubr.msk.bf16.gmra.mxu1 %vm1373_vm8, %v5649_v58 }
 0x476   :  { %3949 = vmatprep.mubr.bf16.mxu1 %v14016_v6 }
 0x529   :  { %v2656_v14 = vpop.f32.mrf.mxu0 }
 0x52a   :  { %v2657_v50 = vadd.f32 %v2656_v14, %v2589_v42  ;;  %v5665_v14 = vld [vmem:[%s12922_s0 + $0x60] sm:$0xff] }
 0x52b   :  { %v2658_v26 = vpop.f32.mrf.mxu0 }
 0x52c   :  { %v9506_v40 = vadd.f32 %v5656_v38, %v2657_v50  ;;  %v2659_v47 = vadd.f32 %v2658_v26, %v2589_v42  ;;  %v5666_v38 = vld [vmem:[%s12922_s0 + $0x50] sm:$0xff] }
 0x52d   :  { %v2660_v62 = vpop.f32.mrf.mxu0  ;;  %v2709_v35 = vpop.f32.mrf.mxu1 }
 0x52e   :  { %14017 = vst [vmem:[#allocation83_spill] sm:$0xff] %v9506_v40  ;;  %v2661_v17 = vadd.f32 %v2660_v62, %v2594_v53  ;;  %v2710_v37 = vadd.f32 %v2709_v35, %v2589_v42  ;;  %2769 = vrot.lane.b32.xlu0 %v9506_v40, %s5695_s17  ;;  %v9532_v27 = vadd.f32 %v5660_v25, %v2659_v47 }
 0x52f   :  { %v2662_v29 = vpop.f32.mrf.mxu0  ;;  %v2711_v5 = vpop.f32.mrf.mxu1 }
 0x530   :  { %v9513_v10 = vadd.f32 %v5657_v23, %v2661_v17  ;;  %v9518_v44 = vadd.f32 %v5658_v43, %v2710_v37  ;;  %v2663_v41 = vadd.f32 %v2662_v29, %v2594_v53  ;;  %14021 = vst [vmem:[#allocation106_spill] sm:$0xff] %v9532_v27  ;;  %v2712_v45 = vadd.f32 %v2711_v5, %v2589_v42  ;;  %v5667_v37 = vld [vmem:[%s12922_s0 + $0x70] sm:$0xff]  ;;  %v5668_v5 = vld [vmem:[%s12922_s0 + $0x48] sm:$0xff] }
 0x531   :  { %v2666_v8 = vpop.f32.mrf.mxu0  ;;  %v2713_v13 = vpop.f32.mrf.mxu1 }
 0x532   :  { %14018 = vst [vmem:[#allocation19_spill] sm:$0xff] %v9513_v10  ;;  %14019 = vst [vmem:[#allocation92_spill] sm:$0xff] %v9518_v44  ;;  %v2714_v9 = vadd.f32 %v2713_v13, %v2594_v53  ;;  %2771 = vrot.lane.b32.xlu1 %v9513_v10, %s5695_s17  ;;  %2785 = vrot.lane.b32.xlu0 %v9518_v44, %s5695_s17  ;;  %v9541_v61 = vadd.f32 %v5661_v32, %v2663_v41  ;;  %v5528_v32 = vld [vmem:[%s12924_s2 + $0x270] sm:$0xff] }
 0x533   :  { %v2715_v19 = vpop.f32.mrf.mxu1  ;;  %v2668_v56 = vpop.f32.mrf.mxu0  ;;  %v9546_v60 = vadd.f32 %v5662_v16, %v2712_v45  ;;  %v2667_v4 = vadd.f32 %v2666_v8, %v2599_v63  ;;  %v5669_v8 = vld [vmem:[%s12922_s0 + $0x68] sm:$0xff]  ;;  %v5522_v45 = vld [vmem:[%s12924_s2 + $0x240] sm:$0xff]  ;;  %v5532_v16 = vld [vmem:[%s12924_s2 + $0x290] sm:$0xff] }
 0x534   :  { %v9527_v57 = vadd.f32 %v5659_v49, %v2714_v9  ;;  %14022 = vst [vmem:[#allocation94_spill] sm:$0xff] %v9541_v61  ;;  %v2716_v20 = vadd.f32 %v2715_v19, %v2594_v53  ;;  %v2669_v53 = vadd.f32 %v2668_v56, %v2599_v63  ;;  %v5670_v19 = vld [vmem:[%s12922_s0 + $0x58] sm:$0xff]  ;;  %v5523_v56 = vld [vmem:[%s12924_s2 + $0x248] sm:$0xff] }
 0x535   :  { %v2719_v54 = vpop.f32.mrf.mxu1  ;;  %14023 = vst [vmem:[#allocation76_spill] sm:$0xff] %v9546_v60  ;;  %v2670_v1 = vpop.f32.mrf.mxu0  ;;  %v9560_v51 = vadd.f32 %v5664_v48, %v2667_v4  ;;  %v5671_v49 = vld [vmem:[%s12922_s0 + $0x78] sm:$0xff] }
 0x536   :  { %14020 = vst [vmem:[#allocation105_spill] sm:$0xff] %v9527_v57  ;;  %2787 = vrot.lane.b32.xlu1 %v9527_v57, %s5695_s17  ;;  %2777 = vrot.lane.b32.xlu0 %v9532_v27, %s5695_s17  ;;  %v9555_v11 = vadd.f32 %v5663_v36, %v2716_v20  ;;  %v2671_v0 = vadd.f32 %v2670_v1, %v2604_v7  ;;  %v5529_v20 = vld [vmem:[%s12924_s2 + $0x278] sm:$0xff]  ;;  %v5526_v1 = vld [vmem:[%s12924_s2 + $0x260] sm:$0xff]  ;;  %v9700_v48 = vpop.permute.xlu0 %2751 }
 0x537   :  { %v2721_v34 = vpop.f32.mrf.mxu1  ;;  %14025 = vst [vmem:[#allocation14_spill] sm:$0xff] %v9560_v51  ;;  %v2720_v58 = vadd.f32 %v2719_v54, %v2599_v63  ;;  %v2672_v35 = vpop.f32.mrf.mxu0  ;;  %v9588_v23 = vadd.f32 %v5668_v5, %v2669_v53  ;;  %v5524_v54 = vld [vmem:[%s12924_s2 + $0x250] sm:$0xff]  ;;  %v5533_v4 = vld [vmem:[%s12924_s2 + $0x298] sm:$0xff] }
 0x538   :  { %14024 = vst [vmem:[#allocation74_spill] sm:$0xff] %v9555_v11  ;;  %v9569_v50 = vadd.f32 %v5665_v14, %v2671_v0  ;;  %v2673_v17 = vadd.f32 %v2672_v35, %v2604_v7  ;;  %v2722_v43 = vadd.f32 %v2721_v34, %v2599_v63  ;;  %v5525_v63 = vld [vmem:[%s12924_s2 + $0x258] sm:$0xff]  ;;  %v5527_v34 = vld [vmem:[%s12924_s2 + $0x268] sm:$0xff]  ;;  %v5530_v0 = vld [vmem:[%s12924_s2 + $0x280] sm:$0xff] }
 0x539   :  { %v2723_v42 = vpop.f32.mrf.mxu1  ;;  %v9574_v62 = vadd.f32 %v5666_v38, %v2720_v58  ;;  %14029 = vst [vmem:[#allocation100_spill] sm:$0xff] %v9588_v23  ;;  %v5537_v36 = vld [vmem:[%s12924_s2 + $0x2b8] sm:$0xff]  ;;  %v5531_v58 = vld [vmem:[%s12924_s2 + $0x288] sm:$0xff] }
 0x53a   :  { %2779 = vrot.lane.b32.xlu1 %v9541_v61, %s5695_s17  ;;  %2793 = vrot.lane.b32.xlu0 %v9546_v60, %s5695_s17  ;;  %14026 = vst [vmem:[#allocation72_spill] sm:$0xff] %v9569_v50  ;;  %v2724_v26 = vadd.f32 %v2723_v42, %v2604_v7  ;;  %v9597_v13 = vadd.f32 %v5669_v8, %v2673_v17  ;;  %v9707_v42 = vpop.permute.xlu1 %2756  ;;  %v9711_v14 = vpop.permute.xlu0 %2761 }
 0x53b   :  { %14027 = vst [vmem:[#allocation113_spill] sm:$0xff] %v9574_v62  ;;  %v2725_v47 = vpop.f32.mrf.mxu1  ;;  %v9602_v41 = vadd.f32 %v5670_v19, %v2722_v43  ;;  %v5541_v43 = vld [vmem:[%s12924_s2 + $0x2d8] sm:$0xff] }
 0x53c   :  { %v9583_v29 = vadd.f32 %v5667_v37, %v2724_v26  ;;  %14030 = vst [vmem:[#allocation18_spill] sm:$0xff] %v9597_v13  ;;  %v2726_v9 = vadd.f32 %v2725_v47, %v2604_v7  ;;  %v5536_v7 = vld [vmem:[%s12924_s2 + $0x2b0] sm:$0xff] }
 0x53d   :  { %14031 = vst [vmem:[#allocation26_spill] sm:$0xff] %v9602_v41  ;;  %v5540_v37 = vld [vmem:[%s12924_s2 + $0x2d0] sm:$0xff] }
 0x53e   :  { %2795 = vrot.lane.b32.xlu1 %v9555_v11, %s5695_s17  ;;  %2773 = vrot.lane.b32.xlu0 %v9560_v51, %s5695_s17  ;;  %14028 = vst [vmem:[#allocation104_spill] sm:$0xff] %v9583_v29  ;;  %v9611_v25 = vadd.f32 %v5671_v49, %v2726_v9  ;;  %v9717_v26 = vpop.permute.xlu1 %2766 }
 0x540   :  { %14032 = vst [vmem:[#allocation27_spill] sm:$0xff] %v9611_v25 }
 0x542   :  { %2775 = vrot.lane.b32.xlu1 %v9569_v50, %s5695_s17  ;;  %2789 = vrot.lane.b32.xlu0 %v9574_v62, %s5695_s17 }
 0x546   :  { %2791 = vrot.lane.b32.xlu1 %v9583_v29, %s5695_s17  ;;  %2781 = vrot.lane.b32.xlu0 %v9588_v23, %s5695_s17 }
 0x54a   :  { %2783 = vrot.lane.b32.xlu1 %v9597_v13, %s5695_s17  ;;  %2797 = vrot.lane.b32.xlu0 %v9602_v41, %s5695_s17 }
 0x54e   :  { %2799 = vrot.lane.b32.xlu1 %v9611_v25, %s5695_s17  ;;  %2840 = vperm.xlu0 %5644, %v5522_v45  }
 0x552   :  { %2845 = vperm.xlu1 %5645, %v5523_v56   ;;  %2850 = vperm.xlu0 %5644, %v5524_v54   ;;  %v5534_v56 = vld [vmem:[%s12924_s2 + $0x2a0] sm:$0xff] }
 0x556   :  { %2855 = vperm.xlu1 %5645, %v5525_v63   ;;  %2971 = vperm.xlu0 %5644, %v5528_v32   ;;  %v5535_v63 = vld [vmem:[%s12924_s2 + $0x2a8] sm:$0xff] }
 0x55a   :  { %2976 = vperm.xlu1 %5645, %v5529_v20   ;;  %2894 = vrot.lane.b32.xlu0 %v9560_v51, %s5696_s11  ;;  %v5544_v20 = vld [vmem:[%s12924_s2 + $0x2f0] sm:$0xff] }
 0x55e   :  { %2896 = vrot.lane.b32.xlu1 %v9569_v50, %s5696_s11  ;;  %2902 = vrot.lane.b32.xlu0 %v9588_v23, %s5696_s11 }
 0x562   :  { %2904 = vrot.lane.b32.xlu1 %v9597_v13, %s5696_s11  ;;  %2910 = vrot.lane.b32.xlu0 %v9574_v62, %s5696_s11 }
 0x566   :  { %2912 = vrot.lane.b32.xlu1 %v9583_v29, %s5696_s11  ;;  %2918 = vrot.lane.b32.xlu0 %v9602_v41, %s5696_s11 }
 0x56a   :  { %2920 = vrot.lane.b32.xlu1 %v9611_v25, %s5696_s11  ;;  %3092 = vperm.xlu0 %5644, %v5532_v16  }
 0x56e   :  { %3097 = vperm.xlu1 %5645, %v5533_v4   ;;  %2961 = vperm.xlu0 %5644, %v5526_v1   ;;  %v5545_v4 = vld [vmem:[%s12924_s2 + $0x2f8] sm:$0xff] }
 0x572   :  { %2966 = vperm.xlu1 %5645, %v5527_v34   ;;  %3015 = vrot.lane.b32.xlu0 %v9560_v51, %s5697_s21 }
 0x576   :  { %3017 = vrot.lane.b32.xlu1 %v9569_v50, %s5697_s21  ;;  %3023 = vrot.lane.b32.xlu0 %v9588_v23, %s5697_s21 }
 0x57a   :  { %3025 = vrot.lane.b32.xlu1 %v9597_v13, %s5697_s21  ;;  %3031 = vrot.lane.b32.xlu0 %v9574_v62, %s5697_s21 }
 0x57e   :  { %3033 = vrot.lane.b32.xlu1 %v9583_v29, %s5697_s21  ;;  %3039 = vrot.lane.b32.xlu0 %v9602_v41, %s5697_s21 }
 0x582   :  { %3041 = vrot.lane.b32.xlu1 %v9611_v25, %s5697_s21  ;;  %3213 = vperm.xlu0 %5644, %v5536_v7  }
 0x586   :  { %3218 = vperm.xlu1 %5645, %v5537_v36   ;;  %2890 = vrot.lane.b32.xlu0 %v9506_v40, %s5696_s11 }
 0x58a   :  { %2892 = vrot.lane.b32.xlu1 %v9513_v10, %s5696_s11  ;;  %2898 = vrot.lane.b32.xlu0 %v9532_v27, %s5696_s11 }
 0x58e   :  { %2900 = vrot.lane.b32.xlu1 %v9541_v61, %s5696_s11  ;;  %2906 = vrot.lane.b32.xlu0 %v9518_v44, %s5696_s11 }
 0x592   :  { %2908 = vrot.lane.b32.xlu1 %v9527_v57, %s5696_s11  ;;  %2914 = vrot.lane.b32.xlu0 %v9546_v60, %s5696_s11 }
 0x596   :  { %2916 = vrot.lane.b32.xlu1 %v9555_v11, %s5696_s11  ;;  %3082 = vperm.xlu0 %5644, %v5530_v0  }
 0x59a   :  { %3087 = vperm.xlu1 %5645, %v5531_v58   ;;  %3136 = vrot.lane.b32.xlu0 %v9560_v51, %s5698_s30 }
 0x59e   :  { %3138 = vrot.lane.b32.xlu1 %v9569_v50, %s5698_s30  ;;  %3144 = vrot.lane.b32.xlu0 %v9588_v23, %s5698_s30 }
 0x5a0   :  { %v9719_v53 = vpop.permute.xlu0 %2769 }
 0x5a2   :  { %3146 = vrot.lane.b32.xlu1 %v9597_v13, %s5698_s30  ;;  %3152 = vrot.lane.b32.xlu0 %v9574_v62, %s5698_s30 }
 0x5a4   :  { %v9725_v38 = vpop.permute.xlu1 %2771  ;;  %v9727_v35 = vpop.permute.xlu0 %2785 }
 0x5a6   :  { %3154 = vrot.lane.b32.xlu1 %v9583_v29, %s5698_s30  ;;  %3160 = vrot.lane.b32.xlu0 %v9602_v41, %s5698_s30 }
 0x5a8   :  { %v9733_v17 = vpop.permute.xlu1 %2787  ;;  %v9738_v5 = vpop.permute.xlu0 %2777 }
 0x5aa   :  { %3162 = vrot.lane.b32.xlu1 %v9611_v25, %s5698_s30  ;;  %3286 = vperm.xlu0 %5644, %v5540_v37  }
 0x5ac   :  { %v9745_v47 = vpop.permute.xlu1 %2779  ;;  %v9747_v8 = vpop.permute.xlu0 %2793 }
 0x5ae   :  { %3291 = vperm.xlu1 %5645, %v5541_v43   ;;  %3011 = vrot.lane.b32.xlu0 %v9506_v40, %s5697_s21  ;;  %v5538_v43 = vld [vmem:[%s12924_s2 + $0x2c0] sm:$0xff] }
 0x5b0   :  { %v9751_v9 = vpop.permute.xlu1 %2795  ;;  %v9757_v19 = vpop.permute.xlu0 %2773 }
 0x5b2   :  { %3013 = vrot.lane.b32.xlu1 %v9513_v10, %s5697_s21  ;;  %3019 = vrot.lane.b32.xlu0 %v9532_v27, %s5697_s21 }
 0x5b4   :  { %v9761_v49 = vpop.permute.xlu1 %2775  ;;  %v9765_v45 = vpop.permute.xlu0 %2789 }
 0x5b6   :  { %3021 = vrot.lane.b32.xlu1 %v9541_v61, %s5697_s21  ;;  %3027 = vrot.lane.b32.xlu0 %v9518_v44, %s5697_s21 }
 0x5b8   :  { %v9774_v54 = vpop.permute.xlu1 %2791  ;;  %v9781_v32 = vpop.permute.xlu0 %2781 }
 0x5ba   :  { %3029 = vrot.lane.b32.xlu1 %v9527_v57, %s5697_s21  ;;  %3035 = vrot.lane.b32.xlu0 %v9546_v60, %s5697_s21 }
 0x5bc   :  { %v9786_v16 = vpop.permute.xlu1 %2783  ;;  %v9791_v1 = vpop.permute.xlu0 %2797 }
 0x5be   :  { %3037 = vrot.lane.b32.xlu1 %v9555_v11, %s5697_s21  ;;  %3203 = vperm.xlu0 %5644, %v5534_v56  }
 0x5c0   :  { %v9795_v34 = vpop.permute.xlu1 %2799 }
 0x5c2   :  { %3208 = vperm.xlu1 %5645, %v5535_v63   ;;  %3407 = vperm.xlu0 %5644, %v5544_v20   ;;  %v5539_v20 = vld [vmem:[%s12924_s2 + $0x2c8] sm:$0xff] }
 0x5c6   :  { %3412 = vperm.xlu1 %5645, %v5545_v4   ;;  %3132 = vrot.lane.b32.xlu0 %v9506_v40, %s5698_s30 }
 0x5c9   :  { %v9797_v7 = vpop.permute.xlu0 %2840 }
 0x5ca   :  { %3134 = vrot.lane.b32.xlu1 %v9513_v10, %s5698_s30  ;;  %3140 = vrot.lane.b32.xlu0 %v9532_v27, %s5698_s30 }
 0x5cd   :  { %v9803_v36 = vpop.permute.xlu1 %2845  ;;  %v9805_v0 = vpop.permute.xlu0 %2850 }
 0x5ce   :  { %3142 = vrot.lane.b32.xlu1 %v9541_v61, %s5698_s30  ;;  %3148 = vrot.lane.b32.xlu0 %v9518_v44, %s5698_s30 }
 0x5d1   :  { %v9811_v58 = vpop.permute.xlu1 %2855  ;;  %v9813_v37 = vpop.permute.xlu0 %2971 }
 0x5d2   :  { %3150 = vrot.lane.b32.xlu1 %v9527_v57, %s5698_s30  ;;  %3156 = vrot.lane.b32.xlu0 %v9546_v60, %s5698_s30 }
 0x5d5   :  { %v9822_v56 = vpop.permute.xlu1 %2976  ;;  %v9824_v63 = vpop.permute.xlu0 %2894 }
 0x5d6   :  { %14033 = vst [vmem:[#allocation59_spill] sm:$0xff] %v9822_v56  ;;  %3158 = vrot.lane.b32.xlu1 %v9555_v11, %s5698_s30  ;;  %3276 = vperm.xlu0 %5644, %v5538_v43  }
 0x5d9   :  { %v9831_v4 = vpop.permute.xlu1 %2896  ;;  %v9833_v6 = vpop.permute.xlu0 %2902 }
 0x5da   :  { %3281 = vperm.xlu1 %5645, %v5539_v20   ;;  %3330 = vrot.lane.b32.xlu0 %v9560_v51, %s5699_s28 }
 0x5dd   :  { %v9837_v28 = vpop.permute.xlu1 %2904  ;;  %v9839_v24 = vpop.permute.xlu0 %2910 }
 0x5de   :  { %3332 = vrot.lane.b32.xlu1 %v9569_v50, %s5699_s28  ;;  %3338 = vrot.lane.b32.xlu0 %v9588_v23, %s5699_s28 }
 0x5e1   :  { %v9845_v43 = vpop.permute.xlu1 %2912  ;;  %v9847_v12 = vpop.permute.xlu0 %2918 }
 0x5e2   :  { %3340 = vrot.lane.b32.xlu1 %v9597_v13, %s5699_s28  ;;  %3346 = vrot.lane.b32.xlu0 %v9574_v62, %s5699_s28 }
 0x5e5   :  { %v9853_v20 = vpop.permute.xlu1 %2920  ;;  %v9855_v15 = vpop.permute.xlu0 %3092 }
 0x5e6   :  { %14034 = vst [vmem:[#allocation55_spill] sm:$0xff] %v9855_v15  ;;  %3348 = vrot.lane.b32.xlu1 %v9583_v29, %s5699_s28  ;;  %3354 = vrot.lane.b32.xlu0 %v9602_v41, %s5699_s28 }
 0x5e9   :  { %v9864_v31 = vpop.permute.xlu1 %3097  ;;  %v9866_v39 = vpop.permute.xlu0 %2961 }
 0x5ea   :  { %14035 = vst [vmem:[#allocation46_spill] sm:$0xff] %v9864_v31  ;;  %14036 = vst [vmem:[#allocation108_spill] sm:$0xff] %v9866_v39  ;;  %3356 = vrot.lane.b32.xlu1 %v9611_v25, %s5699_s28  ;;  %3528 = vperm.xlu0 %5644, %v5548_v33  }
 0x5ed   :  { %v9876_v3 = vpop.permute.xlu1 %2966  ;;  %v9878_v52 = vpop.permute.xlu0 %3015 }
 0x5ee   :  { %14037 = vst [vmem:[#allocation34_spill] sm:$0xff] %v9876_v3  ;;  %3533 = vperm.xlu1 %5645, %v5549_v46   ;;  %3397 = vperm.xlu0 %5644, %v5542_v22   ;;  %v5552_v3 = vld [vmem:[%s12924_s2 + $0x330] sm:$0xff] }
 0x5f1   :  { %v9883_v2 = vpop.permute.xlu1 %3017  ;;  %v9885_v33 = vpop.permute.xlu0 %3023 }
 0x5f2   :  { %3402 = vperm.xlu1 %5645, %v5543_v30   ;;  %3451 = vrot.lane.b32.xlu0 %v9560_v51, %s5700_s18 }
 0x5f5   :  { %v9889_v59 = vpop.permute.xlu1 %3025  ;;  %v9891_v18 = vpop.permute.xlu0 %3031 }
 0x5f6   :  { %14038 = vst [vmem:[#allocation107_spill] sm:$0xff] %v9891_v18  ;;  %3453 = vrot.lane.b32.xlu1 %v9569_v50, %s5700_s18  ;;  %3459 = vrot.lane.b32.xlu0 %v9588_v23, %s5700_s18 }
 0x5f9   :  { %v9897_v22 = vpop.permute.xlu1 %3033  ;;  %v9899_v46 = vpop.permute.xlu0 %3039 }
 0x5fa   :  { %14039 = vst [vmem:[#allocation56_spill] sm:$0xff] %v9897_v22  ;;  %14040 = vst [vmem:[#allocation45_spill] sm:$0xff] %v9899_v46  ;;  %3461 = vrot.lane.b32.xlu1 %v9597_v13, %s5700_s18  ;;  %3467 = vrot.lane.b32.xlu0 %v9574_v62, %s5700_s18  ;;  %v14098_v46 = vld [vmem:[#allocation101_spill] sm:$0xff]  ;;  %v14100_v22 = vld [vmem:[#allocation102_spill] sm:$0xff] }
 0x5fb   :  { %v10143_v18 = vmul.f32 %v9518_v44, %v14100_v22 }
 0x5fd   :  { %v9905_v30 = vpop.permute.xlu1 %3041  ;;  %v9907_v21 = vpop.permute.xlu0 %3213  ;;  %14101 = vst [vmem:[#allocation122_spill] sm:$0xff] %v10143_v18  ;;  %v10163_v18 = vmul.f32 %v9588_v23, %v14098_v46 }
 0x5fe   :  { %14041 = vst [vmem:[#allocation42_spill] sm:$0xff] %v9905_v30  ;;  %14042 = vst [vmem:[#allocation51_spill] sm:$0xff] %v9907_v21  ;;  %3469 = vrot.lane.b32.xlu1 %v9583_v29, %s5700_s18  ;;  %3475 = vrot.lane.b32.xlu0 %v9602_v41, %s5700_s18  ;;  %v5553_v21 = vld [vmem:[%s12924_s2 + $0x338] sm:$0xff] }
 0x601   :  { %v9916_v39 = vpop.permute.xlu1 %3218  ;;  %v9918_v31 = vpop.permute.xlu0 %2890 }
 0x602   :  { %14043 = vst [vmem:[#allocation20_spill] sm:$0xff] %v9916_v39  ;;  %14044 = vst [vmem:[#allocation40_spill] sm:$0xff] %v9918_v31  ;;  %3477 = vrot.lane.b32.xlu1 %v9611_v25, %s5700_s18  ;;  %3649 = vperm.xlu0 %5644, %v5552_v3  }
 0x605   :  { %v9925_v15 = vpop.permute.xlu1 %2892  ;;  %v9927_v56 = vpop.permute.xlu0 %2898 }
 0x606   :  { %14045 = vst [vmem:[#allocation16_spill] sm:$0xff] %v9925_v15  ;;  %14046 = vst [vmem:[#allocation23_spill] sm:$0xff] %v9927_v56  ;;  %3654 = vperm.xlu1 %5645, %v5553_v21   ;;  %3326 = vrot.lane.b32.xlu0 %v9506_v40, %s5699_s28 }
 0x609   :  { %v9931_v30 = vpop.permute.xlu1 %2900  ;;  %v9933_v39 = vpop.permute.xlu0 %2906 }
 0x60a   :  { %14047 = vst [vmem:[#allocation41_spill] sm:$0xff] %v9931_v30  ;;  %14048 = vst [vmem:[#allocation24_spill] sm:$0xff] %v9933_v39  ;;  %3328 = vrot.lane.b32.xlu1 %v9513_v10, %s5699_s28  ;;  %3334 = vrot.lane.b32.xlu0 %v9532_v27, %s5699_s28 }
 0x60d   :  { %v9939_v3 = vpop.permute.xlu1 %2908  ;;  %v9941_v31 = vpop.permute.xlu0 %2914 }
 0x60e   :  { %14049 = vst [vmem:[#allocation28_spill] sm:$0xff] %v9939_v3  ;;  %14050 = vst [vmem:[#allocation43_spill] sm:$0xff] %v9941_v31  ;;  %3336 = vrot.lane.b32.xlu1 %v9541_v61, %s5699_s28  ;;  %3342 = vrot.lane.b32.xlu0 %v9518_v44, %s5699_s28  ;;  %v5546_v31 = vld [vmem:[%s12924_s2 + $0x300] sm:$0xff] }
 0x611   :  { %v9947_v21 = vpop.permute.xlu1 %2916  ;;  %v9949_v15 = vpop.permute.xlu0 %3082 }
 0x612   :  { %14051 = vst [vmem:[#allocation21_spill] sm:$0xff] %v9947_v21  ;;  %14052 = vst [vmem:[#allocation115_spill] sm:$0xff] %v9949_v15  ;;  %3344 = vrot.lane.b32.xlu1 %v9527_v57, %s5699_s28  ;;  %3350 = vrot.lane.b32.xlu0 %v9546_v60, %s5699_s28  ;;  %v5547_v15 = vld [vmem:[%s12924_s2 + $0x308] sm:$0xff] }
 0x615   :  { %v9958_v3 = vpop.permute.xlu1 %3087  ;;  %v9960_v39 = vpop.permute.xlu0 %3136 }
 0x616   :  { %14053 = vst [vmem:[#allocation8_spill] sm:$0xff] %v9958_v3  ;;  %14054 = vst [vmem:[#allocation47_spill] sm:$0xff] %v9960_v39  ;;  %3352 = vrot.lane.b32.xlu1 %v9555_v11, %s5699_s28  ;;  %3518 = vperm.xlu0 %5644, %v5546_v31  }
 0x619   :  { %v9967_v21 = vpop.permute.xlu1 %3138  ;;  %v9969_v30 = vpop.permute.xlu0 %3144 }
 0x61a   :  { %14055 = vst [vmem:[#allocation7_spill] sm:$0xff] %v9967_v21  ;;  %14056 = vst [vmem:[#allocation69_spill] sm:$0xff] %v9969_v30  ;;  %3523 = vperm.xlu1 %5645, %v5547_v15   ;;  %3572 = vrot.lane.b32.xlu0 %v9560_v51, %s5701_s29 }
 0x61d   :  { %v9973_v56 = vpop.permute.xlu1 %3146  ;;  %v9975_v3 = vpop.permute.xlu0 %3152 }
 0x61e   :  { %14057 = vst [vmem:[#allocation110_spill] sm:$0xff] %v9973_v56  ;;  %14058 = vst [vmem:[#allocation67_spill] sm:$0xff] %v9975_v3  ;;  %3574 = vrot.lane.b32.xlu1 %v9569_v50, %s5701_s29  ;;  %3580 = vrot.lane.b32.xlu0 %v9588_v23, %s5701_s29 }
 0x621   :  { %v9981_v31 = vpop.permute.xlu1 %3154  ;;  %v9983_v39 = vpop.permute.xlu0 %3160 }
 0x622   :  { %14059 = vst [vmem:[#allocation11_spill] sm:$0xff] %v9981_v31  ;;  %14060 = vst [vmem:[#allocation70_spill] sm:$0xff] %v9983_v39  ;;  %3582 = vrot.lane.b32.xlu1 %v9597_v13, %s5701_s29  ;;  %3588 = vrot.lane.b32.xlu0 %v9574_v62, %s5701_s29  ;;  %v5556_v39 = vld [vmem:[%s12924_s2 + $0x350] sm:$0xff] }
 0x625   :  { %v9989_v15 = vpop.permute.xlu1 %3162  ;;  %v9991_v21 = vpop.permute.xlu0 %3286 }
 0x626   :  { %14061 = vst [vmem:[#allocation112_spill] sm:$0xff] %v9989_v15  ;;  %14062 = vst [vmem:[#allocation61_spill] sm:$0xff] %v9991_v21  ;;  %3590 = vrot.lane.b32.xlu1 %v9583_v29, %s5701_s29  ;;  %3596 = vrot.lane.b32.xlu0 %v9602_v41, %s5701_s29  ;;  %v5557_v21 = vld [vmem:[%s12924_s2 + $0x358] sm:$0xff] }
 0x629   :  { %v10000_v31 = vpop.permute.xlu1 %3291  ;;  %v10002_v3 = vpop.permute.xlu0 %3011 }
 0x62a   :  { %14063 = vst [vmem:[#allocation58_spill] sm:$0xff] %v10000_v31  ;;  %14064 = vst [vmem:[#allocation116_spill] sm:$0xff] %v10002_v3  ;;  %3598 = vrot.lane.b32.xlu1 %v9611_v25, %s5701_s29  ;;  %3770 = vperm.xlu0 %5644, %v5556_v39  }
 0x62d   :  { %v10009_v15 = vpop.permute.xlu1 %3013  ;;  %v10011_v56 = vpop.permute.xlu0 %3019 }
 0x62e   :  { %14065 = vst [vmem:[#allocation57_spill] sm:$0xff] %v10009_v15  ;;  %14066 = vst [vmem:[#allocation12_spill] sm:$0xff] %v10011_v56  ;;  %3775 = vperm.xlu1 %5645, %v5557_v21   ;;  %3447 = vrot.lane.b32.xlu0 %v9506_v40, %s5700_s18 }
 0x631   :  { %v10015_v30 = vpop.permute.xlu1 %3021  ;;  %v10017_v31 = vpop.permute.xlu0 %3027 }
 0x632   :  { %14067 = vst [vmem:[#allocation9_spill] sm:$0xff] %v10015_v30  ;;  %14068 = vst [vmem:[#allocation52_spill] sm:$0xff] %v10017_v31  ;;  %3449 = vrot.lane.b32.xlu1 %v9513_v10, %s5700_s18  ;;  %3455 = vrot.lane.b32.xlu0 %v9532_v27, %s5700_s18 }
 0x635   :  { %v10023_v39 = vpop.permute.xlu1 %3029  ;;  %v10025_v3 = vpop.permute.xlu0 %3035 }
 0x636   :  { %14069 = vst [vmem:[#allocation48_spill] sm:$0xff] %v10023_v39  ;;  %14070 = vst [vmem:[#allocation44_spill] sm:$0xff] %v10025_v3  ;;  %3457 = vrot.lane.b32.xlu1 %v9541_v61, %s5700_s18  ;;  %3463 = vrot.lane.b32.xlu0 %v9518_v44, %s5700_s18  ;;  %v5550_v3 = vld [vmem:[%s12924_s2 + $0x320] sm:$0xff] }
 0x639   :  { %v10031_v21 = vpop.permute.xlu1 %3037  ;;  %v10033_v15 = vpop.permute.xlu0 %3203 }
 0x63a   :  { %14071 = vst [vmem:[#allocation62_spill] sm:$0xff] %v10031_v21  ;;  %14072 = vst [vmem:[#allocation60_spill] sm:$0xff] %v10033_v15  ;;  %3465 = vrot.lane.b32.xlu1 %v9527_v57, %s5700_s18  ;;  %3471 = vrot.lane.b32.xlu0 %v9546_v60, %s5700_s18  ;;  %v5551_v15 = vld [vmem:[%s12924_s2 + $0x328] sm:$0xff] }
 0x63d   :  { %v10042_v39 = vpop.permute.xlu1 %3208  ;;  %v10044_v31 = vpop.permute.xlu0 %3407 }
 0x63e   :  { %14073 = vst [vmem:[#allocation29_spill] sm:$0xff] %v10042_v39  ;;  %14074 = vst [vmem:[#allocation38_spill] sm:$0xff] %v10044_v31  ;;  %3473 = vrot.lane.b32.xlu1 %v9555_v11, %s5700_s18  ;;  %3639 = vperm.xlu0 %5644, %v5550_v3  }
 0x641   :  { %v10051_v21 = vpop.permute.xlu1 %3412  ;;  %v10053_v30 = vpop.permute.xlu0 %3132 }
 0x642   :  { %14075 = vst [vmem:[#allocation39_spill] sm:$0xff] %v10051_v21  ;;  %14076 = vst [vmem:[#allocation63_spill] sm:$0xff] %v10053_v30  ;;  %3644 = vperm.xlu1 %5645, %v5551_v15   ;;  %3693 = vrot.lane.b32.xlu0 %v9560_v51, %s5702_s25 }
 0x645   :  { %v10057_v56 = vpop.permute.xlu1 %3134  ;;  %v10059_v39 = vpop.permute.xlu0 %3140 }
 0x646   :  { %14077 = vst [vmem:[#allocation33_spill] sm:$0xff] %v10057_v56  ;;  %14078 = vst [vmem:[#allocation64_spill] sm:$0xff] %v10059_v39  ;;  %3695 = vrot.lane.b32.xlu1 %v9569_v50, %s5702_s25  ;;  %3701 = vrot.lane.b32.xlu0 %v9588_v23, %s5702_s25  ;;  %v14095_v39 = vld [vmem:[#allocation99_spill] sm:$0xff]  ;;  %v10185_v23 = vmul.f32 %v9574_v62, %v14100_v22 }
 0x649   :  { %v10065_v3 = vpop.permute.xlu1 %3142  ;;  %v10067_v31 = vpop.permute.xlu0 %3148 }
 0x64a   :  { %14079 = vst [vmem:[#allocation68_spill] sm:$0xff] %v10065_v3  ;;  %14080 = vst [vmem:[#allocation109_spill] sm:$0xff] %v10067_v31  ;;  %3703 = vrot.lane.b32.xlu1 %v9597_v13, %s5702_s25  ;;  %3709 = vrot.lane.b32.xlu0 %v9574_v62, %s5702_s25  ;;  %v2813_v62 = vsel %vm105_vm0, %v9747_v8, %v9719_v53 }
 0x64d   :  { %v10073_v15 = vpop.permute.xlu1 %3150  ;;  %v10075_v21 = vpop.permute.xlu0 %3156 }
 0x64e   :  { %14081 = vst [vmem:[#allocation65_spill] sm:$0xff] %v10073_v15  ;;  %14082 = vst [vmem:[#allocation114_spill] sm:$0xff] %v10075_v21  ;;  %3711 = vrot.lane.b32.xlu1 %v9583_v29, %s5702_s25  ;;  %3717 = vrot.lane.b32.xlu0 %v9602_v41, %s5702_s25 }
 0x651   :  { %v10081_v56 = vpop.permute.xlu1 %3158  ;;  %v10083_v3 = vpop.permute.xlu0 %3276 }
 0x652   :  { %14083 = vst [vmem:[#allocation5_spill] sm:$0xff] %v10081_v56  ;;  %14084 = vst [vmem:[#allocation13_spill] sm:$0xff] %v10083_v3  ;;  %3719 = vrot.lane.b32.xlu1 %v9611_v25, %s5702_s25  ;;  %3568 = vrot.lane.b32.xlu0 %v9506_v40, %s5701_s29 }
 0x655   :  { %v10089_v31 = vpop.permute.xlu1 %3281  ;;  %v10091_v15 = vpop.permute.xlu0 %3330 }
 0x656   :  { %14085 = vst [vmem:[#allocation97_spill] sm:$0xff] %v10089_v31  ;;  %14086 = vst [vmem:[#allocation78_spill] sm:$0xff] %v10091_v15  ;;  %3570 = vrot.lane.b32.xlu1 %v9513_v10, %s5701_s29  ;;  %3576 = vrot.lane.b32.xlu0 %v9532_v27, %s5701_s29 }
 0x659   :  { %v10097_v21 = vpop.permute.xlu1 %3332  ;;  %v10099_v56 = vpop.permute.xlu0 %3338 }
 0x65a   :  { %14087 = vst [vmem:[#allocation73_spill] sm:$0xff] %v10097_v21  ;;  %14088 = vst [vmem:[#allocation75_spill] sm:$0xff] %v10099_v56  ;;  %3578 = vrot.lane.b32.xlu1 %v9541_v61, %s5701_s29  ;;  %3584 = vrot.lane.b32.xlu0 %v9518_v44, %s5701_s29  ;;  %v5554_v21 = vld [vmem:[%s12924_s2 + $0x340] sm:$0xff] }
 0x65d   :  { %v10105_v3 = vpop.permute.xlu1 %3340  ;;  %v10107_v31 = vpop.permute.xlu0 %3346 }
 0x65e   :  { %14089 = vst [vmem:[#allocation111_spill] sm:$0xff] %v10105_v3  ;;  %14090 = vst [vmem:[#allocation66_spill] sm:$0xff] %v10107_v31  ;;  %3586 = vrot.lane.b32.xlu1 %v9527_v57, %s5701_s29  ;;  %3592 = vrot.lane.b32.xlu0 %v9546_v60, %s5701_s29  ;;  %v5555_v31 = vld [vmem:[%s12924_s2 + $0x348] sm:$0xff] }
 0x661   :  { %v10116_v15 = vpop.permute.xlu1 %3348  ;;  %v10118_v56 = vpop.permute.xlu0 %3354 }
 0x662   :  { %14091 = vst [vmem:[#allocation98_spill] sm:$0xff] %v10116_v15  ;;  %14092 = vst [vmem:[#allocation71_spill] sm:$0xff] %v10118_v56  ;;  %3594 = vrot.lane.b32.xlu1 %v9555_v11, %s5701_s29  ;;  %3760 = vperm.xlu0 %5644, %v5554_v21   ;;  %v10133_v15 = vmul.f32 %v9506_v40, %v14095_v39  ;;  %v10139_v21 = vmul.f32 %v9532_v27, %v14098_v46 }
 0x664   :  { %14096 = vst [vmem:[#allocation119_spill] sm:$0xff] %v10133_v15  ;;  %14099 = vst [vmem:[#allocation121_spill] sm:$0xff] %v10139_v21  ;;  %v10215_v21 = vmul.f32 %v9569_v50, %v14095_v39  ;;  %v2814_v50 = vsel %vm105_vm0, %v9751_v9, %v9725_v38 }
 0x665   :  { %v10125_v3 = vpop.permute.xlu1 %3356  ;;  %v10127_v30 = vpop.permute.xlu0 %3528 }
 0x666   :  { %14093 = vst [vmem:[#allocation117_spill] sm:$0xff] %v10125_v3  ;;  %14094 = vst [vmem:[#allocation118_spill] sm:$0xff] %v10127_v30  ;;  %3765 = vperm.xlu1 %5645, %v5555_v31   ;;  %3689 = vrot.lane.b32.xlu0 %v9506_v40, %s5702_s25  ;;  %v14102_v3 = vld [vmem:[#allocation103_spill] sm:$0xff]  ;;  %v10151_v30 = vmul.f32 %v9513_v10, %v14095_v39 }
 0x667   :  { %v10147_v31 = vmul.f32 %v9546_v60, %v14102_v3 }
 0x668   :  { %14104 = vst [vmem:[#allocation124_spill] sm:$0xff] %v10151_v30  ;;  %v10171_v30 = vmul.f32 %v9527_v57, %v14100_v22 }
 0x669   :  { %v10135_v56 = vpop.permute.xlu1 %3533  ;;  %14103 = vst [vmem:[#allocation123_spill] sm:$0xff] %v10147_v31  ;;  %v10153_v40 = vpop.permute.xlu0 %3397  ;;  %v10167_v31 = vmul.f32 %v9541_v61, %v14098_v46 }
 0x66a   :  { %14097 = vst [vmem:[#allocation120_spill] sm:$0xff] %v10135_v56  ;;  %14105 = vst [vmem:[#allocation125_spill] sm:$0xff] %v10153_v40  ;;  %3691 = vrot.lane.b32.xlu1 %v9513_v10, %s5702_s25  ;;  %v10159_v56 = vmul.f32 %v9560_v51, %v14095_v39  ;;  %3697 = vrot.lane.b32.xlu0 %v9532_v27, %s5702_s25  ;;  %v2805_v10 = vsel %vm105_vm0, %v9738_v5, %v9727_v35  ;;  %v14114_v39 = vld [vmem:[#allocation81_spill] sm:$0xff] }
 0x66b   :  { %14106 = vst [vmem:[#allocation126_spill] sm:$0xff] %v10167_v31  ;;  %14107 = vst [vmem:[#allocation127_spill] sm:$0xff] %v10171_v30  ;;  %v2809_v51 = vsel %vm105_vm0, %v9719_v53, %v9738_v5  ;;  %v10189_v40 = vmul.f32 %v9555_v11, %v14102_v3  ;;  %v2806_v27 = vsel %vm105_vm0, %v9745_v47, %v9733_v17  ;;  %v14111_v53 = vld [vmem:[#allocation77_spill] sm:$0xff] }
 0x66c   :  { %v2810_v30 = vsel %vm105_vm0, %v9725_v38, %v9745_v47  ;;  %v2801_v5 = vsel %vm105_vm0, %v9727_v35, %v9747_v8  ;;  %v10211_v31 = vmul.f32 %v9602_v41, %v14102_v3  ;;  %v10219_v47 = vmul.f32 %v9597_v13, %v14098_v46  ;;  %v14112_v41 = vld [vmem:[#allocation79_spill] sm:$0xff] }
 0x66d   :  { %14108 = vst [vmem:[#allocation128_spill] sm:$0xff] %v10189_v40  ;;  %v10207_v40 = vpop.permute.xlu1 %3402  ;;  %v10223_v35 = vmul.f32 %v9583_v29, %v14100_v22  ;;  %v10225_v15 = vpop.permute.xlu0 %3451  ;;  %v2823_v8 = vmul.f32 %v2809_v51, %v14111_v53  ;;  %v10237_v13 = vmul.f32 %v9611_v25, %v14102_v3  ;;  %v2827_v29 = vmul.f32 %v2810_v30, %v14111_v53  ;;  %v14113_v22 = vld [vmem:[#allocation80_spill] sm:$0xff]  ;;  %v5564_v46 = vld [vmem:[%s12927_s5 + $0x50] sm:$0xff] }
 0x66e   :  { %14109 = vst [vmem:[#allocation129_spill] sm:$0xff] %v10207_v40  ;;  %14110 = vst [vmem:[#allocation130_spill] sm:$0xff] %v10225_v15  ;;  %3699 = vrot.lane.b32.xlu1 %v9541_v61, %s5702_s25  ;;  %v2824_v40 = vmul.f32 %v2805_v10, %v14112_v41  ;;  %3705 = vrot.lane.b32.xlu0 %v9518_v44, %s5702_s25  ;;  %v2828_v61 = vmul.f32 %v2806_v27, %v14112_v41 }
 0x66f   :  { %v2822_v51 = vmul.f32 %v2813_v62, %v14113_v22  ;;  %v2825_v10 = vmul.f32 %v2801_v5, %v14114_v39  ;;  %v2802_v38 = vsel %vm105_vm0, %v9733_v17, %v9751_v9  ;;  %v2807_v25 = vsel %vm105_vm0, %v9781_v32, %v9765_v45 }
 0x670   :  { %v2811_v30 = vsel %vm105_vm0, %v9757_v19, %v9781_v32  ;;  %v2812_v27 = vsel %vm105_vm0, %v9761_v49, %v9786_v16  ;;  %v2826_v5 = vmul.f32 %v2814_v50, %v14113_v22  ;;  %v2808_v17 = vsel %vm105_vm0, %v9786_v16, %v9774_v54 }
 0x671   :  { %v10261_v62 = vpop.permute.xlu1 %3453  ;;  %v2803_v9 = vsel %vm105_vm0, %v9765_v45, %v9791_v1  ;;  %v2815_v32 = vsel %vm105_vm0, %v9791_v1, %v9757_v19  ;;  %v10276_v44 = vpop.permute.xlu0 %3459  ;;  %v2804_v50 = vsel %vm105_vm0, %v9774_v54, %v9795_v34  ;;  %v2816_v45 = vsel %vm105_vm0, %v9795_v34, %v9761_v49 }
 0x672   :  { %14115 = vst [vmem:[#allocation131_spill] sm:$0xff] %v10261_v62  ;;  %14116 = vst [vmem:[#allocation132_spill] sm:$0xff] %v10276_v44  ;;  %3707 = vrot.lane.b32.xlu1 %v9527_v57, %s5702_s25  ;;  %v2859_v16 = vmul.f32 %v9797_v7, %v2823_v8  ;;  %v2860_v3 = vmul.f32 %v9797_v7, %v2824_v40  ;;  %3713 = vrot.lane.b32.xlu0 %v9546_v60, %s5702_s25  ;;  %v14137_v62 = vld [vmem:[#allocation90_spill] sm:$0xff] }
 0x673   :  { %v2829_v19 = vmul.f32 %v2802_v38, %v14114_v39  ;;  %v2831_v1 = vmul.f32 %v2811_v30, %v14111_v53  ;;  %v2832_v57 = vmul.f32 %v2807_v25, %v14112_v41  ;;  %v2835_v54 = vmul.f32 %v2812_v27, %v14111_v53 }
 0x674   :  { %v2836_v49 = vmul.f32 %v2808_v17, %v14112_v41  ;;  %v2830_v34 = vmul.f32 %v2815_v32, %v14113_v22  ;;  %v2833_v40 = vmul.f32 %v2803_v9, %v14114_v39  ;;  %v2858_v8 = vmul.f32 %v9797_v7, %v2822_v51 }
 0x675   :  { %v10303_v60 = vpop.permute.xlu1 %3461  ;;  %v2834_v38 = vmul.f32 %v2816_v45, %v14113_v22  ;;  %v2837_v25 = vmul.f32 %v2804_v50, %v14114_v39  ;;  %v2861_v30 = vmul.f32 %v9797_v7, %v2825_v10  ;;  %v2863_v27 = vmul.f32 %v9803_v36, %v2827_v29  ;;  %v10309_v53 = vpop.permute.xlu0 %3467  ;;  %v5565_v29 = vld [vmem:[%s12927_s5 + $0x58] sm:$0xff] }
 0x676   :  { %14117 = vst [vmem:[#allocation133_spill] sm:$0xff] %v10303_v60  ;;  %14118 = vst [vmem:[#allocation134_spill] sm:$0xff] %v10309_v53  ;;  %3715 = vrot.lane.b32.xlu1 %v9555_v11, %s5702_s25  ;;  %v2862_v17 = vmul.f32 %v9803_v36, %v2826_v5  ;;  %v2864_v9 = vmul.f32 %v9803_v36, %v2828_v61  ;;  %v10316_v51 = vadd.f32 %v2859_v16, %v9700_v48  ;;  %v14129_v39 = vld [vmem:[#allocation56_spill] sm:$0xff] }
 0x677   :  { %v10319_v32 = vadd.f32 %v2860_v3, %v9700_v48  ;;  %3840 = vperm.xlu0 %5644, %v5564_v46   ;;  %v2865_v7 = vmul.f32 %v9803_v36, %v2829_v19  ;;  %v2867_v10 = vmul.f32 %v9805_v0, %v2831_v1  ;;  %v2868_v50 = vmul.f32 %v9805_v0, %v2832_v57  ;;  %v5562_v3 = vld [vmem:[%s12927_s5 + $0x40] sm:$0xff] }
 0x678   :  { %v2932_v61 = vsel %vm248_vm1, %v9824_v63, %v9833_v6  ;;  %v2866_v46 = vmul.f32 %v9805_v0, %v2830_v34  ;;  %v2869_v5 = vmul.f32 %v9805_v0, %v2833_v40  ;;  %v2871_v45 = vmul.f32 %v9811_v58, %v2835_v54  ;;  %v14121_v54 = vld [vmem:[#allocation82_spill] sm:$0xff] }
 0x679   :  { %v10338_v36 = vadd.f32 %v2858_v8, %v9700_v48  ;;  %v10340_v16 = vpop.permute.xlu1 %3469  ;;  %v2870_v57 = vmul.f32 %v9811_v58, %v2834_v38  ;;  %v2872_v19 = vmul.f32 %v9811_v58, %v2836_v49  ;;  %v10345_v1 = vadd.f32 %v2863_v27, %v9707_v42  ;;  %v10350_v34 = vpop.permute.xlu0 %3475  ;;  %v5563_v49 = vld [vmem:[%s12927_s5 + $0x48] sm:$0xff]  ;;  %v5578_v27 = vld [vmem:[%s12924_s2 + $0x370] sm:$0xff] }
 0x67a   :  { %14119 = vst [vmem:[#allocation135_spill] sm:$0xff] %v10340_v16  ;;  %v10348_v11 = vadd.f32 %v2861_v30, %v9700_v48  ;;  %14120 = vst [vmem:[#allocation136_spill] sm:$0xff] %v10350_v34  ;;  %3845 = vperm.xlu1 %5645, %v5565_v29   ;;  %v2873_v0 = vmul.f32 %v9811_v58, %v2837_v25  ;;  %v2952_v40 = vmul.f32 %v2932_v61, %v14121_v54 }
 0x67b   :  { %v10355_v8 = vadd.f32 %v2864_v9, %v9707_v42  ;;  %v10358_v38 = vadd.f32 %v2862_v17, %v9707_v42  ;;  %3830 = vperm.xlu0 %5644, %v5562_v3   ;;  %v2883_v48 = vadd.f32 %v2867_v10, %v9711_v14  ;;  %v2933_v58 = vsel %vm248_vm1, %v9831_v4, %v9837_v28 }
 0x67c   :  { %v10369_v25 = vadd.f32 %v2868_v50, %v9711_v14  ;;  %v10372_v30 = vadd.f32 %v2865_v7, %v9707_v42  ;;  %v2887_v17 = vadd.f32 %v2871_v45, %v9717_v26  ;;  %v2928_v9 = vsel %vm248_vm1, %v9833_v6, %v9839_v24  ;;  %v14124_v45 = vld [vmem:[#allocation84_spill] sm:$0xff] }
 0x67d   :  { %v10383_v29 = vadd.f32 %v2866_v46, %v9711_v14  ;;  %v10386_v10 = vadd.f32 %v2869_v5, %v9711_v14  ;;  %v10388_v50 = vpop.permute.xlu1 %3477  ;;  %v10391_v42 = vadd.f32 %v2872_v19, %v9717_v26  ;;  %v2929_v7 = vsel %vm248_vm1, %v9837_v28, %v9845_v43  ;;  %v10404_v14 = vpop.permute.xlu0 %3649 }
 0x67e   :  { %14122 = vst [vmem:[#allocation137_spill] sm:$0xff] %v10388_v50  ;;  %v2936_v6 = vsel %vm248_vm1, %v9847_v12, %v9824_v63  ;;  %v10402_v61 = vadd.f32 %v2870_v57, %v9717_v26  ;;  %14123 = vst [vmem:[#allocation138_spill] sm:$0xff] %v10404_v14  ;;  %3835 = vperm.xlu1 %5645, %v5563_v49   ;;  %v2988_v3 = vmul.f32 %v9813_v37, %v2952_v40  ;;  %v5579_v63 = vld [vmem:[%s12924_s2 + $0x378] sm:$0xff]  ;;  %v14125_v40 = vld [vmem:[#allocation85_spill] sm:$0xff] }
 0x67f   :  { %v2956_v46 = vmul.f32 %v2933_v58, %v14121_v54  ;;  %v2924_v28 = vsel %vm248_vm1, %v9839_v24, %v9847_v12  ;;  %v10413_v5 = vadd.f32 %v2873_v0, %v9717_v26  ;;  %4092 = vperm.xlu0 %5644, %v5578_v27   ;;  %v2953_v57 = vmul.f32 %v2928_v9, %v14124_v45  ;;  %v5574_v26 = vld [vmem:[%s12925_s3 + $0x70] sm:$0xff]  ;;  %v14128_v27 = vld [vmem:[#allocation86_spill] sm:$0xff] }
 0x680   :  { %v2925_v19 = vsel %vm248_vm1, %v9845_v43, %v9853_v20  ;;  %v2937_v12 = vsel %vm248_vm1, %v9853_v20, %v9831_v4  ;;  %v3053_v24 = vsel %vm393_vm2, %v9878_v52, %v9885_v33  ;;  %v2957_v0 = vmul.f32 %v2929_v7, %v14124_v45  ;;  %v14126_v58 = vld [vmem:[#allocation107_spill] sm:$0xff] }
 0x681   :  { %v2951_v49 = vmul.f32 %v2936_v6, %v14125_v40  ;;  %v3054_v43 = vsel %vm393_vm2, %v9883_v2, %v9889_v59  ;;  %v3049_v4 = vsel %vm393_vm2, %v9885_v33, %v14126_v58  ;;  %v10444_v20 = vpop.permute.xlu1 %3654  ;;  %v2954_v9 = vmul.f32 %v2924_v28, %v14128_v27  ;;  %v14130_v6 = vld [vmem:[#allocation45_spill] sm:$0xff]  ;;  %v10459_v33 = vpop.permute.xlu0 %3326  ;;  %v14132_v14 = vld [vmem:[#allocation87_spill] sm:$0xff] }
 0x682   :  { %14127 = vst [vmem:[#allocation107_spill] sm:$0xff] %v10444_v20  ;;  %v3050_v7 = vsel %vm393_vm2, %v9889_v59, %v14129_v39  ;;  %v3045_v22 = vsel %vm393_vm2, %v14126_v58, %v14130_v6  ;;  %v3057_v41 = vsel %vm393_vm2, %v14130_v6, %v9878_v52  ;;  %14131 = vst [vmem:[#allocation56_spill] sm:$0xff] %v10459_v33  ;;  %4097 = vperm.xlu1 %5645, %v5579_v63   ;;  %v14133_v59 = vld [vmem:[#allocation42_spill] sm:$0xff]  ;;  %v5575_v58 = vld [vmem:[%s12925_s3 + $0x78] sm:$0xff] }
 0x683   :  { %v2955_v28 = vmul.f32 %v2937_v12, %v14125_v40  ;;  %v2958_v20 = vmul.f32 %v2925_v19, %v14128_v27  ;;  %v3073_v50 = vmul.f32 %v3053_v24, %v14132_v14  ;;  %v3058_v34 = vsel %vm393_vm2, %v14133_v59, %v9883_v2  ;;  %4003 = vperm.xlu0 %5644, %v5574_v26   ;;  %v14134_v52 = vld [vmem:[#allocation59_spill] sm:$0xff]  ;;  %v14135_v33 = vld [vmem:[#allocation88_spill] sm:$0xff]  ;;  %v14136_v26 = vld [vmem:[#allocation89_spill] sm:$0xff] }
 0x684   :  { %v2992_v6 = vmul.f32 %v14134_v52, %v2956_v46  ;;  %v2989_v63 = vmul.f32 %v9813_v37, %v2953_v57  ;;  %v3077_v12 = vmul.f32 %v3054_v43, %v14132_v14  ;;  %v3074_v19 = vmul.f32 %v3049_v4, %v14135_v33  ;;  %v5582_v24 = vld [vmem:[%s12924_s2 + $0x390] sm:$0xff] }
 0x685   :  { %v2993_v16 = vmul.f32 %v14134_v52, %v2957_v0  ;;  %v3078_v2 = vmul.f32 %v3050_v7, %v14135_v33  ;;  %v3072_v53 = vmul.f32 %v3057_v41, %v14136_v26  ;;  %v3075_v60 = vmul.f32 %v3045_v22, %v14137_v62  ;;  %v10482_v15 = vpop.permute.xlu1 %3328  ;;  %v10491_v0 = vpop.permute.xlu0 %3334 }
 0x686   :  { %14138 = vst [vmem:[#allocation45_spill] sm:$0xff] %v10482_v15  ;;  %v2987_v46 = vmul.f32 %v9813_v37, %v2951_v49  ;;  %v2990_v57 = vmul.f32 %v9813_v37, %v2954_v9  ;;  %v3046_v43 = vsel %vm393_vm2, %v14129_v39, %v14133_v59  ;;  %v3076_v4 = vmul.f32 %v3058_v34, %v14136_v26  ;;  %v14139_v15 = vld [vmem:[#allocation55_spill] sm:$0xff]  ;;  %v5583_v37 = vld [vmem:[%s12924_s2 + $0x398] sm:$0xff]  ;;  %v14140_v9 = vld [vmem:[#allocation46_spill] sm:$0xff] }
 0x687   :  { %4008 = vperm.xlu1 %5645, %v5575_v58   ;;  %v3004_v7 = vadd.f32 %v2988_v3, %v2883_v48  ;;  %v2991_v41 = vmul.f32 %v14134_v52, %v2955_v28  ;;  %v2994_v22 = vmul.f32 %v14134_v52, %v2958_v20  ;;  %v3109_v44 = vmul.f32 %v14139_v15, %v3073_v50  ;;  %v5576_v48 = vld [vmem:[%s12924_s2 + $0x360] sm:$0xff] }
 0x688   :  { %4213 = vperm.xlu0 %5644, %v5582_v24   ;;  %v3008_v49 = vadd.f32 %v2992_v6, %v2887_v17  ;;  %v3005_v39 = vadd.f32 %v2989_v63, %v10369_v25  ;;  %v3113_v34 = vmul.f32 %v14140_v9, %v3077_v12  ;;  %v3110_v59 = vmul.f32 %v14139_v15, %v3074_v19  ;;  %v14144_v19 = vld [vmem:[#allocation40_spill] sm:$0xff]  ;;  %v14145_v24 = vld [vmem:[#allocation41_spill] sm:$0xff] }
 0x689   :  { %v3114_v3 = vmul.f32 %v14140_v9, %v3078_v2  ;;  %v3108_v50 = vmul.f32 %v14139_v15, %v3072_v53  ;;  %v3111_v20 = vmul.f32 %v14139_v15, %v3075_v60  ;;  %v3079_v28 = vmul.f32 %v3046_v43, %v14137_v62  ;;  %v10509_v58 = vpop.permute.xlu1 %3336  ;;  %v10515_v63 = vpop.permute.xlu0 %3342  ;;  %v14143_v15 = vld [vmem:[#allocation23_spill] sm:$0xff] }
 0x68a   :  { %14141 = vst [vmem:[#allocation42_spill] sm:$0xff] %v10509_v58  ;;  %v3009_v25 = vadd.f32 %v2993_v16, %v10391_v42  ;;  %v3003_v17 = vadd.f32 %v2987_v46, %v10383_v29  ;;  %v3006_v52 = vadd.f32 %v2990_v57, %v10386_v10  ;;  %v3112_v6 = vmul.f32 %v14140_v9, %v3076_v4  ;;  %v5577_v29 = vld [vmem:[%s12924_s2 + $0x368] sm:$0xff]  ;;  %v5586_v46 = vld [vmem:[%s12924_s2 + $0x3b0] sm:$0xff]  ;;  %v14171_v58 = vld [vmem:[#allocation20_spill] sm:$0xff] }
 0x68b   :  { %14142 = vst [vmem:[#allocation59_spill] sm:$0xff] %v10515_v63  ;;  %4218 = vperm.xlu1 %5645, %v5583_v37   ;;  %v3007_v12 = vadd.f32 %v2991_v41, %v10402_v61  ;;  %v3010_v53 = vadd.f32 %v2994_v22, %v10413_v5  ;;  %v10519_v60 = vadd.f32 %v3109_v44, %v3004_v7  ;;  %v14146_v61 = vld [vmem:[#allocation16_spill] sm:$0xff] }
 0x68c   :  { %v2930_v16 = vsel %vm248_vm1, %v14144_v19, %v14143_v15  ;;  %4082 = vperm.xlu0 %5644, %v5576_v48   ;;  %v10528_v10 = vadd.f32 %v3113_v34, %v3008_v49  ;;  %v10530_v42 = vadd.f32 %v3110_v59, %v3005_v39  ;;  %v2931_v44 = vsel %vm248_vm1, %v14146_v61, %v14145_v24  ;;  %v14147_v5 = vld [vmem:[#allocation24_spill] sm:$0xff]  ;;  %v14150_v34 = vld [vmem:[#allocation43_spill] sm:$0xff] }
 0x68d   :  { %v2926_v2 = vsel %vm248_vm1, %v14143_v15, %v14147_v5  ;;  %v10543_v57 = vadd.f32 %v3114_v3, %v3009_v25  ;;  %v10545_v43 = vadd.f32 %v3108_v50, %v3003_v17  ;;  %v10547_v4 = vadd.f32 %v3111_v20, %v3006_v52  ;;  %v10550_v41 = vpop.permute.xlu1 %3344  ;;  %v14149_v49 = vld [vmem:[#allocation28_spill] sm:$0xff]  ;;  %v10563_v48 = vpop.permute.xlu0 %3350  ;;  %v14152_v20 = vld [vmem:[#allocation21_spill] sm:$0xff]  ;;  %v14155_v15 = vld [vmem:[#allocation110_spill] sm:$0xff] }
 0x68e   :  { %v3115_v7 = vmul.f32 %v14140_v9, %v3079_v28  ;;  %14148 = vst [vmem:[#allocation55_spill] sm:$0xff] %v10550_v41  ;;  %v10552_v22 = vadd.f32 %v3112_v6, %v3007_v12  ;;  %v2944_v37 = vmul.f32 %v2930_v16, %v14121_v54  ;;  %v2927_v39 = vsel %vm248_vm1, %v14145_v24, %v14149_v49  ;;  %v5587_v25 = vld [vmem:[%s12924_s2 + $0x3b8] sm:$0xff]  ;;  %v14153_v52 = vld [vmem:[#allocation69_spill] sm:$0xff]  ;;  %v14154_v6 = vld [vmem:[#allocation47_spill] sm:$0xff] }
 0x68f   :  { %v2934_v59 = vsel %vm248_vm1, %v14150_v34, %v14144_v19  ;;  %14151 = vst [vmem:[#allocation46_spill] sm:$0xff] %v10563_v48  ;;  %4087 = vperm.xlu1 %5645, %v5577_v29   ;;  %v2948_v9 = vmul.f32 %v2931_v44, %v14121_v54  ;;  %v2945_v3 = vmul.f32 %v2926_v2, %v14124_v45  ;;  %v14156_v19 = vld [vmem:[#allocation7_spill] sm:$0xff]  ;;  %v14160_v54 = vld [vmem:[#allocation70_spill] sm:$0xff] }
 0x690   :  { %v2922_v50 = vsel %vm248_vm1, %v14147_v5, %v14150_v34  ;;  %v2935_v28 = vsel %vm248_vm1, %v14152_v20, %v14146_v61  ;;  %4334 = vperm.xlu0 %5644, %v5586_v46   ;;  %v2923_v17 = vsel %vm248_vm1, %v14149_v49, %v14152_v20  ;;  %v3174_v12 = vsel %vm538_vm3, %v14154_v6, %v14153_v52  ;;  %v14157_v29 = vld [vmem:[#allocation67_spill] sm:$0xff]  ;;  %v14165_v48 = vld [vmem:[#allocation34_spill] sm:$0xff] }
 0x691   :  { %v3175_v16 = vsel %vm538_vm3, %v14156_v19, %v14155_v15  ;;  %v3170_v24 = vsel %vm538_vm3, %v14153_v52, %v14157_v29  ;;  %v10594_v61 = vadd.f32 %v3115_v7, %v3010_v53  ;;  %v2949_v44 = vmul.f32 %v2927_v39, %v14124_v45  ;;  %v14158_v2 = vld [vmem:[#allocation11_spill] sm:$0xff]  ;;  %v10602_v49 = vpop.permute.xlu1 %3352  ;;  %v10614_v39 = vpop.permute.xlu0 %3518  ;;  %v14164_v45 = vld [vmem:[#allocation108_spill] sm:$0xff] }
 0x692   :  { %v2943_v5 = vmul.f32 %v2934_v59, %v14125_v40  ;;  %v3171_v46 = vsel %vm538_vm3, %v14155_v15, %v14158_v2  ;;  %14159 = vst [vmem:[#allocation23_spill] sm:$0xff] %v10602_v49  ;;  %v2946_v34 = vmul.f32 %v2922_v50, %v14128_v27  ;;  %v2947_v20 = vmul.f32 %v2935_v28, %v14125_v40  ;;  %v14162_v52 = vld [vmem:[#allocation91_spill] sm:$0xff]  ;;  %v14163_v28 = vld [vmem:[#allocation93_spill] sm:$0xff] }
 0x693   :  { %v3166_v53 = vsel %vm538_vm3, %v14157_v29, %v14160_v54  ;;  %v3178_v7 = vsel %vm538_vm3, %v14160_v54, %v14154_v6  ;;  %14161 = vst [vmem:[#allocation40_spill] sm:$0xff] %v10614_v39  ;;  %4339 = vperm.xlu1 %5645, %v5587_v25   ;;  %v2950_v59 = vmul.f32 %v2923_v17, %v14128_v27  ;;  %v5573_v29 = vld [vmem:[%s12925_s3 + $0x68] sm:$0xff]  ;;  %v14166_v6 = vld [vmem:[#allocation95_spill] sm:$0xff]  ;;  %v14167_v27 = vld [vmem:[#allocation96_spill] sm:$0xff] }
 0x694   :  { %v3194_v15 = vmul.f32 %v3174_v12, %v14162_v52  ;;  %v3198_v50 = vmul.f32 %v3175_v16, %v14162_v52  ;;  %v3195_v40 = vmul.f32 %v3170_v24, %v14163_v28  ;;  %v2980_v49 = vmul.f32 %v14164_v45, %v2944_v37  ;;  %v14168_v24 = vld [vmem:[#allocation112_spill] sm:$0xff] }
 0x695   :  { %v2984_v41 = vmul.f32 %v14165_v48, %v2948_v9  ;;  %v2981_v54 = vmul.f32 %v14164_v45, %v2945_v3  ;;  %v3199_v25 = vmul.f32 %v3171_v46, %v14163_v28  ;;  %v2985_v17 = vmul.f32 %v14165_v48, %v2949_v44  ;;  %v10634_v63 = vpop.permute.xlu1 %3523  ;;  %v10643_v46 = vpop.permute.xlu0 %3572 }
 0x696   :  { %v3193_v12 = vmul.f32 %v3178_v7, %v14166_v6  ;;  %v3196_v16 = vmul.f32 %v3166_v53, %v14167_v27  ;;  %v3179_v39 = vsel %vm538_vm3, %v14168_v24, %v14156_v19  ;;  %14169 = vst [vmem:[#allocation41_spill] sm:$0xff] %v10634_v63  ;;  %v2979_v37 = vmul.f32 %v14164_v45, %v2943_v5  ;;  %v14170_v7 = vld [vmem:[#allocation51_spill] sm:$0xff] }
 0x697   :  { %v2982_v9 = vmul.f32 %v14164_v45, %v2946_v34  ;;  %v2983_v3 = vmul.f32 %v14165_v48, %v2947_v20  ;;  %v3167_v44 = vsel %vm538_vm3, %v14158_v2, %v14168_v24  ;;  %3998 = vperm.xlu1 %5645, %v5573_v29   ;;  %v2986_v53 = vmul.f32 %v14165_v48, %v2950_v59 }
 0x698   :  { %v3230_v19 = vmul.f32 %v14170_v7, %v3194_v15  ;;  %v3234_v63 = vmul.f32 %v14171_v58, %v3198_v50  ;;  %v3231_v5 = vmul.f32 %v14170_v7, %v3195_v40  ;;  %v10650_v45 = vadd.f32 %v2980_v49, %v10316_v51 }
 0x699   :  { %v10653_v34 = vadd.f32 %v2984_v41, %v10345_v1  ;;  %v3235_v20 = vmul.f32 %v14171_v58, %v3199_v25  ;;  %v3197_v2 = vmul.f32 %v3179_v39, %v14166_v6  ;;  %v10658_v29 = vadd.f32 %v2981_v54, %v10319_v32  ;;  %v10663_v40 = vpop.permute.xlu1 %3574  ;;  %v10677_v49 = vpop.permute.xlu0 %3580 }
 0x69a   :  { %v3229_v48 = vmul.f32 %v14170_v7, %v3193_v12  ;;  %v3232_v59 = vmul.f32 %v14170_v7, %v3196_v16  ;;  %v3200_v15 = vmul.f32 %v3167_v44, %v14167_v27  ;;  %v10666_v51 = vadd.f32 %v2985_v17, %v10355_v8  ;;  %v14174_v12 = vld [vmem:[#allocation116_spill] sm:$0xff] }
 0x69b   :  { %v10669_v1 = vadd.f32 %v2979_v37, %v10338_v36  ;;  %v10672_v41 = vadd.f32 %v2982_v9, %v10348_v11  ;;  %v10675_v32 = vadd.f32 %v2983_v3, %v10358_v38  ;;  %v10680_v39 = vadd.f32 %v2986_v53, %v10372_v30  ;;  %v14172_v11 = vld [vmem:[#allocation61_spill] sm:$0xff]  ;;  %v14173_v38 = vld [vmem:[#allocation12_spill] sm:$0xff]  ;;  %v14177_v9 = vld [vmem:[#allocation58_spill] sm:$0xff] }
 0x69c   :  { %v3246_v50 = vadd.f32 %v3230_v19, %v10519_v60  ;;  %v3250_v54 = vadd.f32 %v3234_v63, %v10528_v10  ;;  %v3247_v8 = vadd.f32 %v3231_v5, %v10530_v42  ;;  %v3251_v36 = vadd.f32 %v3235_v20, %v10543_v57  ;;  %v14175_v10 = vld [vmem:[#allocation9_spill] sm:$0xff]  ;;  %v14178_v3 = vld [vmem:[#allocation52_spill] sm:$0xff] }
 0x69d   :  { %v3233_v25 = vmul.f32 %v14171_v58, %v3197_v2  ;;  %v3302_v17 = vmul.f32 %v14172_v11, %v10159_v56  ;;  %v3051_v16 = vsel %vm393_vm2, %v14174_v12, %v14173_v38  ;;  %v3245_v30 = vadd.f32 %v3229_v48, %v10545_v43  ;;  %v14176_v42 = vld [vmem:[#allocation57_spill] sm:$0xff]  ;;  %v10700_v24 = vpop.permute.xlu1 %3582  ;;  %v14179_v7 = vld [vmem:[#allocation48_spill] sm:$0xff] }
 0x69e   :  { %v3248_v60 = vadd.f32 %v3232_v59, %v10547_v4  ;;  %v3236_v63 = vmul.f32 %v14171_v58, %v3200_v15  ;;  %v3052_v57 = vsel %vm393_vm2, %v14176_v42, %v14175_v10  ;;  %v3303_v56 = vmul.f32 %v14172_v11, %v10163_v18  ;;  %v10712_v4 = vpop.permute.xlu0 %3588  ;;  %v14180_v2 = vld [vmem:[#allocation44_spill] sm:$0xff] }
 0x69f   :  { %v3304_v37 = vmul.f32 %v14172_v11, %v10185_v23  ;;  %v3307_v43 = vmul.f32 %v14177_v9, %v10219_v47  ;;  %v3047_v58 = vsel %vm393_vm2, %v14173_v38, %v14178_v3  ;;  %v3305_v44 = vmul.f32 %v14172_v11, %v10211_v31  ;;  %v14181_v11 = vld [vmem:[#allocation115_spill] sm:$0xff] }
 0x6a0   :  { %v3306_v53 = vmul.f32 %v14177_v9, %v10215_v21  ;;  %v3065_v18 = vmul.f32 %v3051_v16, %v14132_v14  ;;  %v3048_v23 = vsel %vm393_vm2, %v14175_v10, %v14179_v7  ;;  %v3249_v47 = vadd.f32 %v3233_v25, %v10552_v22 }
 0x6a1   :  { %v3308_v19 = vmul.f32 %v14177_v9, %v10223_v35  ;;  %v3309_v5 = vmul.f32 %v14177_v9, %v10237_v13  ;;  %v3069_v31 = vmul.f32 %v3052_v57, %v14132_v14  ;;  %v3252_v20 = vadd.f32 %v3236_v63, %v10594_v61  ;;  %v10737_v22 = vpop.permute.xlu1 %3590  ;;  %v14183_v63 = vld [vmem:[#allocation8_spill] sm:$0xff] }
 0x6a2   :  { %v3066_v21 = vmul.f32 %v3047_v58, %v14135_v33  ;;  %v3055_v48 = vsel %vm393_vm2, %v14180_v2, %v14174_v12  ;;  %v10735_v59 = vadd.f32 %v3302_v17, %v3245_v30  ;;  %v3070_v35 = vmul.f32 %v3048_v23, %v14135_v33  ;;  %v10748_v25 = vpop.permute.xlu0 %3596  ;;  %v14182_v17 = vld [vmem:[#allocation62_spill] sm:$0xff]  ;;  %v14184_v57 = vld [vmem:[#allocation64_spill] sm:$0xff]  ;;  %v14222_v33 = vld [vmem:[#allocation39_spill] sm:$0xff] }
 0x6a3   :  { %v3043_v13 = vsel %vm393_vm2, %v14178_v3, %v14180_v2  ;;  %v10744_v15 = vadd.f32 %v3303_v56, %v3246_v50  ;;  %v10746_v61 = vadd.f32 %v3307_v43, %v3250_v54  ;;  %v3101_v38 = vmul.f32 %v14181_v11, %v3065_v18  ;;  %v14185_v56 = vld [vmem:[#allocation63_spill] sm:$0xff]  ;;  %v14188_v3 = vld [vmem:[#allocation109_spill] sm:$0xff] }
 0x6a4   :  { %v3056_v12 = vsel %vm393_vm2, %v14182_v17, %v14176_v42  ;;  %v10755_v16 = vadd.f32 %v3304_v37, %v3247_v8  ;;  %v10757_v30 = vadd.f32 %v3305_v44, %v3248_v60  ;;  %v3105_v10 = vmul.f32 %v14183_v63, %v3069_v31  ;;  %v14186_v60 = vld [vmem:[#allocation68_spill] sm:$0xff]  ;;  %v14187_v37 = vld [vmem:[#allocation33_spill] sm:$0xff] }
 0x6a5   :  { %v3064_v50 = vmul.f32 %v3055_v48, %v14136_v26  ;;  %v3044_v54 = vsel %vm393_vm2, %v14179_v7, %v14182_v17  ;;  %v3172_v9 = vsel %vm538_vm3, %v14185_v56, %v14184_v57  ;;  %v3102_v42 = vmul.f32 %v14181_v11, %v3066_v21  ;;  %v10779_v44 = vpop.permute.xlu1 %3598 }
 0x6a6   :  { %v3067_v8 = vmul.f32 %v3043_v13, %v14137_v62  ;;  %v3173_v43 = vsel %vm538_vm3, %v14187_v37, %v14186_v60  ;;  %v3168_v58 = vsel %vm538_vm3, %v14184_v57, %v14188_v3  ;;  %v3106_v18 = vmul.f32 %v14183_v63, %v3070_v35  ;;  %v10787_v21 = vpop.permute.xlu0 %3770  ;;  %v14189_v13 = vld [vmem:[#allocation114_spill] sm:$0xff] }
 0x6a7   :  { %v3068_v7 = vmul.f32 %v3056_v12, %v14136_v26  ;;  %v10783_v23 = vadd.f32 %v3306_v53, %v3249_v47  ;;  %v10785_v31 = vadd.f32 %v3308_v19, %v3251_v36  ;;  %v3071_v2 = vmul.f32 %v3044_v54, %v14137_v62  ;;  %v14190_v62 = vld [vmem:[#allocation65_spill] sm:$0xff] }
 0x6a8   :  { %v3186_v48 = vmul.f32 %v3172_v9, %v14162_v52  ;;  %v3164_v17 = vsel %vm538_vm3, %v14188_v3, %v14189_v13  ;;  %v3176_v35 = vsel %vm538_vm3, %v14189_v13, %v14185_v56  ;;  %v3100_v53 = vmul.f32 %v14181_v11, %v3064_v50 }
 0x6a9   :  { %v3190_v36 = vmul.f32 %v3173_v43, %v14162_v52  ;;  %v3187_v47 = vmul.f32 %v3168_v58, %v14163_v28  ;;  %v10802_v19 = vadd.f32 %v3309_v5, %v3252_v20  ;;  %v3117_v12 = vadd.f32 %v3101_v38, %v10650_v45  ;;  %v10808_v3 = vpop.permute.xlu1 %3775  ;;  %v14191_v20 = vld [vmem:[#allocation75_spill] sm:$0xff]  ;;  %v14192_v43 = vld [vmem:[#allocation78_spill] sm:$0xff] }
 0x6aa   :  { %v3121_v54 = vadd.f32 %v3105_v10, %v10653_v34  ;;  %v3118_v57 = vadd.f32 %v3102_v42, %v10658_v29  ;;  %v3103_v9 = vmul.f32 %v14181_v11, %v3067_v8  ;;  %v3169_v50 = vsel %vm538_vm3, %v14186_v60, %v14190_v62  ;;  %v10820_v34 = vpop.permute.xlu0 %3447  ;;  %v14194_v10 = vld [vmem:[#allocation60_spill] sm:$0xff]  ;;  %v14195_v60 = vld [vmem:[#allocation29_spill] sm:$0xff]  ;;  %v14205_v52 = vld [vmem:[#allocation98_spill] sm:$0xff] }
 0x6ab   :  { %v3185_v56 = vmul.f32 %v3176_v35, %v14166_v6  ;;  %v3188_v5 = vmul.f32 %v3164_v17, %v14167_v27  ;;  %v3368_v45 = vsel %vm779_vm4, %v14192_v43, %v14191_v20  ;;  %14193 = vst [vmem:[#allocation16_spill] sm:$0xff] %v10820_v34  ;;  %v10823_v29 = vadd.f32 %v3106_v18, %v10666_v51  ;;  %v14196_v17 = vld [vmem:[#allocation5_spill] sm:$0xff] }
 0x6ac   :  { %v3104_v11 = vmul.f32 %v14183_v63, %v3068_v7  ;;  %v3107_v38 = vmul.f32 %v14183_v63, %v3071_v2  ;;  %v3222_v42 = vmul.f32 %v14194_v10, %v3186_v48  ;;  %v3116_v8 = vadd.f32 %v3100_v53, %v10669_v1  ;;  %v14197_v7 = vld [vmem:[#allocation15_spill] sm:$0xff] }
 0x6ad   :  { %v3226_v58 = vmul.f32 %v14195_v60, %v3190_v36  ;;  %v3223_v13 = vmul.f32 %v14194_v10, %v3187_v47  ;;  %v3177_v35 = vsel %vm538_vm3, %v14196_v17, %v14187_v37  ;;  %v3119_v51 = vadd.f32 %v3103_v9, %v10672_v41  ;;  %v10842_v2 = vpop.permute.xlu1 %3449  ;;  %v14199_v36 = vld [vmem:[#allocation111_spill] sm:$0xff]  ;;  %v14200_v47 = vld [vmem:[#allocation73_spill] sm:$0xff]  ;;  %v14201_v37 = vld [vmem:[#allocation66_spill] sm:$0xff] }
 0x6ae   :  { %v3191_v18 = vmul.f32 %v3169_v50, %v14163_v28  ;;  %v3165_v63 = vsel %vm538_vm3, %v14190_v62, %v14196_v17  ;;  %v3387_v1 = vmul.f32 %v3368_v45, %v14197_v7  ;;  %14198 = vst [vmem:[#allocation24_spill] sm:$0xff] %v10842_v2  ;;  %v3221_v48 = vmul.f32 %v14194_v10, %v3185_v56  ;;  %v10854_v50 = vpop.permute.xlu0 %3455 }
 0x6af   :  { %v3224_v53 = vmul.f32 %v14194_v10, %v3188_v5  ;;  %v3369_v41 = vsel %vm779_vm4, %v14200_v47, %v14199_v36  ;;  %v3364_v9 = vsel %vm779_vm4, %v14191_v20, %v14201_v37  ;;  %14202 = vst [vmem:[#allocation28_spill] sm:$0xff] %v10854_v50  ;;  %v10857_v62 = vadd.f32 %v3104_v11, %v10675_v32 }
 0x6b0   :  { %v10860_v45 = vadd.f32 %v3107_v38, %v10680_v39  ;;  %v10862_v56 = vadd.f32 %v3222_v42, %v3117_v12  ;;  %v3189_v5 = vmul.f32 %v3177_v35, %v14166_v6  ;;  %v10865_v10 = vadd.f32 %v3226_v58, %v3121_v54  ;;  %v14206_v39 = vld [vmem:[#allocation38_spill] sm:$0xff]  ;;  %v14211_v35 = vld [vmem:[#allocation13_spill] sm:$0xff] }
 0x6b1   :  { %v10867_v17 = vadd.f32 %v3223_v13, %v3118_v57  ;;  %v3192_v28 = vmul.f32 %v3165_v63, %v14167_v27  ;;  %v3365_v20 = vsel %vm779_vm4, %v14199_v36, %v14205_v52  ;;  %v10875_v32 = vmul.f32 %v14195_v60, %v3191_v18  ;;  %v14207_v38 = vld [vmem:[#allocation6_spill] sm:$0xff]  ;;  %v10880_v54 = vpop.permute.xlu1 %3457  ;;  %v14210_v13 = vld [vmem:[#allocation119_spill] sm:$0xff]  ;;  %v14212_v36 = vld [vmem:[#allocation121_spill] sm:$0xff] }
 0x6b2   :  { %14203 = vst [vmem:[#allocation43_spill] sm:$0xff] %v10865_v10  ;;  %v3423_v11 = vmul.f32 %v14206_v39, %v3387_v1  ;;  %v3391_v12 = vmul.f32 %v3369_v41, %v14197_v7  ;;  %v3388_v42 = vmul.f32 %v3364_v9, %v14207_v38  ;;  %14208 = vst [vmem:[#allocation69_spill] sm:$0xff] %v10880_v54  ;;  %v10894_v27 = vpop.permute.xlu0 %3463  ;;  %v14214_v41 = vld [vmem:[#allocation122_spill] sm:$0xff]  ;;  %v14220_v6 = vld [vmem:[#allocation97_spill] sm:$0xff] }
 0x6b3   :  { %14204 = vst [vmem:[#allocation21_spill] sm:$0xff] %v10867_v17  ;;  %v10882_v57 = vadd.f32 %v3221_v48, %v3116_v8  ;;  %v10884_v58 = vadd.f32 %v3224_v53, %v3119_v51  ;;  %v10888_v63 = vmul.f32 %v14211_v35, %v14210_v13  ;;  %v10892_v18 = vmul.f32 %v14211_v35, %v14212_v36  ;;  %v14216_v51 = vld [vmem:[#allocation71_spill] sm:$0xff]  ;;  %v14232_v54 = vld [vmem:[#allocation134_spill] sm:$0xff] }
 0x6b4   :  { %14213 = vst [vmem:[#allocation110_spill] sm:$0xff] %v10894_v27  ;;  %v10897_v1 = vmul.f32 %v14195_v60, %v3189_v5  ;;  %v10901_v9 = vmul.f32 %v14211_v35, %v14214_v41  ;;  %v3392_v8 = vmul.f32 %v3365_v20, %v14207_v38  ;;  %v3360_v48 = vsel %vm779_vm4, %v14201_v37, %v14216_v51  ;;  %v14217_v13 = vld [vmem:[#allocation123_spill] sm:$0xff]  ;;  %v14219_v5 = vld [vmem:[#allocation124_spill] sm:$0xff] }
 0x6b5   :  { %14209 = vst [vmem:[#allocation47_spill] sm:$0xff] %v10884_v58  ;;  %v10909_v53 = vmul.f32 %v14195_v60, %v3192_v28  ;;  %v10913_v36 = vmul.f32 %v14211_v35, %v14217_v13  ;;  %v10917_v26 = vmul.f32 %v14220_v6, %v14219_v5  ;;  %v3372_v20 = vsel %vm779_vm4, %v14216_v51, %v14192_v43  ;;  %v14223_v60 = vld [vmem:[#allocation117_spill] sm:$0xff]  ;;  %v10930_v13 = vpop.permute.xlu1 %3465  ;;  %v14225_v5 = vld [vmem:[#allocation10_spill] sm:$0xff]  ;;  %v14226_v51 = vld [vmem:[#allocation132_spill] sm:$0xff] }
 0x6b6   :  { %14215 = vst [vmem:[#allocation7_spill] sm:$0xff] %v10901_v9  ;;  %v3439_v41 = vadd.f32 %v3423_v11, %v10735_v59  ;;  %v3427_v37 = vmul.f32 %v14222_v33, %v3391_v12  ;;  %v3424_v28 = vmul.f32 %v14206_v39, %v3388_v42  ;;  %v3361_v35 = vsel %vm779_vm4, %v14205_v52, %v14223_v60  ;;  %v14227_v59 = vld [vmem:[#allocation130_spill] sm:$0xff]  ;;  %v14228_v12 = vld [vmem:[#allocation133_spill] sm:$0xff]  ;;  %v14229_v42 = vld [vmem:[#allocation131_spill] sm:$0xff]  ;;  %v10945_v52 = vpop.permute.xlu0 %3471 }
 0x6b7   :  { %14218 = vst [vmem:[#allocation67_spill] sm:$0xff] %v10913_v36  ;;  %14221 = vst [vmem:[#allocation11_spill] sm:$0xff] %v10917_v26  ;;  %v3389_v14 = vmul.f32 %v3360_v48, %v14225_v5  ;;  %v3373_v43 = vsel %vm779_vm4, %v14223_v60, %v14200_v47  ;;  %v3489_v11 = vsel %vm924_vm5, %v14227_v59, %v14226_v51  ;;  %v14231_v48 = vld [vmem:[#allocation17_spill] sm:$0xff]  ;;  %v14233_v60 = vld [vmem:[#allocation135_spill] sm:$0xff] }
 0x6b8   :  { %14224 = vst [vmem:[#allocation70_spill] sm:$0xff] %v10930_v13  ;;  %v3490_v27 = vsel %vm924_vm5, %v14229_v42, %v14228_v12  ;;  %14230 = vst [vmem:[#allocation108_spill] sm:$0xff] %v10945_v52  ;;  %v3428_v13 = vmul.f32 %v14222_v33, %v3392_v8  ;;  %v3390_v2 = vmul.f32 %v3372_v20, %v14231_v48  ;;  %v14234_v26 = vld [vmem:[#allocation136_spill] sm:$0xff]  ;;  %v14235_v20 = vld [vmem:[#allocation137_spill] sm:$0xff] }
 0x6b9   :  { %v3485_v47 = vsel %vm924_vm5, %v14226_v51, %v14232_v54  ;;  %v3486_v34 = vsel %vm924_vm5, %v14228_v12, %v14233_v60  ;;  %v3393_v50 = vmul.f32 %v3361_v35, %v14225_v5  ;;  %v3481_v52 = vsel %vm924_vm5, %v14232_v54, %v14234_v26  ;;  %v14236_v12 = vld [vmem:[#allocation22_spill] sm:$0xff]  ;;  %v10977_v5 = vpop.permute.xlu1 %3473  ;;  %v14237_v9 = vld [vmem:[#allocation25_spill] sm:$0xff] }
 0x6ba   :  { %v3493_v8 = vsel %vm924_vm5, %v14234_v26, %v14227_v59  ;;  %v3482_v51 = vsel %vm924_vm5, %v14233_v60, %v14235_v20  ;;  %v3394_v36 = vmul.f32 %v3373_v43, %v14231_v48  ;;  %v3508_v58 = vmul.f32 %v3489_v11, %v14236_v12  ;;  %v10983_v43 = vpop.permute.xlu0 %3639  ;;  %v14240_v48 = vld [vmem:[#allocation32_spill] sm:$0xff] }
 0x6bb   :  { %v3512_v35 = vmul.f32 %v3490_v27, %v14236_v12  ;;  %v3494_v54 = vsel %vm924_vm5, %v14235_v20, %v14229_v42  ;;  %v3443_v26 = vadd.f32 %v3427_v37, %v10783_v23  ;;  %v3425_v59 = vmul.f32 %v14206_v39, %v3389_v14  ;;  %14238 = vst [vmem:[#allocation34_spill] sm:$0xff] %v10983_v43  ;;  %v14239_v27 = vld [vmem:[#allocation31_spill] sm:$0xff] }
 0x6bc   :  { %v3509_v17 = vmul.f32 %v3485_v47, %v14237_v9  ;;  %v3513_v60 = vmul.f32 %v3486_v34, %v14237_v9  ;;  %v3440_v11 = vadd.f32 %v3424_v28, %v10744_v15  ;;  %v3510_v12 = vmul.f32 %v3481_v52, %v14239_v27  ;;  %v14241_v47 = vld [vmem:[#allocation118_spill] sm:$0xff]  ;;  %v14242_v9 = vld [vmem:[#allocation120_spill] sm:$0xff] }
 0x6bd   :  { %v3511_v10 = vmul.f32 %v3493_v8, %v14240_v48  ;;  %v3514_v42 = vmul.f32 %v3482_v51, %v14239_v27  ;;  %v3444_v20 = vadd.f32 %v3428_v13, %v10746_v61  ;;  %v3426_v23 = vmul.f32 %v14206_v39, %v3390_v2  ;;  %v11000_v52 = vpop.permute.xlu1 %3644 }
 0x6be   :  { %v3429_v14 = vmul.f32 %v14222_v33, %v3393_v50  ;;  %v3515_v37 = vmul.f32 %v3494_v54, %v14240_v48  ;;  %v3430_v34 = vmul.f32 %v14222_v33, %v3394_v36  ;;  %v3544_v43 = vmul.f32 %v14241_v47, %v3508_v58  ;;  %14243 = vst [vmem:[#allocation112_spill] sm:$0xff] %v11000_v52  ;;  %v3694_v39 = vpop.permute.xlu0 %3693  ;;  %v14245_v48 = vld [vmem:[#allocation35_spill] sm:$0xff] }
 0x6bf   :  { %v3548_v15 = vmul.f32 %v14242_v9, %v3512_v35  ;;  %v3610_v28 = vsel %vm1069_vm6, %v10643_v46, %v10677_v49  ;;  %v3441_v61 = vadd.f32 %v3425_v59, %v10755_v16  ;;  %v3545_v2 = vmul.f32 %v14241_v47, %v3509_v17  ;;  %v14244_v35 = vld [vmem:[#allocation30_spill] sm:$0xff] }
 0x6c0   :  { %v3549_v50 = vmul.f32 %v14242_v9, %v3513_v60  ;;  %v3611_v33 = vsel %vm1069_vm6, %v10663_v40, %v10700_v24  ;;  %v3546_v58 = vmul.f32 %v14241_v47, %v3510_v12  ;;  %v3547_v36 = vmul.f32 %v14241_v47, %v3511_v10 }
 0x6c1   :  { %v3550_v13 = vmul.f32 %v14242_v9, %v3514_v42  ;;  %v3606_v16 = vsel %vm1069_vm6, %v10677_v49, %v10712_v4  ;;  %v3442_v17 = vadd.f32 %v3426_v23, %v10757_v30  ;;  %v3445_v8 = vadd.f32 %v3429_v14, %v10785_v31  ;;  %v3696_v42 = vpop.permute.xlu1 %3695  ;;  %v14248_v14 = vld [vmem:[#allocation107_spill] sm:$0xff] }
 0x6c2   :  { %v3551_v51 = vmul.f32 %v14242_v9, %v3515_v37  ;;  %v3629_v54 = vmul.f32 %v3610_v28, %v14244_v35  ;;  %v3446_v59 = vadd.f32 %v3430_v34, %v10802_v19  ;;  %v3560_v12 = vadd.f32 %v3544_v43, %v3439_v41  ;;  %v3702_v30 = vpop.permute.xlu0 %3701 }
 0x6c3   :  { %v3564_v60 = vadd.f32 %v3548_v15, %v3443_v26  ;;  %v3633_v10 = vmul.f32 %v3611_v33, %v14244_v35  ;;  %v3561_v47 = vadd.f32 %v3545_v2, %v3440_v11  ;;  %v3565_v52 = vadd.f32 %v3549_v50, %v3444_v20  ;;  %v14246_v26 = vld [vmem:[#allocation56_spill] sm:$0xff]  ;;  %v14247_v11 = vld [vmem:[#allocation138_spill] sm:$0xff] }
 0x6c4   :  { %v3630_v27 = vmul.f32 %v3606_v16, %v14245_v48  ;;  %v3607_v49 = vsel %vm1069_vm6, %v10700_v24, %v10737_v22  ;;  %v3562_v31 = vadd.f32 %v3546_v58, %v3441_v61  ;;  %v3563_v9 = vadd.f32 %v3547_v36, %v3442_v17  ;;  %v14249_v2 = vld [vmem:[#allocation36_spill] sm:$0xff] }
 0x6c5   :  { %v3566_v23 = vadd.f32 %v3550_v13, %v3445_v8  ;;  %v3602_v19 = vsel %vm1069_vm6, %v10712_v4, %v10748_v25  ;;  %v3567_v41 = vadd.f32 %v3551_v51, %v3446_v59  ;;  %v3366_v43 = vsel %vm779_vm4, %v14246_v26, %v10491_v0  ;;  %v3704_v28 = vpop.permute.xlu1 %3703  ;;  %v14251_v13 = vld [vmem:[#allocation53_spill] sm:$0xff] }
 0x6c6   :  { %v3665_v20 = vmul.f32 %v14247_v11, %v3629_v54  ;;  %v3614_v24 = vsel %vm1069_vm6, %v10748_v25, %v10643_v46  ;;  %v3669_v37 = vmul.f32 %v14248_v14, %v3633_v10  ;;  %v3634_v34 = vmul.f32 %v3607_v49, %v14245_v48  ;;  %v3710_v33 = vpop.permute.xlu0 %3709 }
 0x6c7   :  { %v3603_v4 = vsel %vm1069_vm6, %v10737_v22, %v10779_v44  ;;  %v3731_v15 = vsel %vm1214_vm7, %v3694_v39, %v3702_v30  ;;  %v3666_v61 = vmul.f32 %v14247_v11, %v3630_v27  ;;  %v3631_v50 = vmul.f32 %v3602_v19, %v14249_v2  ;;  %v14250_v22 = vld [vmem:[#allocation37_spill] sm:$0xff] }
 0x6c8   :  { %v3615_v46 = vsel %vm1069_vm6, %v10779_v44, %v10663_v40  ;;  %v3732_v25 = vsel %vm1214_vm7, %v3696_v42, %v3704_v28  ;;  %v11057_v58 = vmul.f32 %v3366_v43, %v14197_v7  ;;  %v3632_v36 = vmul.f32 %v3614_v24, %v14250_v22  ;;  %v14252_v40 = vld [vmem:[#allocation49_spill] sm:$0xff] }
 0x6c9   :  { %v3754_v16 = vmul.f32 %v3732_v25, %v14251_v13  ;;  %v3727_v27 = vsel %vm1214_vm7, %v3702_v30, %v3710_v33  ;;  %v3681_v17 = vadd.f32 %v3665_v20, %v3560_v12  ;;  %v3635_v8 = vmul.f32 %v3603_v4, %v14249_v2  ;;  %v3712_v19 = vpop.permute.xlu1 %3711 }
 0x6ca   :  { %v3750_v51 = vmul.f32 %v3731_v15, %v14251_v13  ;;  %v3751_v44 = vmul.f32 %v3727_v27, %v14252_v40  ;;  %v3685_v54 = vadd.f32 %v3669_v37, %v3564_v60  ;;  %v3670_v59 = vmul.f32 %v14248_v14, %v3634_v34  ;;  %v3718_v30 = vpop.permute.xlu0 %3717 }
 0x6cb   :  { %v3636_v10 = vmul.f32 %v3615_v46, %v14250_v22  ;;  %v3790_v49 = vmul.f32 %v10808_v3, %v3754_v16  ;;  %v3667_v43 = vmul.f32 %v14247_v11, %v3631_v50  ;;  %v3728_v12 = vsel %vm1214_vm7, %v3704_v28, %v3712_v19  ;;  %v14253_v46 = vld [vmem:[#allocation54_spill] sm:$0xff] }
 0x6cc   :  { %v3787_v24 = vmul.f32 %v10787_v21, %v3751_v44  ;;  %v3682_v20 = vadd.f32 %v3666_v61, %v3561_v47  ;;  %v3668_v4 = vmul.f32 %v14247_v11, %v3632_v36  ;;  %v3755_v60 = vmul.f32 %v3728_v12, %v14252_v40  ;;  %v14254_v16 = vld [vmem:[#allocation50_spill] sm:$0xff] }
 0x6cd   :  { %v3723_v37 = vsel %vm1214_vm7, %v3710_v33, %v3718_v30  ;;  %v3735_v34 = vsel %vm1214_vm7, %v3718_v30, %v3694_v39  ;;  %v3671_v15 = vmul.f32 %v14248_v14, %v3635_v8  ;;  %v3786_v50 = vmul.f32 %v10787_v21, %v3750_v51  ;;  %v3720_v36 = vpop.permute.xlu1 %3719 }
 0x6ce   :  { %v3752_v25 = vmul.f32 %v3723_v37, %v14253_v46  ;;  %v3753_v28 = vmul.f32 %v3735_v34, %v14254_v16  ;;  %v3672_v47 = vmul.f32 %v14248_v14, %v3636_v10  ;;  %v3806_v61 = vadd.f32 %v3790_v49, %v3685_v54  ;;  %v11090_v51 = vpop.permute.xlu0 %3568 }
 0x6cf   :  { %v3791_v11 = vmul.f32 %v10808_v3, %v3755_v60  ;;  %v3686_v27 = vadd.f32 %v3670_v59, %v3565_v52  ;;  %v3724_v39 = vsel %vm1214_vm7, %v3712_v19, %v3720_v36  ;;  %v3736_v8 = vsel %vm1214_vm7, %v3720_v36, %v3696_v42  ;;  %v14260_v36 = vld [vmem:[#allocation59_spill] sm:$0xff] }
 0x6d0   :  { %v3788_v33 = vmul.f32 %v10787_v21, %v3752_v25  ;;  %v3803_v44 = vadd.f32 %v3787_v24, %v3682_v20  ;;  %v3789_v12 = vmul.f32 %v10787_v21, %v3753_v28  ;;  %v3756_v14 = vmul.f32 %v3724_v39, %v14253_v46  ;;  %v14255_v24 = vld [vmem:[#allocation126_spill] sm:$0xff]  ;;  %v14256_v20 = vld [vmem:[#allocation127_spill] sm:$0xff] }
 0x6d1   :  { %v3757_v54 = vmul.f32 %v3736_v8, %v14254_v16  ;;  %v3807_v10 = vadd.f32 %v3791_v11, %v3686_v27  ;;  %v3683_v49 = vadd.f32 %v3667_v43, %v3562_v31  ;;  %v3687_v52 = vadd.f32 %v3671_v15, %v3566_v23  ;;  %v11097_v37 = vpop.permute.xlu1 %3570  ;;  %v14257_v28 = vld [vmem:[#allocation42_spill] sm:$0xff]  ;;  %v14258_v11 = vld [vmem:[#allocation45_spill] sm:$0xff]  ;;  %v14262_v39 = vld [vmem:[#allocation55_spill] sm:$0xff] }
 0x6d2   :  { %v3802_v59 = vadd.f32 %v3786_v50, %v3681_v17  ;;  %v3684_v30 = vadd.f32 %v3668_v4, %v3563_v9  ;;  %v3792_v60 = vmul.f32 %v10808_v3, %v3756_v14  ;;  %v3688_v34 = vadd.f32 %v3672_v47, %v3567_v41  ;;  %v11107_v9 = vpop.permute.xlu0 %3576  ;;  %v14259_v50 = vld [vmem:[#allocation128_spill] sm:$0xff]  ;;  %v14263_v14 = vld [vmem:[#allocation43_spill] sm:$0xff] }
 0x6d3   :  { %v3793_v19 = vmul.f32 %v10808_v3, %v3757_v54  ;;  %v3825_v42 = vpack.c.bf16 %v3807_v10, %v3803_v44  ;;  %v3299_v21 = vmul.f32 %v14220_v6, %v14255_v24  ;;  %v3300_v25 = vmul.f32 %v14220_v6, %v14256_v20  ;;  %v14264_v10 = vld [vmem:[#allocation21_spill] sm:$0xff]  ;;  %v14270_v24 = vld [vmem:[#allocation23_spill] sm:$0xff] }
 0x6d4   :  { %v3367_v31 = vsel %vm779_vm4, %v14258_v11, %v14257_v28  ;;  %v3824_v23 = vpack.c.bf16 %v3806_v61, %v3802_v59  ;;  %v3804_v17 = vadd.f32 %v3788_v33, %v3683_v49  ;;  %v3808_v3 = vadd.f32 %v3792_v60, %v3687_v52  ;;  %v14261_v61 = vld [vmem:[#allocation125_spill] sm:$0xff]  ;;  %v14265_v49 = vld [vmem:[#allocation7_spill] sm:$0xff]  ;;  %v14266_v59 = vld [vmem:[#allocation46_spill] sm:$0xff] }
 0x6d5   :  { %3876 = vmatprep.subr.bf16.mxu0 %v3825_v42  ;;  %v3805_v43 = vadd.f32 %v3789_v12, %v3684_v30  ;;  %v3809_v4 = vadd.f32 %v3793_v19, %v3688_v34  ;;  %v3241_v41 = vadd.f32 %v10897_v1, %v10857_v62  ;;  %v3244_v15 = vadd.f32 %v10909_v53, %v10860_v45  ;;  %v11125_v1 = vpop.permute.xlu1 %3578  ;;  %v14269_v19 = vld [vmem:[#allocation11_spill] sm:$0xff] }
 0x6d6   :  { %v3301_v47 = vmul.f32 %v14220_v6, %v14259_v50  ;;  %v3362_v27 = vsel %vm779_vm4, %v10491_v0, %v14260_v36  ;;  %3877 = vmatpush1.bf16.msra.mxu0 %v3824_v23  ;;  %v3415_v33 = vmul.f32 %v14261_v61, %v11057_v58  ;;  %v3363_v62 = vsel %vm779_vm4, %v14257_v28, %v14262_v39  ;;  %v11134_v44 = vpop.permute.xlu0 %3584  ;;  %v14271_v28 = vld [vmem:[#allocation129_spill] sm:$0xff]  ;;  %v14272_v23 = vld [vmem:[#allocation10_spill] sm:$0xff] }
 0x6d7   :  { %v3827_v45 = vpack.c.bf16 %v3809_v4, %v3805_v43  ;;  %v3826_v53 = vpack.c.bf16 %v3808_v3, %v3804_v17  ;;  %v3243_v6 = vadd.f32 %v10875_v32, %v10823_v29  ;;  %v3310_v8 = vadd.f32 %v10888_v63, %v10882_v57  ;;  %v14267_v57 = vld [vmem:[#allocation47_spill] sm:$0xff]  ;;  %v14274_v3 = vld [vmem:[#allocation16_spill] sm:$0xff] }
 0x6d8   :  { %v3383_v0 = vmul.f32 %v3367_v31, %v14197_v7  ;;  %v3311_v58 = vadd.f32 %v10892_v18, %v10862_v56  ;;  %v3380_v12 = vmul.f32 %v3362_v27, %v14207_v38  ;;  %v3315_v54 = vadd.f32 %v3299_v21, %v14263_v14  ;;  %v14268_v63 = vld [vmem:[#allocation67_spill] sm:$0xff] }
 0x6d9   :  { %v3312_v52 = vadd.f32 %v14265_v49, %v14264_v10  ;;  %v3358_v29 = vsel %vm779_vm4, %v14260_v36, %v14266_v59  ;;  %3929 = vmatprep.subr.bf16.mxu1 %v3827_v45  ;;  %v3384_v32 = vmul.f32 %v3363_v62, %v14207_v38  ;;  %v3313_v56 = vadd.f32 %v14268_v63, %v14267_v57  ;;  %v11156_v20 = vpop.permute.xlu1 %3586  ;;  %v14277_v36 = vld [vmem:[#allocation24_spill] sm:$0xff]  ;;  %v14279_v45 = vld [vmem:[#allocation70_spill] sm:$0xff]  ;;  %v14282_v63 = vld [vmem:[#allocation25_spill] sm:$0xff] }
 0x6da   :  { %v3370_v18 = vsel %vm779_vm4, %v14266_v59, %v14246_v26  ;;  %v3316_v30 = vadd.f32 %v3300_v25, %v3243_v6  ;;  %3930 = vmatpush1.bf16.msra.mxu1 %v3826_v53  ;;  %v3431_v60 = vadd.f32 %v3415_v33, %v3310_v8  ;;  %v3314_v42 = vadd.f32 %v14269_v19, %v3241_v41  ;;  %v14273_v25 = vld [vmem:[#allocation28_spill] sm:$0xff]  ;;  %v11168_v4 = vpop.permute.xlu0 %3592  ;;  %v14278_v33 = vld [vmem:[#allocation110_spill] sm:$0xff] }
 0x6db   :  { %v3317_v34 = vadd.f32 %v3301_v47, %v3244_v15  ;;  %v3359_v21 = vsel %vm779_vm4, %v14262_v39, %v14270_v24  ;;  %v3419_v31 = vmul.f32 %v14271_v28, %v3383_v0  ;;  %v3381_v17 = vmul.f32 %v3358_v29, %v14272_v23  ;;  %v14275_v15 = vld [vmem:[#allocation17_spill] sm:$0xff]  ;;  %v14280_v6 = vld [vmem:[#allocation108_spill] sm:$0xff] }
 0x6dc   :  { %v3371_v26 = vsel %vm779_vm4, %v14270_v24, %v14258_v11  ;;  %v3487_v43 = vsel %vm924_vm5, %v14274_v3, %v14273_v25  ;;  %v3416_v41 = vmul.f32 %v14261_v61, %v3380_v12  ;;  %v3382_v50 = vmul.f32 %v3370_v18, %v14275_v15  ;;  %v14276_v47 = vld [vmem:[#allocation69_spill] sm:$0xff]  ;;  %v14281_v12 = vld [vmem:[#allocation22_spill] sm:$0xff] }
 0x6dd   :  { %v3488_v27 = vsel %vm924_vm5, %v14277_v36, %v14276_v47  ;;  %v3483_v11 = vsel %vm924_vm5, %v14273_v25, %v14278_v33  ;;  %v3420_v39 = vmul.f32 %v14271_v28, %v3384_v32  ;;  %v3385_v62 = vmul.f32 %v3359_v21, %v14272_v23  ;;  %v3595_v59 = vpop.permute.xlu1 %3594  ;;  %v14283_v25 = vld [vmem:[#allocation31_spill] sm:$0xff] }
 0x6de   :  { %v3484_v53 = vsel %vm924_vm5, %v14276_v47, %v14279_v45  ;;  %v3479_v8 = vsel %vm924_vm5, %v14278_v33, %v14280_v6  ;;  %v3386_v0 = vmul.f32 %v3371_v26, %v14275_v15  ;;  %v3500_v14 = vmul.f32 %v3487_v43, %v14281_v12  ;;  %v11203_v19 = vpop.permute.xlu0 %3760  ;;  %v14284_v47 = vld [vmem:[#allocation32_spill] sm:$0xff] }
 0x6df   :  { %v3491_v10 = vsel %vm924_vm5, %v14280_v6, %v14274_v3  ;;  %v3480_v49 = vsel %vm924_vm5, %v14279_v45, %v10977_v5  ;;  %v3435_v29 = vadd.f32 %v3419_v31, %v3314_v42  ;;  %v3417_v32 = vmul.f32 %v14261_v61, %v3381_v17 }
 0x6e0   :  { %v3504_v57 = vmul.f32 %v3488_v27, %v14281_v12  ;;  %v3501_v18 = vmul.f32 %v3483_v11, %v14282_v63  ;;  %v3432_v24 = vadd.f32 %v3416_v41, %v3311_v58  ;;  %v3418_v21 = vmul.f32 %v14261_v61, %v3382_v50  ;;  %v14285_v41 = vld [vmem:[#allocation40_spill] sm:$0xff]  ;;  %v14286_v11 = vld [vmem:[#allocation41_spill] sm:$0xff] }
 0x6e1   :  { %v3505_v26 = vmul.f32 %v3484_v53, %v14282_v63  ;;  %v3502_v3 = vmul.f32 %v3479_v8, %v14283_v25  ;;  %v3436_v43 = vadd.f32 %v3420_v39, %v3315_v54  ;;  %v3503_v33 = vmul.f32 %v3491_v10, %v14284_v47  ;;  %v11221_v50 = vpop.permute.xlu1 %3765  ;;  %v5596_v63 = vld [vmem:[%s12924_s2 + $0x400] sm:$0xff] }
 0x6e2   :  { %v3492_v42 = vsel %vm924_vm5, %v10977_v5, %v14277_v36  ;;  %v3506_v31 = vmul.f32 %v3480_v49, %v14283_v25  ;;  %v3421_v17 = vmul.f32 %v14271_v28, %v3385_v62  ;;  %v3422_v58 = vmul.f32 %v14271_v28, %v3386_v0  ;;  %v3690_v28 = vpop.permute.xlu0 %3689  ;;  %v5597_v25 = vld [vmem:[%s12924_s2 + $0x408] sm:$0xff] }
 0x6e3   :  { %v3536_v61 = vmul.f32 %v14285_v41, %v3500_v14  ;;  %v3608_v54 = vsel %vm1069_vm6, %v11090_v51, %v11107_v9  ;;  %v3433_v27 = vadd.f32 %v3417_v32, %v3312_v52  ;;  %v3540_v39 = vmul.f32 %v14286_v11, %v3504_v57 }
 0x6e4   :  { %v3537_v5 = vmul.f32 %v14285_v41, %v3501_v18  ;;  %v3609_v36 = vsel %vm1069_vm6, %v11097_v37, %v11125_v1  ;;  %v3541_v62 = vmul.f32 %v14286_v11, %v3505_v26  ;;  %v3538_v45 = vmul.f32 %v14285_v41, %v3502_v3 }
 0x6e5   :  { %v3507_v53 = vmul.f32 %v3492_v42, %v14284_v47  ;;  %v3604_v52 = vsel %vm1069_vm6, %v11107_v9, %v11134_v44  ;;  %v3434_v6 = vadd.f32 %v3418_v21, %v3313_v56  ;;  %v3539_v8 = vmul.f32 %v14285_v41, %v3503_v33  ;;  %v3692_v18 = vpop.permute.xlu1 %3691 }
 0x6e6   :  { %v3542_v0 = vmul.f32 %v14286_v11, %v3506_v31  ;;  %v3621_v14 = vmul.f32 %v3608_v54, %v14244_v35  ;;  %v3437_v10 = vadd.f32 %v3421_v17, %v3316_v30  ;;  %v3438_v49 = vadd.f32 %v3422_v58, %v3317_v34  ;;  %v3698_v56 = vpop.permute.xlu0 %3697 }
 0x6e7   :  { %v3552_v32 = vadd.f32 %v3536_v61, %v3431_v60  ;;  %v3625_v57 = vmul.f32 %v3609_v36, %v14244_v35  ;;  %v3556_v26 = vadd.f32 %v3540_v39, %v3435_v29  ;;  %v3553_v3 = vadd.f32 %v3537_v5, %v3432_v24  ;;  %v14287_v29 = vld [vmem:[#allocation34_spill] sm:$0xff] }
 0x6e8   :  { %v3622_v42 = vmul.f32 %v3604_v52, %v14245_v48  ;;  %v3605_v9 = vsel %vm1069_vm6, %v11125_v1, %v11156_v20  ;;  %v3557_v21 = vadd.f32 %v3541_v62, %v3436_v43  ;;  %v3554_v33 = vadd.f32 %v3538_v45, %v3433_v27  ;;  %v14288_v1 = vld [vmem:[#allocation112_spill] sm:$0xff] }
 0x6e9   :  { %v3543_v31 = vmul.f32 %v14286_v11, %v3507_v53  ;;  %v3600_v30 = vsel %vm1069_vm6, %v11134_v44, %v11168_v4  ;;  %v3555_v60 = vadd.f32 %v3539_v8, %v3434_v6  ;;  %v3558_v34 = vadd.f32 %v3542_v0, %v3437_v10  ;;  %v3700_v61 = vpop.permute.xlu1 %3699 }
 0x6ea   :  { %v3657_v24 = vmul.f32 %v14287_v29, %v3621_v14  ;;  %v3612_v17 = vsel %vm1069_vm6, %v11168_v4, %v11090_v51  ;;  %v3661_v58 = vmul.f32 %v14288_v1, %v3625_v57  ;;  %v3626_v43 = vmul.f32 %v3605_v9, %v14245_v48  ;;  %v3706_v11 = vpop.permute.xlu0 %3705  ;;  %v5602_v48 = vld [vmem:[%s12924_s2 + $0x430] sm:$0xff] }
 0x6eb   :  { %v3601_v41 = vsel %vm1069_vm6, %v11156_v20, %v3595_v59  ;;  %v3729_v44 = vsel %vm1214_vm7, %v3690_v28, %v3698_v56  ;;  %v3658_v54 = vmul.f32 %v14287_v29, %v3622_v42  ;;  %v3623_v27 = vmul.f32 %v3600_v30, %v14249_v2 }
 0x6ec   :  { %v3613_v51 = vsel %vm1069_vm6, %v3595_v59, %v11097_v37  ;;  %v3730_v4 = vsel %vm1214_vm7, %v3692_v18, %v3700_v61  ;;  %v3559_v39 = vadd.f32 %v3543_v31, %v3438_v49  ;;  %v3624_v5 = vmul.f32 %v3612_v17, %v14250_v22 }
 0x6ed   :  { %v3746_v20 = vmul.f32 %v3730_v4, %v14251_v13  ;;  %v3725_v36 = vsel %vm1214_vm7, %v3698_v56, %v3706_v11  ;;  %v3673_v62 = vadd.f32 %v3657_v24, %v3552_v32  ;;  %v3627_v45 = vmul.f32 %v3601_v41, %v14249_v2  ;;  %v3708_v0 = vpop.permute.xlu1 %3707  ;;  %v5603_v2 = vld [vmem:[%s12924_s2 + $0x438] sm:$0xff] }
 0x6ee   :  { %v3742_v53 = vmul.f32 %v3729_v44, %v14251_v13  ;;  %v3743_v52 = vmul.f32 %v3725_v36, %v14252_v40  ;;  %v3677_v37 = vadd.f32 %v3661_v58, %v3556_v26  ;;  %v3662_v59 = vmul.f32 %v14288_v1, %v3626_v43  ;;  %v3714_v32 = vpop.permute.xlu0 %3713 }
 0x6ef   :  { %v3628_v6 = vmul.f32 %v3613_v51, %v14250_v22  ;;  %v3782_v8 = vmul.f32 %v11221_v50, %v3746_v20  ;;  %v3659_v14 = vmul.f32 %v14287_v29, %v3623_v27  ;;  %v3726_v49 = vsel %vm1214_vm7, %v3700_v61, %v3708_v0 }
 0x6f0   :  { %v3779_v10 = vmul.f32 %v11203_v19, %v3743_v52  ;;  %v3674_v57 = vadd.f32 %v3658_v54, %v3553_v3  ;;  %v3660_v42 = vmul.f32 %v14287_v29, %v3624_v5  ;;  %v3747_v26 = vmul.f32 %v3726_v49, %v14252_v40 }
 0x6f1   :  { %v3721_v9 = vsel %vm1214_vm7, %v3706_v11, %v3714_v32  ;;  %v3733_v56 = vsel %vm1214_vm7, %v3714_v32, %v3690_v28  ;;  %v3663_v31 = vmul.f32 %v14288_v1, %v3627_v45  ;;  %v3778_v30 = vmul.f32 %v11203_v19, %v3742_v53  ;;  %v3716_v43 = vpop.permute.xlu1 %3715 }
 0x6f2   :  { %v3744_v24 = vmul.f32 %v3721_v9, %v14253_v46  ;;  %v3745_v17 = vmul.f32 %v3733_v56, %v14254_v16  ;;  %v3664_v3 = vmul.f32 %v14288_v1, %v3628_v6  ;;  %v3798_v58 = vadd.f32 %v3782_v8, %v3677_v37  ;;  %v3841_v32 = vpop.permute.xlu0 %3840 }
 0x6f3   :  { %v3783_v29 = vmul.f32 %v11221_v50, %v3747_v26  ;;  %v3678_v41 = vadd.f32 %v3662_v59, %v3557_v21  ;;  %v3722_v28 = vsel %vm1214_vm7, %v3708_v0, %v3716_v43  ;;  %v3734_v61 = vsel %vm1214_vm7, %v3716_v43, %v3692_v18 }
 0x6f4   :  { %v3780_v44 = vmul.f32 %v11203_v19, %v3744_v24  ;;  %v3795_v54 = vadd.f32 %v3779_v10, %v3674_v57  ;;  %v3781_v27 = vmul.f32 %v11203_v19, %v3745_v17  ;;  %v3748_v51 = vmul.f32 %v3722_v28, %v14253_v46  ;;  %v5650_v19 = vld [vmem:[%s12926_s4 + $0x20] sm:$0xff]  }
 0x6f5   :  { %v3749_v1 = vmul.f32 %v3734_v61, %v14254_v16  ;;  %v3799_v4 = vadd.f32 %v3783_v29, %v3678_v41  ;;  %v3675_v11 = vadd.f32 %v3659_v14, %v3554_v33  ;;  %v3679_v5 = vadd.f32 %v3663_v31, %v3558_v34  ;;  %v3846_v31 = vpop.permute.xlu1 %3845 }
 0x6f6   :  { %v3794_v20 = vadd.f32 %v3778_v30, %v3673_v62  ;;  %v3676_v21 = vadd.f32 %v3660_v42, %v3555_v60  ;;  %v3784_v36 = vmul.f32 %v11221_v50, %v3748_v51  ;;  %v3680_v52 = vadd.f32 %v3664_v3, %v3559_v39  ;;  %v5651_v60 = vld [vmem:[%s12926_s4 + $0x28] sm:$0xff]  }
 0x6f7   :  { %v3785_v45 = vmul.f32 %v11221_v50, %v3749_v1  ;;  %v3821_v53 = vpack.c.bf16 %v3799_v4, %v3795_v54  ;;  %v3796_v18 = vadd.f32 %v3780_v44, %v3675_v11  ;;  %v14289_v50 = vmov 0  }
 0x6f8   :  { %v3820_v37 = vpack.c.bf16 %v3798_v58, %v3794_v20  ;;  %v3800_v59 = vadd.f32 %v3784_v36, %v3679_v5  ;;  %v3797_v6 = vadd.f32 %v3781_v27, %v3676_v21 }
 0x6f9   :  { %3878 = vmatprep.subr.bf16.mxu0 %v3821_v53  ;;  %v3801_v8 = vadd.f32 %v3785_v45, %v3680_v52  ;;  %v3831_v45 = vpop.permute.xlu0 %3830  ;;  %v3836_v53 = vpop.permute.xlu1 %3835  ;;  %v5572_v52 = vld [vmem:[%s12925_s3 + $0x60] sm:$0xff] }
 0x6fa   :  { %3879 = vmatpush1.bf16.msra.mxu0 %v3820_v37  ;;  %v3822_v34 = vpack.c.bf16 %v3800_v59, %v3796_v18 }
 0x6fb   :  { %v3823_v33 = vpack.c.bf16 %v3801_v8, %v3797_v6 }
 0x6fd   :  { %5568 = vmatmul.mubr.msk.bf16.vlgmr.msra.gmra.mxu0 %vm1373_vm8, %v5650_v19  ;;  %3931 = vmatprep.subr.bf16.mxu1 %v3823_v33 }
 0x6fe   :  { %3932 = vmatpush1.bf16.msra.mxu1 %v3822_v34  ;;  %3906 = vmatprep.mubr.bf16.mxu0 %v14289_v50 }
 0x701   :  { %5570 = vmatmul.mubr.msk.bf16.vlgmr.msra.gmra.mxu1 %vm1373_vm8, %v5650_v19 }
 0x702   :  { %3959 = vmatprep.mubr.bf16.mxu1 %v14289_v50 }
 0x705   :  { %5569 = vmatmul.mubr.msk.bf16.gmra.mxu0 %vm1373_vm8, %v5651_v60 }
 0x706   :  { %5138 = vmatprep.mubr.bf16.mxu0 %v14289_v50 }
 0x709   :  { %5571 = vmatmul.mubr.msk.bf16.gmra.mxu1 %vm1373_vm8, %v5651_v60 }
 0x70a   :  { %5191 = vmatprep.mubr.bf16.mxu1 %v14289_v50 }
 0x7bd   :  { %v3898_v39 = vpop.f32.mrf.mxu0 }
 0x7be   :  { %v3899_v37 = vadd.f32 %v3898_v39, %v3831_v45 }
 0x7bf   :  { %v3900_v62 = vpop.f32.mrf.mxu0 }
 0x7c0   :  { %v11372_v59 = vmax.f32 %v3899_v37, 0.0  ;;  %v3901_v19 = vadd.f32 %v3900_v62, %v3831_v45 }
 0x7c1   :  { %v3902_v0 = vpop.f32.mrf.mxu0  ;;  %v3951_v14 = vpop.f32.mrf.mxu1 }
 0x7c2   :  { %v3903_v18 = vadd.f32 %v3902_v0, %v3836_v53  ;;  %v11380_v33 = vmax.f32 %v3901_v19, 0.0  ;;  %v3952_v34 = vadd.f32 %v3951_v14, %v3831_v45 }
 0x7c3   :  { %v3904_v10 = vpop.f32.mrf.mxu0  ;;  %v11319_v49 = vpop.f32.mrf.mxu1 }
 0x7c4   :  { %v11374_v6 = vmax.f32 %v3903_v18, 0.0  ;;  %v3905_v8 = vadd.f32 %v3904_v10, %v3836_v53  ;;  %v11388_v62 = vmax.f32 %v3952_v34, 0.0  ;;  %v3954_v0 = vadd.f32 %v11319_v49, %v3831_v45  ;;  %v5581_v49 = vld [vmem:[%s12924_s2 + $0x388] sm:$0xff] }
 0x7c5   :  { %v3908_v57 = vpop.f32.mrf.mxu0  ;;  %v3955_v42 = vpop.f32.mrf.mxu1  ;;  %v5589_v34 = vld [vmem:[%s12924_s2 + $0x3c8] sm:$0xff] }
 0x7c6   :  { %v3909_v26 = vadd.f32 %v3908_v57, %v3841_v32  ;;  %v11382_v60 = vmax.f32 %v3905_v8, 0.0  ;;  %v3956_v39 = vadd.f32 %v3955_v42, %v3836_v53  ;;  %14292 = vst [vmem:[#allocation61_spill] sm:$0xff] %v11388_v62  ;;  %v11397_v14 = vmax.f32 %v3954_v0, 0.0  ;;  %v5580_v42 = vld [vmem:[%s12924_s2 + $0x380] sm:$0xff] }
 0x7c7   :  { %v3910_v9 = vpop.f32.mrf.mxu0  ;;  %v3957_v56 = vpop.f32.mrf.mxu1 }
 0x7c8   :  { %v11321_v30 = vmax.f32 %v3909_v26, 0.0  ;;  %v3911_v54 = vadd.f32 %v3910_v9, %v3841_v32  ;;  %v11391_v10 = vmax.f32 %v3956_v39, 0.0  ;;  %14294 = vst [vmem:[#allocation116_spill] sm:$0xff] %v11397_v14  ;;  %v5591_v26 = vld [vmem:[%s12924_s2 + $0x3d8] sm:$0xff]  ;;  %v5590_v9 = vld [vmem:[%s12924_s2 + $0x3d0] sm:$0xff]  ;;  %v5588_v39 = vld [vmem:[%s12924_s2 + $0x3c0] sm:$0xff] }
 0x7c9   :  { %v3912_v24 = vpop.f32.mrf.mxu0  ;;  %v3961_v17 = vpop.f32.mrf.mxu1 }
 0x7ca   :  { %14290 = vst [vmem:[#allocation51_spill] sm:$0xff] %v11321_v30  ;;  %v3913_v3 = vadd.f32 %v3912_v24, %v3846_v31  ;;  %v3962_v58 = vadd.f32 %v3961_v17, %v3841_v32  ;;  %4015 = vrot.lane.b32.xlu0 %v11321_v30, %s5695_s17  ;;  %v11343_v51 = vmax.f32 %v3911_v54, 0.0  ;;  %14293 = vst [vmem:[#allocation12_spill] sm:$0xff] %v11391_v10  ;;  %v5585_v24 = vld [vmem:[%s12924_s2 + $0x3a8] sm:$0xff]  ;;  %v5584_v17 = vld [vmem:[%s12924_s2 + $0x3a0] sm:$0xff] }
 0x7cb   :  { %v3963_v29 = vpop.f32.mrf.mxu1  ;;  %v3914_v27 = vpop.f32.mrf.mxu0 }
 0x7cc   :  { %v11325_v43 = vmax.f32 %v3913_v3, 0.0  ;;  %v11327_v41 = vmax.f32 %v3962_v58, 0.0  ;;  %14291 = vst [vmem:[#allocation20_spill] sm:$0xff] %v11343_v51  ;;  %v3915_v1 = vadd.f32 %v3914_v27, %v3846_v31  ;;  %v3964_v4 = vadd.f32 %v3963_v29, %v3841_v32 }
 0x7cd   :  { %v3965_v44 = vpop.f32.mrf.mxu1  ;;  %v3958_v32 = vadd.f32 %v3957_v56, %v3836_v53  ;;  %v11441_v56 = vpop.permute.xlu1 %4097 }
 0x7ce   :  { %v3966_v28 = vadd.f32 %v3965_v44, %v3846_v31  ;;  %4017 = vrot.lane.b32.xlu1 %v11325_v43, %s5695_s17  ;;  %4031 = vrot.lane.b32.xlu0 %v11327_v41, %s5695_s17  ;;  %v11349_v5 = vmax.f32 %v3915_v1, 0.0  ;;  %v11351_v20 = vmax.f32 %v3964_v4, 0.0  ;;  %v5595_v1 = vld [vmem:[%s12924_s2 + $0x3f8] sm:$0xff]  ;;  %v5594_v4 = vld [vmem:[%s12924_s2 + $0x3f0] sm:$0xff] }
 0x7cf   :  { %v3967_v11 = vpop.f32.mrf.mxu1  ;;  %v11399_v57 = vmax.f32 %v3958_v32, 0.0 }
 0x7d0   :  { %v11333_v61 = vmax.f32 %v3966_v28, 0.0  ;;  %v3968_v21 = vadd.f32 %v3967_v11, %v3846_v31  ;;  %v11447_v31 = vpop.permute.xlu0 %4092 }
 0x7d1   :  { %14295 = vst [vmem:[#allocation9_spill] sm:$0xff] %v11399_v57  ;;  %v11459_v3 = vpop.permute.xlu1 %4008 }
 0x7d2   :  { %4033 = vrot.lane.b32.xlu1 %v11333_v61, %s5695_s17  ;;  %4136 = vrot.lane.b32.xlu0 %v11321_v30, %s5696_s11  ;;  %v11357_v36 = vmax.f32 %v3968_v21, 0.0 }
 0x7d4   :  { %v11461_v58 = vpop.permute.xlu0 %4003 }
 0x7d5   :  { %v11463_v29 = vpop.permute.xlu1 %4218 }
 0x7d6   :  { %4138 = vrot.lane.b32.xlu1 %v11325_v43, %s5696_s11  ;;  %4152 = vrot.lane.b32.xlu0 %v11327_v41, %s5696_s11  ;;  %14296 = vst [vmem:[#allocation57_spill] sm:$0xff] %v11463_v29  ;;  %v5600_v29 = vld [vmem:[%s12924_s2 + $0x420] sm:$0xff] }
 0x7d8   :  { %v11469_v44 = vpop.permute.xlu0 %4213 }
 0x7d9   :  { %v11475_v28 = vpop.permute.xlu1 %4087 }
 0x7da   :  { %4154 = vrot.lane.b32.xlu1 %v11333_v61, %s5696_s11  ;;  %4023 = vrot.lane.b32.xlu0 %v11343_v51, %s5695_s17  ;;  %14297 = vst [vmem:[#allocation58_spill] sm:$0xff] %v11475_v28 }
 0x7dc   :  { %v11477_v54 = vpop.permute.xlu0 %4082 }
 0x7dd   :  { %14298 = vst [vmem:[#allocation52_spill] sm:$0xff] %v11477_v54  ;;  %v11483_v27 = vpop.permute.xlu1 %4339  ;;  %v14336_v54 = vld [vmem:[#allocation77_spill] sm:$0xff] }
 0x7de   :  { %4025 = vrot.lane.b32.xlu1 %v11349_v5, %s5695_s17  ;;  %4039 = vrot.lane.b32.xlu0 %v11351_v20, %s5695_s17  ;;  %14299 = vst [vmem:[#allocation48_spill] sm:$0xff] %v11483_v27 }
 0x7e0   :  { %v11495_v11 = vpop.permute.xlu0 %4334 }
 0x7e1   :  { %14300 = vst [vmem:[#allocation44_spill] sm:$0xff] %v11495_v11  ;;  %v11497_v21 = vpop.permute.xlu1 %3998 }
 0x7e2   :  { %4041 = vrot.lane.b32.xlu1 %v11357_v36, %s5695_s17  ;;  %4144 = vrot.lane.b32.xlu0 %v11343_v51, %s5696_s11  ;;  %14301 = vst [vmem:[#allocation115_spill] sm:$0xff] %v11497_v21 }
 0x7e6   :  { %4146 = vrot.lane.b32.xlu1 %v11349_v5, %s5696_s11  ;;  %4160 = vrot.lane.b32.xlu0 %v11351_v20, %s5696_s11 }
 0x7ea   :  { %4162 = vrot.lane.b32.xlu1 %v11357_v36, %s5696_s11  ;;  %3993 = vperm.xlu0 %5644, %v5572_v52  }
 0x7ee   :  { %4013 = vrot.lane.b32.xlu1 %v11374_v6, %s5695_s17  ;;  %4011 = vrot.lane.b32.xlu0 %v11372_v59, %s5695_s17 }
 0x7f2   :  { %4021 = vrot.lane.b32.xlu1 %v11382_v60, %s5695_s17  ;;  %4019 = vrot.lane.b32.xlu0 %v11380_v33, %s5695_s17 }
 0x7f6   :  { %4029 = vrot.lane.b32.xlu1 %v11391_v10, %s5695_s17  ;;  %4027 = vrot.lane.b32.xlu0 %v11388_v62, %s5695_s17 }
 0x7fa   :  { %4037 = vrot.lane.b32.xlu1 %v11399_v57, %s5695_s17  ;;  %4035 = vrot.lane.b32.xlu0 %v11397_v14, %s5695_s17 }
 0x7fe   :  { %4208 = vperm.xlu1 %5645, %v5581_v49   ;;  %4203 = vperm.xlu0 %5644, %v5580_v42   ;;  %v5599_v49 = vld [vmem:[%s12924_s2 + $0x418] sm:$0xff] }
 0x802   :  { %4259 = vrot.lane.b32.xlu1 %v11325_v43, %s5697_s21  ;;  %4257 = vrot.lane.b32.xlu0 %v11321_v30, %s5697_s21 }
 0x806   :  { %4267 = vrot.lane.b32.xlu1 %v11349_v5, %s5697_s21  ;;  %4265 = vrot.lane.b32.xlu0 %v11343_v51, %s5697_s21 }
 0x80a   :  { %4275 = vrot.lane.b32.xlu1 %v11333_v61, %s5697_s21  ;;  %4273 = vrot.lane.b32.xlu0 %v11327_v41, %s5697_s21 }
 0x80e   :  { %4283 = vrot.lane.b32.xlu1 %v11357_v36, %s5697_s21  ;;  %4281 = vrot.lane.b32.xlu0 %v11351_v20, %s5697_s21 }
 0x812   :  { %4460 = vperm.xlu1 %5645, %v5591_v26   ;;  %4455 = vperm.xlu0 %5644, %v5590_v9   ;;  %v5598_v26 = vld [vmem:[%s12924_s2 + $0x410] sm:$0xff] }
 0x816   :  { %4134 = vrot.lane.b32.xlu1 %v11374_v6, %s5696_s11  ;;  %4132 = vrot.lane.b32.xlu0 %v11372_v59, %s5696_s11 }
 0x81a   :  { %4142 = vrot.lane.b32.xlu1 %v11382_v60, %s5696_s11  ;;  %4140 = vrot.lane.b32.xlu0 %v11380_v33, %s5696_s11 }
 0x81e   :  { %4150 = vrot.lane.b32.xlu1 %v11391_v10, %s5696_s11  ;;  %4148 = vrot.lane.b32.xlu0 %v11388_v62, %s5696_s11 }
 0x822   :  { %4158 = vrot.lane.b32.xlu1 %v11399_v57, %s5696_s11  ;;  %4156 = vrot.lane.b32.xlu0 %v11397_v14, %s5696_s11 }
 0x826   :  { %4329 = vperm.xlu1 %5645, %v5585_v24   ;;  %4324 = vperm.xlu0 %5644, %v5584_v17  }
 0x82a   :  { %4380 = vrot.lane.b32.xlu1 %v11325_v43, %s5698_s30  ;;  %4378 = vrot.lane.b32.xlu0 %v11321_v30, %s5698_s30 }
 0x82e   :  { %4388 = vrot.lane.b32.xlu1 %v11349_v5, %s5698_s30  ;;  %4386 = vrot.lane.b32.xlu0 %v11343_v51, %s5698_s30 }
 0x832   :  { %4396 = vrot.lane.b32.xlu1 %v11333_v61, %s5698_s30  ;;  %4394 = vrot.lane.b32.xlu0 %v11327_v41, %s5698_s30 }
 0x836   :  { %4404 = vrot.lane.b32.xlu1 %v11357_v36, %s5698_s30  ;;  %4402 = vrot.lane.b32.xlu0 %v11351_v20, %s5698_s30 }
 0x83a   :  { %4533 = vperm.xlu1 %5645, %v5595_v1   ;;  %4528 = vperm.xlu0 %5644, %v5594_v4  }
 0x83c   :  { %v11499_v45 = vpop.permute.xlu0 %4015 }
 0x83e   :  { %4255 = vrot.lane.b32.xlu1 %v11374_v6, %s5697_s21  ;;  %4253 = vrot.lane.b32.xlu0 %v11372_v59, %s5697_s21 }
 0x840   :  { %v11505_v53 = vpop.permute.xlu1 %4017  ;;  %v11507_v52 = vpop.permute.xlu0 %4031 }
 0x842   :  { %4263 = vrot.lane.b32.xlu1 %v11382_v60, %s5697_s21  ;;  %4261 = vrot.lane.b32.xlu0 %v11380_v33, %s5697_s21 }
 0x844   :  { %v11513_v37 = vpop.permute.xlu1 %4033  ;;  %v11515_v18 = vpop.permute.xlu0 %4136 }
 0x846   :  { %4271 = vrot.lane.b32.xlu1 %v11391_v10, %s5697_s21  ;;  %4269 = vrot.lane.b32.xlu0 %v11388_v62, %s5697_s21 }
 0x848   :  { %v11521_v19 = vpop.permute.xlu1 %4138  ;;  %v11523_v8 = vpop.permute.xlu0 %4152 }
 0x84a   :  { %4279 = vrot.lane.b32.xlu1 %v11399_v57, %s5697_s21  ;;  %4277 = vrot.lane.b32.xlu0 %v11397_v14, %s5697_s21 }
 0x84c   :  { %v11535_v0 = vpop.permute.xlu1 %4154  ;;  %v11537_v32 = vpop.permute.xlu0 %4023 }
 0x84e   :  { %4450 = vperm.xlu1 %5645, %v5589_v34   ;;  %4445 = vperm.xlu0 %5644, %v5588_v39  }
 0x850   :  { %v11542_v42 = vpop.permute.xlu1 %4025  ;;  %v11549_v24 = vpop.permute.xlu0 %4039 }
 0x852   :  { %4654 = vperm.xlu1 %5645, %v5599_v49   ;;  %4649 = vperm.xlu0 %5644, %v5598_v26   ;;  %v5593_v49 = vld [vmem:[%s12924_s2 + $0x3e8] sm:$0xff]  ;;  %v5592_v26 = vld [vmem:[%s12924_s2 + $0x3e0] sm:$0xff] }
 0x854   :  { %v11547_v9 = vpop.permute.xlu1 %4041  ;;  %v11559_v1 = vpop.permute.xlu0 %4144 }
 0x856   :  { %4376 = vrot.lane.b32.xlu1 %v11374_v6, %s5698_s30  ;;  %4374 = vrot.lane.b32.xlu0 %v11372_v59, %s5698_s30 }
 0x858   :  { %v11555_v17 = vpop.permute.xlu1 %4146  ;;  %v11569_v34 = vpop.permute.xlu0 %4160 }
 0x85a   :  { %4384 = vrot.lane.b32.xlu1 %v11382_v60, %s5698_s30  ;;  %4382 = vrot.lane.b32.xlu0 %v11380_v33, %s5698_s30 }
 0x85c   :  { %v11563_v4 = vpop.permute.xlu1 %4162 }
 0x85d   :  { %14302 = vst [vmem:[#allocation62_spill] sm:$0xff] %v11563_v4 }
 0x85e   :  { %4392 = vrot.lane.b32.xlu1 %v11391_v10, %s5698_s30  ;;  %4390 = vrot.lane.b32.xlu0 %v11388_v62, %s5698_s30 }
 0x860   :  { %v11573_v39 = vpop.permute.xlu1 %4013 }
 0x862   :  { %4400 = vrot.lane.b32.xlu1 %v11399_v57, %s5698_s30  ;;  %4398 = vrot.lane.b32.xlu0 %v11397_v14, %s5698_s30 }
 0x864   :  { %v11585_v16 = vpop.permute.xlu1 %4021 }
 0x865   :  { %v11583_v50 = vpop.permute.xlu0 %3993 }
 0x866   :  { %14303 = vst [vmem:[#allocation8_spill] sm:$0xff] %v11583_v50  ;;  %4523 = vperm.xlu1 %5645, %v5593_v49   ;;  %4518 = vperm.xlu0 %5644, %v5592_v26  }
 0x868   :  { %v11597_v13 = vpop.permute.xlu1 %4029 }
 0x869   :  { %v11587_v46 = vpop.permute.xlu0 %4011 }
 0x86a   :  { %4574 = vrot.lane.b32.xlu1 %v11325_v43, %s5699_s28  ;;  %4572 = vrot.lane.b32.xlu0 %v11321_v30, %s5699_s28 }
 0x86c   :  { %v11607_v26 = vpop.permute.xlu1 %4037 }
 0x86d   :  { %v11593_v40 = vpop.permute.xlu0 %4019 }
 0x86e   :  { %4582 = vrot.lane.b32.xlu1 %v11349_v5, %s5699_s28  ;;  %4580 = vrot.lane.b32.xlu0 %v11343_v51, %s5699_s28 }
 0x871   :  { %v11601_v49 = vpop.permute.xlu0 %4027 }
 0x872   :  { %4590 = vrot.lane.b32.xlu1 %v11333_v61, %s5699_s28  ;;  %4588 = vrot.lane.b32.xlu0 %v11327_v41, %s5699_s28 }
 0x875   :  { %v11609_v22 = vpop.permute.xlu0 %4035 }
 0x876   :  { %4598 = vrot.lane.b32.xlu1 %v11357_v36, %s5699_s28  ;;  %4596 = vrot.lane.b32.xlu0 %v11351_v20, %s5699_s28 }
 0x879   :  { %v11621_v35 = vpop.permute.xlu1 %4208  ;;  %v11623_v47 = vpop.permute.xlu0 %4203 }
 0x87a   :  { %14304 = vst [vmem:[#allocation64_spill] sm:$0xff] %v11621_v35  ;;  %14305 = vst [vmem:[#allocation63_spill] sm:$0xff] %v11623_v47  ;;  %4775 = vperm.xlu1 %5645, %v5603_v2   ;;  %4770 = vperm.xlu0 %5644, %v5602_v48   ;;  %v14334_v35 = vld [vmem:[#allocation99_spill] sm:$0xff] }
 0x87b   :  { %v11777_v21 = vmul.f32 %v11372_v59, %v14334_v35 }
 0x87d   :  { %v11631_v12 = vpop.permute.xlu1 %4259  ;;  %v11633_v11 = vpop.permute.xlu0 %4257  ;;  %14335 = vst [vmem:[#allocation133_spill] sm:$0xff] %v11777_v21 }
 0x87e   :  { %14306 = vst [vmem:[#allocation68_spill] sm:$0xff] %v11631_v12  ;;  %14307 = vst [vmem:[#allocation33_spill] sm:$0xff] %v11633_v11  ;;  %4644 = vperm.xlu1 %5645, %v5597_v25   ;;  %4639 = vperm.xlu0 %5644, %v5596_v63  }
 0x881   :  { %v11635_v15 = vpop.permute.xlu1 %4267  ;;  %v11637_v23 = vpop.permute.xlu0 %4265 }
 0x882   :  { %14308 = vst [vmem:[#allocation109_spill] sm:$0xff] %v11635_v15  ;;  %14309 = vst [vmem:[#allocation114_spill] sm:$0xff] %v11637_v23  ;;  %4695 = vrot.lane.b32.xlu1 %v11325_v43, %s5700_s18  ;;  %4693 = vrot.lane.b32.xlu0 %v11321_v30, %s5700_s18  ;;  %v5601_v15 = vld [vmem:[%s12924_s2 + $0x428] sm:$0xff] }
 0x885   :  { %v11643_v48 = vpop.permute.xlu1 %4275  ;;  %v11645_v2 = vpop.permute.xlu0 %4273 }
 0x886   :  { %14310 = vst [vmem:[#allocation65_spill] sm:$0xff] %v11643_v48  ;;  %14311 = vst [vmem:[#allocation75_spill] sm:$0xff] %v11645_v2  ;;  %4703 = vrot.lane.b32.xlu1 %v11349_v5, %s5700_s18  ;;  %4701 = vrot.lane.b32.xlu0 %v11343_v51, %s5700_s18 }
 0x889   :  { %v11651_v63 = vpop.permute.xlu1 %4283  ;;  %v11653_v25 = vpop.permute.xlu0 %4281 }
 0x88a   :  { %14312 = vst [vmem:[#allocation78_spill] sm:$0xff] %v11651_v63  ;;  %14313 = vst [vmem:[#allocation60_spill] sm:$0xff] %v11653_v25  ;;  %4711 = vrot.lane.b32.xlu1 %v11333_v61, %s5700_s18  ;;  %4709 = vrot.lane.b32.xlu0 %v11327_v41, %s5700_s18  ;;  %v5607_v25 = vld [vmem:[%s12924_s2 + $0x458] sm:$0xff]  ;;  %v5606_v63 = vld [vmem:[%s12924_s2 + $0x450] sm:$0xff] }
 0x88d   :  { %v11659_v27 = vpop.permute.xlu1 %4460  ;;  %v11661_v38 = vpop.permute.xlu0 %4455 }
 0x88e   :  { %14314 = vst [vmem:[#allocation29_spill] sm:$0xff] %v11659_v27  ;;  %14315 = vst [vmem:[#allocation5_spill] sm:$0xff] %v11661_v38  ;;  %4719 = vrot.lane.b32.xlu1 %v11357_v36, %s5700_s18  ;;  %4717 = vrot.lane.b32.xlu0 %v11351_v20, %s5700_s18 }
 0x891   :  { %v11673_v2 = vpop.permute.xlu1 %4134  ;;  %v11675_v48 = vpop.permute.xlu0 %4132 }
 0x892   :  { %4896 = vperm.xlu1 %5645, %v5607_v25   ;;  %4891 = vperm.xlu0 %5644, %v5606_v63  }
 0x895   :  { %v11677_v38 = vpop.permute.xlu1 %4142  ;;  %v11679_v27 = vpop.permute.xlu0 %4140 }
 0x896   :  { %4570 = vrot.lane.b32.xlu1 %v11374_v6, %s5699_s28  ;;  %4568 = vrot.lane.b32.xlu0 %v11372_v59, %s5699_s28 }
 0x899   :  { %v11685_v11 = vpop.permute.xlu1 %4150  ;;  %v11687_v23 = vpop.permute.xlu0 %4148 }
 0x89a   :  { %14316 = vst [vmem:[#allocation111_spill] sm:$0xff] %v11685_v11  ;;  %14317 = vst [vmem:[#allocation73_spill] sm:$0xff] %v11687_v23  ;;  %4578 = vrot.lane.b32.xlu1 %v11382_v60, %s5699_s28  ;;  %4576 = vrot.lane.b32.xlu0 %v11380_v33, %s5699_s28 }
 0x89d   :  { %v11693_v63 = vpop.permute.xlu1 %4158  ;;  %v11695_v25 = vpop.permute.xlu0 %4156 }
 0x89e   :  { %14318 = vst [vmem:[#allocation66_spill] sm:$0xff] %v11693_v63  ;;  %14319 = vst [vmem:[#allocation98_spill] sm:$0xff] %v11695_v25  ;;  %4586 = vrot.lane.b32.xlu1 %v11391_v10, %s5699_s28  ;;  %4584 = vrot.lane.b32.xlu0 %v11388_v62, %s5699_s28 }
 0x8a1   :  { %v11701_v7 = vpop.permute.xlu1 %4329  ;;  %v11703_v12 = vpop.permute.xlu0 %4324 }
 0x8a2   :  { %14320 = vst [vmem:[#allocation38_spill] sm:$0xff] %v11701_v7  ;;  %14321 = vst [vmem:[#allocation119_spill] sm:$0xff] %v11703_v12  ;;  %4594 = vrot.lane.b32.xlu1 %v11399_v57, %s5699_s28  ;;  %4592 = vrot.lane.b32.xlu0 %v11397_v14, %s5699_s28 }
 0x8a5   :  { %v11715_v25 = vpop.permute.xlu1 %4380  ;;  %v11717_v50 = vpop.permute.xlu0 %4378 }
 0x8a6   :  { %14322 = vst [vmem:[#allocation13_spill] sm:$0xff] %v11715_v25  ;;  %14323 = vst [vmem:[#allocation121_spill] sm:$0xff] %v11717_v50  ;;  %4765 = vperm.xlu1 %5645, %v5601_v15   ;;  %4760 = vperm.xlu0 %5644, %v5600_v29   ;;  %v4045_v50 = vsel %vm105_vm0, %v11507_v52, %v11549_v24 }
 0x8a9   :  { %v11719_v12 = vpop.permute.xlu1 %4388  ;;  %v11721_v7 = vpop.permute.xlu0 %4386 }
 0x8aa   :  { %14324 = vst [vmem:[#allocation122_spill] sm:$0xff] %v11719_v12  ;;  %14325 = vst [vmem:[#allocation71_spill] sm:$0xff] %v11721_v7  ;;  %4816 = vrot.lane.b32.xlu1 %v11325_v43, %s5701_s29  ;;  %4814 = vrot.lane.b32.xlu0 %v11321_v30, %s5701_s29  ;;  %v4050_v7 = vsel %vm105_vm0, %v11542_v42, %v11513_v37  ;;  %v14332_v12 = vld [vmem:[#allocation101_spill] sm:$0xff] }
 0x8ad   :  { %v11727_v63 = vpop.permute.xlu1 %4396  ;;  %v11729_v47 = vpop.permute.xlu0 %4394 }
 0x8ae   :  { %14326 = vst [vmem:[#allocation123_spill] sm:$0xff] %v11727_v63  ;;  %14327 = vst [vmem:[#allocation124_spill] sm:$0xff] %v11729_v47  ;;  %4824 = vrot.lane.b32.xlu1 %v11349_v5, %s5701_s29  ;;  %4822 = vrot.lane.b32.xlu0 %v11343_v51, %s5701_s29  ;;  %v4049_v63 = vsel %vm105_vm0, %v11537_v32, %v11507_v52  ;;  %v4053_v47 = vsel %vm105_vm0, %v11499_v45, %v11537_v32  ;;  %v14337_v52 = vld [vmem:[#allocation79_spill] sm:$0xff] }
 0x8af   :  { %v4057_v32 = vsel %vm105_vm0, %v11549_v24, %v11499_v45  ;;  %v4073_v23 = vmul.f32 %v4053_v47, %v14336_v54  ;;  %v4074_v4 = vmul.f32 %v4049_v63, %v14337_v52  ;;  %v4078_v45 = vmul.f32 %v4050_v7, %v14337_v52  ;;  %v14338_v24 = vld [vmem:[#allocation80_spill] sm:$0xff] }
 0x8b0   :  { %v5611_v47 = vld [vmem:[%s12924_s2 + $0x478] sm:$0xff]  ;;  %v11794_v63 = vmul.f32 %v11374_v6, %v14334_v35 }
 0x8b1   :  { %v11735_v15 = vpop.permute.xlu1 %4404  ;;  %v11737_v29 = vpop.permute.xlu0 %4402 }
 0x8b2   :  { %14328 = vst [vmem:[#allocation97_spill] sm:$0xff] %v11735_v15  ;;  %14329 = vst [vmem:[#allocation39_spill] sm:$0xff] %v11737_v29  ;;  %4832 = vrot.lane.b32.xlu1 %v11333_v61, %s5701_s29  ;;  %v4054_v29 = vsel %vm105_vm0, %v11505_v53, %v11542_v42  ;;  %4830 = vrot.lane.b32.xlu0 %v11327_v41, %s5701_s29  ;;  %v11773_v42 = vmul.f32 %v11380_v33, %v14332_v12 }
 0x8b3   :  { %v4077_v28 = vmul.f32 %v4054_v29, %v14336_v54  ;;  %14340 = vst [vmem:[#allocation131_spill] sm:$0xff] %v11794_v63  ;;  %v14341_v29 = vld [vmem:[#allocation102_spill] sm:$0xff]  ;;  %v14346_v63 = vld [vmem:[#allocation103_spill] sm:$0xff] }
 0x8b4   :  { %14333 = vst [vmem:[#allocation130_spill] sm:$0xff] %v11773_v42  ;;  %v11798_v7 = vmul.f32 %v11388_v62, %v14341_v29  ;;  %v11809_v42 = vmul.f32 %v11382_v60, %v14332_v12  ;;  %v11813_v21 = vmul.f32 %v11391_v10, %v14341_v29  ;;  %v11817_v62 = vmul.f32 %v11397_v14, %v14346_v63 }
 0x8b5   :  { %v11767_v15 = vpop.permute.xlu1 %4533  ;;  %v11769_v25 = vpop.permute.xlu0 %4528  ;;  %v4109_v14 = vmul.f32 %v11447_v31, %v4073_v23  ;;  %v4113_v10 = vmul.f32 %v11441_v56, %v4077_v28  ;;  %v4174_v23 = vsel %vm248_vm1, %v11515_v18, %v11559_v1 }
 0x8b6   :  { %14330 = vst [vmem:[#allocation117_spill] sm:$0xff] %v11767_v15  ;;  %14331 = vst [vmem:[#allocation132_spill] sm:$0xff] %v11769_v25  ;;  %4840 = vrot.lane.b32.xlu1 %v11357_v36, %s5701_s29  ;;  %v4072_v25 = vmul.f32 %v4057_v32, %v14338_v24  ;;  %v14339_v15 = vld [vmem:[#allocation81_spill] sm:$0xff]  ;;  %4838 = vrot.lane.b32.xlu0 %v11351_v20, %s5701_s29  ;;  %v11802_v32 = vmul.f32 %v11321_v30, %v14334_v35 }
 0x8b7   :  { %v4075_v11 = vmul.f32 %v4045_v50, %v14339_v15  ;;  %14342 = vst [vmem:[#allocation134_spill] sm:$0xff] %v11798_v7  ;;  %v5610_v50 = vld [vmem:[%s12924_s2 + $0x470] sm:$0xff]  ;;  %14344 = vst [vmem:[#allocation136_spill] sm:$0xff] %v11809_v42  ;;  %v4058_v7 = vsel %vm105_vm0, %v11547_v9, %v11505_v53  ;;  %v11829_v42 = vmul.f32 %v11343_v51, %v14332_v12 }
 0x8b8   :  { %14343 = vst [vmem:[#allocation135_spill] sm:$0xff] %v11802_v32  ;;  %14345 = vst [vmem:[#allocation137_spill] sm:$0xff] %v11813_v21  ;;  %v4046_v32 = vsel %vm105_vm0, %v11513_v37, %v11547_v9  ;;  %v4110_v37 = vmul.f32 %v11447_v31, %v4074_v4  ;;  %v4114_v53 = vmul.f32 %v11441_v56, %v4078_v45 }
 0x8b9   :  { %14347 = vst [vmem:[#allocation118_spill] sm:$0xff] %v11817_v62  ;;  %14348 = vst [vmem:[#allocation120_spill] sm:$0xff] %v11829_v42  ;;  %v11831_v30 = vpop.permute.xlu1 %4255  ;;  %v11833_v21 = vpop.permute.xlu0 %4253  ;;  %v11837_v62 = vmul.f32 %v11399_v57, %v14346_v63  ;;  %v4108_v9 = vmul.f32 %v11447_v31, %v4072_v25  ;;  %v4111_v42 = vmul.f32 %v11447_v31, %v4075_v11 }
 0x8ba   :  { %5017 = vperm.xlu1 %5645, %v5611_v47   ;;  %v4170_v51 = vsel %vm248_vm1, %v11559_v1, %v11523_v8  ;;  %5012 = vperm.xlu0 %5644, %v5610_v50   ;;  %v4076_v28 = vmul.f32 %v4058_v7, %v14338_v24  ;;  %v4079_v4 = vmul.f32 %v4046_v32, %v14339_v15 }
 0x8bb   :  { %v11857_v25 = vmul.f32 %v11325_v43, %v14334_v35  ;;  %v11861_v31 = vmul.f32 %v11327_v41, %v14341_v29  ;;  %v11865_v11 = vmul.f32 %v11349_v5, %v14332_v12  ;;  %v11869_v1 = vmul.f32 %v11333_v61, %v14341_v29  ;;  %v14357_v29 = vld [vmem:[#allocation82_spill] sm:$0xff] }
 0x8bc   :  { %v11873_v45 = vmul.f32 %v11357_v36, %v14346_v63  ;;  %v11877_v35 = vmul.f32 %v11351_v20, %v14346_v63  ;;  %v11884_v32 = vadd.f32 %v4109_v14, %v11461_v58  ;;  %v11887_v12 = vadd.f32 %v4110_v37, %v11461_v58 }
 0x8bd   :  { %14349 = vst [vmem:[#allocation56_spill] sm:$0xff] %v11857_v25  ;;  %14350 = vst [vmem:[#allocation138_spill] sm:$0xff] %v11861_v31  ;;  %v11879_v47 = vpop.permute.xlu1 %4263  ;;  %v11881_v7 = vpop.permute.xlu0 %4261  ;;  %v4194_v50 = vmul.f32 %v4174_v23, %v14357_v29  ;;  %v14358_v31 = vld [vmem:[#allocation84_spill] sm:$0xff]  ;;  %v11894_v63 = vadd.f32 %v4113_v10, %v11459_v3  ;;  %v11903_v14 = vadd.f32 %v4111_v42, %v11461_v58 }
 0x8be   :  { %14351 = vst [vmem:[#allocation107_spill] sm:$0xff] %v11865_v11  ;;  %14352 = vst [vmem:[#allocation126_spill] sm:$0xff] %v11869_v1  ;;  %v4195_v1 = vmul.f32 %v4170_v51, %v14358_v31  ;;  %4691 = vrot.lane.b32.xlu1 %v11374_v6, %s5700_s18  ;;  %4689 = vrot.lane.b32.xlu0 %v11372_v59, %s5700_s18  ;;  %v11908_v51 = vmul.f32 %v11441_v56, %v4076_v28 }
 0x8bf   :  { %14353 = vst [vmem:[#allocation127_spill] sm:$0xff] %v11873_v45  ;;  %14354 = vst [vmem:[#allocation42_spill] sm:$0xff] %v11877_v35  ;;  %v11897_v35 = vadd.f32 %v4114_v53, %v11459_v3  ;;  %v11900_v45 = vadd.f32 %v4108_v9, %v11461_v58  ;;  %v11911_v37 = vmul.f32 %v11441_v56, %v4079_v4 }
 0x8c0   :  { %14355 = vst [vmem:[#allocation45_spill] sm:$0xff] %v11884_v32  ;;  %14356 = vst [vmem:[#allocation128_spill] sm:$0xff] %v11887_v12  ;;  %v4171_v10 = vsel %vm248_vm1, %v11555_v17, %v11535_v0  ;;  %v4052_v58 = vsel %vm105_vm0, %v11573_v39, %v11585_v16  ;;  %v4175_v42 = vsel %vm248_vm1, %v11521_v19, %v11555_v17 }
 0x8c1   :  { %14359 = vst [vmem:[#allocation59_spill] sm:$0xff] %v11894_v63  ;;  %14360 = vst [vmem:[#allocation125_spill] sm:$0xff] %v11897_v35  ;;  %v4166_v56 = vsel %vm248_vm1, %v11523_v8, %v11569_v34  ;;  %v4178_v53 = vsel %vm248_vm1, %v11569_v34, %v11515_v18  ;;  %v4048_v9 = vsel %vm105_vm0, %v11585_v16, %v11597_v13  ;;  %v11937_v23 = vpop.permute.xlu1 %4271  ;;  %v11939_v28 = vpop.permute.xlu0 %4269  ;;  %v14368_v63 = vld [vmem:[#allocation58_spill] sm:$0xff] }
 0x8c2   :  { %14361 = vst [vmem:[#allocation55_spill] sm:$0xff] %v11900_v45  ;;  %14362 = vst [vmem:[#allocation43_spill] sm:$0xff] %v11903_v14  ;;  %v11942_v17 = vmul.f32 %v11469_v44, %v4194_v50  ;;  %v11945_v4 = vmul.f32 %v11469_v44, %v4195_v1  ;;  %v4044_v18 = vsel %vm105_vm0, %v11597_v13, %v11607_v26  ;;  %4699 = vrot.lane.b32.xlu1 %v11382_v60, %s5700_s18  ;;  %v14365_v14 = vld [vmem:[#allocation111_spill] sm:$0xff]  ;;  %v14367_v45 = vld [vmem:[#allocation85_spill] sm:$0xff] }
 0x8c3   :  { %v4056_v16 = vsel %vm105_vm0, %v11607_v26, %v11573_v39  ;;  %v4069_v8 = vmul.f32 %v4052_v58, %v14336_v54  ;;  %v4051_v34 = vsel %vm105_vm0, %v11587_v46, %v11593_v40  ;;  %v4047_v13 = vsel %vm105_vm0, %v11593_v40, %v11601_v49  ;;  %4697 = vrot.lane.b32.xlu0 %v11380_v33, %s5700_s18 }
 0x8c4   :  { %14363 = vst [vmem:[#allocation21_spill] sm:$0xff] %v11942_v17  ;;  %14364 = vst [vmem:[#allocation7_spill] sm:$0xff] %v11945_v4  ;;  %v4055_v39 = vsel %vm105_vm0, %v11609_v22, %v11587_v46  ;;  %v11973_v26 = vmul.f32 %v4175_v42, %v14357_v29  ;;  %v4070_v1 = vmul.f32 %v4048_v9, %v14337_v52  ;;  %v14377_v17 = vld [vmem:[#allocation64_spill] sm:$0xff] }
 0x8c5   :  { %v4043_v50 = vsel %vm105_vm0, %v11601_v49, %v11609_v22  ;;  %v4173_v40 = vsel %vm248_vm1, %v11673_v2, %v11677_v38  ;;  %v11985_v46 = vmul.f32 %v4171_v10, %v14358_v31  ;;  %v4068_v58 = vmul.f32 %v4056_v16, %v14338_v24  ;;  %v11993_v11 = vpop.permute.xlu1 %4279  ;;  %v11995_v22 = vpop.permute.xlu0 %4277  ;;  %v14366_v16 = vld [vmem:[#allocation12_spill] sm:$0xff] }
 0x8c6   :  { %v4071_v42 = vmul.f32 %v4044_v18, %v14339_v15  ;;  %v4172_v9 = vsel %vm248_vm1, %v11675_v48, %v11679_v27  ;;  %v4065_v49 = vmul.f32 %v4051_v34, %v14336_v54  ;;  %v4066_v25 = vmul.f32 %v4047_v13, %v14337_v52  ;;  %4707 = vrot.lane.b32.xlu1 %v14366_v16, %s5700_s18  ;;  %v14369_v52 = vld [vmem:[#allocation61_spill] sm:$0xff] }
 0x8c7   :  { %v4064_v10 = vmul.f32 %v4055_v39, %v14338_v24  ;;  %v4169_v18 = vsel %vm248_vm1, %v11677_v38, %v14365_v14  ;;  %v12007_v35 = vmul.f32 %v4178_v53, %v14367_v45  ;;  %v4105_v4 = vmul.f32 %v14368_v63, %v4069_v8  ;;  %4705 = vrot.lane.b32.xlu0 %v14369_v52, %s5700_s18  ;;  %v14370_v24 = vld [vmem:[#allocation86_spill] sm:$0xff] }
 0x8c8   :  { %v4067_v12 = vmul.f32 %v4043_v50, %v14339_v15  ;;  %v4190_v54 = vmul.f32 %v4173_v40, %v14357_v29  ;;  %v12015_v34 = vmul.f32 %v4166_v56, %v14370_v24  ;;  %v14372_v38 = vld [vmem:[#allocation62_spill] sm:$0xff]  ;;  %v4106_v53 = vmul.f32 %v14368_v63, %v4070_v1  ;;  %v14373_v40 = vld [vmem:[#allocation73_spill] sm:$0xff] }
 0x8c9   :  { %v4179_v13 = vsel %vm248_vm1, %v14372_v38, %v11521_v19  ;;  %v4186_v39 = vmul.f32 %v4172_v9, %v14357_v29  ;;  %v4104_v8 = vmul.f32 %v14368_v63, %v4068_v58  ;;  %v4107_v15 = vmul.f32 %v14368_v63, %v4071_v42  ;;  %v12030_v52 = vpop.permute.xlu1 %4450  ;;  %v12032_v16 = vpop.permute.xlu0 %4445  ;;  %v14374_v29 = vld [vmem:[#allocation52_spill] sm:$0xff]  ;;  %v14376_v42 = vld [vmem:[#allocation115_spill] sm:$0xff] }
 0x8ca   :  { %14371 = vst [vmem:[#allocation46_spill] sm:$0xff] %v12015_v34  ;;  %v4191_v50 = vmul.f32 %v4169_v18, %v14358_v31  ;;  %v4168_v56 = vsel %vm248_vm1, %v11679_v27, %v14373_v40  ;;  %v12038_v19 = vsel %vm248_vm1, %v11535_v0, %v14372_v38  ;;  %v4101_v1 = vmul.f32 %v14374_v29, %v4065_v49  ;;  %v14378_v0 = vld [vmem:[#allocation116_spill] sm:$0xff]  ;;  %v14382_v34 = vld [vmem:[#allocation98_spill] sm:$0xff] }
 0x8cb   :  { %v4102_v63 = vmul.f32 %v14374_v29, %v4066_v25  ;;  %v4100_v58 = vmul.f32 %v14374_v29, %v4064_v10  ;;  %4715 = vrot.lane.b32.xlu1 %v11399_v57, %s5700_s18  ;;  %v12046_v27 = vmul.f32 %v4179_v13, %v14367_v45  ;;  %v4121_v9 = vadd.f32 %v4105_v4, %v14376_v42  ;;  %v5605_v25 = vld [vmem:[%s12924_s2 + $0x448] sm:$0xff]  ;;  %v14379_v10 = vld [vmem:[#allocation63_spill] sm:$0xff]  ;;  %v5604_v4 = vld [vmem:[%s12924_s2 + $0x440] sm:$0xff] }
 0x8cc   :  { %v4103_v18 = vmul.f32 %v14374_v29, %v4067_v12  ;;  %v4226_v32 = vmul.f32 %v14377_v17, %v4190_v54  ;;  %4713 = vrot.lane.b32.xlu0 %v14378_v0, %s5700_s18  ;;  %v4122_v49 = vadd.f32 %v4106_v53, %v14376_v42  ;;  %v4222_v38 = vmul.f32 %v14379_v10, %v4186_v39  ;;  %v14380_v57 = vld [vmem:[#allocation66_spill] sm:$0xff]  ;;  %v14381_v39 = vld [vmem:[#allocation8_spill] sm:$0xff] }
 0x8cd   :  { %14375 = vst [vmem:[#allocation47_spill] sm:$0xff] %v12046_v27  ;;  %v4187_v13 = vmul.f32 %v4168_v56, %v14358_v31  ;;  %v4177_v12 = vsel %vm248_vm1, %v14380_v57, %v11673_v2  ;;  %v4120_v54 = vadd.f32 %v4104_v8, %v14376_v42  ;;  %v4123_v29 = vadd.f32 %v4107_v15, %v14376_v42  ;;  %v12073_v53 = vpop.permute.xlu1 %4654  ;;  %v12082_v15 = vpop.permute.xlu0 %4649 }
 0x8ce   :  { %v4227_v0 = vmul.f32 %v14377_v17, %v4191_v50  ;;  %v4165_v31 = vsel %vm248_vm1, %v14365_v14, %v14380_v57  ;;  %v4117_v56 = vadd.f32 %v4101_v1, %v14381_v39  ;;  %v4118_v2 = vadd.f32 %v4102_v63, %v14381_v39  ;;  %14383 = vst [vmem:[#allocation67_spill] sm:$0xff] %v12082_v15 }
 0x8cf   :  { %v4116_v27 = vadd.f32 %v4100_v58, %v14381_v39  ;;  %v4176_v8 = vsel %vm248_vm1, %v14382_v34, %v11675_v48  ;;  %4886 = vperm.xlu1 %5645, %v5605_v25   ;;  %v4119_v50 = vadd.f32 %v4103_v18, %v14381_v39  ;;  %v4242_v42 = vadd.f32 %v4226_v32, %v4121_v9 }
 0x8d0   :  { %v4189_v57 = vmul.f32 %v4177_v12, %v14367_v45  ;;  %v4164_v14 = vsel %vm248_vm1, %v14373_v40, %v14382_v34  ;;  %4881 = vperm.xlu0 %5644, %v5604_v4   ;;  %v4238_v1 = vadd.f32 %v4222_v38, %v4117_v56  ;;  %v4223_v63 = vmul.f32 %v14379_v10, %v4187_v13  ;;  %v14384_v13 = vld [vmem:[#allocation87_spill] sm:$0xff] }
 0x8d1   :  { %v4192_v58 = vmul.f32 %v4165_v31, %v14370_v24  ;;  %v4294_v48 = vsel %vm393_vm2, %v11831_v30, %v11879_v47  ;;  %v4243_v18 = vadd.f32 %v4227_v0, %v4122_v49  ;;  %v4185_v32 = vmul.f32 %v4176_v8, %v14367_v45  ;;  %v12105_v40 = vpop.permute.xlu1 %4376  ;;  %v14386_v31 = vld [vmem:[#allocation88_spill] sm:$0xff] }
 0x8d2   :  { %v4293_v9 = vsel %vm393_vm2, %v11833_v21, %v11881_v7  ;;  %v4290_v34 = vsel %vm393_vm2, %v11879_v47, %v11937_v23  ;;  %v4188_v25 = vmul.f32 %v4164_v14, %v14370_v24  ;;  %v4289_v0 = vsel %vm393_vm2, %v11881_v7, %v11939_v28  ;;  %v12120_v47 = vpop.permute.xlu0 %4374  ;;  %v14388_v14 = vld [vmem:[#allocation90_spill] sm:$0xff] }
 0x8d3   :  { %v4286_v45 = vsel %vm393_vm2, %v11937_v23, %v11993_v11  ;;  %v4298_v49 = vsel %vm393_vm2, %v11993_v11, %v11831_v30  ;;  %4937 = vrot.lane.b32.xlu1 %v11325_v43, %s5702_s25  ;;  %v4225_v38 = vmul.f32 %v14377_v17, %v4189_v57  ;;  %v4311_v12 = vmul.f32 %v4294_v48, %v14384_v13  ;;  %v14385_v30 = vld [vmem:[#allocation51_spill] sm:$0xff] }
 0x8d4   :  { %v4285_v7 = vsel %vm393_vm2, %v11939_v28, %v11995_v22  ;;  %v4297_v23 = vsel %vm393_vm2, %v11995_v22, %v11833_v21  ;;  %4935 = vrot.lane.b32.xlu0 %v14385_v30, %s5702_s25  ;;  %v4239_v11 = vadd.f32 %v4223_v63, %v4118_v2  ;;  %v4228_v43 = vmul.f32 %v14377_v17, %v4192_v58  ;;  %v14387_v28 = vld [vmem:[#allocation89_spill] sm:$0xff] }
 0x8d5   :  { %v4307_v4 = vmul.f32 %v4293_v9, %v14384_v13  ;;  %v4312_v39 = vmul.f32 %v4290_v34, %v14386_v31  ;;  %v4221_v56 = vmul.f32 %v14379_v10, %v4185_v32  ;;  %v4308_v8 = vmul.f32 %v4289_v0, %v14386_v31  ;;  %v4385_v15 = vpop.permute.xlu1 %4384  ;;  %v14389_v32 = vld [vmem:[#allocation38_spill] sm:$0xff]  ;;  %v14390_v34 = vld [vmem:[#allocation91_spill] sm:$0xff] }
 0x8d6   :  { %v4310_v57 = vmul.f32 %v4298_v49, %v14387_v28  ;;  %v4313_v48 = vmul.f32 %v4286_v45, %v14388_v14  ;;  %v4224_v21 = vmul.f32 %v14379_v10, %v4188_v25  ;;  %v4306_v22 = vmul.f32 %v4297_v23, %v14387_v28  ;;  %v4383_v63 = vpop.permute.xlu0 %4382  ;;  %v14391_v25 = vld [vmem:[#allocation20_spill] sm:$0xff]  ;;  %v14392_v49 = vld [vmem:[#allocation119_spill] sm:$0xff] }
 0x8d7   :  { %v4309_v2 = vmul.f32 %v4285_v7, %v14388_v14  ;;  %v4415_v17 = vsel %vm538_vm3, %v12105_v40, %v4385_v15  ;;  %4945 = vrot.lane.b32.xlu1 %v11349_v5, %s5702_s25  ;;  %v4241_v58 = vadd.f32 %v4225_v38, %v4120_v54  ;;  %v4347_v9 = vmul.f32 %v14389_v32, %v4311_v12 }
 0x8d8   :  { %v4432_v0 = vmul.f32 %v4415_v17, %v14390_v34  ;;  %v4414_v10 = vsel %vm538_vm3, %v12120_v47, %v4383_v63  ;;  %4943 = vrot.lane.b32.xlu0 %v14391_v25, %s5702_s25  ;;  %v4244_v45 = vadd.f32 %v4228_v43, %v4123_v29  ;;  %v4343_v7 = vmul.f32 %v14392_v49, %v4307_v4 }
 0x8d9   :  { %v4348_v23 = vmul.f32 %v14389_v32, %v4312_v39  ;;  %v4428_v30 = vmul.f32 %v4414_v10, %v14390_v34  ;;  %v4237_v5 = vadd.f32 %v4221_v56, %v4116_v27  ;;  %v4344_v54 = vmul.f32 %v14392_v49, %v4308_v8  ;;  %v4393_v17 = vpop.permute.xlu1 %4392  ;;  %v14393_v39 = vld [vmem:[#allocation93_spill] sm:$0xff] }
 0x8da   :  { %v4346_v38 = vmul.f32 %v14389_v32, %v4310_v57  ;;  %v4349_v12 = vmul.f32 %v14389_v32, %v4313_v48  ;;  %v4240_v14 = vadd.f32 %v4224_v21, %v4119_v50  ;;  %v4342_v28 = vmul.f32 %v14392_v49, %v4306_v22  ;;  %v4391_v43 = vpop.permute.xlu0 %4390 }
 0x8db   :  { %v4345_v25 = vmul.f32 %v14392_v49, %v4309_v2  ;;  %v4411_v29 = vsel %vm538_vm3, %v4385_v15, %v4393_v17  ;;  %4953 = vrot.lane.b32.xlu1 %v11333_v61, %s5702_s25  ;;  %v4363_v27 = vadd.f32 %v4347_v9, %v4242_v42  ;;  %v4468_v4 = vmul.f32 %v12030_v52, %v4432_v0  ;;  %v14395_v0 = vld [vmem:[#allocation96_spill] sm:$0xff] }
 0x8dc   :  { %v4433_v56 = vmul.f32 %v4411_v29, %v14393_v39  ;;  %v4410_v8 = vsel %vm538_vm3, %v4383_v63, %v4391_v43  ;;  %4951 = vrot.lane.b32.xlu0 %v11327_v41, %s5702_s25  ;;  %v4359_v50 = vadd.f32 %v4343_v7, %v4238_v1  ;;  %v4364_v57 = vadd.f32 %v4348_v23, %v4243_v18 }
 0x8dd   :  { %v4464_v48 = vmul.f32 %v12032_v16, %v4428_v30  ;;  %v4429_v15 = vmul.f32 %v4410_v8, %v14393_v39  ;;  %v4360_v21 = vadd.f32 %v4344_v54, %v4239_v11  ;;  %v4362_v22 = vadd.f32 %v4346_v38, %v4241_v58  ;;  %v4401_v2 = vpop.permute.xlu1 %4400  ;;  %v14394_v11 = vld [vmem:[#allocation95_spill] sm:$0xff] }
 0x8de   :  { %v4365_v61 = vadd.f32 %v4349_v12, %v4244_v45  ;;  %v4469_v42 = vmul.f32 %v12030_v52, %v4433_v56  ;;  %v4358_v32 = vadd.f32 %v4342_v28, %v4237_v5  ;;  %v4361_v9 = vadd.f32 %v4345_v25, %v4240_v14  ;;  %v4399_v1 = vpop.permute.xlu0 %4398  ;;  %v14397_v12 = vld [vmem:[#allocation136_spill] sm:$0xff]  ;;  %v14398_v25 = vld [vmem:[#allocation137_spill] sm:$0xff] }
 0x8df   :  { %v4407_v63 = vsel %vm538_vm3, %v4393_v17, %v4401_v2  ;;  %v4419_v41 = vsel %vm538_vm3, %v4401_v2, %v12105_v40  ;;  %4961 = vrot.lane.b32.xlu1 %v11357_v36, %s5702_s25  ;;  %v4484_v18 = vadd.f32 %v4468_v4, %v4363_v27  ;;  %v4406_v28 = vsel %vm538_vm3, %v4391_v43, %v4399_v1 }
 0x8e0   :  { %v4431_v58 = vmul.f32 %v4419_v41, %v14394_v11  ;;  %v4434_v10 = vmul.f32 %v4407_v63, %v14395_v0  ;;  %4959 = vrot.lane.b32.xlu0 %v11351_v20, %s5702_s25  ;;  %v4480_v14 = vadd.f32 %v4464_v48, %v4359_v50  ;;  %v4465_v45 = vmul.f32 %v12032_v16, %v4429_v15  ;;  %v14396_v20 = vld [vmem:[#allocation131_spill] sm:$0xff] }
 0x8e1   :  { %v4418_v40 = vsel %vm538_vm3, %v4399_v1, %v12120_v47  ;;  %v4430_v36 = vmul.f32 %v4406_v28, %v14395_v0  ;;  %v4485_v49 = vadd.f32 %v4469_v42, %v4364_v57  ;;  %v4524_v5 = vpop.permute.xlu1 %4523  ;;  %v14400_v57 = vld [vmem:[#allocation133_spill] sm:$0xff]  ;;  %v14404_v1 = vld [vmem:[#allocation118_spill] sm:$0xff] }
 0x8e2   :  { %v4467_v7 = vmul.f32 %v12030_v52, %v4431_v58  ;;  %v4470_v23 = vmul.f32 %v12030_v52, %v4434_v10  ;;  %v4427_v30 = vmul.f32 %v4418_v40, %v14394_v11  ;;  %v4540_v38 = vmul.f32 %v4524_v5, %v14396_v20  ;;  %v4519_v43 = vpop.permute.xlu0 %4518 }
 0x8e3   :  { %v4466_v54 = vmul.f32 %v12032_v16, %v4430_v36  ;;  %v4541_v17 = vmul.f32 %v4524_v5, %v14397_v12  ;;  %v4542_v29 = vmul.f32 %v4524_v5, %v14398_v25  ;;  %4812 = vrot.lane.b32.xlu1 %v11374_v6, %s5701_s29  ;;  %v4543_v52 = vmul.f32 %v4524_v5, %v11837_v62  ;;  %v14416_v12 = vld [vmem:[#allocation7_spill] sm:$0xff]  ;;  %v14417_v25 = vld [vmem:[#allocation12_spill] sm:$0xff] }
 0x8e4   :  { %v4483_v47 = vadd.f32 %v4467_v7, %v4362_v22  ;;  %v4486_v27 = vadd.f32 %v4470_v23, %v4365_v61  ;;  %v4463_v4 = vmul.f32 %v12032_v16, %v4427_v30  ;;  %4810 = vrot.lane.b32.xlu0 %v11372_v59, %s5701_s29  ;;  %v4536_v48 = vmul.f32 %v4519_v43, %v14400_v57  ;;  %v14402_v22 = vld [vmem:[#allocation130_spill] sm:$0xff]  ;;  %v14411_v23 = vld [vmem:[#allocation109_spill] sm:$0xff]  ;;  %v14412_v30 = vld [vmem:[#allocation68_spill] sm:$0xff] }
 0x8e5   :  { %v4482_v56 = vadd.f32 %v4466_v54, %v4361_v9  ;;  %v12210_v8 = vadd.f32 %v4541_v17, %v4484_v18  ;;  %v12212_v50 = vadd.f32 %v4542_v29, %v4485_v49  ;;  %v4537_v61 = vmul.f32 %v4519_v43, %v14402_v22  ;;  %v12220_v16 = vpop.permute.xlu1 %4574  ;;  %v14403_v9 = vld [vmem:[#allocation134_spill] sm:$0xff]  ;;  %v14410_v49 = vld [vmem:[#allocation47_spill] sm:$0xff]  ;;  %v14414_v54 = vld [vmem:[#allocation21_spill] sm:$0xff] }
 0x8e6   :  { %v4479_v15 = vadd.f32 %v4463_v4, %v4358_v32  ;;  %v12215_v42 = vadd.f32 %v4540_v38, %v4483_v47  ;;  %v12217_v2 = vadd.f32 %v4543_v52, %v4486_v27  ;;  %v4200_v62 = vmul.f32 %v12038_v19, %v14370_v24  ;;  %v12226_v58 = vpop.permute.xlu0 %4572  ;;  %v14405_v32 = vld [vmem:[#allocation57_spill] sm:$0xff]  ;;  %v14415_v38 = vld [vmem:[#allocation128_spill] sm:$0xff]  ;;  %v14418_v29 = vld [vmem:[#allocation59_spill] sm:$0xff] }
 0x8e7   :  { %14399 = vst [vmem:[#allocation11_spill] sm:$0xff] %v12212_v50  ;;  %v4481_v63 = vadd.f32 %v4465_v45, %v4360_v21  ;;  %v4538_v41 = vmul.f32 %v4519_v43, %v14403_v9  ;;  %v4539_v18 = vmul.f32 %v4519_v43, %v14404_v1  ;;  %4820 = vrot.lane.b32.xlu1 %v11382_v60, %s5701_s29  ;;  %v14419_v47 = vld [vmem:[#allocation125_spill] sm:$0xff]  ;;  %v14420_v4 = vld [vmem:[#allocation15_spill] sm:$0xff]  ;;  %v14445_v50 = vld [vmem:[#allocation124_spill] sm:$0xff] }
 0x8e8   :  { %14401 = vst [vmem:[#allocation23_spill] sm:$0xff] %v12217_v2  ;;  %v4234_v10 = vmul.f32 %v14405_v32, %v11973_v26  ;;  %v4235_v28 = vmul.f32 %v14405_v32, %v11985_v46  ;;  %v12234_v40 = vadd.f32 %v4536_v48, %v4479_v15  ;;  %v12236_v36 = vadd.f32 %v4537_v61, %v4480_v14  ;;  %v14409_v46 = vld [vmem:[#allocation46_spill] sm:$0xff]  ;;  %v14421_v57 = vld [vmem:[#allocation61_spill] sm:$0xff]  ;;  %v14422_v48 = vld [vmem:[#allocation55_spill] sm:$0xff] }
 0x8e9   :  { %4818 = vrot.lane.b32.xlu0 %v11380_v33, %s5701_s29  ;;  %v4128_v24 = vadd.f32 %v11908_v51, %v11459_v3  ;;  %v4229_v19 = vmul.f32 %v11469_v44, %v12007_v35  ;;  %v12244_v21 = vadd.f32 %v4538_v41, %v4481_v63  ;;  %v12246_v45 = vadd.f32 %v4539_v18, %v4482_v56  ;;  %v4583_v5 = vpop.permute.xlu1 %4582  ;;  %v14413_v35 = vld [vmem:[#allocation45_spill] sm:$0xff]  ;;  %v14423_v61 = vld [vmem:[#allocation114_spill] sm:$0xff]  ;;  %v14425_v41 = vld [vmem:[#allocation43_spill] sm:$0xff] }
 0x8ea   :  { %14406 = vst [vmem:[#allocation129_spill] sm:$0xff] %v12236_v36  ;;  %v4131_v26 = vadd.f32 %v11911_v37, %v11459_v3  ;;  %v4232_v14 = vmul.f32 %v11469_v44, %v14409_v46  ;;  %v4233_v7 = vmul.f32 %v14405_v32, %v14410_v49  ;;  %v4296_v51 = vsel %vm393_vm2, %v14412_v30, %v14411_v23  ;;  %v4581_v37 = vpop.permute.xlu0 %4580  ;;  %v14427_v49 = vld [vmem:[#allocation75_spill] sm:$0xff] }
 0x8eb   :  { %14407 = vst [vmem:[#allocation28_spill] sm:$0xff] %v12244_v21  ;;  %14408 = vst [vmem:[#allocation16_spill] sm:$0xff] %v12246_v45  ;;  %v12260_v20 = vadd.f32 %v14414_v54, %v14413_v35  ;;  %v12264_v17 = vadd.f32 %v14416_v12, %v14415_v38  ;;  %v4236_v3 = vmul.f32 %v14405_v32, %v4200_v62  ;;  %4828 = vrot.lane.b32.xlu1 %v14417_v25, %s5701_s29  ;;  %v14424_v62 = vld [vmem:[#allocation33_spill] sm:$0xff]  ;;  %v14431_v12 = vld [vmem:[#allocation6_spill] sm:$0xff] }
 0x8ec   :  { %v4611_v44 = vsel %vm779_vm4, %v12220_v16, %v4583_v5  ;;  %v12273_v43 = vadd.f32 %v4234_v10, %v14418_v29  ;;  %v12276_v27 = vadd.f32 %v4235_v28, %v14419_v47  ;;  %v4610_v56 = vsel %vm779_vm4, %v12226_v58, %v4581_v37  ;;  %v14426_v32 = vld [vmem:[#allocation65_spill] sm:$0xff]  ;;  %v14432_v29 = vld [vmem:[#allocation116_spill] sm:$0xff]  ;;  %v14443_v2 = vld [vmem:[#allocation71_spill] sm:$0xff] }
 0x8ed   :  { %v4633_v52 = vmul.f32 %v4611_v44, %v14420_v4  ;;  %4826 = vrot.lane.b32.xlu0 %v14421_v57, %s5701_s29  ;;  %v12285_v15 = vadd.f32 %v4229_v19, %v14422_v48  ;;  %v4319_v22 = vmul.f32 %v4296_v51, %v14384_v13  ;;  %v4295_v63 = vsel %vm393_vm2, %v14424_v62, %v14423_v61  ;;  %v4591_v19 = vpop.permute.xlu1 %4590  ;;  %v14433_v47 = vld [vmem:[#allocation48_spill] sm:$0xff]  ;;  %v14439_v45 = vld [vmem:[#allocation13_spill] sm:$0xff] }
 0x8ee   :  { %v4629_v9 = vmul.f32 %v4610_v56, %v14420_v4  ;;  %v12294_v1 = vadd.f32 %v4232_v14, %v14425_v41  ;;  %v12296_v18 = vadd.f32 %v4233_v7, %v4128_v24  ;;  %v4292_v10 = vsel %vm393_vm2, %v14411_v23, %v14426_v32  ;;  %v14428_v14 = vld [vmem:[#allocation67_spill] sm:$0xff]  ;;  %v4589_v7 = vpop.permute.xlu0 %4588  ;;  %v14429_v23 = vld [vmem:[#allocation9_spill] sm:$0xff]  ;;  %v14434_v56 = vld [vmem:[#allocation60_spill] sm:$0xff] }
 0x8ef   :  { %v12303_v28 = vmul.f32 %v12073_v53, %v4633_v52  ;;  %v12305_v46 = vadd.f32 %v4236_v3, %v4131_v26  ;;  %v4291_v51 = vsel %vm393_vm2, %v14423_v61, %v14427_v49  ;;  %v4607_v24 = vsel %vm779_vm4, %v4583_v5, %v4591_v19  ;;  %4836 = vrot.lane.b32.xlu1 %v14429_v23, %s5701_s29  ;;  %v14430_v26 = vld [vmem:[#allocation78_spill] sm:$0xff]  ;;  %v14435_v41 = vld [vmem:[#allocation89_spill] sm:$0xff] }
 0x8f0   :  { %v12312_v35 = vmul.f32 %v14428_v14, %v4629_v9  ;;  %v4315_v54 = vmul.f32 %v4295_v63, %v14384_v13  ;;  %v4300_v38 = vsel %vm393_vm2, %v14430_v26, %v14412_v30  ;;  %v4634_v3 = vmul.f32 %v4607_v24, %v14431_v12  ;;  %v5609_v5 = vld [vmem:[%s12924_s2 + $0x468] sm:$0xff]  ;;  %v14440_v21 = vld [vmem:[#allocation97_spill] sm:$0xff] }
 0x8f1   :  { %v4606_v44 = vsel %vm779_vm4, %v4581_v37, %v4589_v7  ;;  %4834 = vrot.lane.b32.xlu0 %v14432_v29, %s5701_s29  ;;  %v4355_v52 = vmul.f32 %v14433_v47, %v4319_v22  ;;  %v4320_v13 = vmul.f32 %v4292_v10, %v14386_v31  ;;  %v4299_v30 = vsel %vm393_vm2, %v14434_v56, %v14424_v62  ;;  %v5608_v37 = vld [vmem:[%s12924_s2 + $0x460] sm:$0xff]  ;;  %v4599_v9 = vpop.permute.xlu1 %4598 }
 0x8f2   :  { %v4630_v48 = vmul.f32 %v4606_v44, %v14431_v12  ;;  %v4316_v61 = vmul.f32 %v4291_v51, %v14386_v31  ;;  %v4288_v22 = vsel %vm393_vm2, %v14426_v32, %v14430_v26  ;;  %v4287_v63 = vsel %vm393_vm2, %v14427_v49, %v14434_v56  ;;  %v4597_v51 = vpop.permute.xlu0 %4596  ;;  %v14436_v26 = vld [vmem:[#allocation10_spill] sm:$0xff]  ;;  %v14437_v44 = vld [vmem:[#allocation17_spill] sm:$0xff] }
 0x8f3   :  { %v12351_v62 = vmul.f32 %v12073_v53, %v4634_v3  ;;  %v4318_v10 = vmul.f32 %v4300_v38, %v14435_v41  ;;  %v4603_v31 = vsel %vm779_vm4, %v4591_v19, %v4599_v9  ;;  %v4615_v32 = vsel %vm779_vm4, %v4599_v9, %v12220_v16  ;;  %5007 = vperm.xlu1 %5645, %v5609_v5   ;;  %v14441_v9 = vld [vmem:[#allocation121_spill] sm:$0xff] }
 0x8f4   :  { %v12355_v24 = vmul.f32 %v14428_v14, %v4630_v48  ;;  %v4314_v49 = vmul.f32 %v4299_v30, %v14435_v41  ;;  %v4635_v3 = vmul.f32 %v4603_v31, %v14436_v26  ;;  %v4636_v56 = vmul.f32 %v4615_v32, %v14437_v44  ;;  %v14438_v48 = vld [vmem:[#allocation122_spill] sm:$0xff]  ;;  %v14442_v41 = vld [vmem:[#allocation39_spill] sm:$0xff] }
 0x8f5   :  { %v4602_v38 = vsel %vm779_vm4, %v4589_v7, %v4597_v51  ;;  %5002 = vperm.xlu0 %5644, %v5608_v37   ;;  %v4417_v19 = vsel %vm538_vm3, %v14439_v45, %v14438_v48  ;;  %v4421_v16 = vsel %vm538_vm3, %v14440_v21, %v14439_v45  ;;  %v4614_v5 = vsel %vm779_vm4, %v4597_v51, %v12226_v58  ;;  %v12390_v45 = vpop.permute.xlu1 %4775  ;;  %v14444_v51 = vld [vmem:[#allocation123_spill] sm:$0xff] }
 0x8f6   :  { %v4631_v30 = vmul.f32 %v4602_v38, %v14436_v26  ;;  %v4420_v7 = vsel %vm538_vm3, %v14442_v41, %v14441_v9  ;;  %v12384_v37 = vmul.f32 %v12073_v53, %v4635_v3  ;;  %v12387_v31 = vmul.f32 %v12073_v53, %v4636_v56  ;;  %v12407_v56 = vpop.permute.xlu0 %4770 }
 0x8f7   :  { %v4632_v32 = vmul.f32 %v4614_v5, %v14437_v44  ;;  %v4416_v58 = vsel %vm538_vm3, %v14441_v9, %v14443_v2  ;;  %v4413_v38 = vsel %vm538_vm3, %v14438_v48, %v14444_v51  ;;  %v4412_v53 = vsel %vm538_vm3, %v14443_v2, %v14445_v50  ;;  %4933 = vrot.lane.b32.xlu1 %v11374_v6, %s5702_s25  ;;  %v14446_v5 = vld [vmem:[#allocation90_spill] sm:$0xff] }
 0x8f8   :  { %v12405_v3 = vmul.f32 %v14428_v14, %v4631_v30  ;;  %v4321_v9 = vmul.f32 %v4288_v22, %v14446_v5  ;;  %v4409_v48 = vsel %vm538_vm3, %v14444_v51, %v14440_v21  ;;  %v4439_v36 = vmul.f32 %v4421_v16, %v14394_v11  ;;  %v14449_v51 = vld [vmem:[#allocation5_spill] sm:$0xff] }
 0x8f9   :  { %v12418_v44 = vmul.f32 %v14428_v14, %v4632_v32  ;;  %4931 = vrot.lane.b32.xlu0 %v11372_v59, %s5702_s25  ;;  %v4354_v2 = vmul.f32 %v14433_v47, %v4318_v10  ;;  %v4317_v30 = vmul.f32 %v4287_v63, %v14446_v5  ;;  %v4440_v6 = vmul.f32 %v4417_v19, %v14390_v34  ;;  %v12433_v59 = vpop.permute.xlu1 %4644  ;;  %v14447_v10 = vld [vmem:[#allocation44_spill] sm:$0xff] }
 0x8fa   :  { %v4435_v22 = vmul.f32 %v4420_v7, %v14394_v11  ;;  %v4436_v26 = vmul.f32 %v4416_v58, %v14390_v34  ;;  %v4441_v21 = vmul.f32 %v4413_v38, %v14393_v39  ;;  %v4437_v16 = vmul.f32 %v4412_v53, %v14393_v39  ;;  %v12439_v34 = vpop.permute.xlu0 %4639 }
 0x8fb   :  { %v4408_v14 = vsel %vm538_vm3, %v14445_v50, %v14442_v41  ;;  %v4351_v32 = vmul.f32 %v14447_v10, %v4315_v54  ;;  %v4356_v63 = vmul.f32 %v14433_v47, %v4320_v13  ;;  %v4350_v19 = vmul.f32 %v14447_v10, %v4314_v49  ;;  %4941 = vrot.lane.b32.xlu1 %v11382_v60, %s5702_s25  ;;  %v14448_v41 = vld [vmem:[#allocation29_spill] sm:$0xff] }
 0x8fc   :  { %v4442_v11 = vmul.f32 %v4409_v48, %v14395_v0  ;;  %v4371_v39 = vadd.f32 %v4355_v52, %v12273_v43  ;;  %v4352_v7 = vmul.f32 %v14447_v10, %v4316_v61  ;;  %v4357_v50 = vmul.f32 %v14433_v47, %v4321_v9  ;;  %v14450_v48 = vld [vmem:[#allocation56_spill] sm:$0xff] }
 0x8fd   :  { %v4475_v58 = vmul.f32 %v14448_v41, %v4439_v36  ;;  %4939 = vrot.lane.b32.xlu0 %v11380_v33, %s5702_s25  ;;  %v4370_v54 = vadd.f32 %v4354_v2, %v12296_v18  ;;  %v4353_v13 = vmul.f32 %v14447_v10, %v4317_v30  ;;  %v4438_v49 = vmul.f32 %v4408_v14, %v14395_v0  ;;  %v12457_v36 = vpop.permute.xlu1 %4695  ;;  %v14451_v2 = vld [vmem:[#allocation117_spill] sm:$0xff] }
 0x8fe   :  { %v4471_v38 = vmul.f32 %v14449_v51, %v4435_v22  ;;  %v4476_v60 = vmul.f32 %v14448_v41, %v4440_v6  ;;  %v4472_v43 = vmul.f32 %v14449_v51, %v4436_v26  ;;  %v4477_v52 = vmul.f32 %v14448_v41, %v4441_v21  ;;  %v12463_v53 = vpop.permute.xlu0 %4693  ;;  %v14452_v6 = vld [vmem:[#allocation135_spill] sm:$0xff]  ;;  %v14453_v22 = vld [vmem:[#allocation132_spill] sm:$0xff] }
 0x8ff   :  { %v4473_v47 = vmul.f32 %v14449_v51, %v4437_v16  ;;  %v4367_v33 = vadd.f32 %v4351_v32, %v12260_v20  ;;  %v4372_v18 = vadd.f32 %v4356_v63, %v12276_v27  ;;  %v4366_v61 = vadd.f32 %v4350_v19, %v12285_v15  ;;  %4949 = vrot.lane.b32.xlu1 %v14417_v25, %s5702_s25  ;;  %v14454_v32 = vld [vmem:[#allocation107_spill] sm:$0xff]  ;;  %v14455_v19 = vld [vmem:[#allocation126_spill] sm:$0xff] }
 0x900   :  { %v4478_v0 = vmul.f32 %v14448_v41, %v4442_v11  ;;  %v4368_v26 = vadd.f32 %v4352_v7, %v12264_v17  ;;  %v4373_v5 = vadd.f32 %v4357_v50, %v12305_v46  ;;  %v4491_v9 = vadd.f32 %v4475_v58, %v4370_v54  ;;  %v14457_v41 = vld [vmem:[#allocation22_spill] sm:$0xff] }
 0x901   :  { %v4548_v30 = vmul.f32 %v14451_v2, %v14450_v48  ;;  %4947 = vrot.lane.b32.xlu0 %v14421_v57, %s5702_s25  ;;  %v4369_v20 = vadd.f32 %v4353_v13, %v12294_v1  ;;  %v4474_v27 = vmul.f32 %v14449_v51, %v4438_v49  ;;  %v4487_v15 = vadd.f32 %v4471_v38, %v4366_v61  ;;  %v4704_v46 = vpop.permute.xlu1 %4703  ;;  %v5619_v13 = vld [vmem:[%s12927_s5 + $0x78] sm:$0xff]  ;;  %v14458_v51 = vld [vmem:[#allocation127_spill] sm:$0xff] }
 0x902   :  { %v4544_v21 = vmul.f32 %v14453_v22, %v14452_v6  ;;  %v4492_v25 = vadd.f32 %v4476_v60, %v4371_v39  ;;  %v4488_v16 = vadd.f32 %v4472_v43, %v4367_v33  ;;  %v4493_v17 = vadd.f32 %v4477_v52, %v4372_v18  ;;  %v4702_v11 = vpop.permute.xlu0 %4701  ;;  %v14456_v39 = vld [vmem:[#allocation120_spill] sm:$0xff]  ;;  %v5618_v43 = vld [vmem:[%s12927_s5 + $0x70] sm:$0xff]  ;;  %v14459_v52 = vld [vmem:[#allocation138_spill] sm:$0xff] }
 0x903   :  { %v4489_v14 = vadd.f32 %v4473_v47, %v4368_v26  ;;  %v4494_v10 = vadd.f32 %v4478_v0, %v4373_v5  ;;  %v4549_v63 = vmul.f32 %v14451_v2, %v14454_v32  ;;  %v4550_v57 = vmul.f32 %v14451_v2, %v14455_v19  ;;  %4957 = vrot.lane.b32.xlu1 %v14429_v23, %s5702_s25  ;;  %v14460_v33 = vld [vmem:[#allocation42_spill] sm:$0xff] }
 0x904   :  { %v4732_v1 = vsel %vm924_vm5, %v12457_v36, %v4704_v46  ;;  %v4545_v7 = vmul.f32 %v14453_v22, %v14456_v39  ;;  %v4564_v50 = vadd.f32 %v4548_v30, %v4491_v9  ;;  %v4731_v54 = vsel %vm924_vm5, %v12463_v53, %v4702_v11 }
 0x905   :  { %v4754_v58 = vmul.f32 %v4732_v1, %v14457_v41  ;;  %4955 = vrot.lane.b32.xlu0 %v14432_v29, %s5702_s25  ;;  %v4490_v49 = vadd.f32 %v4474_v27, %v4369_v20  ;;  %v4551_v23 = vmul.f32 %v14451_v2, %v14458_v51  ;;  %v4560_v38 = vadd.f32 %v4544_v21, %v4487_v15  ;;  %v4712_v0 = vpop.permute.xlu1 %4711  ;;  %v14461_v27 = vld [vmem:[#allocation25_spill] sm:$0xff] }
 0x906   :  { %v4750_v60 = vmul.f32 %v4731_v54, %v14457_v41  ;;  %v4546_v47 = vmul.f32 %v14453_v22, %v14459_v52  ;;  %v4547_v29 = vmul.f32 %v14453_v22, %v14460_v33  ;;  %v4685_v18 = vadd.f32 %v12303_v28, %v4564_v50  ;;  %v4710_v2 = vpop.permute.xlu0 %4709  ;;  %v14463_v50 = vld [vmem:[#allocation32_spill] sm:$0xff]  ;;  %v5233_v54 = vld [vmem:[%s12929_s7 + $0x8] sm:$0xff] }
 0x907   :  { %v4790_v61 = vmul.f32 %v12390_v45, %v4754_v58  ;;  %v4681_v26 = vadd.f32 %v12312_v35, %v4560_v38  ;;  %v4565_v5 = vadd.f32 %v4549_v63, %v4492_v25  ;;  %v4728_v48 = vsel %vm924_vm5, %v4704_v46, %v4712_v0  ;;  %5087 = vperm.xlu1 %5645, %v5619_v13   ;;  %v5617_v35 = vld [vmem:[%s12927_s5 + $0x68] sm:$0xff] }
 0x908   :  { %v4786_v9 = vmul.f32 %v12407_v56, %v4750_v60  ;;  %v4561_v30 = vadd.f32 %v4545_v7, %v4488_v16  ;;  %v4755_v15 = vmul.f32 %v4728_v48, %v14461_v27  ;;  %v4727_v28 = vsel %vm924_vm5, %v4702_v11, %v4710_v2  ;;  %v5616_v16 = vld [vmem:[%s12927_s5 + $0x60] sm:$0xff] }
 0x909   :  { %v12513_v20 = vadd.f32 %v4790_v61, %v4685_v18  ;;  %5082 = vperm.xlu0 %5644, %v5618_v43   ;;  %v4566_v6 = vadd.f32 %v4550_v57, %v4493_v17  ;;  %v4567_v22 = vadd.f32 %v4551_v23, %v4494_v10  ;;  %v4751_v25 = vmul.f32 %v4727_v28, %v14461_v27  ;;  %v4720_v1 = vpop.permute.xlu1 %4719  ;;  %v5232_v23 = vld [vmem:[%s12929_s7] sm:$0xff] }
 0x90a   :  { %v12521_v21 = vadd.f32 %v4786_v9, %v4681_v26  ;;  %v4686_v46 = vadd.f32 %v12351_v62, %v4565_v5  ;;  %v4562_v32 = vadd.f32 %v4546_v47, %v4489_v14  ;;  %v4563_v63 = vadd.f32 %v4547_v29, %v4490_v49  ;;  %v4718_v39 = vpop.permute.xlu0 %4717  ;;  %v14462_v62 = vld [vmem:[#allocation31_spill] sm:$0xff] }
 0x90b   :  { %v4791_v19 = vmul.f32 %v12390_v45, %v4755_v15  ;;  %v4682_v11 = vadd.f32 %v12355_v24, %v4561_v30  ;;  %v4787_v17 = vmul.f32 %v12407_v56, %v4751_v25  ;;  %v4724_v10 = vsel %vm924_vm5, %v4712_v0, %v4720_v1  ;;  %5077 = vperm.xlu1 %5645, %v5617_v35  }
 0x90c   :  { %v4736_v57 = vsel %vm924_vm5, %v4720_v1, %v12457_v36  ;;  %v4756_v14 = vmul.f32 %v4724_v10, %v14462_v62  ;;  %v4723_v24 = vsel %vm924_vm5, %v4710_v2, %v4718_v39  ;;  %v4687_v13 = vadd.f32 %v12384_v37, %v4566_v6 }
 0x90d   :  { %v12536_v7 = vadd.f32 %v4791_v19, %v4686_v46  ;;  %v4757_v58 = vmul.f32 %v4736_v57, %v14463_v50  ;;  %5072 = vperm.xlu0 %5644, %v5616_v16   ;;  %v12546_v49 = vadd.f32 %v4787_v17, %v4682_v11  ;;  %v4735_v36 = vsel %vm924_vm5, %v4718_v39, %v12463_v53  ;;  %v12559_v52 = vpop.permute.xlu1 %4896  ;;  %v14464_v39 = vld [vmem:[#allocation10_spill] sm:$0xff] }
 0x90e   :  { %v4752_v51 = vmul.f32 %v4723_v24, %v14462_v62  ;;  %v4688_v38 = vadd.f32 %v12387_v31, %v4567_v22  ;;  %v4792_v60 = vmul.f32 %v12390_v45, %v4756_v14  ;;  %v4753_v37 = vmul.f32 %v4735_v36, %v14463_v50  ;;  %v12563_v33 = vpop.permute.xlu0 %4891  ;;  %v14465_v14 = vld [vmem:[#allocation17_spill] sm:$0xff] }
 0x90f   :  { %v4793_v43 = vmul.f32 %v12390_v45, %v4757_v58  ;;  %v4683_v47 = vadd.f32 %v12405_v3, %v4562_v32  ;;  %5251 = vperm.xlu1 %5645, %v5233_v54   ;;  %v4684_v29 = vadd.f32 %v12418_v44, %v4563_v63  ;;  %v5235_v45 = vld [vmem:[%s12929_s7 + $0x18] sm:$0xff]  ;;  %v5234_v3 = vld [vmem:[%s12929_s7 + $0x10] sm:$0xff]  ;;  %v14466_v24 = vld [vmem:[#allocation129_spill] sm:$0xff] }
 0x910   :  { %v4788_v53 = vmul.f32 %v12407_v56, %v4752_v51  ;;  %v12566_v18 = vadd.f32 %v4792_v60, %v4687_v13  ;;  %v4789_v61 = vmul.f32 %v12407_v56, %v4753_v37  ;;  %v14467_v37 = vld [vmem:[#allocation11_spill] sm:$0xff] }
 0x911   :  { %v12568_v31 = vadd.f32 %v4793_v43, %v4688_v38  ;;  %5246 = vperm.xlu0 %5644, %v5232_v23   ;;  %v4571_v44 = vpop.permute.xlu1 %4570 }
 0x912   :  { %v12574_v0 = vadd.f32 %v4788_v53, %v4683_v47  ;;  %v12579_v26 = vadd.f32 %v4789_v61, %v4684_v29  ;;  %v4569_v5 = vpop.permute.xlu0 %4568  ;;  %v14468_v53 = vld [vmem:[#allocation23_spill] sm:$0xff] }
 0x913   :  { %5261 = vperm.xlu1 %5645, %v5235_v45   ;;  %v14469_v45 = vld [vmem:[#allocation28_spill] sm:$0xff] }
 0x915   :  { %5256 = vperm.xlu0 %5644, %v5234_v3   ;;  %v4579_v9 = vpop.permute.xlu1 %4578 }
 0x916   :  { %v4609_v56 = vsel %vm779_vm4, %v4571_v44, %v4579_v9  ;;  %v4577_v48 = vpop.permute.xlu0 %4576 }
 0x917   :  { %v4625_v2 = vmul.f32 %v4609_v56, %v14420_v4  ;;  %v4608_v30 = vsel %vm779_vm4, %v4569_v5, %v4577_v48 }
 0x918   :  { %v4621_v15 = vmul.f32 %v4608_v30, %v14420_v4  ;;  %v14471_v30 = vld [vmem:[#allocation30_spill] sm:$0xff] }
 0x919   :  { %v4661_v28 = vmul.f32 %v12433_v59, %v4625_v2  ;;  %v4587_v35 = vpop.permute.xlu1 %4586 }
 0x91a   :  { %v4657_v6 = vmul.f32 %v12439_v34, %v4621_v15  ;;  %v4605_v22 = vsel %vm779_vm4, %v4579_v9, %v4587_v35  ;;  %v4585_v25 = vpop.permute.xlu0 %4584 }
 0x91b   :  { %v12592_v16 = vadd.f32 %v4661_v28, %v12215_v42  ;;  %v4626_v46 = vmul.f32 %v4605_v22, %v14431_v12  ;;  %v4604_v32 = vsel %vm779_vm4, %v4577_v48, %v4585_v25 }
 0x91c   :  { %v12598_v63 = vadd.f32 %v4657_v6, %v12234_v40  ;;  %v4622_v4 = vmul.f32 %v4604_v32, %v14431_v12 }
 0x91d   :  { %v4662_v19 = vmul.f32 %v12433_v59, %v4626_v46  ;;  %v4595_v1 = vpop.permute.xlu1 %4594 }
 0x91e   :  { %v4658_v11 = vmul.f32 %v12439_v34, %v4622_v4  ;;  %v4601_v17 = vsel %vm779_vm4, %v4587_v35, %v4595_v1  ;;  %v4613_v42 = vsel %vm779_vm4, %v4595_v1, %v4571_v44  ;;  %v4593_v10 = vpop.permute.xlu0 %4592  ;;  %v14472_v4 = vld [vmem:[#allocation35_spill] sm:$0xff] }
 0x91f   :  { %v12608_v57 = vadd.f32 %v4662_v19, %v12210_v8  ;;  %v4627_v40 = vmul.f32 %v4601_v17, %v14464_v39  ;;  %v4628_v58 = vmul.f32 %v4613_v42, %v14465_v14  ;;  %v4600_v12 = vsel %vm779_vm4, %v4585_v25, %v4593_v10 }
 0x920   :  { %v12615_v54 = vadd.f32 %v4658_v11, %v14466_v24  ;;  %v4612_v13 = vsel %vm779_vm4, %v4593_v10, %v4569_v5  ;;  %v4623_v36 = vmul.f32 %v4600_v12, %v14464_v39  ;;  %v14473_v12 = vld [vmem:[#allocation36_spill] sm:$0xff]  ;;  %v14474_v24 = vld [vmem:[#allocation37_spill] sm:$0xff] }
 0x921   :  { %v4663_v51 = vmul.f32 %v12433_v59, %v4627_v40  ;;  %v4664_v8 = vmul.f32 %v12433_v59, %v4628_v58  ;;  %v4624_v23 = vmul.f32 %v4612_v13, %v14465_v14  ;;  %v12623_v38 = vpop.permute.xlu1 %4765  ;;  %v14470_v59 = vld [vmem:[#allocation16_spill] sm:$0xff] }
 0x922   :  { %v4659_v60 = vmul.f32 %v12439_v34, %v4623_v36  ;;  %v12626_v43 = vpop.permute.xlu0 %4760 }
 0x923   :  { %v12629_v47 = vadd.f32 %v4663_v51, %v14467_v37  ;;  %v12632_v29 = vadd.f32 %v4664_v8, %v14468_v53  ;;  %v4660_v61 = vmul.f32 %v12439_v34, %v4624_v23 }
 0x924   :  { %v12636_v3 = vadd.f32 %v4659_v60, %v14469_v45 }
 0x925   :  { %v12639_v44 = vadd.f32 %v4660_v61, %v14470_v59  ;;  %v4817_v5 = vpop.permute.xlu1 %4816 }
 0x926   :  { %v4815_v9 = vpop.permute.xlu0 %4814 }
 0x929   :  { %v4825_v56 = vpop.permute.xlu1 %4824 }
 0x92a   :  { %v4853_v48 = vsel %vm1069_vm6, %v4817_v5, %v4825_v56  ;;  %v4823_v2 = vpop.permute.xlu0 %4822 }
 0x92b   :  { %v4875_v15 = vmul.f32 %v4853_v48, %v14471_v30  ;;  %v4852_v28 = vsel %vm1069_vm6, %v4815_v9, %v4823_v2 }
 0x92c   :  { %v4871_v34 = vmul.f32 %v4852_v28, %v14471_v30 }
 0x92d   :  { %v4911_v35 = vmul.f32 %v12559_v52, %v4875_v15  ;;  %v4833_v6 = vpop.permute.xlu1 %4832 }
 0x92e   :  { %v4907_v22 = vmul.f32 %v12563_v33, %v4871_v34  ;;  %v4849_v25 = vsel %vm1069_vm6, %v4825_v56, %v4833_v6  ;;  %v4831_v46 = vpop.permute.xlu0 %4830 }
 0x92f   :  { %v12652_v32 = vadd.f32 %v4911_v35, %v12513_v20  ;;  %v4876_v19 = vmul.f32 %v4849_v25, %v14472_v4  ;;  %v4848_v1 = vsel %vm1069_vm6, %v4823_v2, %v4831_v46 }
 0x930   :  { %v12658_v11 = vadd.f32 %v4907_v22, %v12521_v21  ;;  %v4872_v17 = vmul.f32 %v4848_v1, %v14472_v4 }
 0x931   :  { %v4912_v42 = vmul.f32 %v12559_v52, %v4876_v19  ;;  %v4841_v10 = vpop.permute.xlu1 %4840 }
 0x932   :  { %v4908_v39 = vmul.f32 %v12563_v33, %v4872_v17  ;;  %v4845_v40 = vsel %vm1069_vm6, %v4833_v6, %v4841_v10  ;;  %v4857_v20 = vsel %vm1069_vm6, %v4841_v10, %v4817_v5  ;;  %v4839_v14 = vpop.permute.xlu0 %4838 }
 0x933   :  { %v12668_v58 = vadd.f32 %v4912_v42, %v12536_v7  ;;  %v4877_v21 = vmul.f32 %v4845_v40, %v14473_v12  ;;  %v4878_v13 = vmul.f32 %v4857_v20, %v14474_v24  ;;  %v4844_v36 = vsel %vm1069_vm6, %v4831_v46, %v4839_v14 }
 0x934   :  { %v12675_v51 = vadd.f32 %v4908_v39, %v12546_v49  ;;  %v4856_v8 = vsel %vm1069_vm6, %v4839_v14, %v4815_v9  ;;  %v4873_v23 = vmul.f32 %v4844_v36, %v14473_v12 }
 0x935   :  { %v4913_v60 = vmul.f32 %v12559_v52, %v4877_v21  ;;  %v4914_v7 = vmul.f32 %v12559_v52, %v4878_v13  ;;  %v4874_v37 = vmul.f32 %v4856_v8, %v14474_v24  ;;  %v12683_v53 = vpop.permute.xlu1 %5017 }
 0x936   :  { %v4909_v61 = vmul.f32 %v12563_v33, %v4873_v23  ;;  %v12686_v45 = vpop.permute.xlu0 %5012 }
 0x937   :  { %v12689_v49 = vadd.f32 %v4913_v60, %v12566_v18  ;;  %v12692_v59 = vadd.f32 %v4914_v7, %v12568_v31  ;;  %v4910_v5 = vmul.f32 %v12563_v33, %v4874_v37 }
 0x938   :  { %v12696_v9 = vadd.f32 %v4909_v61, %v12574_v0 }
 0x939   :  { %v12699_v52 = vadd.f32 %v4910_v5, %v12579_v26  ;;  %v4692_v56 = vpop.permute.xlu1 %4691 }
 0x93a   :  { %v4690_v48 = vpop.permute.xlu0 %4689 }
 0x93d   :  { %v4700_v2 = vpop.permute.xlu1 %4699 }
 0x93e   :  { %v4730_v15 = vsel %vm924_vm5, %v4692_v56, %v4700_v2  ;;  %v4698_v28 = vpop.permute.xlu0 %4697 }
 0x93f   :  { %v4746_v18 = vmul.f32 %v4730_v15, %v14457_v41  ;;  %v4729_v31 = vsel %vm924_vm5, %v4690_v48, %v4698_v28 }
 0x940   :  { %v4742_v33 = vmul.f32 %v4729_v31, %v14457_v41 }
 0x941   :  { %v4782_v0 = vmul.f32 %v12623_v38, %v4746_v18  ;;  %v4708_v34 = vpop.permute.xlu1 %4707 }
 0x942   :  { %v4778_v26 = vmul.f32 %v12626_v43, %v4742_v33  ;;  %v4726_v35 = vsel %vm924_vm5, %v4700_v2, %v4708_v34  ;;  %v4706_v6 = vpop.permute.xlu0 %4705 }
 0x943   :  { %v12712_v22 = vadd.f32 %v4782_v0, %v12592_v16  ;;  %v4747_v25 = vmul.f32 %v4726_v35, %v14461_v27  ;;  %v4725_v46 = vsel %vm924_vm5, %v4698_v28, %v4706_v6  ;;  %v14476_v0 = vld [vmem:[#allocation49_spill] sm:$0xff] }
 0x944   :  { %v12718_v19 = vadd.f32 %v4778_v26, %v12598_v63  ;;  %v4743_v41 = vmul.f32 %v4725_v46, %v14461_v27 }
 0x945   :  { %v4783_v1 = vmul.f32 %v12623_v38, %v4747_v25  ;;  %v4716_v17 = vpop.permute.xlu1 %4715 }
 0x946   :  { %v4779_v42 = vmul.f32 %v12626_v43, %v4743_v41  ;;  %v4722_v10 = vsel %vm924_vm5, %v4708_v34, %v4716_v17  ;;  %v4734_v16 = vsel %vm924_vm5, %v4716_v17, %v4692_v56  ;;  %v4714_v39 = vpop.permute.xlu0 %4713 }
 0x947   :  { %v12728_v40 = vadd.f32 %v4783_v1, %v12608_v57  ;;  %v4748_v63 = vmul.f32 %v4722_v10, %v14462_v62  ;;  %v4749_v20 = vmul.f32 %v4734_v16, %v14463_v50  ;;  %v4721_v27 = vsel %vm924_vm5, %v4706_v6, %v4714_v39  ;;  %v14477_v10 = vld [vmem:[#allocation54_spill] sm:$0xff] }
 0x948   :  { %v12735_v14 = vadd.f32 %v4779_v42, %v12615_v54  ;;  %v4733_v21 = vsel %vm924_vm5, %v4714_v39, %v4690_v48  ;;  %v4744_v13 = vmul.f32 %v4721_v27, %v14462_v62  ;;  %v14478_v39 = vld [vmem:[#allocation50_spill] sm:$0xff] }
 0x949   :  { %v4784_v36 = vmul.f32 %v12623_v38, %v4748_v63  ;;  %v4785_v57 = vmul.f32 %v12623_v38, %v4749_v20  ;;  %v4745_v8 = vmul.f32 %v4733_v21, %v14463_v50 }
 0x94a   :  { %v12743_v23 = vpop.permute.xlu1 %4886  ;;  %v4780_v60 = vmul.f32 %v12626_v43, %v4744_v13 }
 0x94b   :  { %v12746_v7 = vpop.permute.xlu0 %4881  ;;  %v12749_v54 = vadd.f32 %v4784_v36, %v12629_v47  ;;  %v12752_v37 = vadd.f32 %v4785_v57, %v12632_v29  ;;  %v4781_v62 = vmul.f32 %v12626_v43, %v4745_v8  ;;  %v14475_v47 = vld [vmem:[#allocation53_spill] sm:$0xff] }
 0x94c   :  { %v12756_v61 = vadd.f32 %v4780_v60, %v12636_v3 }
 0x94d   :  { %v12759_v38 = vadd.f32 %v4781_v62, %v12639_v44 }
 0x94e   :  { %v4938_v50 = vpop.permute.xlu1 %4937 }
 0x94f   :  { %v4936_v5 = vpop.permute.xlu0 %4935 }
 0x952   :  { %v4946_v56 = vpop.permute.xlu1 %4945 }
 0x953   :  { %v4974_v48 = vsel %vm1214_vm7, %v4938_v50, %v4946_v56  ;;  %v4944_v2 = vpop.permute.xlu0 %4943 }
 0x954   :  { %v4996_v15 = vmul.f32 %v4974_v48, %v14475_v47  ;;  %v4973_v29 = vsel %vm1214_vm7, %v4936_v5, %v4944_v2 }
 0x955   :  { %v4992_v43 = vmul.f32 %v4973_v29, %v14475_v47 }
 0x956   :  { %v5032_v3 = vmul.f32 %v12683_v53, %v4996_v15  ;;  %v4954_v28 = vpop.permute.xlu1 %4953 }
 0x957   :  { %v5028_v44 = vmul.f32 %v12686_v45, %v4992_v43  ;;  %v4970_v18 = vsel %vm1214_vm7, %v4946_v56, %v4954_v28  ;;  %v4952_v31 = vpop.permute.xlu0 %4951 }
 0x958   :  { %v5048_v33 = vadd.f32 %v5032_v3, %v12652_v32  ;;  %v4997_v34 = vmul.f32 %v4970_v18, %v14476_v0  ;;  %v4969_v26 = vsel %vm1214_vm7, %v4944_v2, %v4952_v31 }
 0x959   :  { %v5044_v35 = vadd.f32 %v5028_v44, %v12658_v11  ;;  %v4993_v6 = vmul.f32 %v4969_v26, %v14476_v0 }
 0x95a   :  { %v5033_v25 = vmul.f32 %v12683_v53, %v4997_v34  ;;  %v4962_v46 = vpop.permute.xlu1 %4961 }
 0x95b   :  { %v5029_v41 = vmul.f32 %v12686_v45, %v4993_v6  ;;  %v4966_v1 = vsel %vm1214_vm7, %v4954_v28, %v4962_v46  ;;  %v4978_v32 = vsel %vm1214_vm7, %v4962_v46, %v4938_v50  ;;  %v4960_v17 = vpop.permute.xlu0 %4959  ;;  %v5066_v42 = vpack.c.bf16 %v5048_v33, %v5044_v35 }
 0x95c   :  { %v4998_v16 = vmul.f32 %v4966_v1, %v14477_v10  ;;  %v4999_v63 = vmul.f32 %v4978_v32, %v14478_v39  ;;  %v4965_v11 = vsel %vm1214_vm7, %v4952_v31, %v4960_v17  ;;  %v4977_v20 = vsel %vm1214_vm7, %v4960_v17, %v4936_v5 }
 0x95d   :  { %v4994_v27 = vmul.f32 %v4965_v11, %v14477_v10  ;;  %v4995_v21 = vmul.f32 %v4977_v20, %v14478_v39  ;;  %v5045_v13 = vadd.f32 %v5029_v41, %v12675_v51  ;;  %v5049_v36 = vadd.f32 %v5033_v25, %v12668_v58 }
 0x95e   :  { %v5034_v57 = vmul.f32 %v12683_v53, %v4998_v16  ;;  %v5035_v8 = vmul.f32 %v12683_v53, %v4999_v63  ;;  %v4813_v60 = vpop.permute.xlu1 %4812 }
 0x95f   :  { %v5030_v62 = vmul.f32 %v12686_v45, %v4994_v27  ;;  %v5031_v50 = vmul.f32 %v12686_v45, %v4995_v21  ;;  %v4811_v56 = vpop.permute.xlu0 %4810  ;;  %v5067_v48 = vpack.c.bf16 %v5049_v36, %v5045_v13 }
 0x960   :  { %v5050_v5 = vadd.f32 %v5034_v57, %v12689_v49  ;;  %v5051_v2 = vadd.f32 %v5035_v8, %v12692_v59 }
 0x961   :  { %v5046_v15 = vadd.f32 %v5030_v62, %v12696_v9  ;;  %5118 = vmatprep.subr.bf16.mxu0 %v5067_v48  ;;  %v5047_v58 = vadd.f32 %v5031_v50, %v12699_v52 }
 0x962   :  { %5119 = vmatpush1.bf16.msra.mxu0 %v5066_v42  ;;  %v4821_v51 = vpop.permute.xlu1 %4820 }
 0x963   :  { %v4819_v29 = vpop.permute.xlu0 %4818  ;;  %v5069_v53 = vpack.c.bf16 %v5051_v2, %v5047_v58  ;;  %v5068_v43 = vpack.c.bf16 %v5050_v5, %v5046_v15  ;;  %v4851_v49 = vsel %vm1069_vm6, %v4813_v60, %v4821_v51 }
 0x964   :  { %v4850_v52 = vsel %vm1069_vm6, %v4811_v56, %v4819_v29  ;;  %v4867_v18 = vmul.f32 %v4851_v49, %v14471_v30 }
 0x965   :  { %5171 = vmatprep.subr.bf16.mxu1 %v5069_v53  ;;  %v4863_v26 = vmul.f32 %v4850_v52, %v14471_v30 }
 0x966   :  { %5172 = vmatpush1.bf16.msra.mxu1 %v5068_v43  ;;  %v4829_v3 = vpop.permute.xlu1 %4828  ;;  %v4903_v46 = vmul.f32 %v12743_v23, %v4867_v18 }
 0x967   :  { %v4827_v45 = vpop.permute.xlu0 %4826  ;;  %v4847_v31 = vsel %vm1069_vm6, %v4821_v51, %v4829_v3  ;;  %v4899_v42 = vmul.f32 %v12746_v7, %v4863_v26 }
 0x968   :  { %v4846_v33 = vsel %vm1069_vm6, %v4819_v29, %v4827_v45  ;;  %v4868_v25 = vmul.f32 %v4847_v31, %v14472_v4  ;;  %v4919_v21 = vadd.f32 %v4903_v46, %v12712_v22 }
 0x969   :  { %v4864_v41 = vmul.f32 %v4846_v33, %v14472_v4  ;;  %v4915_v48 = vadd.f32 %v4899_v42, %v12718_v19 }
 0x96a   :  { %v4837_v28 = vpop.permute.xlu1 %4836  ;;  %v4904_v4 = vmul.f32 %v12743_v23, %v4868_v25 }
 0x96b   :  { %v4835_v44 = vpop.permute.xlu0 %4834  ;;  %v4843_v35 = vsel %vm1069_vm6, %v4829_v3, %v4837_v28  ;;  %v4855_v1 = vsel %vm1069_vm6, %v4837_v28, %v4813_v60  ;;  %v4900_v13 = vmul.f32 %v12746_v7, %v4864_v41 }
 0x96c   :  { %v4869_v32 = vmul.f32 %v4843_v35, %v14473_v12  ;;  %v4842_v30 = vsel %vm1069_vm6, %v4827_v45, %v4835_v44  ;;  %v4854_v16 = vsel %vm1069_vm6, %v4835_v44, %v4811_v56  ;;  %v4870_v36 = vmul.f32 %v4855_v1, %v14474_v24 }
 0x96d   :  { %v4865_v60 = vmul.f32 %v4842_v30, %v14473_v12  ;;  %v4866_v62 = vmul.f32 %v4854_v16, %v14474_v24  ;;  %v4920_v15 = vadd.f32 %v4904_v4, %v12728_v40  ;;  %v4916_v24 = vadd.f32 %v4900_v13, %v12735_v14 }
 0x96e   :  { %v12803_v59 = vpop.permute.xlu1 %5007  ;;  %v4905_v8 = vmul.f32 %v12743_v23, %v4869_v32  ;;  %v4906_v51 = vmul.f32 %v12743_v23, %v4870_v36 }
 0x96f   :  { %v4901_v43 = vmul.f32 %v12746_v7, %v4865_v60  ;;  %v4902_v3 = vmul.f32 %v12746_v7, %v4866_v62 }
 0x970   :  { %v12805_v9 = vpop.permute.xlu0 %5002  ;;  %v4921_v53 = vadd.f32 %v4905_v8, %v12749_v54 }
 0x971   :  { %v4917_v35 = vadd.f32 %v4901_v43, %v12756_v61  ;;  %v4918_v41 = vadd.f32 %v4902_v3, %v12759_v38  ;;  %v14479_v38 = vmov 0   ;;  %v14482_v3 = vld [vmem:[#allocation100_spill] sm:$0xff] }
 0x972   :  { %v4934_v34 = vpop.permute.xlu1 %4933 }
 0x974   :  { %v4932_v6 = vpop.permute.xlu0 %4931 }
 0x976   :  { %v4942_v17 = vpop.permute.xlu1 %4941 }
 0x977   :  { %v4972_v63 = vsel %vm1214_vm7, %v4934_v34, %v4942_v17 }
 0x978   :  { %v4940_v11 = vpop.permute.xlu0 %4939  ;;  %v4988_v20 = vmul.f32 %v4972_v63, %v14475_v47 }
 0x979   :  { %v4971_v27 = vsel %vm1214_vm7, %v4932_v6, %v4940_v11 }
 0x97a   :  { %v4984_v57 = vmul.f32 %v4971_v27, %v14475_v47  ;;  %v5024_v50 = vmul.f32 %v12803_v59, %v4988_v20  ;;  %v4950_v56 = vpop.permute.xlu1 %4949 }
 0x97b   :  { %v4968_v22 = vsel %vm1214_vm7, %v4942_v17, %v4950_v56 }
 0x97c   :  { %v5020_v5 = vmul.f32 %v12805_v9, %v4984_v57  ;;  %v4948_v2 = vpop.permute.xlu0 %4947  ;;  %v5040_v47 = vadd.f32 %v5024_v50, %v4919_v21  ;;  %v4989_v58 = vmul.f32 %v4968_v22, %v14476_v0 }
 0x97d   :  { %v4967_v12 = vsel %vm1214_vm7, %v4940_v11, %v4948_v2 }
 0x97e   :  { %v5036_v29 = vadd.f32 %v5020_v5, %v4915_v48  ;;  %v4985_v19 = vmul.f32 %v4967_v12, %v14476_v0  ;;  %v5025_v40 = vmul.f32 %v12803_v59, %v4989_v58  ;;  %v4958_v45 = vpop.permute.xlu1 %4957 }
 0x97f   :  { %v4964_v44 = vsel %vm1214_vm7, %v4950_v56, %v4958_v45  ;;  %v4976_v14 = vsel %vm1214_vm7, %v4958_v45, %v4934_v34  ;;  %v4922_v34 = vadd.f32 %v4906_v51, %v12752_v37  ;;  %v5652_v37 = vld [vmem:[%s12926_s4 + $0x30] sm:$0xff]   ;;  %v14483_v45 = vld [vmem:[#allocation18_spill] sm:$0xff] }
 0x980   :  { %v5021_v28 = vmul.f32 %v12805_v9, %v4985_v19  ;;  %v4956_v23 = vpop.permute.xlu0 %4955  ;;  %v5062_v49 = vpack.c.bf16 %v5040_v47, %v5036_v29  ;;  %v4990_v0 = vmul.f32 %v4964_v44, %v14477_v10  ;;  %v4991_v54 = vmul.f32 %v4976_v14, %v14478_v39  ;;  %v14481_v19 = vld [vmem:[#allocation72_spill] sm:$0xff] }
 0x981   :  { %v4963_v7 = vsel %vm1214_vm7, %v4948_v2, %v4956_v23  ;;  %v4975_v52 = vsel %vm1214_vm7, %v4956_v23, %v4932_v6  ;;  %v5041_v26 = vadd.f32 %v5025_v40, %v4920_v15 }
 0x982   :  { %v4986_v18 = vmul.f32 %v4963_v7, %v14477_v10  ;;  %v4987_v31 = vmul.f32 %v4975_v52, %v14478_v39  ;;  %v5037_v33 = vadd.f32 %v5021_v28, %v4916_v24  ;;  %v5026_v25 = vmul.f32 %v12803_v59, %v4990_v0  ;;  %v5088_v11 = vpop.permute.xlu1 %5087  ;;  %v14480_v24 = vld [vmem:[#allocation94_spill] sm:$0xff] }
 0x983   :  { %v5027_v46 = vmul.f32 %v12803_v59, %v4991_v54  ;;  %v5653_v59 = vld [vmem:[%s12926_s4 + $0x38] sm:$0xff]   ;;  %v14485_v52 = vld [vmem:[#allocation106_spill] sm:$0xff] }
 0x984   :  { %v5022_v1 = vmul.f32 %v12805_v9, %v4986_v18  ;;  %v5023_v55 = vmul.f32 %v12805_v9, %v4987_v31  ;;  %v5063_v6 = vpack.c.bf16 %v5041_v26, %v5037_v33  ;;  %v5042_v10 = vadd.f32 %v5026_v25, %v4921_v53  ;;  %v5083_v27 = vpop.permute.xlu0 %5082 }
 0x985   :  { %v5043_v32 = vadd.f32 %v5027_v46, %v4922_v34  ;;  %v14486_v34 = vld [vmem:[#allocation19_spill] sm:$0xff] }
 0x986   :  { %v5038_v39 = vadd.f32 %v5022_v1, %v4917_v35  ;;  %5120 = vmatprep.subr.bf16.mxu0 %v5063_v6  ;;  %v5039_v61 = vadd.f32 %v5023_v55, %v4918_v41  ;;  %v5078_v8 = vpop.permute.xlu1 %5077  ;;  %v14487_v41 = vld [vmem:[#allocation104_spill] sm:$0xff]  ;;  %v14488_v55 = vld [vmem:[#allocation74_spill] sm:$0xff] }
 0x987   :  { %5121 = vmatpush1.bf16.msra.mxu0 %v5062_v49  ;;  %v14484_v49 = vld [vmem:[#allocation14_spill] sm:$0xff] }
 0x988   :  { %v5065_v17 = vpack.c.bf16 %v5043_v32, %v5039_v61  ;;  %v5064_v42 = vpack.c.bf16 %v5042_v10, %v5038_v39  ;;  %v5073_v56 = vpop.permute.xlu0 %5072  ;;  %v14489_v10 = vld [vmem:[#allocation26_spill] sm:$0xff]  ;;  %v14490_v39 = vld [vmem:[#allocation27_spill] sm:$0xff] }
 0x98a   :  { %5622 = vmatmul.mubr.msk.bf16.vlgmr.msra.gmra.mxu0 %vm1373_vm8, %v5652_v37  ;;  %5173 = vmatprep.subr.bf16.mxu1 %v5065_v17  ;;  %v14491_v17 = vld [vmem:[#allocation83_spill] sm:$0xff] }
 0x98b   :  { %5174 = vmatpush1.bf16.msra.mxu1 %v5064_v42  ;;  %5148 = vmatprep.mubr.bf16.mxu0 %v14479_v38 }
 0x98e   :  { %5624 = vmatmul.mubr.msk.bf16.vlgmr.msra.gmra.mxu1 %vm1373_vm8, %v5652_v37 }
 0x98f   :  { %5201 = vmatprep.mubr.bf16.mxu1 %v14479_v38 }
 0x992   :  { %5623 = vmatmul.mubr.msk.bf16.gmra.mxu0 %vm1373_vm8, %v5653_v59 }
 0x993   :  { %5312 = vmatprep.mubr.bf16.mxu0 %v14479_v38 }
 0x996   :  { %5625 = vmatmul.mubr.msk.bf16.gmra.mxu1 %vm1373_vm8, %v5653_v59 }
 0x997   :  { %5365 = vmatprep.mubr.bf16.mxu1 %v14479_v38 }
 0xa4a   :  { %v5140_v9 = vpop.f32.mrf.mxu0 }
 0xa4b   :  { %v5141_v23 = vadd.f32 %v5140_v9, %v5073_v56  ;;  %v14492_v9 = vld [vmem:[#allocation113_spill] sm:$0xff] }
 0xa4c   :  { %v5142_v30 = vpop.f32.mrf.mxu0 }
 0xa4d   :  { %v5143_v47 = vadd.f32 %v5142_v30, %v5073_v56  ;;  %v5212_v42 = vadd.f32 %v5141_v23, %v14491_v17 }
 0xa4e   :  { %v5144_v16 = vpop.f32.mrf.mxu0  ;;  %v5193_v63 = vpop.f32.mrf.mxu1 }
 0xa4f   :  { %v5145_v12 = vadd.f32 %v5144_v16, %v5078_v8  ;;  %v5213_v18 = vadd.f32 %v5143_v47, %v14485_v52  ;;  %v5194_v59 = vadd.f32 %v5193_v63, %v5073_v56  ;;  %v14493_v16 = vld [vmem:[#allocation76_spill] sm:$0xff] }
 0xa50   :  { %v5146_v4 = vpop.f32.mrf.mxu0  ;;  %v5195_v20 = vpop.f32.mrf.mxu1 }
 0xa51   :  { %v5147_v60 = vadd.f32 %v5146_v4, %v5078_v8  ;;  %v5196_v31 = vadd.f32 %v5195_v20, %v5073_v56  ;;  %v5216_v35 = vadd.f32 %v5145_v12, %v14486_v34 }
 0xa52   :  { %v5150_v21 = vpop.f32.mrf.mxu0  ;;  %v5197_v13 = vpop.f32.mrf.mxu1 }
 0xa53   :  { %v5151_v22 = vadd.f32 %v5150_v21, %v5083_v27  ;;  %v5217_v51 = vadd.f32 %v5147_v60, %v14480_v24  ;;  %v5198_v25 = vadd.f32 %v5197_v13, %v5078_v8  ;;  %v5236_v20 = vpack.c.bf16 %v5216_v35, %v5212_v42 }
 0xa54   :  { %v5152_v36 = vpop.f32.mrf.mxu0  ;;  %v5199_v57 = vpop.f32.mrf.mxu1 }
 0xa55   :  { %v5153_v48 = vadd.f32 %v5152_v36, %v5083_v27  ;;  %v5200_v29 = vadd.f32 %v5199_v57, %v5078_v8  ;;  %v5220_v0 = vadd.f32 %v5151_v22, %v14484_v49  ;;  %v5237_v61 = vpack.c.bf16 %v5217_v51, %v5213_v18  ;;  %v5654_v57 = vld [vmem:[%s12928_s6] sm:$0xff]   ;;  %v14495_v8 = vld [vmem:[#allocation92_spill] sm:$0xff]  ;;  %v5252_v22 = vpop.permute.xlu1 %5251 }
 0xa56   :  { %v5154_v62 = vpop.f32.mrf.mxu0  ;;  %v5203_v50 = vpop.f32.mrf.mxu1  ;;  %v5214_v60 = vadd.f32 %v5194_v59, %v14495_v8 }
 0xa57   :  { %v5155_v5 = vadd.f32 %v5154_v62, %v5088_v11  ;;  %v5221_v40 = vadd.f32 %v5153_v48, %v14482_v3  ;;  %v5204_v54 = vadd.f32 %v5203_v50, %v5083_v27  ;;  %v5219_v6 = vadd.f32 %v5200_v29, %v14488_v55  ;;  %v5655_v62 = vld [vmem:[%s12928_s6 + $0x8] sm:$0xff]   ;;  %v5247_v50 = vpop.permute.xlu0 %5246  ;;  %s5703_s6 = smov [#allocation2]  }
 0xa58   :  { %v5156_v2 = vpop.f32.mrf.mxu0  ;;  %v5205_v15 = vpop.f32.mrf.mxu1  ;;  %s5407_s13 = sshll.u32 %s5703_s6, 4  ;;  %s5408_s13 = int_to_ptr.vmem [resolvable:$true] %s5407_s13 }
 0xa59   :  { %v5157_v58 = vadd.f32 %v5156_v2, %v5088_v11  ;;  %v5224_v53 = vadd.f32 %v5155_v5, %v14481_v19  ;;  %v5206_v44 = vadd.f32 %v5205_v15, %v5083_v27  ;;  %v5222_v30 = vadd.f32 %v5204_v54, %v14492_v9  ;;  %v14494_v27 = vld [vmem:[#allocation105_spill] sm:$0xff]  ;;  %s5672_s18 = scalar_lea.vmem %s5408_s13, 2048  ;;  %p5677_p1 = scmp.lt.s32.totalorder %s5408_s13, %s5408_s13 }
 0xa5a   :  { %v5207_v43 = vpop.f32.mrf.mxu1  ;;  %v5218_v21 = vadd.f32 %v5198_v25, %v14494_v27  ;;  %p5673_p0 = scmp.ne.s32.totalorder %s5408_s13, %s5672_s18  ;;  %p5678_p2 = scmp.lt.s32.totalorder %s5672_s18, %s5672_s18 }
 0xa5b   :  { %v5225_v28 = vadd.f32 %v5157_v58, %v14483_v45  ;;  %v5208_v14 = vadd.f32 %v5207_v43, %v5088_v11  ;;  %v5240_v46 = vpack.c.bf16 %v5224_v53, %v5220_v0  ;;  %v5223_v32 = vadd.f32 %v5206_v44, %v14489_v10  ;;  %v5257_v29 = vpop.permute.xlu0 %5256  ;;  %v5262_v44 = vpop.permute.xlu1 %5261 }
 0xa5c   :  { %v5209_v7 = vpop.f32.mrf.mxu1  ;;  %v5238_v63 = vpack.c.bf16 %v5218_v21, %v5214_v60  ;;  %p5679_p3 = por %p5678_p2, %p5677_p1 }
 0xa5d   :  { %v5210_v33 = vadd.f32 %v5209_v7, %v5088_v11  ;;  %v5241_v26 = vpack.c.bf16 %v5225_v28, %v5221_v40  ;;  %v5226_v1 = vadd.f32 %v5208_v14, %v14487_v41  ;;  %v5215_v11 = vadd.f32 %v5196_v31, %v14493_v16 }
 0xa5e   :  { %p5680_p4 = pnand %p5679_p3, %p5673_p0 }
 0xa5f   :  { %v5227_v37 = vadd.f32 %v5210_v33, %v14490_v39  ;;  %5292 = vmatprep.subr.bf16.mxu0 %v5241_v26  ;;  %v5242_v13 = vpack.c.bf16 %v5226_v1, %v5222_v30  ;;  %v5239_v36 = vpack.c.bf16 %v5219_v6, %v5215_v11 }
 0xa60   :  { %5293 = vmatpush1.bf16.msra.mxu0 %v5240_v46 }
 0xa61   :  { %5294 = vmatprep.subr.bf16.mxu0 %v5237_v61  ;;  %v5243_v4 = vpack.c.bf16 %v5227_v37, %v5223_v32 }
 0xa63   :  { %5345 = vmatprep.subr.bf16.mxu1 %v5243_v4 }
 0xa64   :  { %5295 = vmatpush1.bf16.msra.mxu0 %v5236_v20  ;;  %5346 = vmatpush1.bf16.msra.mxu1 %v5242_v13 }
 0xa65   :  { %5347 = vmatprep.subr.bf16.mxu1 %v5239_v36 }
 0xa67   :  { %5628 = vmatmul.mubr.msk.bf16.vlgmr.msra.gmra.mxu0 %vm1373_vm8, %v5654_v57 }
 0xa68   :  { %5348 = vmatpush1.bf16.msra.mxu1 %v5238_v63  ;;  %5322 = vmatprep.mubr.bf16.mxu0 %v14479_v38 }
 0xa6b   :  { %5630 = vmatmul.mubr.msk.bf16.vlgmr.msra.gmra.mxu1 %vm1373_vm8, %v5654_v57 }
 0xa6c   :  { %5375 = vmatprep.mubr.bf16.mxu1 %v14479_v38 }
 0xa6f   :  { %5629 = vmatmul.mubr.msk.bf16.gmra.mxu0 %vm1373_vm8, %v5655_v62 }
 0xa73   :  { %5631 = vmatmul.mubr.msk.bf16.gmra.mxu1 %vm1373_vm8, %v5655_v62 }
 0xb27   :  { %v5314_v56 = vpop.f32.mrf.mxu0 }
 0xb28   :  { %v5315_v48 = vadd.f32 %v5314_v56, %v5247_v50 }
 0xb29   :  { %v5316_v5 = vpop.f32.mrf.mxu0 }
 0xb2a   :  { %5386 = vst [vmem:[#allocation2] sm:$0xff] %v5315_v48  ;;  %v5317_v2 = vadd.f32 %v5316_v5, %v5247_v50 }
 0xb2b   :  { %v5318_v15 = vpop.f32.mrf.mxu0  ;;  %v5367_v47 = vpop.f32.mrf.mxu1 }
 0xb2c   :  { %5387 = vst [vmem:[#allocation2 + $0x8] sm:$0xff] %v5317_v2  ;;  %v5319_v58 = vadd.f32 %v5318_v15, %v5252_v22  ;;  %v5368_v12 = vadd.f32 %v5367_v47, %v5247_v50 }
 0xb2d   :  { %v5320_v24 = vpop.f32.mrf.mxu0  ;;  %v5369_v51 = vpop.f32.mrf.mxu1 }
 0xb2e   :  { %5390 = vst [vmem:[#allocation2 + $0x20] sm:$0xff] %v5319_v58  ;;  %5388 = vst [vmem:[#allocation2 + $0x10] sm:$0xff] %v5368_v12  ;;  %v5321_v38 = vadd.f32 %v5320_v24, %v5252_v22  ;;  %v5370_v19 = vadd.f32 %v5369_v51, %v5247_v50 }
 0xb2f   :  { %v5324_v53 = vpop.f32.mrf.mxu0  ;;  %v5371_v43 = vpop.f32.mrf.mxu1 }
 0xb30   :  { %5391 = vst [vmem:[#allocation2 + $0x28] sm:$0xff] %v5321_v38  ;;  %5389 = vst [vmem:[#allocation2 + $0x18] sm:$0xff] %v5370_v19  ;;  %v5325_v3 = vadd.f32 %v5324_v53, %v5257_v29  ;;  %v5372_v40 = vadd.f32 %v5371_v43, %v5252_v22 }
 0xb31   :  { %v5326_v45 = vpop.f32.mrf.mxu0  ;;  %v5373_v28 = vpop.f32.mrf.mxu1 }
 0xb32   :  { %5394 = vst [vmem:[#allocation2 + $0x40] sm:$0xff] %v5325_v3  ;;  %5392 = vst [vmem:[#allocation2 + $0x30] sm:$0xff] %v5372_v40  ;;  %v5327_v14 = vadd.f32 %v5326_v45, %v5257_v29  ;;  %v5374_v23 = vadd.f32 %v5373_v28, %v5252_v22 }
 0xb33   :  { %v5328_v49 = vpop.f32.mrf.mxu0  ;;  %v5377_v0 = vpop.f32.mrf.mxu1 }
 0xb34   :  { %5395 = vst [vmem:[#allocation2 + $0x48] sm:$0xff] %v5327_v14  ;;  %5393 = vst [vmem:[#allocation2 + $0x38] sm:$0xff] %v5374_v23  ;;  %v5329_v54 = vadd.f32 %v5328_v49, %v5262_v44  ;;  %v5378_v7 = vadd.f32 %v5377_v0, %v5257_v29 }
 0xb35   :  { %v5330_v52 = vpop.f32.mrf.mxu0  ;;  %v5379_v18 = vpop.f32.mrf.mxu1 }
 0xb36   :  { %5398 = vst [vmem:[#allocation2 + $0x60] sm:$0xff] %v5329_v54  ;;  %5396 = vst [vmem:[#allocation2 + $0x50] sm:$0xff] %v5378_v7  ;;  %v5331_v31 = vadd.f32 %v5330_v52, %v5262_v44  ;;  %v5380_v33 = vadd.f32 %v5379_v18, %v5257_v29 }
 0xb37   :  { %v5381_v26 = vpop.f32.mrf.mxu1 }
 0xb38   :  { %5399 = vst [vmem:[#allocation2 + $0x68] sm:$0xff] %v5331_v31  ;;  %5397 = vst [vmem:[#allocation2 + $0x58] sm:$0xff] %v5380_v33  ;;  %v5382_v34 = vadd.f32 %v5381_v26, %v5262_v44 }
 0xb39   :  { %v5383_v35 = vpop.f32.mrf.mxu1 }
 0xb3a   :  { %5400 = vst [vmem:[#allocation2 + $0x70] sm:$0xff] %v5382_v34  ;;  %v5384_v25 = vadd.f32 %v5383_v35, %v5262_v44 }
 0xb3c   :  { %5401 = vst [vmem:[#allocation2 + $0x78] sm:$0xff] %v5384_v25 }
 0xb3d   :  { %5683 = shalt.err (!%p5680_p4)
}
 0xb3e   :  { %s5704_s14 = smov 512   ;;  %s5705_s15 = smov 32  }
 0xb3f   :  { %5413 = dma.vmem_to_hbm [thread:$0]  %s5408_s13, 2048, %s12930_s8, [#allocation3], %s5704_s14, %s5704_s14, %s5705_s15  }
 0xb40   :  { %5692 = dma.done.wait [#allocation3], 2048  }
 0xb41   :  { %5693 = vsyncadd [#allocation3], 4294965248 }
 0xb42   :  { %5417 = vsyncpa [#allocation3], 1 }

</bundles_post_ra>
